<compile_context>
chip_gen: v5e
topology: v5e:2x2
jax: 0.10.0
libtpu: 0.0.40
codegen_flags: <defaults>
</compile_context>

<pallas_src>
import numpy as np
import jax
import jax.numpy as jnp
from jax.experimental import pallas as pl
from jax.experimental.pallas import tpu as pltpu

# ---------------- model hyper-params (small but consistent with the module) --
X_DIM = 768            # args.x_dim (residual with 768-dim output forces this)
GRAPH_EMB_DIM = 128    # args.graph_emb_dim (shrunk from 512 for the demo)
NUM_LAYERS = 3         # args.num_layers
HEADS = 4              # args.GAT_heads
HEAD_DIM = GRAPH_EMB_DIM // HEADS
OUT_DIM = 768          # hard-coded 768 in the module
ALPHA_PAD = 128        # lane-padded width of the packed attention-coefficient matmul
NEG_BIG = -1e9

_BF16 = jnp.bfloat16
_VMEM = pl.BlockSpec(memory_space=pltpu.MemorySpace.VMEM)


def _pick_row_tile(n):
    # At scale use >=256 rows per tile (MXU height on v6e/v7x); the demo picks 8 so the
    # grid has >1 step and the "parallel" axis is exercised.
    for t in (256, 128, 64, 32, 16, 8):
        if n % t == 0 and n // t >= 2:
            return t
    return n


def _attend_cost(n):
    flops = (2 * n * n * GRAPH_EMB_DIM                  # per-head aggregation matmuls
             + 2 * n * GRAPH_EMB_DIM * GRAPH_EMB_DIM    # fused row-local matmuls
             + 10 * HEADS * n * n)                      # attention elementwise work
    return pl.CostEstimate(flops=flops,
                           transcendentals=HEADS * n * n,
                           bytes_accessed=4 * (n * n + 8 * n * GRAPH_EMB_DIM))


# ---------------- kernels ------------------------------------------------------
def _head_proj_kernel(xf_ref, hw_ref, hb_ref, w0_ref, a0_ref, xs_ref, al_ref):
    # additional_head: Linear(2*x_dim, x_dim) + ReLU  (row-local, fully parallel)
    x = jnp.dot(xf_ref[...].astype(_BF16), hw_ref[...], preferred_element_type=jnp.float32)
    x = jnp.maximum(x + hb_ref[...], 0.0)
    # conv0 node projection + packed per-head attention coefficients (lane-padded)
    xs = jnp.dot(x.astype(_BF16), w0_ref[...], preferred_element_type=jnp.float32)
    xs_ref[...] = xs
    al_ref[...] = jnp.dot(xs.astype(_BF16), a0_ref[...], preferred_element_type=jnp.float32)


def _gat_attend_tile(xs_all_ref, aldst_ref, alall_ref, adjb_ref, b_ref):
    """One GAT layer for a tile of dst rows; only one [tm, N] head matrix live at a time."""
    xs_bf = xs_all_ref[...].astype(_BF16)                 # [N, H*C] src features
    a_dst = aldst_ref[...]                                # [tm, ALPHA_PAD] (cols 0..H-1 used)
    a_src_t = alall_ref[...][:, HEADS:2 * HEADS].T        # [H, N]  (one small transpose)
    adj_bias = adjb_ref[...]                              # [tm, N] additive mask (0 / -1e9)
    outs = []
    for h in range(HEADS):
        e = a_dst[:, h:h + 1] + a_src_t[h:h + 1, :]       # [tm, N]
        e = jnp.maximum(e, 0.2 * e) + adj_bias            # LeakyReLU(0.2) then mask bias
        m = jnp.max(e, axis=-1, keepdims=True)
        p = jnp.exp(e - m)                                # unnormalized softmax numerator (f32)
        s = jnp.sum(p, axis=-1, keepdims=True)            # row normalizer
        agg = jnp.dot(p.astype(_BF16), xs_bf[:, h * HEAD_DIM:(h + 1) * HEAD_DIM],
                      preferred_element_type=jnp.float32)               # [tm, C]
        outs.append(agg * pl.reciprocal(s, approx=True))  # normalize the small block only
    out = jnp.concatenate(outs, axis=-1)                  # [tm, H*C]  -> one lane-dense store
    return jnp.maximum(out + b_ref[...], 0.0)             # GATConv bias + F.relu


def _attend_mid_kernel(xs_all_ref, aldst_ref, alall_ref, adjb_ref, b_ref,
                       wn_ref, an_ref, x_ref, xsn_ref, aln_ref):
    x = _gat_attend_tile(xs_all_ref, aldst_ref, alall_ref, adjb_ref, b_ref)
    x_ref[...] = x
    # fused next-layer projection + attention coefficients (row-local)
    xs_n = jnp.dot(x.astype(_BF16), wn_ref[...], preferred_element_type=jnp.float32)
    xsn_ref[...] = xs_n
    aln_ref[...] = jnp.dot(xs_n.astype(_BF16), an_ref[...], preferred_element_type=jnp.float32)


def _attend_last_kernel(xs_all_ref, aldst_ref, alall_ref, adjb_ref, b_ref,
                        x1_ref, x2_ref, ow1_ref, ob1_ref, ow2_ref, ob2_ref, emb_ref):
    x3 = _gat_attend_tile(xs_all_ref, aldst_ref, alall_ref, adjb_ref, b_ref)
    # output_layer fused (row-local): Linear(3*D, D) -> ReLU -> Linear(D, 768)
    node_emb = jnp.concatenate([x1_ref[...], x2_ref[...], x3], axis=-1)      # [tm, 3*D]
    t = jnp.dot(node_emb.astype(_BF16), ow1_ref[...], preferred_element_type=jnp.float32)
    t = jnp.maximum(t + ob1_ref[...], 0.0)
    emb_ref[...] = jnp.dot(t.astype(_BF16), ow2_ref[...],
                           preferred_element_type=jnp.float32) + ob2_ref[...]


def _pool_kernel(pool_ref, emb_ref, eg_ref):
    # global_mean_pool as a bf16 [B,N]@[N,768] matmul with f32 accumulation
    eg_ref[...] = jnp.dot(pool_ref[...], emb_ref[...].astype(_BF16),
                          preferred_element_type=jnp.float32)


def _flatten_kernel(tbl_ref, valid_ref, emb_ref, oldx_ref, o_ref):
    # graph_flatten + residual: gather node row tbl[r] into padded slab row r;
    # padding rows (valid==0) become zero so the downstream mask matches the module.
    v = valid_ref[pl.program_id(0)]
    row = emb_ref[...] + oldx_ref[...]
    o_ref[...] = row * v.astype(jnp.float32)


# ---------------- pallas_call wrappers ----------------------------------------
def _head_proj_call(xf, hw, hb, w0, a0, tm):
    n = xf.shape[0]
    return pl.pallas_call(
        _head_proj_kernel,
        grid=(n // tm,),
        in_specs=[
            pl.BlockSpec((tm, 2 * X_DIM), lambda i: (i, 0)),
            pl.BlockSpec((2 * X_DIM, X_DIM), lambda i: (0, 0)),
            pl.BlockSpec((1, X_DIM), lambda i: (0, 0)),
            pl.BlockSpec((X_DIM, GRAPH_EMB_DIM), lambda i: (0, 0)),
            pl.BlockSpec((GRAPH_EMB_DIM, ALPHA_PAD), lambda i: (0, 0)),
        ],
        out_specs=(
            pl.BlockSpec((tm, GRAPH_EMB_DIM), lambda i: (i, 0)),
            pl.BlockSpec((tm, ALPHA_PAD), lambda i: (i, 0)),
        ),
        out_shape=(jax.ShapeDtypeStruct((n, GRAPH_EMB_DIM), jnp.float32),
                   jax.ShapeDtypeStruct((n, ALPHA_PAD), jnp.float32)),
        compiler_params=pltpu.CompilerParams(
            dimension_semantics=("parallel",),
            vmem_limit_bytes=48 * 1024 * 1024),
    )(xf, hw, hb, w0, a0)


def _attend_mid_call(xs, alpha, adj_bias, b, wn, an, tm):
    n = xs.shape[0]
    return pl.pallas_call(
        _attend_mid_kernel,
        grid=(n // tm,),
        in_specs=[
            pl.BlockSpec((n, GRAPH_EMB_DIM), lambda i: (0, 0)),          # xs (all src rows)
            pl.BlockSpec((tm, ALPHA_PAD), lambda i: (i, 0)),             # alpha, dst tile rows
            pl.BlockSpec((n, ALPHA_PAD), lambda i: (0, 0)),              # alpha, all src rows
            pl.BlockSpec((tm, n), lambda i: (i, 0)),                     # additive adjacency mask
            pl.BlockSpec((1, GRAPH_EMB_DIM), lambda i: (0, 0)),          # GATConv bias
            pl.BlockSpec((GRAPH_EMB_DIM, GRAPH_EMB_DIM), lambda i: (0, 0)),  # next-layer lin
            pl.BlockSpec((GRAPH_EMB_DIM, ALPHA_PAD), lambda i: (0, 0)),      # next-layer att
        ],
        out_specs=(
            pl.BlockSpec((tm, GRAPH_EMB_DIM), lambda i: (i, 0)),
            pl.BlockSpec((tm, GRAPH_EMB_DIM), lambda i: (i, 0)),
            pl.BlockSpec((tm, ALPHA_PAD), lambda i: (i, 0)),
        ),
        out_shape=(jax.ShapeDtypeStruct((n, GRAPH_EMB_DIM), jnp.float32),
                   jax.ShapeDtypeStruct((n, GRAPH_EMB_DIM), jnp.float32),
                   jax.ShapeDtypeStruct((n, ALPHA_PAD), jnp.float32)),
        compiler_params=pltpu.CompilerParams(
            dimension_semantics=("parallel",),
            vmem_limit_bytes=48 * 1024 * 1024),
        cost_estimate=_attend_cost(n),
    )(xs, alpha, alpha, adj_bias, b, wn, an)


def _attend_last_call(xs, alpha, adj_bias, b, x1, x2, ow1, ob1, ow2, ob2, tm):
    n = xs.shape[0]
    return pl.pallas_call(
        _attend_last_kernel,
        grid=(n // tm,),
        in_specs=[
            pl.BlockSpec((n, GRAPH_EMB_DIM), lambda i: (0, 0)),
            pl.BlockSpec((tm, ALPHA_PAD), lambda i: (i, 0)),
            pl.BlockSpec((n, ALPHA_PAD), lambda i: (0, 0)),
            pl.BlockSpec((tm, n), lambda i: (i, 0)),
            pl.BlockSpec((1, GRAPH_EMB_DIM), lambda i: (0, 0)),
            pl.BlockSpec((tm, GRAPH_EMB_DIM), lambda i: (i, 0)),         # x1 tile
            pl.BlockSpec((tm, GRAPH_EMB_DIM), lambda i: (i, 0)),         # x2 tile
            pl.BlockSpec((NUM_LAYERS * GRAPH_EMB_DIM, GRAPH_EMB_DIM), lambda i: (0, 0)),
            pl.BlockSpec((1, GRAPH_EMB_DIM), lambda i: (0, 0)),
            pl.BlockSpec((GRAPH_EMB_DIM, OUT_DIM), lambda i: (0, 0)),
            pl.BlockSpec((1, OUT_DIM), lambda i: (0, 0)),
        ],
        out_specs=pl.BlockSpec((tm, OUT_DIM), lambda i: (i, 0)),
        out_shape=jax.ShapeDtypeStruct((n, OUT_DIM), jnp.float32),
        compiler_params=pltpu.CompilerParams(
            dimension_semantics=("parallel",),
            vmem_limit_bytes=48 * 1024 * 1024),
        cost_estimate=_attend_cost(n),
    )(xs, alpha, alpha, adj_bias, b, x1, x2, ow1, ob1, ow2, ob2)


def _pool_call(pool_bf, emb):
    return pl.pallas_call(
        _pool_kernel,
        out_shape=jax.ShapeDtypeStruct((pool_bf.shape[0], OUT_DIM), jnp.float32),
        in_specs=[_VMEM, _VMEM],
        out_specs=_VMEM,
    )(pool_bf, emb)


def _flatten_call(tbl, valid, emb, old_x):
    flat_rows = tbl.shape[0]
    n = emb.shape[0]
    emb3 = emb.reshape(n, 1, OUT_DIM)
    oldx3 = old_x.reshape(n, 1, OUT_DIM)
    grid_spec = pltpu.PrefetchScalarGridSpec(
        num_scalar_prefetch=2,
        grid=(flat_rows,),
        in_specs=[
            pl.BlockSpec((1, 1, OUT_DIM), lambda r, t, v: (t[r], 0, 0)),
            pl.BlockSpec((1, 1, OUT_DIM), lambda r, t, v: (t[r], 0, 0)),
        ],
        out_specs=pl.BlockSpec((1, 1, OUT_DIM), lambda r, t, v: (r, 0, 0)),
    )
    flat = pl.pallas_call(
        _flatten_kernel,
        grid_spec=grid_spec,
        out_shape=jax.ShapeDtypeStruct((flat_rows, 1, OUT_DIM), jnp.float32),
        compiler_params=pltpu.CompilerParams(dimension_semantics=("arbitrary",)),
    )(tbl, valid, emb3, oldx3)
    return flat.reshape(flat_rows, OUT_DIM)


# ---------------- parameter init (deterministic, xavier_uniform / zeros) -----
def _xavier(key, fan_in, fan_out, shape=None):
    if shape is None:
        shape = (fan_in, fan_out)
    bound = float(np.sqrt(6.0 / (fan_in + fan_out)))
    return jax.random.uniform(key, shape, jnp.float32, -bound, bound)


def init_params(key):
    keys = jax.random.split(key, 8)
    params = {
        "head_w": _xavier(keys[0], 2 * X_DIM, X_DIM),
        "head_b": jnp.zeros((X_DIM,), jnp.float32),
        "out_w1": _xavier(keys[1], NUM_LAYERS * GRAPH_EMB_DIM, GRAPH_EMB_DIM),
        "out_b1": jnp.zeros((GRAPH_EMB_DIM,), jnp.float32),
        "out_w2": _xavier(keys[2], GRAPH_EMB_DIM, OUT_DIM),
        "out_b2": jnp.zeros((OUT_DIM,), jnp.float32),
        "convs": [],
    }
    for i in range(NUM_LAYERS):
        fin = X_DIM if i == 0 else GRAPH_EMB_DIM
        k = jax.random.split(keys[3 + i], 3)
        params["convs"].append({
            "w": _xavier(k[0], fin, HEADS * HEAD_DIM),                     # lin (no bias)
            "att_src": _xavier(k[1], HEADS, HEAD_DIM, (HEADS, HEAD_DIM)),  # glorot
            "att_dst": _xavier(k[2], HEADS, HEAD_DIM, (HEADS, HEAD_DIM)),  # glorot
            "bias": jnp.zeros((HEADS * HEAD_DIM,), jnp.float32),
        })
    return params


def pack_weights(params):
    """Pre-cast MXU weights to bf16; pack per-head att vectors into one lane-padded matrix."""
    bf = lambda v: v.astype(_BF16)
    eye = jnp.eye(HEADS, dtype=jnp.float32)
    packed = [bf(params["head_w"]), params["head_b"].reshape(1, -1)]
    for c in params["convs"]:
        a_dst = (c["att_dst"][:, :, None] * eye[:, None, :]).reshape(HEADS * HEAD_DIM, HEADS)
        a_src = (c["att_src"][:, :, None] * eye[:, None, :]).reshape(HEADS * HEAD_DIM, HEADS)
        a_pk = jnp.concatenate([a_dst, a_src], axis=1)                     # [H*C, 2H]
        a_pk = jnp.pad(a_pk, ((0, 0), (0, ALPHA_PAD - 2 * HEADS)))         # lane-dense [H*C,128]
        packed += [bf(c["w"]), bf(a_pk), c["bias"].reshape(1, -1)]
    packed += [bf(params["out_w1"]), params["out_b1"].reshape(1, -1),
               bf(params["out_w2"]), params["out_b2"].reshape(1, -1)]
    return tuple(packed)


# ---------------- forward -----------------------------------------------------
def gat_forward(weights, xf, old_x, adj_bias, pool_bf, tbl, valid, bsz, max_len, tm):
    (hw, hb, w0, a0, b0, w1, a1, b1, w2, a2, b2, ow1, ob1, ow2, ob2) = weights
    xs0, al0 = _head_proj_call(xf, hw, hb, w0, a0, tm)
    x1, xs1, al1 = _attend_mid_call(xs0, al0, adj_bias, b0, w1, a1, tm)
    x2, xs2, al2 = _attend_mid_call(xs1, al1, adj_bias, b1, w2, a2, tm)
    emb = _attend_last_call(xs2, al2, adj_bias, b2, x1, x2, ow1, ob1, ow2, ob2, tm)
    eg = _pool_call(pool_bf, emb)                       # mean-pool BEFORE residual (as module)
    flat = _flatten_call(tbl, valid, emb, old_x)        # residual + graph_flatten scatter
    flat = flat.reshape(bsz, max_len, OUT_DIM)
    mask = (jnp.sum(flat, axis=-1) != 0).astype(jnp.int32)   # same criterion as the module
    return eg[:, None, :], flat, mask


# ---------------- demo --------------------------------------------------------
if __name__ == "__main__":
    key = jax.random.PRNGKey(0)
    kp, kx = jax.random.split(key)
    params = init_params(kp)
    packed = pack_weights(params)

    # 2 graphs: 9 + 7 = 16 nodes
    graph_sizes = [9, 7]
    batch_np = np.concatenate([np.full(s, g, np.int32) for g, s in enumerate(graph_sizes)])
    N = int(batch_np.shape[0])
    B = len(graph_sizes)
    max_len = int(np.max(np.bincount(batch_np)))

    # node features: [N, 2, x_dim]  (label emb + description emb, node_feat='labeldes')
    x = jax.random.normal(kx, (N, 2, X_DIM), jnp.float32)
    old_x = x[:, 0, :]
    xf = x.reshape(N, -1)

    # edge_index: undirected chain inside each graph
    src, dst = [], []
    start = 0
    for s in graph_sizes:
        for i in range(s - 1):
            a, b = start + i, start + i + 1
            src += [a, b]
            dst += [b, a]
        start += s
    edge_index = np.array([src, dst], dtype=np.int32)

    # dense adjacency (adj[dst, src]) with self-loops (PyG GATConv default), shipped as an
    # additive softmax mask so the kernel never does per-head selects.
    adj_np = np.zeros((N, N), np.float32)
    adj_np[edge_index[1], edge_index[0]] = 1.0
    adj_np[np.arange(N), np.arange(N)] = 1.0
    adj_bias = jnp.asarray(np.where(adj_np > 0, 0.0, NEG_BIG).astype(np.float32))
    # TODO(synk): ship adj as int8 and build the additive mask in-kernel to cut the
    #             O(N^2) HBM transfer 4x (matters most on v5e's ~820 GB/s HBM).

    # global_mean_pool as a dense bf16 [B, N] averaging matrix
    one_hot = (batch_np[None, :] == np.arange(B)[:, None]).astype(np.float32)
    pool_bf = jnp.asarray(one_hot / one_hot.sum(axis=1, keepdims=True)).astype(_BF16)

    # graph_flatten gather table: output row b*max_len+j <- node row (start_b + j); padding
    # rows gather node 0 and are zeroed via the valid flag.
    tbl_np = np.zeros(B * max_len, np.int32)
    valid_np = np.zeros(B * max_len, np.int32)
    start = 0
    for g, s in enumerate(graph_sizes):
        tbl_np[g * max_len:g * max_len + s] = np.arange(start, start + s)
        valid_np[g * max_len:g * max_len + s] = 1
        start += s
    tbl = jnp.asarray(tbl_np)
    valid = jnp.asarray(valid_np)

    tm = _pick_row_tile(N)
    fwd = jax.jit(gat_forward, static_argnums=(7, 8, 9))
    emb_g, emb_n, mask = fwd(packed, xf, old_x, adj_bias, pool_bf, tbl, valid, B, max_len, tm)
    jax.block_until_ready((emb_g, emb_n, mask))

    assert emb_g.shape == (B, 1, OUT_DIM)
    assert emb_n.shape == (B, max_len, OUT_DIM)
    assert mask.shape == (B, max_len)
    assert bool(jnp.all(jnp.isfinite(emb_g))) and bool(jnp.all(jnp.isfinite(emb_n)))
    print("KERNEL_OK")
</pallas_src>

<mosaic_0001>
module attributes {stable_mosaic.version = 11 : i64} {
  func.func @_pool_kernel(%arg0: memref<2x16xbf16, #tpu.memory_space<vmem>>, %arg1: memref<16x768xf32, #tpu.memory_space<vmem>>, %arg2: memref<2x768xf32, #tpu.memory_space<vmem>>) attributes {dimension_semantics = [], scalar_prefetch = 0 : i64, scratch_operands = 0 : i64, tpu.core_type = #tpu.core_type<tc>} {
    %c0 = arith.constant 0 : index
    %c0_0 = arith.constant 0 : index
    %0 = vector.load %arg0[%c0, %c0_0] : memref<2x16xbf16, #tpu.memory_space<vmem>>, vector<2x16xbf16>
    %c0_1 = arith.constant 0 : index
    %c0_2 = arith.constant 0 : index
    %1 = vector.load %arg1[%c0_1, %c0_2] : memref<16x768xf32, #tpu.memory_space<vmem>>, vector<16x768xf32>
    %2 = arith.truncf %1 : vector<16x768xf32> to vector<16x768xbf16>
    %cst = arith.constant dense<0.000000e+00> : vector<2x768xf32>
    %3 = tpu.matmul %0, %2, %cst {dimension_numbers = #tpu.dot_dimension_numbers<[1], [0], [0], [1], [0, 0, 1, 1], [], []>} : vector<2x16xbf16>, vector<16x768xbf16>, vector<2x768xf32> -> vector<2x768xf32>
    %c0_3 = arith.constant 0 : index
    %c0_4 = arith.constant 0 : index
    %4 = vector.load %arg2[%c0_3, %c0_4] : memref<2x768xf32, #tpu.memory_space<vmem>>, vector<2x768xf32>
    tpu.vector_store %arg2[%c0_3, %c0_4], %3 {strides = array<i32>} : memref<2x768xf32, #tpu.memory_space<vmem>>, vector<2x768xf32>,
    return
  }
}

module attributes {stable_mosaic.version = 11 : i64} {
  func.func @_head_proj_kernel(%arg0: i32, %arg1: memref<8x1536xf32, #tpu.memory_space<vmem>>, %arg2: memref<1536x768xbf16, #tpu.memory_space<vmem>>, %arg3: memref<1x768xf32, #tpu.memory_space<vmem>>, %arg4: memref<768x128xbf16, #tpu.memory_space<vmem>>, %arg5: memref<128x128xbf16, #tpu.memory_space<vmem>>, %arg6: memref<8x128xf32, #tpu.memory_space<vmem>>, %arg7: memref<8x128xf32, #tpu.memory_space<vmem>>) attributes {dimension_semantics = [#tpu.dimension_semantics<parallel>], iteration_bounds = array<i64: 2>, scalar_prefetch = 0 : i64, scratch_operands = 0 : i64, tpu.core_type = #tpu.core_type<tc>, window_params = [{transform_indices = @transform_0, window_bounds = array<i64: 8, 1536>}, {pipeline_mode = #tpu.pipeline_mode<synchronous>, transform_indices = @transform_1, window_bounds = array<i64: 1536, 768>}, {pipeline_mode = #tpu.pipeline_mode<synchronous>, transform_indices = @transform_2, window_bounds = array<i64: 1, 768>}, {pipeline_mode = #tpu.pipeline_mode<synchronous>, transform_indices = @transform_3, window_bounds = array<i64: 768, 128>}, {pipeline_mode = #tpu.pipeline_mode<synchronous>, transform_indices = @transform_4, window_bounds = array<i64: 128, 128>}, {transform_indices = @transform_5, window_bounds = array<i64: 8, 128>}, {transform_indices = @transform_6, window_bounds = array<i64: 8, 128>}]} {
    %c0 = arith.constant 0 : index
    %c0_0 = arith.constant 0 : index
    %0 = vector.load %arg1[%c0, %c0_0] : memref<8x1536xf32, #tpu.memory_space<vmem>>, vector<8x1536xf32>
    %1 = arith.truncf %0 : vector<8x1536xf32> to vector<8x1536xbf16>
    %c0_1 = arith.constant 0 : index
    %c0_2 = arith.constant 0 : index
    %2 = vector.load %arg2[%c0_1, %c0_2] : memref<1536x768xbf16, #tpu.memory_space<vmem>>, vector<1536x768xbf16>
    %cst = arith.constant dense<0.000000e+00> : vector<8x768xf32>
    %3 = tpu.matmul %1, %2, %cst {dimension_numbers = #tpu.dot_dimension_numbers<[1], [0], [0], [1], [0, 0, 1, 1], [], []>} : vector<8x1536xbf16>, vector<1536x768xbf16>, vector<8x768xf32> -> vector<8x768xf32>
    %c0_3 = arith.constant 0 : index
    %c0_4 = arith.constant 0 : index
    %4 = vector.load %arg3[%c0_3, %c0_4] : memref<1x768xf32, #tpu.memory_space<vmem>>, vector<1x768xf32>
    %5 = vector.broadcast %4 : vector<1x768xf32> to vector<8x768xf32>
    %6 = arith.addf %3, %5 : vector<8x768xf32>
    %cst_5 = arith.constant 0.000000e+00 : f32
    %7 = vector.broadcast %cst_5 : f32 to vector<8x768xf32>
    %8 = arith.maximumf %6, %7 : vector<8x768xf32>
    %9 = arith.truncf %8 : vector<8x768xf32> to vector<8x768xbf16>
    %c0_6 = arith.constant 0 : index
    %c0_7 = arith.constant 0 : index
    %10 = vector.load %arg4[%c0_6, %c0_7] : memref<768x128xbf16, #tpu.memory_space<vmem>>, vector<768x128xbf16>
    %cst_8 = arith.constant dense<0.000000e+00> : vector<8x128xf32>
    %11 = tpu.matmul %9, %10, %cst_8 {dimension_numbers = #tpu.dot_dimension_numbers<[1], [0], [0], [1], [0, 0, 1, 1], [], []>} : vector<8x768xbf16>, vector<768x128xbf16>, vector<8x128xf32> -> vector<8x128xf32>
    %c0_9 = arith.constant 0 : index
    %c0_10 = arith.constant 0 : index
    %12 = vector.load %arg6[%c0_9, %c0_10] : memref<8x128xf32, #tpu.memory_space<vmem>>, vector<8x128xf32>
    tpu.vector_store %arg6[%c0_9, %c0_10], %11 {strides = array<i32>} : memref<8x128xf32, #tpu.memory_space<vmem>>, vector<8x128xf32>,
    %13 = arith.truncf %11 : vector<8x128xf32> to vector<8x128xbf16>
    %c0_11 = arith.constant 0 : index
    %c0_12 = arith.constant 0 : index
    %14 = vector.load %arg5[%c0_11, %c0_12] : memref<128x128xbf16, #tpu.memory_space<vmem>>, vector<128x128xbf16>
    %cst_13 = arith.constant dense<0.000000e+00> : vector<8x128xf32>
    %15 = tpu.matmul %13, %14, %cst_13 {dimension_numbers = #tpu.dot_dimension_numbers<[1], [0], [0], [1], [0, 0, 1, 1], [], []>} : vector<8x128xbf16>, vector<128x128xbf16>, vector<8x128xf32> -> vector<8x128xf32>
    %c0_14 = arith.constant 0 : index
    %c0_15 = arith.constant 0 : index
    %16 = vector.load %arg7[%c0_14, %c0_15] : memref<8x128xf32, #tpu.memory_space<vmem>>, vector<8x128xf32>
    tpu.vector_store %arg7[%c0_14, %c0_15], %15 {strides = array<i32>} : memref<8x128xf32, #tpu.memory_space<vmem>>, vector<8x128xf32>,
    return
  }
  func.func @transform_0(%arg0: i32) -> (i32, i32) {
    %c0_i32 = arith.constant 0 : i32
    %c0_i32_0 = arith.constant 0 : i32
    return %arg0, %c0_i32 : i32, i32
  }
  func.func @transform_1(%arg0: i32) -> (i32, i32) {
    %c0_i32 = arith.constant 0 : i32
    %c0_i32_0 = arith.constant 0 : i32
    %c0_i32_1 = arith.constant 0 : i32
    return %c0_i32, %c0_i32_0 : i32, i32
  }
  func.func @transform_2(%arg0: i32) -> (i32, i32) {
    %c0_i32 = arith.constant 0 : i32
    %c0_i32_0 = arith.constant 0 : i32
    %c0_i32_1 = arith.constant 0 : i32
    return %c0_i32, %c0_i32_0 : i32, i32
  }
  func.func @transform_3(%arg0: i32) -> (i32, i32) {
    %c0_i32 = arith.constant 0 : i32
    %c0_i32_0 = arith.constant 0 : i32
    %c0_i32_1 = arith.constant 0 : i32
    return %c0_i32, %c0_i32_0 : i32, i32
  }
  func.func @transform_4(%arg0: i32) -> (i32, i32) {
    %c0_i32 = arith.constant 0 : i32
    %c0_i32_0 = arith.constant 0 : i32
    %c0_i32_1 = arith.constant 0 : i32
    return %c0_i32, %c0_i32_0 : i32, i32
  }
  func.func @transform_5(%arg0: i32) -> (i32, i32) {
    %c0_i32 = arith.constant 0 : i32
    %c0_i32_0 = arith.constant 0 : i32
    return %arg0, %c0_i32 : i32, i32
  }
  func.func @transform_6(%arg0: i32) -> (i32, i32) {
    %c0_i32 = arith.constant 0 : i32
    %c0_i32_0 = arith.constant 0 : i32
    return %arg0, %c0_i32 : i32, i32
  }
}

module attributes {stable_mosaic.version = 11 : i64} {
  func.func @_attend_last_kernel(%arg0: i32, %arg1: memref<16x128xf32, #tpu.memory_space<vmem>>, %arg2: memref<8x128xf32, #tpu.memory_space<vmem>>, %arg3: memref<16x128xf32, #tpu.memory_space<vmem>>, %arg4: memref<8x16xf32, #tpu.memory_space<vmem>>, %arg5: memref<1x128xf32, #tpu.memory_space<vmem>>, %arg6: memref<8x128xf32, #tpu.memory_space<vmem>>, %arg7: memref<8x128xf32, #tpu.memory_space<vmem>>, %arg8: memref<384x128xbf16, #tpu.memory_space<vmem>>, %arg9: memref<1x128xf32, #tpu.memory_space<vmem>>, %arg10: memref<128x768xbf16, #tpu.memory_space<vmem>>, %arg11: memref<1x768xf32, #tpu.memory_space<vmem>>, %arg12: memref<8x768xf32, #tpu.memory_space<vmem>>) attributes {dimension_semantics = [#tpu.dimension_semantics<parallel>], iteration_bounds = array<i64: 2>, scalar_prefetch = 0 : i64, scratch_operands = 0 : i64, tpu.core_type = #tpu.core_type<tc>, window_params = [{pipeline_mode = #tpu.pipeline_mode<synchronous>, transform_indices = @transform_0, window_bounds = array<i64: 16, 128>}, {transform_indices = @transform_1, window_bounds = array<i64: 8, 128>}, {pipeline_mode = #tpu.pipeline_mode<synchronous>, transform_indices = @transform_2, window_bounds = array<i64: 16, 128>}, {transform_indices = @transform_3, window_bounds = array<i64: 8, 16>}, {pipeline_mode = #tpu.pipeline_mode<synchronous>, transform_indices = @transform_4, window_bounds = array<i64: 1, 128>}, {transform_indices = @transform_5, window_bounds = array<i64: 8, 128>}, {transform_indices = @transform_6, window_bounds = array<i64: 8, 128>}, {pipeline_mode = #tpu.pipeline_mode<synchronous>, transform_indices = @transform_7, window_bounds = array<i64: 384, 128>}, {pipeline_mode = #tpu.pipeline_mode<synchronous>, transform_indices = @transform_8, window_bounds = array<i64: 1, 128>}, {pipeline_mode = #tpu.pipeline_mode<synchronous>, transform_indices = @transform_9, window_bounds = array<i64: 128, 768>}, {pipeline_mode = #tpu.pipeline_mode<synchronous>, transform_indices = @transform_10, window_bounds = array<i64: 1, 768>}, {transform_indices = @transform_11, window_bounds = array<i64: 8, 768>}]} {
    %c0 = arith.constant 0 : index
    %c0_0 = arith.constant 0 : index
    %0 = vector.load %arg1[%c0, %c0_0] : memref<16x128xf32, #tpu.memory_space<vmem>>, vector<16x128xf32>
    %1 = arith.truncf %0 : vector<16x128xf32> to vector<16x128xbf16>
    %c0_1 = arith.constant 0 : index
    %c0_2 = arith.constant 0 : index
    %2 = vector.load %arg2[%c0_1, %c0_2] : memref<8x128xf32, #tpu.memory_space<vmem>>, vector<8x128xf32>
    %c0_3 = arith.constant 0 : index
    %c0_4 = arith.constant 0 : index
    %3 = vector.load %arg3[%c0_3, %c0_4] : memref<16x128xf32, #tpu.memory_space<vmem>>, vector<16x128xf32>
    %4 = vector.extract_strided_slice %3 {offsets = [0, 4], sizes = [16, 4], strides = [1, 1]} : vector<16x128xf32> to vector<16x4xf32>
    %5 = tpu.transpose %4, [1, 0] : vector<16x4xf32> -> vector<4x16xf32>
    %c0_5 = arith.constant 0 : index
    %c0_6 = arith.constant 0 : index
    %6 = vector.load %arg4[%c0_5, %c0_6] : memref<8x16xf32, #tpu.memory_space<vmem>>, vector<8x16xf32>
    %7 = vector.extract_strided_slice %2 {offsets = [0, 0], sizes = [8, 1], strides = [1, 1]} : vector<8x128xf32> to vector<8x1xf32>
    %8 = vector.extract_strided_slice %5 {offsets = [0, 0], sizes = [1, 16], strides = [1, 1]} : vector<4x16xf32> to vector<1x16xf32>
    %9 = vector.broadcast %7 : vector<8x1xf32> to vector<8x16xf32>
    %10 = vector.broadcast %8 : vector<1x16xf32> to vector<8x16xf32>
    %11 = arith.addf %9, %10 : vector<8x16xf32>
    %cst = arith.constant 2.000000e-01 : f32
    %12 = vector.broadcast %cst : f32 to vector<8x16xf32>
    %13 = arith.mulf %12, %11 : vector<8x16xf32>
    %14 = arith.maximumf %11, %13 : vector<8x16xf32>
    %15 = arith.addf %14, %6 : vector<8x16xf32>
    %cst_7 = arith.constant dense<0xFF800000> : vector<8xf32>
    %16 = vector.multi_reduction <maximumf>, %15, %cst_7 [1] : vector<8x16xf32> to vector<8xf32>
    %17 = vector.shape_cast %16 : vector<8xf32> to vector<8x1xf32>
    %18 = vector.broadcast %17 : vector<8x1xf32> to vector<8x16xf32>
    %19 = arith.subf %15, %18 : vector<8x16xf32>
    %20 = math.exp %19 : vector<8x16xf32>
    %cst_8 = arith.constant dense<0.000000e+00> : vector<8xf32>
    %21 = vector.multi_reduction <add>, %20, %cst_8 [1] : vector<8x16xf32> to vector<8xf32>
    %22 = vector.shape_cast %21 : vector<8xf32> to vector<8x1xf32>
    %23 = arith.truncf %20 : vector<8x16xf32> to vector<8x16xbf16>
    %24 = vector.extract_strided_slice %1 {offsets = [0, 0], sizes = [16, 32], strides = [1, 1]} : vector<16x128xbf16> to vector<16x32xbf16>
    %cst_9 = arith.constant dense<0.000000e+00> : vector<8x32xf32>
    %25 = tpu.matmul %23, %24, %cst_9 {dimension_numbers = #tpu.dot_dimension_numbers<[1], [0], [0], [1], [0, 0, 1, 1], [], []>} : vector<8x16xbf16>, vector<16x32xbf16>, vector<8x32xf32> -> vector<8x32xf32>
    %26 = tpu.reciprocal %22 {approx = true} : vector<8x1xf32> -> vector<8x1xf32>
    %27 = vector.broadcast %26 : vector<8x1xf32> to vector<8x32xf32>
    %28 = arith.mulf %25, %27 : vector<8x32xf32>
    %29 = vector.extract_strided_slice %2 {offsets = [0, 1], sizes = [8, 1], strides = [1, 1]} : vector<8x128xf32> to vector<8x1xf32>
    %30 = vector.extract_strided_slice %5 {offsets = [1, 0], sizes = [1, 16], strides = [1, 1]} : vector<4x16xf32> to vector<1x16xf32>
    %31 = vector.broadcast %29 : vector<8x1xf32> to vector<8x16xf32>
    %32 = vector.broadcast %30 : vector<1x16xf32> to vector<8x16xf32>
    %33 = arith.addf %31, %32 : vector<8x16xf32>
    %cst_10 = arith.constant 2.000000e-01 : f32
    %34 = vector.broadcast %cst_10 : f32 to vector<8x16xf32>
    %35 = arith.mulf %34, %33 : vector<8x16xf32>
    %36 = arith.maximumf %33, %35 : vector<8x16xf32>
    %37 = arith.addf %36, %6 : vector<8x16xf32>
    %cst_11 = arith.constant dense<0xFF800000> : vector<8xf32>
    %38 = vector.multi_reduction <maximumf>, %37, %cst_11 [1] : vector<8x16xf32> to vector<8xf32>
    %39 = vector.shape_cast %38 : vector<8xf32> to vector<8x1xf32>
    %40 = vector.broadcast %39 : vector<8x1xf32> to vector<8x16xf32>
    %41 = arith.subf %37, %40 : vector<8x16xf32>
    %42 = math.exp %41 : vector<8x16xf32>
    %cst_12 = arith.constant dense<0.000000e+00> : vector<8xf32>
    %43 = vector.multi_reduction <add>, %42, %cst_12 [1] : vector<8x16xf32> to vector<8xf32>
    %44 = vector.shape_cast %43 : vector<8xf32> to vector<8x1xf32>
    %45 = arith.truncf %42 : vector<8x16xf32> to vector<8x16xbf16>
    %46 = vector.extract_strided_slice %1 {offsets = [0, 32], sizes = [16, 32], strides = [1, 1]} : vector<16x128xbf16> to vector<16x32xbf16>
    %cst_13 = arith.constant dense<0.000000e+00> : vector<8x32xf32>
    %47 = tpu.matmul %45, %46, %cst_13 {dimension_numbers = #tpu.dot_dimension_numbers<[1], [0], [0], [1], [0, 0, 1, 1], [], []>} : vector<8x16xbf16>, vector<16x32xbf16>, vector<8x32xf32> -> vector<8x32xf32>
    %48 = tpu.reciprocal %44 {approx = true} : vector<8x1xf32> -> vector<8x1xf32>
    %49 = vector.broadcast %48 : vector<8x1xf32> to vector<8x32xf32>
    %50 = arith.mulf %47, %49 : vector<8x32xf32>
    %51 = vector.extract_strided_slice %2 {offsets = [0, 2], sizes = [8, 1], strides = [1, 1]} : vector<8x128xf32> to vector<8x1xf32>
    %52 = vector.extract_strided_slice %5 {offsets = [2, 0], sizes = [1, 16], strides = [1, 1]} : vector<4x16xf32> to vector<1x16xf32>
    %53 = vector.broadcast %51 : vector<8x1xf32> to vector<8x16xf32>
    %54 = vector.broadcast %52 : vector<1x16xf32> to vector<8x16xf32>
    %55 = arith.addf %53, %54 : vector<8x16xf32>
    %cst_14 = arith.constant 2.000000e-01 : f32
    %56 = vector.broadcast %cst_14 : f32 to vector<8x16xf32>
    %57 = arith.mulf %56, %55 : vector<8x16xf32>
    %58 = arith.maximumf %55, %57 : vector<8x16xf32>
    %59 = arith.addf %58, %6 : vector<8x16xf32>
    %cst_15 = arith.constant dense<0xFF800000> : vector<8xf32>
    %60 = vector.multi_reduction <maximumf>, %59, %cst_15 [1] : vector<8x16xf32> to vector<8xf32>
    %61 = vector.shape_cast %60 : vector<8xf32> to vector<8x1xf32>
    %62 = vector.broadcast %61 : vector<8x1xf32> to vector<8x16xf32>
    %63 = arith.subf %59, %62 : vector<8x16xf32>
    %64 = math.exp %63 : vector<8x16xf32>
    %cst_16 = arith.constant dense<0.000000e+00> : vector<8xf32>
    %65 = vector.multi_reduction <add>, %64, %cst_16 [1] : vector<8x16xf32> to vector<8xf32>
    %66 = vector.shape_cast %65 : vector<8xf32> to vector<8x1xf32>
    %67 = arith.truncf %64 : vector<8x16xf32> to vector<8x16xbf16>
    %68 = vector.extract_strided_slice %1 {offsets = [0, 64], sizes = [16, 32], strides = [1, 1]} : vector<16x128xbf16> to vector<16x32xbf16>
    %cst_17 = arith.constant dense<0.000000e+00> : vector<8x32xf32>
    %69 = tpu.matmul %67, %68, %cst_17 {dimension_numbers = #tpu.dot_dimension_numbers<[1], [0], [0], [1], [0, 0, 1, 1], [], []>} : vector<8x16xbf16>, vector<16x32xbf16>, vector<8x32xf32> -> vector<8x32xf32>
    %70 = tpu.reciprocal %66 {approx = true} : vector<8x1xf32> -> vector<8x1xf32>
    %71 = vector.broadcast %70 : vector<8x1xf32> to vector<8x32xf32>
    %72 = arith.mulf %69, %71 : vector<8x32xf32>
    %73 = vector.extract_strided_slice %2 {offsets = [0, 3], sizes = [8, 1], strides = [1, 1]} : vector<8x128xf32> to vector<8x1xf32>
    %74 = vector.extract_strided_slice %5 {offsets = [3, 0], sizes = [1, 16], strides = [1, 1]} : vector<4x16xf32> to vector<1x16xf32>
    %75 = vector.broadcast %73 : vector<8x1xf32> to vector<8x16xf32>
    %76 = vector.broadcast %74 : vector<1x16xf32> to vector<8x16xf32>
    %77 = arith.addf %75, %76 : vector<8x16xf32>
    %cst_18 = arith.constant 2.000000e-01 : f32
    %78 = vector.broadcast %cst_18 : f32 to vector<8x16xf32>
    %79 = arith.mulf %78, %77 : vector<8x16xf32>
    %80 = arith.maximumf %77, %79 : vector<8x16xf32>
    %81 = arith.addf %80, %6 : vector<8x16xf32>
    %cst_19 = arith.constant dense<0xFF800000> : vector<8xf32>
    %82 = vector.multi_reduction <maximumf>, %81, %cst_19 [1] : vector<8x16xf32> to vector<8xf32>
    %83 = vector.shape_cast %82 : vector<8xf32> to vector<8x1xf32>
    %84 = vector.broadcast %83 : vector<8x1xf32> to vector<8x16xf32>
    %85 = arith.subf %81, %84 : vector<8x16xf32>
    %86 = math.exp %85 : vector<8x16xf32>
    %cst_20 = arith.constant dense<0.000000e+00> : vector<8xf32>
    %87 = vector.multi_reduction <add>, %86, %cst_20 [1] : vector<8x16xf32> to vector<8xf32>
    %88 = vector.shape_cast %87 : vector<8xf32> to vector<8x1xf32>
    %89 = arith.truncf %86 : vector<8x16xf32> to vector<8x16xbf16>
    %90 = vector.extract_strided_slice %1 {offsets = [0, 96], sizes = [16, 32], strides = [1, 1]} : vector<16x128xbf16> to vector<16x32xbf16>
    %cst_21 = arith.constant dense<0.000000e+00> : vector<8x32xf32>
    %91 = tpu.matmul %89, %90, %cst_21 {dimension_numbers = #tpu.dot_dimension_numbers<[1], [0], [0], [1], [0, 0, 1, 1], [], []>} : vector<8x16xbf16>, vector<16x32xbf16>, vector<8x32xf32> -> vector<8x32xf32>
    %92 = tpu.reciprocal %88 {approx = true} : vector<8x1xf32> -> vector<8x1xf32>
    %93 = vector.broadcast %92 : vector<8x1xf32> to vector<8x32xf32>
    %94 = arith.mulf %91, %93 : vector<8x32xf32>
    %95 = tpu.concatenate %28, %50, %72, %94 in 1 : vector<8x32xf32>, vector<8x32xf32>, vector<8x32xf32>, vector<8x32xf32> -> vector<8x128xf32>
    %c0_22 = arith.constant 0 : index
    %c0_23 = arith.constant 0 : index
    %96 = vector.load %arg5[%c0_22, %c0_23] : memref<1x128xf32, #tpu.memory_space<vmem>>, vector<1x128xf32>
    %97 = vector.broadcast %96 : vector<1x128xf32> to vector<8x128xf32>
    %98 = arith.addf %95, %97 : vector<8x128xf32>
    %cst_24 = arith.constant 0.000000e+00 : f32
    %99 = vector.broadcast %cst_24 : f32 to vector<8x128xf32>
    %100 = arith.maximumf %98, %99 : vector<8x128xf32>
    %c0_25 = arith.constant 0 : index
    %c0_26 = arith.constant 0 : index
    %101 = vector.load %arg6[%c0_25, %c0_26] : memref<8x128xf32, #tpu.memory_space<vmem>>, vector<8x128xf32>
    %c0_27 = arith.constant 0 : index
    %c0_28 = arith.constant 0 : index
    %102 = vector.load %arg7[%c0_27, %c0_28] : memref<8x128xf32, #tpu.memory_space<vmem>>, vector<8x128xf32>
    %103 = tpu.concatenate %101, %102, %100 in 1 : vector<8x128xf32>, vector<8x128xf32>, vector<8x128xf32> -> vector<8x384xf32>
    %104 = arith.truncf %103 : vector<8x384xf32> to vector<8x384xbf16>
    %c0_29 = arith.constant 0 : index
    %c0_30 = arith.constant 0 : index
    %105 = vector.load %arg8[%c0_29, %c0_30] : memref<384x128xbf16, #tpu.memory_space<vmem>>, vector<384x128xbf16>
    %cst_31 = arith.constant dense<0.000000e+00> : vector<8x128xf32>
    %106 = tpu.matmul %104, %105, %cst_31 {dimension_numbers = #tpu.dot_dimension_numbers<[1], [0], [0], [1], [0, 0, 1, 1], [], []>} : vector<8x384xbf16>, vector<384x128xbf16>, vector<8x128xf32> -> vector<8x128xf32>
    %c0_32 = arith.constant 0 : index
    %c0_33 = arith.constant 0 : index
    %107 = vector.load %arg9[%c0_32, %c0_33] : memref<1x128xf32, #tpu.memory_space<vmem>>, vector<1x128xf32>
    %108 = vector.broadcast %107 : vector<1x128xf32> to vector<8x128xf32>
    %109 = arith.addf %106, %108 : vector<8x128xf32>
    %cst_34 = arith.constant 0.000000e+00 : f32
    %110 = vector.broadcast %cst_34 : f32 to vector<8x128xf32>
    %111 = arith.maximumf %109, %110 : vector<8x128xf32>
    %112 = arith.truncf %111 : vector<8x128xf32> to vector<8x128xbf16>
    %c0_35 = arith.constant 0 : index
    %c0_36 = arith.constant 0 : index
    %113 = vector.load %arg10[%c0_35, %c0_36] : memref<128x768xbf16, #tpu.memory_space<vmem>>, vector<128x768xbf16>
    %cst_37 = arith.constant dense<0.000000e+00> : vector<8x768xf32>
    %114 = tpu.matmul %112, %113, %cst_37 {dimension_numbers = #tpu.dot_dimension_numbers<[1], [0], [0], [1], [0, 0, 1, 1], [], []>} : vector<8x128xbf16>, vector<128x768xbf16>, vector<8x768xf32> -> vector<8x768xf32>
    %c0_38 = arith.constant 0 : index
    %c0_39 = arith.constant 0 : index
    %115 = vector.load %arg11[%c0_38, %c0_39] : memref<1x768xf32, #tpu.memory_space<vmem>>, vector<1x768xf32>
    %116 = vector.broadcast %115 : vector<1x768xf32> to vector<8x768xf32>
    %117 = arith.addf %114, %116 : vector<8x768xf32>
    %c0_40 = arith.constant 0 : index
    %c0_41 = arith.constant 0 : index
    %118 = vector.load %arg12[%c0_40, %c0_41] : memref<8x768xf32, #tpu.memory_space<vmem>>, vector<8x768xf32>
    tpu.vector_store %arg12[%c0_40, %c0_41], %117 {strides = array<i32>} : memref<8x768xf32, #tpu.memory_space<vmem>>, vector<8x768xf32>,
    return
  }
  func.func @transform_0(%arg0: i32) -> (i32, i32) {
    %c0_i32 = arith.constant 0 : i32
    %c0_i32_0 = arith.constant 0 : i32
    %c0_i32_1 = arith.constant 0 : i32
    return %c0_i32, %c0_i32_0 : i32, i32
  }
  func.func @transform_1(%arg0: i32) -> (i32, i32) {
    %c0_i32 = arith.constant 0 : i32
    %c0_i32_0 = arith.constant 0 : i32
    return %arg0, %c0_i32 : i32, i32
  }
  func.func @transform_2(%arg0: i32) -> (i32, i32) {
    %c0_i32 = arith.constant 0 : i32
    %c0_i32_0 = arith.constant 0 : i32
    %c0_i32_1 = arith.constant 0 : i32
    return %c0_i32, %c0_i32_0 : i32, i32
  }
  func.func @transform_3(%arg0: i32) -> (i32, i32) {
    %c0_i32 = arith.constant 0 : i32
    %c0_i32_0 = arith.constant 0 : i32
    return %arg0, %c0_i32 : i32, i32
  }
  func.func @transform_4(%arg0: i32) -> (i32, i32) {
    %c0_i32 = arith.constant 0 : i32
    %c0_i32_0 = arith.constant 0 : i32
    %c0_i32_1 = arith.constant 0 : i32
    return %c0_i32, %c0_i32_0 : i32, i32
  }
  func.func @transform_5(%arg0: i32) -> (i32, i32) {
    %c0_i32 = arith.constant 0 : i32
    %c0_i32_0 = arith.constant 0 : i32
    return %arg0, %c0_i32 : i32, i32
  }
  func.func @transform_6(%arg0: i32) -> (i32, i32) {
    %c0_i32 = arith.constant 0 : i32
    %c0_i32_0 = arith.constant 0 : i32
    return %arg0, %c0_i32 : i32, i32
  }
  func.func @transform_7(%arg0: i32) -> (i32, i32) {
    %c0_i32 = arith.constant 0 : i32
    %c0_i32_0 = arith.constant 0 : i32
    %c0_i32_1 = arith.constant 0 : i32
    return %c0_i32, %c0_i32_0 : i32, i32
  }
  func.func @transform_8(%arg0: i32) -> (i32, i32) {
    %c0_i32 = arith.constant 0 : i32
    %c0_i32_0 = arith.constant 0 : i32
    %c0_i32_1 = arith.constant 0 : i32
    return %c0_i32, %c0_i32_0 : i32, i32
  }
  func.func @transform_9(%arg0: i32) -> (i32, i32) {
    %c0_i32 = arith.constant 0 : i32
    %c0_i32_0 = arith.constant 0 : i32
    %c0_i32_1 = arith.constant 0 : i32
    return %c0_i32, %c0_i32_0 : i32, i32
  }
  func.func @transform_10(%arg0: i32) -> (i32, i32) {
    %c0_i32 = arith.constant 0 : i32
    %c0_i32_0 = arith.constant 0 : i32
    %c0_i32_1 = arith.constant 0 : i32
    return %c0_i32, %c0_i32_0 : i32, i32
  }
  func.func @transform_11(%arg0: i32) -> (i32, i32) {
    %c0_i32 = arith.constant 0 : i32
    %c0_i32_0 = arith.constant 0 : i32
    return %arg0, %c0_i32 : i32, i32
  }
}

module attributes {stable_mosaic.version = 11 : i64} {
  func.func @_attend_mid_kernel(%arg0: i32, %arg1: memref<16x128xf32, #tpu.memory_space<vmem>>, %arg2: memref<8x128xf32, #tpu.memory_space<vmem>>, %arg3: memref<16x128xf32, #tpu.memory_space<vmem>>, %arg4: memref<8x16xf32, #tpu.memory_space<vmem>>, %arg5: memref<1x128xf32, #tpu.memory_space<vmem>>, %arg6: memref<128x128xbf16, #tpu.memory_space<vmem>>, %arg7: memref<128x128xbf16, #tpu.memory_space<vmem>>, %arg8: memref<8x128xf32, #tpu.memory_space<vmem>>, %arg9: memref<8x128xf32, #tpu.memory_space<vmem>>, %arg10: memref<8x128xf32, #tpu.memory_space<vmem>>) attributes {dimension_semantics = [#tpu.dimension_semantics<parallel>], iteration_bounds = array<i64: 2>, scalar_prefetch = 0 : i64, scratch_operands = 0 : i64, tpu.core_type = #tpu.core_type<tc>, window_params = [{pipeline_mode = #tpu.pipeline_mode<synchronous>, transform_indices = @transform_0, window_bounds = array<i64: 16, 128>}, {transform_indices = @transform_1, window_bounds = array<i64: 8, 128>}, {pipeline_mode = #tpu.pipeline_mode<synchronous>, transform_indices = @transform_2, window_bounds = array<i64: 16, 128>}, {transform_indices = @transform_3, window_bounds = array<i64: 8, 16>}, {pipeline_mode = #tpu.pipeline_mode<synchronous>, transform_indices = @transform_4, window_bounds = array<i64: 1, 128>}, {pipeline_mode = #tpu.pipeline_mode<synchronous>, transform_indices = @transform_5, window_bounds = array<i64: 128, 128>}, {pipeline_mode = #tpu.pipeline_mode<synchronous>, transform_indices = @transform_6, window_bounds = array<i64: 128, 128>}, {transform_indices = @transform_7, window_bounds = array<i64: 8, 128>}, {transform_indices = @transform_8, window_bounds = array<i64: 8, 128>}, {transform_indices = @transform_9, window_bounds = array<i64: 8, 128>}]} {
    %c0 = arith.constant 0 : index
    %c0_0 = arith.constant 0 : index
    %0 = vector.load %arg1[%c0, %c0_0] : memref<16x128xf32, #tpu.memory_space<vmem>>, vector<16x128xf32>
    %1 = arith.truncf %0 : vector<16x128xf32> to vector<16x128xbf16>
    %c0_1 = arith.constant 0 : index
    %c0_2 = arith.constant 0 : index
    %2 = vector.load %arg2[%c0_1, %c0_2] : memref<8x128xf32, #tpu.memory_space<vmem>>, vector<8x128xf32>
    %c0_3 = arith.constant 0 : index
    %c0_4 = arith.constant 0 : index
    %3 = vector.load %arg3[%c0_3, %c0_4] : memref<16x128xf32, #tpu.memory_space<vmem>>, vector<16x128xf32>
    %4 = vector.extract_strided_slice %3 {offsets = [0, 4], sizes = [16, 4], strides = [1, 1]} : vector<16x128xf32> to vector<16x4xf32>
    %5 = tpu.transpose %4, [1, 0] : vector<16x4xf32> -> vector<4x16xf32>
    %c0_5 = arith.constant 0 : index
    %c0_6 = arith.constant 0 : index
    %6 = vector.load %arg4[%c0_5, %c0_6] : memref<8x16xf32, #tpu.memory_space<vmem>>, vector<8x16xf32>
    %7 = vector.extract_strided_slice %2 {offsets = [0, 0], sizes = [8, 1], strides = [1, 1]} : vector<8x128xf32> to vector<8x1xf32>
    %8 = vector.extract_strided_slice %5 {offsets = [0, 0], sizes = [1, 16], strides = [1, 1]} : vector<4x16xf32> to vector<1x16xf32>
    %9 = vector.broadcast %7 : vector<8x1xf32> to vector<8x16xf32>
    %10 = vector.broadcast %8 : vector<1x16xf32> to vector<8x16xf32>
    %11 = arith.addf %9, %10 : vector<8x16xf32>
    %cst = arith.constant 2.000000e-01 : f32
    %12 = vector.broadcast %cst : f32 to vector<8x16xf32>
    %13 = arith.mulf %12, %11 : vector<8x16xf32>
    %14 = arith.maximumf %11, %13 : vector<8x16xf32>
    %15 = arith.addf %14, %6 : vector<8x16xf32>
    %cst_7 = arith.constant dense<0xFF800000> : vector<8xf32>
    %16 = vector.multi_reduction <maximumf>, %15, %cst_7 [1] : vector<8x16xf32> to vector<8xf32>
    %17 = vector.shape_cast %16 : vector<8xf32> to vector<8x1xf32>
    %18 = vector.broadcast %17 : vector<8x1xf32> to vector<8x16xf32>
    %19 = arith.subf %15, %18 : vector<8x16xf32>
    %20 = math.exp %19 : vector<8x16xf32>
    %cst_8 = arith.constant dense<0.000000e+00> : vector<8xf32>
    %21 = vector.multi_reduction <add>, %20, %cst_8 [1] : vector<8x16xf32> to vector<8xf32>
    %22 = vector.shape_cast %21 : vector<8xf32> to vector<8x1xf32>
    %23 = arith.truncf %20 : vector<8x16xf32> to vector<8x16xbf16>
    %24 = vector.extract_strided_slice %1 {offsets = [0, 0], sizes = [16, 32], strides = [1, 1]} : vector<16x128xbf16> to vector<16x32xbf16>
    %cst_9 = arith.constant dense<0.000000e+00> : vector<8x32xf32>
    %25 = tpu.matmul %23, %24, %cst_9 {dimension_numbers = #tpu.dot_dimension_numbers<[1], [0], [0], [1], [0, 0, 1, 1], [], []>} : vector<8x16xbf16>, vector<16x32xbf16>, vector<8x32xf32> -> vector<8x32xf32>
    %26 = tpu.reciprocal %22 {approx = true} : vector<8x1xf32> -> vector<8x1xf32>
    %27 = vector.broadcast %26 : vector<8x1xf32> to vector<8x32xf32>
    %28 = arith.mulf %25, %27 : vector<8x32xf32>
    %29 = vector.extract_strided_slice %2 {offsets = [0, 1], sizes = [8, 1], strides = [1, 1]} : vector<8x128xf32> to vector<8x1xf32>
    %30 = vector.extract_strided_slice %5 {offsets = [1, 0], sizes = [1, 16], strides = [1, 1]} : vector<4x16xf32> to vector<1x16xf32>
    %31 = vector.broadcast %29 : vector<8x1xf32> to vector<8x16xf32>
    %32 = vector.broadcast %30 : vector<1x16xf32> to vector<8x16xf32>
    %33 = arith.addf %31, %32 : vector<8x16xf32>
    %cst_10 = arith.constant 2.000000e-01 : f32
    %34 = vector.broadcast %cst_10 : f32 to vector<8x16xf32>
    %35 = arith.mulf %34, %33 : vector<8x16xf32>
    %36 = arith.maximumf %33, %35 : vector<8x16xf32>
    %37 = arith.addf %36, %6 : vector<8x16xf32>
    %cst_11 = arith.constant dense<0xFF800000> : vector<8xf32>
    %38 = vector.multi_reduction <maximumf>, %37, %cst_11 [1] : vector<8x16xf32> to vector<8xf32>
    %39 = vector.shape_cast %38 : vector<8xf32> to vector<8x1xf32>
    %40 = vector.broadcast %39 : vector<8x1xf32> to vector<8x16xf32>
    %41 = arith.subf %37, %40 : vector<8x16xf32>
    %42 = math.exp %41 : vector<8x16xf32>
    %cst_12 = arith.constant dense<0.000000e+00> : vector<8xf32>
    %43 = vector.multi_reduction <add>, %42, %cst_12 [1] : vector<8x16xf32> to vector<8xf32>
    %44 = vector.shape_cast %43 : vector<8xf32> to vector<8x1xf32>
    %45 = arith.truncf %42 : vector<8x16xf32> to vector<8x16xbf16>
    %46 = vector.extract_strided_slice %1 {offsets = [0, 32], sizes = [16, 32], strides = [1, 1]} : vector<16x128xbf16> to vector<16x32xbf16>
    %cst_13 = arith.constant dense<0.000000e+00> : vector<8x32xf32>
    %47 = tpu.matmul %45, %46, %cst_13 {dimension_numbers = #tpu.dot_dimension_numbers<[1], [0], [0], [1], [0, 0, 1, 1], [], []>} : vector<8x16xbf16>, vector<16x32xbf16>, vector<8x32xf32> -> vector<8x32xf32>
    %48 = tpu.reciprocal %44 {approx = true} : vector<8x1xf32> -> vector<8x1xf32>
    %49 = vector.broadcast %48 : vector<8x1xf32> to vector<8x32xf32>
    %50 = arith.mulf %47, %49 : vector<8x32xf32>
    %51 = vector.extract_strided_slice %2 {offsets = [0, 2], sizes = [8, 1], strides = [1, 1]} : vector<8x128xf32> to vector<8x1xf32>
    %52 = vector.extract_strided_slice %5 {offsets = [2, 0], sizes = [1, 16], strides = [1, 1]} : vector<4x16xf32> to vector<1x16xf32>
    %53 = vector.broadcast %51 : vector<8x1xf32> to vector<8x16xf32>
    %54 = vector.broadcast %52 : vector<1x16xf32> to vector<8x16xf32>
    %55 = arith.addf %53, %54 : vector<8x16xf32>
    %cst_14 = arith.constant 2.000000e-01 : f32
    %56 = vector.broadcast %cst_14 : f32 to vector<8x16xf32>
    %57 = arith.mulf %56, %55 : vector<8x16xf32>
    %58 = arith.maximumf %55, %57 : vector<8x16xf32>
    %59 = arith.addf %58, %6 : vector<8x16xf32>
    %cst_15 = arith.constant dense<0xFF800000> : vector<8xf32>
    %60 = vector.multi_reduction <maximumf>, %59, %cst_15 [1] : vector<8x16xf32> to vector<8xf32>
    %61 = vector.shape_cast %60 : vector<8xf32> to vector<8x1xf32>
    %62 = vector.broadcast %61 : vector<8x1xf32> to vector<8x16xf32>
    %63 = arith.subf %59, %62 : vector<8x16xf32>
    %64 = math.exp %63 : vector<8x16xf32>
    %cst_16 = arith.constant dense<0.000000e+00> : vector<8xf32>
    %65 = vector.multi_reduction <add>, %64, %cst_16 [1] : vector<8x16xf32> to vector<8xf32>
    %66 = vector.shape_cast %65 : vector<8xf32> to vector<8x1xf32>
    %67 = arith.truncf %64 : vector<8x16xf32> to vector<8x16xbf16>
    %68 = vector.extract_strided_slice %1 {offsets = [0, 64], sizes = [16, 32], strides = [1, 1]} : vector<16x128xbf16> to vector<16x32xbf16>
    %cst_17 = arith.constant dense<0.000000e+00> : vector<8x32xf32>
    %69 = tpu.matmul %67, %68, %cst_17 {dimension_numbers = #tpu.dot_dimension_numbers<[1], [0], [0], [1], [0, 0, 1, 1], [], []>} : vector<8x16xbf16>, vector<16x32xbf16>, vector<8x32xf32> -> vector<8x32xf32>
    %70 = tpu.reciprocal %66 {approx = true} : vector<8x1xf32> -> vector<8x1xf32>
    %71 = vector.broadcast %70 : vector<8x1xf32> to vector<8x32xf32>
    %72 = arith.mulf %69, %71 : vector<8x32xf32>
    %73 = vector.extract_strided_slice %2 {offsets = [0, 3], sizes = [8, 1], strides = [1, 1]} : vector<8x128xf32> to vector<8x1xf32>
    %74 = vector.extract_strided_slice %5 {offsets = [3, 0], sizes = [1, 16], strides = [1, 1]} : vector<4x16xf32> to vector<1x16xf32>
    %75 = vector.broadcast %73 : vector<8x1xf32> to vector<8x16xf32>
    %76 = vector.broadcast %74 : vector<1x16xf32> to vector<8x16xf32>
    %77 = arith.addf %75, %76 : vector<8x16xf32>
    %cst_18 = arith.constant 2.000000e-01 : f32
    %78 = vector.broadcast %cst_18 : f32 to vector<8x16xf32>
    %79 = arith.mulf %78, %77 : vector<8x16xf32>
    %80 = arith.maximumf %77, %79 : vector<8x16xf32>
    %81 = arith.addf %80, %6 : vector<8x16xf32>
    %cst_19 = arith.constant dense<0xFF800000> : vector<8xf32>
    %82 = vector.multi_reduction <maximumf>, %81, %cst_19 [1] : vector<8x16xf32> to vector<8xf32>
    %83 = vector.shape_cast %82 : vector<8xf32> to vector<8x1xf32>
    %84 = vector.broadcast %83 : vector<8x1xf32> to vector<8x16xf32>
    %85 = arith.subf %81, %84 : vector<8x16xf32>
    %86 = math.exp %85 : vector<8x16xf32>
    %cst_20 = arith.constant dense<0.000000e+00> : vector<8xf32>
    %87 = vector.multi_reduction <add>, %86, %cst_20 [1] : vector<8x16xf32> to vector<8xf32>
    %88 = vector.shape_cast %87 : vector<8xf32> to vector<8x1xf32>
    %89 = arith.truncf %86 : vector<8x16xf32> to vector<8x16xbf16>
    %90 = vector.extract_strided_slice %1 {offsets = [0, 96], sizes = [16, 32], strides = [1, 1]} : vector<16x128xbf16> to vector<16x32xbf16>
    %cst_21 = arith.constant dense<0.000000e+00> : vector<8x32xf32>
    %91 = tpu.matmul %89, %90, %cst_21 {dimension_numbers = #tpu.dot_dimension_numbers<[1], [0], [0], [1], [0, 0, 1, 1], [], []>} : vector<8x16xbf16>, vector<16x32xbf16>, vector<8x32xf32> -> vector<8x32xf32>
    %92 = tpu.reciprocal %88 {approx = true} : vector<8x1xf32> -> vector<8x1xf32>
    %93 = vector.broadcast %92 : vector<8x1xf32> to vector<8x32xf32>
    %94 = arith.mulf %91, %93 : vector<8x32xf32>
    %95 = tpu.concatenate %28, %50, %72, %94 in 1 : vector<8x32xf32>, vector<8x32xf32>, vector<8x32xf32>, vector<8x32xf32> -> vector<8x128xf32>
    %c0_22 = arith.constant 0 : index
    %c0_23 = arith.constant 0 : index
    %96 = vector.load %arg5[%c0_22, %c0_23] : memref<1x128xf32, #tpu.memory_space<vmem>>, vector<1x128xf32>
    %97 = vector.broadcast %96 : vector<1x128xf32> to vector<8x128xf32>
    %98 = arith.addf %95, %97 : vector<8x128xf32>
    %cst_24 = arith.constant 0.000000e+00 : f32
    %99 = vector.broadcast %cst_24 : f32 to vector<8x128xf32>
    %100 = arith.maximumf %98, %99 : vector<8x128xf32>
    %c0_25 = arith.constant 0 : index
    %c0_26 = arith.constant 0 : index
    %101 = vector.load %arg8[%c0_25, %c0_26] : memref<8x128xf32, #tpu.memory_space<vmem>>, vector<8x128xf32>
    tpu.vector_store %arg8[%c0_25, %c0_26], %100 {strides = array<i32>} : memref<8x128xf32, #tpu.memory_space<vmem>>, vector<8x128xf32>,
    %102 = arith.truncf %100 : vector<8x128xf32> to vector<8x128xbf16>
    %c0_27 = arith.constant 0 : index
    %c0_28 = arith.constant 0 : index
    %103 = vector.load %arg6[%c0_27, %c0_28] : memref<128x128xbf16, #tpu.memory_space<vmem>>, vector<128x128xbf16>
    %cst_29 = arith.constant dense<0.000000e+00> : vector<8x128xf32>
    %104 = tpu.matmul %102, %103, %cst_29 {dimension_numbers = #tpu.dot_dimension_numbers<[1], [0], [0], [1], [0, 0, 1, 1], [], []>} : vector<8x128xbf16>, vector<128x128xbf16>, vector<8x128xf32> -> vector<8x128xf32>
    %c0_30 = arith.constant 0 : index
    %c0_31 = arith.constant 0 : index
    %105 = vector.load %arg9[%c0_30, %c0_31] : memref<8x128xf32, #tpu.memory_space<vmem>>, vector<8x128xf32>
    tpu.vector_store %arg9[%c0_30, %c0_31], %104 {strides = array<i32>} : memref<8x128xf32, #tpu.memory_space<vmem>>, vector<8x128xf32>,
    %106 = arith.truncf %104 : vector<8x128xf32> to vector<8x128xbf16>
    %c0_32 = arith.constant 0 : index
    %c0_33 = arith.constant 0 : index
    %107 = vector.load %arg7[%c0_32, %c0_33] : memref<128x128xbf16, #tpu.memory_space<vmem>>, vector<128x128xbf16>
    %cst_34 = arith.constant dense<0.000000e+00> : vector<8x128xf32>
    %108 = tpu.matmul %106, %107, %cst_34 {dimension_numbers = #tpu.dot_dimension_numbers<[1], [0], [0], [1], [0, 0, 1, 1], [], []>} : vector<8x128xbf16>, vector<128x128xbf16>, vector<8x128xf32> -> vector<8x128xf32>
    %c0_35 = arith.constant 0 : index
    %c0_36 = arith.constant 0 : index
    %109 = vector.load %arg10[%c0_35, %c0_36] : memref<8x128xf32, #tpu.memory_space<vmem>>, vector<8x128xf32>
    tpu.vector_store %arg10[%c0_35, %c0_36], %108 {strides = array<i32>} : memref<8x128xf32, #tpu.memory_space<vmem>>, vector<8x128xf32>,
    return
  }
  func.func @transform_0(%arg0: i32) -> (i32, i32) {
    %c0_i32 = arith.constant 0 : i32
    %c0_i32_0 = arith.constant 0 : i32
    %c0_i32_1 = arith.constant 0 : i32
    return %c0_i32, %c0_i32_0 : i32, i32
  }
  func.func @transform_1(%arg0: i32) -> (i32, i32) {
    %c0_i32 = arith.constant 0 : i32
    %c0_i32_0 = arith.constant 0 : i32
    return %arg0, %c0_i32 : i32, i32
  }
  func.func @transform_2(%arg0: i32) -> (i32, i32) {
    %c0_i32 = arith.constant 0 : i32
    %c0_i32_0 = arith.constant 0 : i32
    %c0_i32_1 = arith.constant 0 : i32
    return %c0_i32, %c0_i32_0 : i32, i32
  }
  func.func @transform_3(%arg0: i32) -> (i32, i32) {
    %c0_i32 = arith.constant 0 : i32
    %c0_i32_0 = arith.constant 0 : i32
    return %arg0, %c0_i32 : i32, i32
  }
  func.func @transform_4(%arg0: i32) -> (i32, i32) {
    %c0_i32 = arith.constant 0 : i32
    %c0_i32_0 = arith.constant 0 : i32
    %c0_i32_1 = arith.constant 0 : i32
    return %c0_i32, %c0_i32_0 : i32, i32
  }
  func.func @transform_5(%arg0: i32) -> (i32, i32) {
    %c0_i32 = arith.constant 0 : i32
    %c0_i32_0 = arith.constant 0 : i32
    %c0_i32_1 = arith.constant 0 : i32
    return %c0_i32, %c0_i32_0 : i32, i32
  }
  func.func @transform_6(%arg0: i32) -> (i32, i32) {
    %c0_i32 = arith.constant 0 : i32
    %c0_i32_0 = arith.constant 0 : i32
    %c0_i32_1 = arith.constant 0 : i32
    return %c0_i32, %c0_i32_0 : i32, i32
  }
  func.func @transform_7(%arg0: i32) -> (i32, i32) {
    %c0_i32 = arith.constant 0 : i32
    %c0_i32_0 = arith.constant 0 : i32
    return %arg0, %c0_i32 : i32, i32
  }
  func.func @transform_8(%arg0: i32) -> (i32, i32) {
    %c0_i32 = arith.constant 0 : i32
    %c0_i32_0 = arith.constant 0 : i32
    return %arg0, %c0_i32 : i32, i32
  }
  func.func @transform_9(%arg0: i32) -> (i32, i32) {
    %c0_i32 = arith.constant 0 : i32
    %c0_i32_0 = arith.constant 0 : i32
    return %arg0, %c0_i32 : i32, i32
  }
}

module attributes {stable_mosaic.version = 11 : i64} {
  func.func @_flatten_kernel(%arg0: i32, %arg1: memref<18xi32, #tpu.memory_space<smem>>, %arg2: memref<18xi32, #tpu.memory_space<smem>>, %arg3: memref<1x1x768xf32, #tpu.memory_space<vmem>>, %arg4: memref<1x1x768xf32, #tpu.memory_space<vmem>>, %arg5: memref<1x1x768xf32, #tpu.memory_space<vmem>>) attributes {dimension_semantics = [#tpu.dimension_semantics<arbitrary>], iteration_bounds = array<i64: 18>, scalar_prefetch = 2 : i64, scratch_operands = 0 : i64, tpu.core_type = #tpu.core_type<tc>, window_params = [{transform_indices = @transform_0, window_bounds = array<i64: 1, 1, 768>}, {transform_indices = @transform_1, window_bounds = array<i64: 1, 1, 768>}, {transform_indices = @transform_2, window_bounds = array<i64: 1, 1, 768>}]} {
    %0 = arith.index_cast %arg0 : i32 to index
    %1 = memref.load %arg2[%0] : memref<18xi32, #tpu.memory_space<smem>>
    %c0 = arith.constant 0 : index
    %c0_0 = arith.constant 0 : index
    %c0_1 = arith.constant 0 : index
    %2 = vector.load %arg3[%c0, %c0_0, %c0_1] : memref<1x1x768xf32, #tpu.memory_space<vmem>>, vector<1x1x768xf32>
    %c0_2 = arith.constant 0 : index
    %c0_3 = arith.constant 0 : index
    %c0_4 = arith.constant 0 : index
    %3 = vector.load %arg4[%c0_2, %c0_3, %c0_4] : memref<1x1x768xf32, #tpu.memory_space<vmem>>, vector<1x1x768xf32>
    %4 = arith.addf %2, %3 : vector<1x1x768xf32>
    %5 = arith.sitofp %1 : i32 to f32
    %6 = vector.broadcast %5 : f32 to vector<1x1x768xf32>
    %7 = arith.mulf %4, %6 : vector<1x1x768xf32>
    %c0_5 = arith.constant 0 : index
    %c0_6 = arith.constant 0 : index
    %c0_7 = arith.constant 0 : index
    %8 = vector.load %arg5[%c0_5, %c0_6, %c0_7] : memref<1x1x768xf32, #tpu.memory_space<vmem>>, vector<1x1x768xf32>
    tpu.vector_store %arg5[%c0_5, %c0_6, %c0_7], %7 {strides = array<i32>} : memref<1x1x768xf32, #tpu.memory_space<vmem>>, vector<1x1x768xf32>,
    return
  }
  func.func @transform_0(%arg0: i32, %arg1: memref<18xi32, #tpu.memory_space<smem>>, %arg2: memref<18xi32, #tpu.memory_space<smem>>) -> (i32, i32, i32) {
    %0 = arith.index_cast %arg0 : i32 to index
    %1 = memref.load %arg1[%0] : memref<18xi32, #tpu.memory_space<smem>>
    %c0_i32 = arith.constant 0 : i32
    %c0_i32_0 = arith.constant 0 : i32
    %c0_i32_1 = arith.constant 0 : i32
    return %1, %c0_i32, %c0_i32_0 : i32, i32, i32
  }
  func.func @transform_1(%arg0: i32, %arg1: memref<18xi32, #tpu.memory_space<smem>>, %arg2: memref<18xi32, #tpu.memory_space<smem>>) -> (i32, i32, i32) {
    %0 = arith.index_cast %arg0 : i32 to index
    %1 = memref.load %arg1[%0] : memref<18xi32, #tpu.memory_space<smem>>
    %c0_i32 = arith.constant 0 : i32
    %c0_i32_0 = arith.constant 0 : i32
    %c0_i32_1 = arith.constant 0 : i32
    return %1, %c0_i32, %c0_i32_0 : i32, i32, i32
  }
  func.func @transform_2(%arg0: i32, %arg1: memref<18xi32, #tpu.memory_space<smem>>, %arg2: memref<18xi32, #tpu.memory_space<smem>>) -> (i32, i32, i32) {
    %c0_i32 = arith.constant 0 : i32
    %c0_i32_0 = arith.constant 0 : i32
    %c0_i32_1 = arith.constant 0 : i32
    return %arg0, %c0_i32, %c0_i32_0 : i32, i32, i32
  }
}

</mosaic_0001>

<bundles_post_ra>
// kernel: gat_forward.10
= control target key start
LH: loop header
LB: loop body
LE: loop exit
PB: predicated region body
PF: predicated region fallthrough
CT: control target
= control target key end

     0   :  { %7 = vsyncpa [#allocation3], 0  ;;  %s186_s12 = smov [#allocation2]   ;;  %s255_s0 = inlined_call_operand.hbm [shape: bf16[2,16], index: 0, kind: input, shape index: {}]   ;;  %s256_s1 = inlined_call_operand.vmem [shape: f32[16,768], index: 1, kind: input, shape index: {}]   ;;  %s257_s2 = inlined_call_operand.vmem [shape: f32[2,768], index: 2, kind: output, shape index: {}]  }
   0x1   :  { %s13_s11 = sshll.u32 %s255_s0, 4  ;;  %s15_s13 = sshll.u32 %s186_s12, 4  ;;  %s14_s11 = int_to_ptr.hbm [resolvable:$true] %s13_s11  ;;  %s16_s13 = int_to_ptr.vmem [resolvable:$true] %s15_s13 }
   0x2   :  { %18 = dma.hbm_to_vmem [thread:$0]  %s14_s11, 16, %s16_s13, [#allocation3]  }
   0x3   :  { %184 = dma.done.wait [#allocation3], 16  }
   0x4   :  { %185 = vsyncadd [#allocation3], 4294967280  ;;  %v27_v0 = vld [vmem:[%s256_s1] sm:$0xff]  ;;  %v33_v1 = vld [vmem:[%s256_s1 + $0x30] sm:$0xff]  ;;  %vm45_vm0 = vcmask 130048   ;;  %vm137_vm1 = vcmask 1041408  }
   0x5   :  { %v28_v2 = vld [vmem:[%s256_s1 + $0x8] sm:$0xff]  ;;  %v39_v3 = vpack.c.bf16 %v33_v1, %v27_v0  ;;  %v34_v4 = vld [vmem:[%s256_s1 + $0x38] sm:$0xff]  ;;  %v29_v5 = vld [vmem:[%s256_s1 + $0x10] sm:$0xff]  ;;  %vm139_vm2 = vcmask 1045508   ;;  %vm141_vm3 = vcmask 1043456  }
   0x6   :  { %v35_v6 = vld [vmem:[%s256_s1 + $0x40] sm:$0xff]  ;;  %v40_v7 = vpack.c.bf16 %v34_v4, %v28_v2  ;;  %v30_v9 = vld [vmem:[%s256_s1 + $0x18] sm:$0xff]  ;;  %v36_v10 = vld [vmem:[%s256_s1 + $0x48] sm:$0xff] }
   0x7   :  { %v41_v8 = vpack.c.bf16 %v35_v6, %v29_v5  ;;  %v26_v11 = vld [vmem:[#allocation2] sm:$0x1]  ;;  %56 = vmatpush.bf16.msra.mxu0 %v39_v3  ;;  %v42_v12 = vpack.c.bf16 %v36_v10, %v30_v9  ;;  %v37_v14 = vld [vmem:[%s256_s1 + $0x50] sm:$0xff]  ;;  %v32_v15 = vld [vmem:[%s256_s1 + $0x28] sm:$0xff] }
   0x8   :  { %v31_v13 = vld [vmem:[%s256_s1 + $0x20] sm:$0xff]  ;;  %69 = vmatpush.bf16.msra.mxu1 %v40_v7  ;;  %v38_v17 = vld [vmem:[%s256_s1 + $0x58] sm:$0xff] }
   0x9   :  { %82 = vmatpush.bf16.msra.mxu2 %v41_v8  ;;  %v43_v16 = vpack.c.bf16 %v37_v14, %v31_v13  ;;  %95 = vmatpush.bf16.msra.mxu3 %v42_v12  ;;  %v44_v18 = vpack.c.bf16 %v38_v17, %v32_v15 }
   0xa   :  { %153 = vmatmul.msk.bf16.vlgmr.msra.gmra.mxu0 %vm45_vm0, %v26_v11 }
   0xb   :  { %154 = vmatmul.msk.bf16.vlgmr.msra.gmra.mxu1 %vm45_vm0, %v26_v11  ;;  %108 = vmatpush.bf16.msrb.mxu0 %v43_v16 }
   0xc   :  { %155 = vmatmul.msk.bf16.vlgmr.msra.gmra.mxu2 %vm45_vm0, %v26_v11  ;;  %156 = vmatmul.msk.bf16.vlgmr.msra.gmra.mxu3 %vm45_vm0, %v26_v11 }
   0xd   :  { %121 = vmatpush.bf16.msrb.mxu1 %v44_v18 }
  0x1a   :  { %157 = vmatmul.msk.bf16.vlgmr.msrb.gmra.mxu0 %vm45_vm0, %v26_v11 }
  0x1b   :  { %158 = vmatmul.msk.bf16.vlgmr.msrb.gmra.mxu1 %vm45_vm0, %v26_v11 }
  0x87   :  { %v58_v19 = vpop.f32.mrf.mxu0 }
  0x88   :  { %v71_v20 = vpop.f32.mrf.mxu1 }
  0x89   :  { %v133_v21 = vrot.slane %v71_v20, 6 }
  0x8b   :  { %v138_v28 = vsel %vm137_vm1, %v58_v19, %v133_v21 }
  0x8f   :  { %v84_v22 = vpop.f32.mrf.mxu2  ;;  %v97_v24 = vpop.f32.mrf.mxu3 }
  0x90   :  { %v134_v23 = vrot.slane %v84_v22, 4  ;;  %v60_v25 = vpop.f32.mrf.mxu0  ;;  %v135_v26 = vrot.slane %v97_v24, 2  ;;  %v73_v27 = vpop.f32.mrf.mxu1 }
  0x92   :  { %v140_v29 = vsel %vm139_vm2, %v134_v23, %v135_v26 }
  0x93   :  { %v142_v30 = vsel %vm141_vm3, %v138_v28, %v140_v29 }
  0x94   :  { %146 = vst [vmem:[%s257_s2] sm:$0xff] %v142_v30 }
  0x97   :  { %v86_v31 = vpop.f32.mrf.mxu2  ;;  %v99_v32 = vpop.f32.mrf.mxu3 }
  0x98   :  { %v110_v33 = vpop.f32.mrf.mxu0  ;;  %v123_v34 = vpop.f32.mrf.mxu1 }
  0x99   :  { %v136_v35 = vrot.slane %v123_v34, 6 }
  0x9b   :  { %v143_v36 = vsel %vm137_vm1, %v110_v33, %v136_v35 }
  0x9c   :  { %147 = vst [vmem:[%s257_s2 + $0x8] sm:$0xf] %v143_v36 }
  0xa0   :  { %v112_v37 = vpop.f32.mrf.mxu0  ;;  %v125_v38 = vpop.f32.mrf.mxu1 }
  0xa1   :  { %152 = vsyncpa [#allocation3], 1 }

// kernel: gat_forward.7
= control target key start
LH: loop header
LB: loop body
LE: loop exit
PB: predicated region body
PF: predicated region fallthrough
CT: control target
= control target key end

     0   :  { %15 = vsyncpa [#allocation3], 0  ;;  %s1607_s0 = inlined_call_operand.vmem [shape: f32[16,128], index: 0, kind: input, shape index: {}]   ;;  %s1608_s1 = inlined_call_operand.vmem [shape: f32[16,128], index: 1, kind: input, shape index: {}, may-alias: {1,2}]   ;;  %s1609_s2 = inlined_call_operand.vmem [shape: f32[16,128], index: 2, kind: input, shape index: {}, may-alias: {1,2}]   ;;  %s1610_s3 = inlined_call_operand.hbm [shape: f32[16,16], index: 3, kind: input, shape index: {}]   ;;  %s1611_s4 = inlined_call_operand.hbm [shape: f32[1,128], index: 4, kind: input, shape index: {}]   ;;  %s1612_s5 = inlined_call_operand.hbm [shape: bf16[128,128], index: 5, kind: input, shape index: {}]   ;;  %s1613_s6 = inlined_call_operand.hbm [shape: bf16[128,128], index: 6, kind: input, shape index: {}]   ;;  %s1614_s7 = inlined_call_operand.vmem [shape: f32[16,128], index: 7, kind: output, shape index: {0}]   ;;  %s1615_s8 = inlined_call_operand.vmem [shape: f32[16,128], index: 8, kind: output, shape index: {1}]   ;;  %s1616_s9 = inlined_call_operand.vmem [shape: f32[16,128], index: 9, kind: output, shape index: {2}]  }
   0x1   :  { %17 = vsyncpa [#allocation3 + $0x1], 0 }
   0x2   :  { %18 = vsyncpa [#allocation5], 0 }
   0x3   :  { %19 = vsyncpa [#allocation8], 0  ;;  %s1434_s30 = smov 0   ;;  %s1436_s10 = smov 0  }
   0x4   :  { %s1438_s11 = smov 0   ;;  %s1440_s12 = smov 0  }
   0x5 LB: > { %s1453_s13 = sadd.s32 4294967295, %s1369_s12   ;;  %p113_p0 = scmp.ne.s32.totalorder %s1361_s10, %s1357_s30  ;;  %s1369_s12 = sphi %s1440_s12, %s1624_s12   ;;  %s1365_s11 = sphi %s1438_s11, %s1623_s11   ;;  %s1361_s10 = sphi %s1436_s10, %s1622_s10   ;;  %s1357_s30 = sphi %s1434_s30, %s1621_s30  }
   0x6   : > { %p114_p1 = scmp.eq.s32.totalorder %s1453_s13, 0  ;;  %p1002_p2 = scmp.ge.s32.totalorder %s1369_s12, 1 }
   0x7   : > { %p265_p3 = scmp.lt.s32.totalorder %s1369_s12, 3  ;;  %s283_s17 = sshll.u32 %s1611_s4, 4  ;;  %s284_s17 = int_to_ptr.hbm [resolvable:$true] %s283_s17 }
   0x8   : > { %p1461_p4 = por %p114_p1, %p113_p0  ;;  %s1371_s19 = smov [#allocation4]  }
   0x9   : > { %p1468_p5 = pnand %p1002_p2, %p265_p3  ;;  %s285_s20 = sshll.u32 %s1371_s19, 4  ;;  %s286_s20 = int_to_ptr.vmem [resolvable:$true] %s285_s20 }
   0xa   : > { %s294_s23 = sshll.u32 %s1612_s5, 4  ;;  %s1372_s25 = smov [#allocation6]   ;;  %s295_s23 = int_to_ptr.hbm [resolvable:$true] %s294_s23 }
   0xb   : > { %p1118_p6 = pneg %p1468_p5  ;;  %s296_s26 = sshll.u32 %s1372_s25, 4  ;;  %s297_s26 = int_to_ptr.vmem [resolvable:$true] %s296_s26 }
   0xc   : > { %s1373_s27 = smov 64   ;;  %s1374_s28 = smov 4  }
   0xd   : > { %p1479_p7 = pnand %p1118_p6, %p114_p1  ;;  %s308_s15 = sshll.u32 %s1613_s6, 4  ;;  %s309_s15 = int_to_ptr.hbm [resolvable:$true] %s308_s15 }
   0xe   : > { %s1375_s16 = smov [#allocation7]   ;;  %s100_s21 = sadd.s32 1, %s1365_s11 }
   0xf   : > { %1121 = dma.hbm_to_vmem [thread:$0]  (!%p1479_p7), %s284_s17, 16, %s286_s20, [#allocation5]  }
  0x10   : > { %1124 = dma.hbm_to_vmem [thread:$0]  (!%p1479_p7), %s295_s23, 1024, %s297_s26, [#allocation5], %s1373_s27, %s1373_s27, %s1374_s28  }
  0x11   : > { %s310_s19 = sshll.u32 %s1375_s16, 4  ;;  %s1493_s17 = sadd.s32 1, %s1369_s12   ;;  %s311_s19 = int_to_ptr.vmem [resolvable:$true] %s310_s19 }
  0x12   : > { %1127 = dma.hbm_to_vmem [thread:$0]  (!%p1479_p7), %s309_s15, 1024, %s311_s19, [#allocation8], %s1373_s27, %s1373_s27, %s1374_s28  }
  0x13   : > { %s97_s20 = ssub.s32 %s1369_s12, %s1493_s17  ;;  %p107_p9 = scmp.ne.s32.totalorder %s1365_s11, %s1361_s10 }
  0x14   : > { %p98_p8 = scmp.eq.s32.totalorder %s97_s20, 0  ;;  %p108_p10 = scmp.eq.s32.totalorder %s1369_s12, 0 }
  0x15   : > { %p1135_p11 = scmp.lt.s32.totalorder %s1369_s12, 2  ;;  %s331_s23 = sand.u32 1, %s1365_s11  }
  0x16   : > { %s1503_s22 = scalar_select %p98_p8, %s1365_s11, %s100_s21  }
  0x17   : > { %p109_p12 = por %p108_p10, %p107_p9  ;;  %s1007_s25 = sshll.u32 %s331_s23, 3 }
  0x18   : > { %s1008_s26 = sshll.u32 %s1369_s12, 3  ;;  %s335_s27 = scalar_lea.vmem [#allocation2], %s1007_s25 }
  0x19   : > { %s339_s24 = scalar_lea.hbm %s1610_s3, %s1008_s26  ;;  %s343_s28 = sshll.u32 %s335_s27, 4  ;;  %s344_s28 = int_to_ptr.vmem [resolvable:$true] %s343_s28 }
  0x1a   : > { %s341_s15 = sshll.u32 %s339_s24, 4  ;;  %p1510_p13 = pnand %p1135_p11, %p109_p12  ;;  %s342_s15 = int_to_ptr.hbm [resolvable:$true] %s341_s15 }
  0x1b   : > { %s332_s19 = scalar_lea.sflag [#allocation3], %s331_s23  ;;  %s1297_s20 = sshra.s32 %s342_s15, 4  ;;  %s1298_s20 = int_to_ptr.hbm [resolvable:$true] %s1297_s20 }
  0x1c   : > { %s1299_s21 = scalar_lea.hbm %s1298_s20, 8  ;;  %p1301_p2 = pneg %p1510_p13 }
  0x1d   : > { %p1300_p0 = scmp.ne.s32.totalorder %s1298_s20, %s1299_s21  ;;  %s1304_s26 = scalar_lea.hbm %s1610_s3, 16 }
  0x1e   : > { %p1305_p7 = scmp.lt.s32.totalorder %s1298_s20, %s1610_s3  ;;  %p1306_p8 = scmp.lt.s32.totalorder %s1304_s26, %s1299_s21 }
  0x1f   : > { %p1302_p3 = pnand %p1301_p2, %p1300_p0 }
  0x20   : > { %p1307_p9 = por %p1306_p8, %p1305_p7 }
  0x21   : > { %p1303_p6 = pneg %p1302_p3 }
  0x23   : > { %p1308_p10 = pnand %p1307_p9, %p1303_p6 }
  0x25   : > { %1311 = shalt.err (!%p1308_p10)
}
  0x26   : > { %1131 = dma.hbm_to_vmem [thread:$0]  (!%p1510_p13), %s342_s15, 128, %s344_s28, %s332_s19  }
  0x27   : > { %352 = sbr.rel (%p1468_p5) target bundleno = 1012 (0x3f4), region = 48  ;;  %s354_s23 = sand.u32 (!%p1468_p5), 1, %s1361_s10  }
  0x28   : > { %s1527_s24 = sshll.u32 (!%p1468_p5), %s354_s23, 3  ;;  %s355_s27 = scalar_lea.sflag (!%p1468_p5), [#allocation3], %s354_s23 }
  0x29   : > { %s358_s12 = scalar_lea.vmem (!%p1468_p5), [#allocation2], %s1527_s24 }
  0x2c   : > { %1344 = dma.done.wait (%p1461_p4), %s355_s27, 128  }
  0x2d   : > { %1346 = vsyncadd (%p1461_p4), %s355_s27, 4294967168 }
  0x2e   : > { %1348 = dma.done.wait (%p114_p1), [#allocation5], 1040  }
  0x2f   : > { %1350 = vsyncadd (%p114_p1), [#allocation5], 4294966256 }
  0x30   : > { %1352 = dma.done.wait (%p114_p1), [#allocation8], 1024  }
  0x31   : > { %1354 = vsyncadd (%p114_p1), [#allocation8], 4294966272  ;;  %v442_v0 = vld [vmem:[%s1609_s2] sm:$0xff]  ;;  %s1376_s14 = smov 124   ;;  %v443_v1 = vld [vmem:[%s1609_s2 + $0x8] sm:$0xff]  ;;  %p420_p4 = scmp.lt.s32.totalorder %s1453_s13, 1 }
  0x32   : > { %446 = vrot.lane.b32.xlu0 %v442_v0, %s1376_s14  ;;  %v437_v3 = vld [vmem:[%s1607_s0] sm:$0xff]  ;;  %v1377_v4 = vmov 0   ;;  %v1378_v5 = vmov 2   ;;  %v438_v6 = vld [vmem:[%s1607_s0 + $0x8] sm:$0xff]  ;;  %v1379_v12 = vmov 1   ;;  %v1380_v13 = vmov 3  }
  0x33   : > { %s1626_s13 = smov (!%p420_p4, %s1453_s13), 1  ;;  %1185 = vset.pattern.permute.xlu1 %v1377_v4  ;;  %1187 = vset.pattern.permute.xlu2 %v1378_v5  ;;  %v439_v7 = vpack.c.bf16 %v437_v3, %v437_v3  ;;  %v440_v8 = vpack.c.bf16 %v438_v6, %v438_v6  ;;  %v484_v31 = vld [vmem:[%s358_s12] sm:$0xff]  ;;  %vm495_vm0 = vcmask 130048   ;;  %s1382_s24 = smov 32   ;;  %vm662_vm1 = vcmask 261120  }
  0x34   : > { %s1550_s19 = sshll.u32 %s1626_s13, 3  ;;  %s1381_s13 = smov 96   ;;  %vm664_vm2 = vcmask 523264   ;;  %vm666_vm3 = vcmask 785408  }
  0x35   : > { %s423_s25 = scalar_lea.vmem %s1608_s1, %s1550_s19  ;;  %v508_v9 = vunpack.c.l.b16 %v439_v7  ;;  %v509_v10 = vunpack.c.l.b16 %v440_v8  ;;  %s1383_s27 = smov 64  }
  0x36   : > { %v441_v2 = vld [vmem:[%s423_s25] sm:$0xff]  ;;  %s427_s28 = scalar_lea.vmem %s1614_s7, %s1550_s19  ;;  %s431_s16 = scalar_lea.vmem %s1615_s8, %s1550_s19 }
  0x37   : > { %487 = vperm.xlu1 %1185, %v441_v2   ;;  %571 = vperm.xlu2 %1187, %v441_v2   ;;  %v510_v11 = vpack.c.b16 %v509_v10, %v508_v9  ;;  %s435_s25 = scalar_lea.vmem %s1616_s9, %s1550_s19 }
  0x39   : > { %522 = vmatpush.bf16.msra.mxu2 %v510_v11 }
  0x3a   : > { %448 = vrot.lane.b32.xlu0 %v443_v1, %s1376_s14 }
  0x3f   : > { %1186 = vset.pattern.permute.xlu1 %v1379_v12  ;;  %1188 = vset.pattern.permute.xlu2 %v1380_v13 }
  0x40   : > { %531 = vperm.xlu1 %1186, %v441_v2   ;;  %611 = vperm.xlu2 %1188, %v441_v2  }
  0x48   : > { %549 = vrot.lane.b32.xlu2 %v510_v11, %s1381_s13 }
  0x91   : > { %v572_v17 = vpop.permute.xlu2 %571 }
  0x9a   : > { %v612_v23 = vpop.permute.xlu2 %611 }
  0xa2   : > { %v550_v44 = vpop.permute.xlu2 %549 }
  0xa3   : > { %562 = vmatpush.bf16.msra.mxu3 %v550_v44  ;;  %v1190_v44 = vld [vmem:[#allocation4] ss:$0 sm:$0xff] }
  0xa4   : > { %v447_v14 = vpop.permute.xlu0 %446 }
  0xa5   : > { %452 = vxpose.xlu0.b32.start [1/2] (short) (narrow) %v447_v14, 8 }
  0xa9   : > { %v488_v16 = vpop.permute.xlu1 %487 }
  0xac   : > { %v449_v15 = vpop.permute.xlu0 %448 }
  0xad   : > { %453 = vxpose.xlu0.b32.end [2/2] (short) (narrow) %v449_v15, 8 }
  0xb2   : > { %v532_v19 = vpop.permute.xlu1 %531 }
 0x114   : > { %1189 = vset.pattern.permute.xlu0 %v1380_v13 }
 0x149   : > { %v468_v18 = vpop.trf.xlu0 }
 0x14a   : > { %v490_v20 = vperm.slane %v468_v18, 0  ;;  %v574_v21 = vperm.slane %v468_v18, 2  ;;  %v614_v22 = vperm.slane %v468_v18, 3  ;;  %v534_v24 = vperm.slane %v468_v18, 1 }
 0x14c   : > { %v535_v25 = vadd.f32 %v534_v24, %v532_v19  ;;  %v575_v26 = vadd.f32 %v574_v21, %v572_v17  ;;  %v491_v27 = vadd.f32 %v490_v20, %v488_v16  ;;  %v615_v28 = vadd.f32 %v614_v22, %v612_v23 }
 0x14e   : > { %v536_v29 = vmul.f32 0.2, %v535_v25  ;;  %v576_v30 = vmul.f32 0.2, %v575_v26  ;;  %v492_v32 = vmul.f32 0.2, %v491_v27 }
 0x14f   : > { %v616_v35 = vmul.f32 0.2, %v615_v28 }
 0x150   : > { %v537_v33 = vmax.f32 %v535_v25, %v536_v29  ;;  %v577_v34 = vmax.f32 %v575_v26, %v576_v30  ;;  %v493_v36 = vmax.f32 %v491_v27, %v492_v32  ;;  %v1095_v26 = vld [vmem:[#allocation6 + $0x38] sm:$0xff]  ;;  %v1094_v27 = vld [vmem:[#allocation6 + $0x30] sm:$0xff]  ;;  %v1092_v29 = vld [vmem:[#allocation6 + $0x20] sm:$0xff] }
 0x151   : > { %v617_v42 = vmax.f32 %v615_v28, %v616_v35  ;;  %740 = vmatpush.bf16.msra.mxu0 %v1095_v26  ;;  %v1093_v28 = vld [vmem:[#allocation6 + $0x28] sm:$0xff]  ;;  %v1091_v30 = vld [vmem:[#allocation6 + $0x18] sm:$0xff]  ;;  %v1102_v35 = vld [vmem:[#allocation7 + $0x30] sm:$0xff] }
 0x152   : > { %v578_v37 = vadd.f32 %v577_v34, %v484_v31  ;;  %v538_v38 = vadd.f32 %v537_v33, %v484_v31  ;;  %v494_v39 = vadd.f32 %v493_v36, %v484_v31  ;;  %v1089_v32 = vld [vmem:[#allocation6 + $0x8] sm:$0xff]  ;;  %v1088_v33 = vld [vmem:[#allocation6] sm:$0xff]  ;;  %v1103_v34 = vld [vmem:[#allocation7 + $0x38] sm:$0xff] }
 0x153   : > { %v618_v45 = vadd.f32 %v617_v42, %v484_v31  ;;  %v1090_v31 = vld [vmem:[#allocation6 + $0x10] sm:$0xff]  ;;  %819 = vmatpush.bf16.msra.mxu1 %v1103_v34  ;;  %v1101_v36 = vld [vmem:[#allocation7 + $0x28] sm:$0xff] }
 0x154   : > { %v579_v40 = vsel %vm495_vm0, %v578_v37, -inf  ;;  %v539_v41 = vsel %vm495_vm0, %v538_v38, -inf  ;;  %v496_v43 = vsel %vm495_vm0, %v494_v39, -inf }
 0x155   : > { %580 = vmax.xlane.f32.xlu0 %v579_v40  ;;  %540 = vmax.xlane.f32.xlu2 %v539_v41  ;;  %v619_v46 = vsel %vm495_vm0, %v618_v45, -inf  ;;  %v1098_v41 = vld [vmem:[#allocation7 + $0x10] sm:$0xff] }
 0x156   : > { %497 = vmax.xlane.f32.xlu1 %v496_v43  ;;  %741 = vmatpush.bf16.msra.mxu0 %v1094_v27 }
 0x157   : > { %820 = vmatpush.bf16.msra.mxu1 %v1102_v35 }
 0x15a   : > { %742 = vmatpush.bf16.msra.mxu0 %v1093_v28 }
 0x15b   : > { %821 = vmatpush.bf16.msra.mxu1 %v1101_v36 }
 0x15e   : > { %620 = vmax.xlane.f32.xlu1 %v619_v46  ;;  %743 = vmatpush.bf16.msra.mxu0 %v1092_v29 }
 0x162   : > { %744 = vmatpush.bf16.msra.mxu0 %v1091_v30 }
 0x166   : > { %745 = vmatpush.bf16.msra.mxu0 %v1090_v31 }
 0x16a   : > { %746 = vmatpush.bf16.msra.mxu0 %v1089_v32 }
 0x16d   : > { %629 = vrot.lane.b32.xlu2 %v510_v11, %s1382_s24 }
 0x16e   : > { %747 = vmatpush.bf16.msra.mxu0 %v1088_v33 }
 0x177   : > { %589 = vrot.lane.b32.xlu1 %v510_v11, %s1383_s27 }
 0x1c8   : > { %v581_v47 = vpop.xlane.xlu0 %580  ;;  %v541_v48 = vpop.xlane.xlu2 %540 }
 0x1c9   : > { %v582_v49 = vsub.f32 %v578_v37, %v581_v47  ;;  %v498_v50 = vpop.xlane.xlu1 %497  ;;  %v542_v51 = vsub.f32 %v538_v38, %v541_v48  ;;  %v1100_v37 = vld [vmem:[#allocation7 + $0x20] sm:$0xff] }
 0x1ca   : > { %v499_v52 = vsub.f32 %v494_v39, %v498_v50  ;;  %822 = vmatpush.bf16.msra.mxu1 %v1100_v37  ;;  %v1099_v39 = vld [vmem:[#allocation7 + $0x18] sm:$0xff] }
 0x1cb   : > { %v583_v53 = vmul.f32 1.442695, %v582_v49  ;;  %v543_v54 = vmul.f32 1.442695, %v542_v51 }
 0x1cc   : > { %v500_v55 = vmul.f32 1.442695, %v499_v52 }
 0x1cd   : > { %1191 = vpow2.f32 %v583_v53 }
 0x1ce   : > { %1193 = vpow2.f32 %v500_v55  ;;  %823 = vmatpush.bf16.msra.mxu1 %v1099_v39 }
 0x1cf   : > { %1195 = vpow2.f32 %v543_v54  ;;  %v1096_v54 = vld [vmem:[#allocation7] sm:$0xff] }
 0x1d0   : > { %v630_v56 = vpop.permute.xlu2 %629 }
 0x1d1   : > { %v621_v57 = vpop.xlane.xlu1 %620  ;;  %642 = vmatpush.bf16.msrb.mxu3 %v630_v56 }
 0x1d2   : > { %v622_v58 = vsub.f32 %v618_v45, %v621_v57  ;;  %824 = vmatpush.bf16.msra.mxu1 %v1098_v41  ;;  %v1097_v45 = vld [vmem:[#allocation7 + $0x8] sm:$0xff] }
 0x1d3   : > { %v1192_v59 = vpop.eup %1191 }
 0x1d4   : > { %v1194_v60 = vpop.eup %1193  ;;  %v623_v61 = vmul.f32 1.442695, %v622_v58  ;;  %v585_v62 = vsel %vm495_vm0, %v1192_v59, 0.0  ;;  %v588_v8 = vpack.c.bf16 %v1192_v59, %v1192_v59 }
 0x1d5   : > { %v1196_v63 = vpop.eup %1195  ;;  %586 = vadd.xlane.f32.xlu1 %v585_v62  ;;  %v505_v0 = vpack.c.bf16 %v1194_v60, %v1194_v60  ;;  %v502_v4 = vsel %vm495_vm0, %v1194_v60, 0.0 }
 0x1d6   : > { %1197 = vpow2.f32 %v623_v61  ;;  %v545_v1 = vsel %vm495_vm0, %v1196_v63, 0.0  ;;  %v548_v2 = vpack.c.bf16 %v1196_v63, %v1196_v63  ;;  %825 = vmatpush.bf16.msra.mxu1 %v1097_v45 }
 0x1d7   : > { %546 = vadd.xlane.f32.xlu2 %v545_v1  ;;  %1018 = vmatmul.msk.bf16.vlgmr.msra.gmra.mxu2 %vm495_vm0, %v505_v0 }
 0x1d8   : > { %1019 = vmatmul.msk.bf16.vlgmr.msra.gmra.mxu3 %vm495_vm0, %v548_v2 }
 0x1da   : > { %826 = vmatpush.bf16.msra.mxu1 %v1096_v54 }
 0x1dc   : > { %v1198_v3 = vpop.eup %1197 }
 0x1dd   : > { %503 = vadd.xlane.f32.xlu1 %v502_v4  ;;  %v625_v5 = vsel %vm495_vm0, %v1198_v3, 0.0  ;;  %v628_v6 = vpack.c.bf16 %v1198_v3, %v1198_v3 }
 0x1df   : > { %626 = vadd.xlane.f32.xlu2 %v625_v5 }
 0x1e8   : > { %1021 = vmatmul.msk.bf16.vlgmr.msrb.gmra.mxu3 %vm495_vm0, %v628_v6 }
 0x1e9   : > { %v590_v7 = vpop.permute.xlu1 %589 }
 0x1ea   : > { %602 = vmatpush.bf16.msrb.mxu2 %v590_v7 }
 0x1ed   : > { %1020 = vmatmul.msk.bf16.vlgmr.msrb.gmra.mxu2 %vm495_vm0, %v588_v8 }
 0x248   : > { %v587_v17 = vpop.xlane.xlu1 %586 }
 0x24a   : > { %v547_v9 = vpop.xlane.xlu2 %546 }
 0x24b   : > { %1199 = vrcp.f32 %v547_v9 }
 0x250   : > { %v504_v38 = vpop.xlane.xlu1 %503 }
 0x251   : > { %v1200_v11 = vpop.eup %1199 }
 0x252   : > { %v627_v14 = vpop.xlane.xlu2 %626 }
 0x253   : > { %1201 = vrcp.f32 %v627_v14 }
 0x254   : > { %1203 = vrcp.f32 %v587_v17 }
 0x255   : > { %1205 = vrcp.f32 %v504_v38 }
 0x259   : > { %v1202_v18 = vpop.eup %1201 }
 0x25a   : > { %v524_v10 = vpop.f32.mrf.mxu2  ;;  %v1204_v21 = vpop.eup %1203 }
 0x25b   : > { %v564_v12 = vpop.f32.mrf.mxu3  ;;  %v1206_v42 = vpop.eup %1205 }
 0x25c   : > { %v569_v13 = vmul.f32 %v1200_v11, %v564_v12  ;;  %v529_v43 = vmul.f32 %v1206_v42, %v524_v10 }
 0x25e   : > { %651 = vrot.lane.b32.xlu2 %v569_v13, %s1382_s24 }
 0x262   : > { %v526_v15 = vpop.f32.mrf.mxu2 }
 0x263   : > { %v566_v16 = vpop.f32.mrf.mxu3 }
 0x26b   : > { %v644_v19 = vpop.f32.mrf.mxu3 }
 0x26c   : > { %v649_v20 = vmul.f32 %v1202_v18, %v644_v19 }
 0x26e   : > { %659 = vrot.lane.b32.xlu2 %v649_v20, %s1381_s13 }
 0x270   : > { %v604_v22 = vpop.f32.mrf.mxu2 }
 0x271   : > { %v609_v23 = vmul.f32 %v1204_v21, %v604_v22 }
 0x273   : > { %v646_v24 = vpop.f32.mrf.mxu3  ;;  %655 = vrot.lane.b32.xlu1 %v609_v23, %s1383_s27 }
 0x278   : > { %v606_v25 = vpop.f32.mrf.mxu2 }
 0x2b8   : > { %v652_v40 = vpop.permute.xlu2 %651 }
 0x2b9   : > { %v663_v46 = vsel %vm662_vm1, %v529_v43, %v652_v40 }
 0x2c8   : > { %v660_v48 = vpop.permute.xlu2 %659 }
 0x2e5   : > { %v656_v47 = vpop.permute.xlu1 %655 }
 0x2e6   : > { %v665_v49 = vsel %vm664_vm2, %v663_v46, %v656_v47 }
 0x2e7   : > { %v667_v50 = vsel %vm666_vm3, %v665_v49, %v660_v48 }
 0x2e8   : > { %v672_v51 = vadd.f32 %v1190_v44, %v667_v50 }
 0x2ea   : > { %v673_v52 = vmax.f32 %v672_v51, 0.0 }
 0x2ec   : > { %674 = vst [vmem:[%s427_s28] sm:$0xff] %v673_v52  ;;  %v675_v53 = vpack.c.bf16 %v673_v52, %v673_v52 }
 0x2ee   : > { %748 = vmatmul.bf16.vlgmr.msra.gmra.mxu0 %v675_v53 }
 0x36b   : > { %v749_v55 = vpop.f32.mrf.mxu0 }
 0x36c   : > { %753 = vst [vmem:[%s431_s16] sm:$0xff] %v749_v55  ;;  %v754_v56 = vpack.c.bf16 %v749_v55, %v749_v55 }
 0x36e   : > { %827 = vmatmul.bf16.vlgmr.msra.gmra.mxu1 %v754_v56 }
 0x373   : > { %v751_v57 = vpop.f32.mrf.mxu0 }
 0x3eb   : > { %v828_v58 = vpop.f32.mrf.mxu1 }
 0x3ec   : > { %832 = vst [vmem:[%s435_s25] sm:$0xff] %v828_v58 }
 0x3f3   : > { %v830_v59 = vpop.f32.mrf.mxu1 }
 0x3f4 PF: > { %p22_p1 = scmp.ge.s32.totalorder %s1493_s17, 4   ;;  %s1621_s30 = smov %s1361_s10 }
 0x3f5   : > { %s1622_s10 = smov %s1365_s11  ;;  %s1623_s11 = smov %s1503_s22 }
 0x3f6   : > { %s1624_s12 = smov %s1493_s17  ;;  %24 = sbr.rel (!%p22_p1) target bundleno = 5 (0x5), region = 127 }
 0x3fb   :  { %880 = vsyncpa [#allocation3], 1 }
 0x3fc   :  { %882 = vsyncpa [#allocation3 + $0x1], 1 }
 0x3fd   :  { %883 = vsyncpa [#allocation5], 1 }
 0x3fe   :  { %884 = vsyncpa [#allocation8], 1 }

// kernel: gat_forward.9
= control target key start
LH: loop header
LB: loop body
LE: loop exit
PB: predicated region body
PF: predicated region fallthrough
CT: control target
= control target key end

     0   :  { %s2572_s0 = inlined_call_operand.vmem [shape: f32[16,128], index: 0, kind: input, shape index: {}]   ;;  %s2573_s1 = inlined_call_operand.vmem [shape: f32[16,128], index: 1, kind: input, shape index: {}, may-alias: {1,2}]   ;;  %s2574_s2 = inlined_call_operand.vmem [shape: f32[16,128], index: 2, kind: input, shape index: {}, may-alias: {1,2}]   ;;  %s2575_s3 = inlined_call_operand.hbm [shape: f32[16,16], index: 3, kind: input, shape index: {}]   ;;  %s2576_s4 = inlined_call_operand.hbm [shape: f32[1,128], index: 4, kind: input, shape index: {}]   ;;  %s2577_s5 = inlined_call_operand.vmem [shape: f32[16,128], index: 5, kind: input, shape index: {}]   ;;  %s2578_s6 = inlined_call_operand.vmem [shape: f32[16,128], index: 6, kind: input, shape index: {}]   ;;  %s2579_s7 = inlined_call_operand.hbm [shape: bf16[384,128], index: 7, kind: input, shape index: {}]   ;;  %s2580_s8 = inlined_call_operand.hbm [shape: f32[1,128], index: 8, kind: input, shape index: {}]   ;;  %s2581_s9 = inlined_call_operand.hbm [shape: bf16[128,768], index: 9, kind: input, shape index: {}]   ;;  %s2582_s10 = inlined_call_operand.hbm [shape: f32[1,768], index: 10, kind: input, shape index: {}]   ;;  %s2583_s11 = inlined_call_operand.vmem [shape: f32[16,768], index: 11, kind: output, shape index: {}]  }
   0x1   :  { %2584 = sst [smem:[#allocation16_spill]] %s2576_s4 }
   0x2   :  { %2585 = sst [smem:[#allocation17_spill]] %s2580_s8 }
   0x3   :  { %16 = vsyncpa [#allocation3], 0 }
   0x4   :  { %18 = vsyncpa [#allocation3 + $0x1], 0 }
   0x5   :  { %19 = vsyncpa [#allocation5], 0 }
   0x6   :  { %20 = vsyncpa [#allocation8], 0 }
   0x7   :  { %21 = vsyncpa [#allocation11], 0  ;;  %s2370_s17 = smov 0   ;;  %s2372_s18 = smov 0  }
   0x8   :  { %s2374_s19 = smov 0   ;;  %s2376_s20 = smov 0  }
   0x9 LB: > { %s2586_s4 = sld [smem:[#allocation16_spill]]  ;;  %s2394_s24 = sadd.s32 4294967295, %s2291_s20   ;;  %s2291_s20 = sphi %s2376_s20, %s2595_s20   ;;  %s2287_s19 = sphi %s2374_s19, %s2594_s19   ;;  %s2283_s18 = sphi %s2372_s18, %s2593_s18   ;;  %s2279_s17 = sphi %s2370_s17, %s2592_s17  }
   0xa   : > { %p1552_p0 = scmp.ge.s32.totalorder %s2291_s20, 1  ;;  %p116_p1 = scmp.eq.s32.totalorder %s2394_s24, 0 }
   0xb   : > { %p309_p2 = scmp.lt.s32.totalorder %s2291_s20, 3  ;;  %s2293_s26 = smov [#allocation4]  }
   0xc   : > { %s329_s27 = sshll.u32 %s2293_s26, 4  ;;  %s2588_s8 = sld [smem:[#allocation17_spill]]  ;;  %s330_s27 = int_to_ptr.vmem [resolvable:$true] %s329_s27 }
   0xd   : > { %p2399_p3 = pnand %p1552_p0, %p309_p2  ;;  %s2294_s13 = smov [#allocation7]  }
   0xe   : > { %s355_s14 = sshll.u32 %s2294_s13, 4  ;;  %s338_s21 = sshll.u32 %s2579_s7, 4  ;;  %s356_s14 = int_to_ptr.vmem [resolvable:$true] %s355_s14  ;;  %s339_s21 = int_to_ptr.hbm [resolvable:$true] %s338_s21 }
   0xf   : > { %s327_s23 = sshll.u32 %s2586_s4, 4  ;;  %p1961_p4 = pneg %p2399_p3  ;;  %s328_s23 = int_to_ptr.hbm [resolvable:$true] %s327_s23 }
  0x10   : > { %s2295_s22 = smov [#allocation6]   ;;  %s364_s4 = sshll.u32 %s2581_s9, 4  ;;  %s365_s4 = int_to_ptr.hbm [resolvable:$true] %s364_s4 }
  0x11   : > { %p2410_p5 = pnand %p1961_p4, %p116_p1  ;;  %s340_s26 = sshll.u32 %s2295_s22, 4  ;;  %s341_s26 = int_to_ptr.vmem [resolvable:$true] %s340_s26 }
  0x12   : > { %s353_s30 = sshll.u32 %s2588_s8, 4  ;;  %s2296_s13 = smov 64   ;;  %s354_s30 = int_to_ptr.hbm [resolvable:$true] %s353_s30 }
  0x13   : > { %1964 = dma.hbm_to_vmem [thread:$0]  (!%p2410_p5), %s328_s23, 16, %s330_s27, [#allocation5]  }
  0x14   : > { %1970 = dma.hbm_to_vmem [thread:$0]  (!%p2410_p5), %s354_s30, 16, %s356_s14, [#allocation8]  }
  0x15   : > { %s2297_s8 = smov 4   ;;  %s2298_s15 = smov [#allocation9]  }
  0x16   : > { %1967 = dma.hbm_to_vmem [thread:$0]  (!%p2410_p5), %s339_s21, 3072, %s341_s26, [#allocation5], %s2296_s13, %s2296_s13, %s2297_s8  }
  0x17   : > { %s366_s23 = sshll.u32 %s2298_s15, 4  ;;  %s2299_s27 = smov 384   ;;  %s367_s23 = int_to_ptr.vmem [resolvable:$true] %s366_s23 }
  0x18   : > { %s2300_s30 = smov 24   ;;  %s379_s8 = sshll.u32 %s2582_s10, 4  ;;  %s380_s8 = int_to_ptr.hbm [resolvable:$true] %s379_s8 }
  0x19   : > { %1973 = dma.hbm_to_vmem [thread:$0]  (!%p2410_p5), %s365_s4, 6144, %s367_s23, [#allocation8], %s2299_s27, %s2299_s27, %s2300_s30  }
  0x1a   : > { %s2301_s21 = smov [#allocation10]   ;;  %s2434_s26 = sadd.s32 1, %s2291_s20  }
  0x1b   : > { %s381_s22 = sshll.u32 %s2301_s21, 4  ;;  %s99_s28 = ssub.s32 %s2291_s20, %s2434_s26  ;;  %s382_s22 = int_to_ptr.vmem [resolvable:$true] %s381_s22 }
  0x1c   : > { %1976 = dma.hbm_to_vmem [thread:$0]  (!%p2410_p5), %s380_s8, 96, %s382_s22, [#allocation11]  }
  0x1d   : > { %s102_s29 = sadd.s32 1, %s2287_s19  ;;  %p100_p6 = scmp.eq.s32.totalorder %s99_s28, 0 }
  0x1e   : > { %p109_p7 = scmp.ne.s32.totalorder %s2287_s19, %s2283_s18  ;;  %p110_p8 = scmp.eq.s32.totalorder %s2291_s20, 0 }
  0x1f   : > { %p115_p9 = scmp.ne.s32.totalorder %s2283_s18, %s2279_s17  ;;  %p1986_p12 = scmp.lt.s32.totalorder %s2291_s20, 2 }
  0x20   : > { %s2445_s4 = scalar_select %p100_p6, %s2287_s19, %s102_s29  }
  0x21   : > { %p111_p10 = por %p110_p8, %p109_p7  ;;  %p2449_p11 = por %p116_p1, %p115_p9 }
  0x22   : > { %s399_s12 = sand.u32 1, %s2287_s19   ;;  %s1560_s23 = sshll.u32 %s2291_s20, 3 }
  0x23   : > { %s1559_s15 = sshll.u32 %s399_s12, 3  ;;  %s407_s14 = scalar_lea.hbm %s2575_s3, %s1560_s23 }
  0x24   : > { %s403_s16 = scalar_lea.vmem [#allocation2], %s1559_s15  ;;  %s409_s21 = sshll.u32 %s407_s14, 4  ;;  %s410_s21 = int_to_ptr.hbm [resolvable:$true] %s409_s21 }
  0x25   : > { %s411_s8 = sshll.u32 %s403_s16, 4  ;;  %p2459_p13 = pnand %p1986_p12, %p111_p10  ;;  %s412_s8 = int_to_ptr.vmem [resolvable:$true] %s411_s8 }
  0x26   : > { %s400_s22 = scalar_lea.sflag [#allocation3], %s399_s12  ;;  %s2215_s28 = sshra.s32 %s410_s21, 4  ;;  %s2216_s28 = int_to_ptr.hbm [resolvable:$true] %s2215_s28 }
  0x27   : > { %s2217_s29 = scalar_lea.hbm %s2216_s28, 8  ;;  %p2219_p2 = pneg %p2459_p13 }
  0x28   : > { %p2218_p0 = scmp.ne.s32.totalorder %s2216_s28, %s2217_s29  ;;  %s2222_s23 = scalar_lea.hbm %s2575_s3, 16 }
  0x29   : > { %p2223_p6 = scmp.lt.s32.totalorder %s2216_s28, %s2575_s3  ;;  %p2224_p7 = scmp.lt.s32.totalorder %s2222_s23, %s2217_s29 }
  0x2a   : > { %p2220_p4 = pnand %p2219_p2, %p2218_p0 }
  0x2b   : > { %p2225_p8 = por %p2224_p7, %p2223_p6 }
  0x2c   : > { %p2221_p5 = pneg %p2220_p4 }
  0x2e   : > { %p2226_p9 = pnand %p2225_p8, %p2221_p5 }
  0x30   : > { %2229 = shalt.err (!%p2226_p9)
}
  0x31   : > { %1980 = dma.hbm_to_vmem [thread:$0]  (!%p2459_p13), %s410_s21, 128, %s412_s8, %s400_s22  }
  0x32   : > { %434 = sbr.rel (%p2399_p3) target bundleno = 1048 (0x418), region = 64  ;;  %s436_s12 = sand.u32 (!%p2399_p3), 1, %s2283_s18  }
  0x33   : > { %s2476_s14 = sshll.u32 (!%p2399_p3), %s436_s12, 3  ;;  %s437_s16 = scalar_lea.sflag (!%p2399_p3), [#allocation3], %s436_s12 }
  0x34   : > { %s440_s20 = scalar_lea.vmem (!%p2399_p3), [#allocation2], %s2476_s14 }
  0x37   : > { %2262 = dma.done.wait (%p2449_p11), %s437_s16, 128  }
  0x38   : > { %2264 = vsyncadd (%p2449_p11), %s437_s16, 4294967168 }
  0x39   : > { %2266 = dma.done.wait (%p116_p1), [#allocation5], 3088  }
  0x3a   : > { %2268 = vsyncadd (%p116_p1), [#allocation5], 4294964208 }
  0x3b   : > { %2270 = dma.done.wait (%p116_p1), [#allocation8], 6160  }
  0x3c   : > { %2272 = vsyncadd (%p116_p1), [#allocation8], 4294961136 }
  0x3d   : > { %2274 = dma.done.wait (%p116_p1), [#allocation11], 96  }
  0x3e   : > { %2276 = vsyncadd (%p116_p1), [#allocation11], 4294967200  ;;  %v540_v0 = vld [vmem:[%s2574_s2] sm:$0xff]  ;;  %s2302_s8 = smov 124   ;;  %v541_v1 = vld [vmem:[%s2574_s2 + $0x8] sm:$0xff]  ;;  %p517_p3 = scmp.lt.s32.totalorder %s2394_s24, 1 }
  0x3f   : > { %544 = vrot.lane.b32.xlu0 %v540_v0, %s2302_s8  ;;  %v2303_v3 = vmov 0   ;;  %v2304_v4 = vmov 3   ;;  %v2305_v5 = vmov 2   ;;  %v2306_v6 = vmov 1   ;;  %v535_v10 = vld [vmem:[%s2572_s0] sm:$0xff]  ;;  %v536_v11 = vld [vmem:[%s2572_s0 + $0x8] sm:$0xff] }
  0x40   : > { %s2597_s24 = smov (!%p517_p3, %s2394_s24), 1  ;;  %2042 = vset.pattern.permute.xlu1 %v2303_v3  ;;  %2044 = vset.pattern.permute.xlu2 %v2304_v4  ;;  %v537_v13 = vpack.c.bf16 %v535_v10, %v535_v10  ;;  %v538_v14 = vpack.c.bf16 %v536_v11, %v536_v11  ;;  %v582_v32 = vld [vmem:[%s440_s20] sm:$0xff]  ;;  %vm593_vm0 = vcmask 130048   ;;  %s2307_s14 = smov 64   ;;  %vm760_vm1 = vcmask 261120  }
  0x41   : > { %s2506_s22 = sshll.u32 %s2597_s24, 3  ;;  %s2308_s16 = smov 96   ;;  %v1881_v10 = vld [vmem:[#allocation6 + $0x78] sm:$0xff]  ;;  %vm762_vm2 = vcmask 523264   ;;  %vm764_vm3 = vcmask 785408  }
  0x42   : > { %s520_s15 = scalar_lea.vmem %s2573_s1, %s2506_s22  ;;  %v606_v15 = vunpack.c.l.b16 %v537_v13  ;;  %v607_v16 = vunpack.c.l.b16 %v538_v14  ;;  %s2309_s20 = smov 32   ;;  %v1872_v13 = vld [vmem:[#allocation6 + $0x30] sm:$0xff] }
  0x43   : > { %v539_v2 = vld [vmem:[%s520_s15] sm:$0xff]  ;;  %s528_s28 = scalar_lea.vmem %s2578_s6, %s2506_s22 }
  0x44   : > { %585 = vperm.xlu1 %2042, %v539_v2   ;;  %709 = vperm.xlu2 %2044, %v539_v2   ;;  %v608_v17 = vpack.c.b16 %v607_v16, %v606_v15  ;;  %v1880_v14 = vld [vmem:[#allocation6 + $0x70] sm:$0xff] }
  0x46   : > { %620 = vmatpush.bf16.msra.mxu1 %v608_v17 }
  0x47   : > { %546 = vrot.lane.b32.xlu0 %v541_v1, %s2302_s8  ;;  %s524_s8 = scalar_lea.vmem %s2577_s5, %s2506_s22  ;;  %s1938_s22 = smul.u32 48, %s2597_s24 }
  0x49   : > { %s533_s23 = scalar_lea.vmem %s2583_s11, %s1938_s22 }
  0x4c   : > { %2043 = vset.pattern.permute.xlu1 %v2305_v5  ;;  %2045 = vset.pattern.permute.xlu2 %v2306_v6 }
  0x4d   : > { %669 = vperm.xlu1 %2043, %v539_v2   ;;  %629 = vperm.xlu2 %2045, %v539_v2  }
  0x9e   : > { %v710_v9 = vpop.permute.xlu2 %709 }
  0xa7   : > { %v630_v18 = vpop.permute.xlu2 %629 }
  0xb1   : > { %v545_v7 = vpop.permute.xlu0 %544 }
  0xb2   : > { %550 = vxpose.xlu0.b32.start [1/2] (short) (narrow) %v545_v7, 8 }
  0xb6   : > { %v586_v12 = vpop.permute.xlu1 %585 }
  0xb9   : > { %v547_v8 = vpop.permute.xlu0 %546 }
  0xba   : > { %551 = vxpose.xlu0.b32.end [2/2] (short) (narrow) %v547_v8, 8 }
  0xbf   : > { %v670_v20 = vpop.permute.xlu1 %669 }
 0x121   : > { %2046 = vset.pattern.permute.xlu0 %v2304_v4 }
 0x156   : > { %v566_v19 = vpop.trf.xlu0 }
 0x157   : > { %v588_v21 = vperm.slane %v566_v19, 0  ;;  %v712_v22 = vperm.slane %v566_v19, 3  ;;  %v632_v23 = vperm.slane %v566_v19, 1  ;;  %v672_v24 = vperm.slane %v566_v19, 2 }
 0x159   : > { %v633_v25 = vadd.f32 %v632_v23, %v630_v18  ;;  %v673_v26 = vadd.f32 %v672_v24, %v670_v20  ;;  %v589_v27 = vadd.f32 %v588_v21, %v586_v12  ;;  %v713_v28 = vadd.f32 %v712_v22, %v710_v9  ;;  %v1873_v9 = vld [vmem:[#allocation6 + $0x38] sm:$0xff] }
 0x15a   : > { %v1889_v12 = vld [vmem:[#allocation6 + $0xb8] sm:$0xff]  ;;  %973 = vmatpush.bf16.msra.mxu0 %v1873_v9 }
 0x15b   : > { %v634_v29 = vmul.f32 0.2, %v633_v25  ;;  %v674_v30 = vmul.f32 0.2, %v673_v26  ;;  %v590_v31 = vmul.f32 0.2, %v589_v27 }
 0x15c   : > { %v714_v36 = vmul.f32 0.2, %v713_v28  ;;  %v1933_v9 = vld [vmem:[#allocation9 + $0x15c] sm:$0xf] }
 0x15d   : > { %v635_v33 = vmax.f32 %v633_v25, %v634_v29  ;;  %v675_v34 = vmax.f32 %v673_v26, %v674_v30  ;;  %v591_v35 = vmax.f32 %v589_v27, %v590_v31  ;;  %v1871_v31 = vld [vmem:[#allocation6 + $0x28] sm:$0xff] }
 0x15e   : > { %v715_v43 = vmax.f32 %v713_v28, %v714_v36  ;;  %974 = vmatpush.bf16.msra.mxu0 %v1872_v13  ;;  %v1887_v36 = vld [vmem:[#allocation6 + $0xa8] sm:$0xff]  ;;  %v1770_v13 = vld [vmem:[#allocation9 + $0xc0] sm:$0xf] }
 0x15f   : > { %v636_v37 = vadd.f32 %v635_v33, %v582_v32  ;;  %v592_v38 = vadd.f32 %v591_v35, %v582_v32  ;;  %v676_v39 = vadd.f32 %v675_v34, %v582_v32  ;;  %v1888_v33 = vld [vmem:[#allocation6 + $0xb0] sm:$0xff]  ;;  %v1870_v34 = vld [vmem:[#allocation6 + $0x20] sm:$0xff] }
 0x160   : > { %v716_v44 = vadd.f32 %v715_v43, %v582_v32  ;;  %v1879_v32 = vld [vmem:[#allocation6 + $0x68] sm:$0xff]  ;;  %v1878_v35 = vld [vmem:[#allocation6 + $0x60] sm:$0xff] }
 0x161   : > { %v637_v40 = vsel %vm593_vm0, %v636_v37, -inf  ;;  %v594_v41 = vsel %vm593_vm0, %v592_v38, -inf  ;;  %v677_v42 = vsel %vm593_vm0, %v676_v39, -inf  ;;  %v1867_v43 = vld [vmem:[#allocation6 + $0x8] sm:$0xff] }
 0x162   : > { %638 = vmax.xlane.f32.xlu0 %v637_v40  ;;  %595 = vmax.xlane.f32.xlu1 %v594_v41  ;;  %v717_v45 = vsel %vm593_vm0, %v716_v44, -inf  ;;  %v1868_v40 = vld [vmem:[#allocation6 + $0x10] sm:$0xff] }
 0x163   : > { %678 = vmax.xlane.f32.xlu2 %v677_v42  ;;  %975 = vmatpush.bf16.msra.mxu0 %v1871_v31  ;;  %v1876_v41 = vld [vmem:[#allocation6 + $0x50] sm:$0xff]  ;;  %v1885_v42 = vld [vmem:[#allocation6 + $0x98] sm:$0xff] }
 0x167   : > { %976 = vmatpush.bf16.msra.mxu0 %v1870_v34 }
 0x16b   : > { %718 = vmax.xlane.f32.xlu2 %v717_v45  ;;  %v1884_v45 = vld [vmem:[#allocation6 + $0x90] sm:$0xff] }
 0x17b   : > { %687 = vrot.lane.b32.xlu1 %v608_v17, %s2307_s14 }
 0x183   : > { %647 = vrot.lane.b32.xlu1 %v608_v17, %s2308_s16  ;;  %727 = vrot.lane.b32.xlu2 %v608_v17, %s2309_s20 }
 0x1d5   : > { %v639_v46 = vpop.xlane.xlu0 %638  ;;  %v596_v47 = vpop.xlane.xlu1 %595 }
 0x1d6   : > { %v640_v48 = vsub.f32 %v636_v37, %v639_v46  ;;  %v679_v49 = vpop.xlane.xlu2 %678  ;;  %v597_v50 = vsub.f32 %v592_v38, %v596_v47  ;;  %v1869_v37 = vld [vmem:[#allocation6 + $0x18] sm:$0xff]  ;;  %v1866_v46 = vld [vmem:[#allocation6] sm:$0xff] }
 0x1d7   : > { %v680_v51 = vsub.f32 %v676_v39, %v679_v49  ;;  %v1877_v38 = vld [vmem:[#allocation6 + $0x58] sm:$0xff]  ;;  %v1886_v39 = vld [vmem:[#allocation6 + $0xa0] sm:$0xff]  ;;  %977 = vmatpush.bf16.msra.mxu0 %v1869_v37  ;;  %v772_v49 = vld [vmem:[%s524_s8] sm:$0xff] }
 0x1d8   : > { %v641_v52 = vmul.f32 1.442695, %v640_v48  ;;  %v598_v53 = vmul.f32 1.442695, %v597_v50  ;;  %v1874_v47 = vld [vmem:[#allocation6 + $0x40] sm:$0xff]  ;;  %v1883_v48 = vld [vmem:[#allocation6 + $0x88] sm:$0xff]  ;;  %v774_v50 = vpack.c.bf16 %v772_v49, %v772_v49 }
 0x1d9   : > { %v681_v54 = vmul.f32 1.442695, %v680_v51  ;;  %v773_v51 = vld [vmem:[%s528_s28] sm:$0xff]  ;;  %v1899_v49 = vld [vmem:[#allocation9 + $0x44] sm:$0xf0] }
 0x1da   : > { %2049 = vpow2.f32 %v641_v52  ;;  %v775_v52 = vpack.c.bf16 %v773_v51, %v773_v51  ;;  %v1896_v51 = vld [vmem:[#allocation9 + $0x34] sm:$0xf] }
 0x1db   : > { %2051 = vpow2.f32 %v681_v54  ;;  %978 = vmatpush.bf16.msra.mxu0 %v1868_v40  ;;  %v1842_v54 = vld [vmem:[#allocation9 + $0x150] sm:$0xf] }
 0x1dc   : > { %2053 = vpow2.f32 %v598_v53  ;;  %v1882_v53 = vld [vmem:[#allocation6 + $0x80] sm:$0xff] }
 0x1de   : > { %v719_v55 = vpop.xlane.xlu2 %718 }
 0x1df   : > { %v720_v56 = vsub.f32 %v716_v44, %v719_v55  ;;  %v1875_v44 = vld [vmem:[#allocation6 + $0x48] sm:$0xff]  ;;  %979 = vmatpush.bf16.msra.mxu0 %v1867_v43 }
 0x1e0   : > { %v2050_v57 = vpop.eup %2049  ;;  %v1935_v55 = vld [vmem:[#allocation9 + $0x164] sm:$0xf0]  ;;  %v1902_v43 = vld [vmem:[#allocation9 + $0x64] sm:$0xf] }
 0x1e1   : > { %v2052_v58 = vpop.eup %2051  ;;  %v721_v59 = vmul.f32 1.442695, %v720_v56  ;;  %v643_v60 = vsel %vm593_vm0, %v2050_v57, 0.0  ;;  %v646_v8 = vpack.c.bf16 %v2050_v57, %v2050_v57  ;;  %v1932_v56 = vld [vmem:[#allocation9 + $0x154] sm:$0xf]  ;;  %v1843_v57 = vor.u32 %v1935_v55, %v1842_v54 }
 0x1e2   : > { %v2054_v61 = vpop.eup %2053  ;;  %644 = vadd.xlane.f32.xlu2 %v643_v60  ;;  %v683_v62 = vsel %vm593_vm0, %v2052_v58, 0.0  ;;  %v686_v6 = vpack.c.bf16 %v2052_v58, %v2052_v58  ;;  %v1844_v58 = vld [vmem:[#allocation9 + $0x168] sm:$0xf0]  ;;  %v1929_v60 = vld [vmem:[#allocation9 + $0x134] sm:$0xf0] }
 0x1e3   : > { %2055 = vpow2.f32 %v721_v59  ;;  %684 = vadd.xlane.f32.xlu1 %v683_v62  ;;  %v603_v63 = vpack.c.bf16 %v2054_v61, %v2054_v61  ;;  %v600_v3 = vsel %vm593_vm0, %v2054_v61, 0.0  ;;  %980 = vmatpush.bf16.msra.mxu0 %v1866_v46  ;;  %v1818_v59 = vld [vmem:[#allocation9 + $0x120] sm:$0xf]  ;;  %v1847_v61 = vor.u32 %v1932_v56, %v1844_v58  ;;  %v1926_v62 = vld [vmem:[#allocation9 + $0x124] sm:$0xf] }
 0x1e5   : > { %1572 = vmatmul.msk.bf16.vlgmr.msra.gmra.mxu1 %vm593_vm0, %v603_v63  ;;  %v1820_v63 = vld [vmem:[#allocation9 + $0x138] sm:$0xf0] }
 0x1e6   : > { %v728_v0 = vpop.permute.xlu2 %727  ;;  %981 = vmatmul.bf16.vlgmr.msra.gmra.mxu0 %v774_v50 }
 0x1e7   : > { %740 = vmatpush.bf16.msra.mxu3 %v728_v0  ;;  %v1819_v0 = vor.u32 %v1929_v60, %v1818_v59  ;;  %1329 = vmatpush.bf16.msrb.mxu0 %v1847_v61 }
 0x1e9   : > { %v2056_v1 = vpop.eup %2055 }
 0x1ea   : > { %v723_v2 = vsel %vm593_vm0, %v2056_v1, 0.0  ;;  %v726_v4 = vpack.c.bf16 %v2056_v1, %v2056_v1  ;;  %v1823_v1 = vor.u32 %v1926_v62, %v1820_v63 }
 0x1eb   : > { %724 = vadd.xlane.f32.xlu2 %v723_v2  ;;  %601 = vadd.xlane.f32.xlu1 %v600_v3  ;;  %v1794_v2 = vld [vmem:[#allocation9 + $0xf0] sm:$0xf]  ;;  %v1923_v3 = vld [vmem:[#allocation9 + $0x104] sm:$0xf0] }
 0x1ec   : > { %1575 = vmatmul.msk.bf16.vlgmr.msra.gmra.mxu3 %vm593_vm0, %v726_v4  ;;  %v1920_v4 = vld [vmem:[#allocation9 + $0xf4] sm:$0xf]  ;;  %1330 = vmatpush.bf16.msrb.mxu0 %v1823_v1  ;;  %v1915_v1 = vld [vmem:[#allocation9 + $0xcc] sm:$0xf] }
 0x1ed   : > { %v688_v5 = vpop.permute.xlu1 %687  ;;  %1316 = vmatpush.bf16.msrb.mxu3 %v1843_v57 }
 0x1ee   : > { %700 = vmatpush.bf16.msra.mxu2 %v688_v5  ;;  %v1796_v5 = vld [vmem:[#allocation9 + $0x108] sm:$0xf0] }
 0x1f1   : > { %1574 = vmatmul.msk.bf16.vlgmr.msra.gmra.mxu2 %vm593_vm0, %v686_v6  ;;  %v1850_v6 = vld [vmem:[#allocation9 + $0x158] sm:$0xf]  ;;  %1317 = vmatpush.bf16.msrb.mxu3 %v1819_v0  ;;  %v1918_v0 = vld [vmem:[#allocation9 + $0xdc] sm:$0xf0] }
 0x1f2   : > { %999 = vmatpush.bf16.msrb.mxu2 %v1889_v12  ;;  %v1795_v12 = vor.u32 %v1923_v3, %v1794_v2  ;;  %v1780_v3 = vld [vmem:[#allocation9 + $0xe0] sm:$0xf0] }
 0x1f5   : > { %v648_v7 = vpop.permute.xlu1 %647  ;;  %1318 = vmatpush.bf16.msrb.mxu3 %v1795_v12  ;;  %v1912_v12 = vld [vmem:[#allocation9 + $0xac] sm:$0xf0] }
 0x1f6   : > { %660 = vmatpush.bf16.msrb.mxu1 %v648_v7  ;;  %1000 = vmatpush.bf16.msrb.mxu2 %v1888_v33  ;;  %v1936_v7 = vld [vmem:[#allocation9 + $0x16c] sm:$0xf0]  ;;  %v1911_v33 = vld [vmem:[#allocation9 + $0xa4] sm:$0xf0] }
 0x1f9   : > { %1573 = vmatmul.msk.bf16.vlgmr.msrb.gmra.mxu1 %vm593_vm0, %v646_v8  ;;  %v1851_v8 = vor.u32 %v1936_v7, %v1850_v6  ;;  %v1893_v6 = vld [vmem:[#allocation9 + $0x14] sm:$0xf0]  ;;  %v1890_v7 = vld [vmem:[#allocation9 + $0x4] sm:$0xf] }
 0x1fa   : > { %986 = vmatpush.bf16.msra.mxu1 %v1881_v10  ;;  %1001 = vmatpush.bf16.msrb.mxu2 %v1887_v36  ;;  %v1852_v10 = vld [vmem:[#allocation9 + $0x170] sm:$0xf0]  ;;  %v1748_v36 = vld [vmem:[#allocation9 + $0xa8] sm:$0xf0] }
 0x1fe   : > { %987 = vmatpush.bf16.msra.mxu1 %v1880_v14  ;;  %1002 = vmatpush.bf16.msrb.mxu2 %v1886_v39  ;;  %v1917_v14 = vld [vmem:[#allocation9 + $0xd4] sm:$0xf0] }
 0x202   : > { %988 = vmatpush.bf16.msra.mxu1 %v1879_v32  ;;  %1003 = vmatpush.bf16.msrb.mxu2 %v1885_v42  ;;  %v1746_v32 = vld [vmem:[#allocation9 + $0x90] sm:$0xf]  ;;  %v1905_v42 = vld [vmem:[#allocation9 + $0x74] sm:$0xf0] }
 0x203   : > { %v1747_v39 = vor.u32 %v1911_v33, %v1746_v32  ;;  %v1928_v33 = vld [vmem:[#allocation9 + $0x134] sm:$0xf] }
 0x206   : > { %989 = vmatpush.bf16.msra.mxu1 %v1878_v35  ;;  %1004 = vmatpush.bf16.msrb.mxu2 %v1884_v45  ;;  %v1908_v35 = vld [vmem:[#allocation9 + $0x94] sm:$0xf] }
 0x207   : > { %v1751_v40 = vor.u32 %v1908_v35, %v1748_v36 }
 0x20a   : > { %990 = vmatpush.bf16.msra.mxu1 %v1877_v38  ;;  %1005 = vmatpush.bf16.msrb.mxu2 %v1883_v48  ;;  %v1698_v48 = vld [vmem:[#allocation9 + $0x30] sm:$0xf] }
 0x20b   : > { %v1699_v56 = vor.u32 %v1899_v49, %v1698_v48  ;;  %v1922_v49 = vld [vmem:[#allocation9 + $0x104] sm:$0xf] }
 0x20e   : > { %991 = vmatpush.bf16.msra.mxu1 %v1876_v41  ;;  %1006 = vmatpush.bf16.msrb.mxu2 %v1882_v53  ;;  %v1722_v41 = vld [vmem:[#allocation9 + $0x60] sm:$0xf]  ;;  %v2047_v53 = vld [vmem:[#allocation4] ss:$0 sm:$0xff] }
 0x20f   : > { %v1723_v46 = vor.u32 %v1905_v42, %v1722_v41  ;;  %v1897_v41 = vld [vmem:[#allocation9 + $0x3c] sm:$0xf] }
 0x212   : > { %992 = vmatpush.bf16.msra.mxu1 %v1875_v44  ;;  %v1724_v44 = vld [vmem:[#allocation9 + $0x78] sm:$0xf0] }
 0x216   : > { %993 = vmatpush.bf16.msra.mxu1 %v1874_v47  ;;  %v1727_v47 = vor.u32 %v1902_v43, %v1724_v44  ;;  %v1708_v44 = vld [vmem:[#allocation9 + $0x50] sm:$0xf0] }
 0x219   : > { %994 = vmatmul.bf16.vlgmr.msra.gmra.mxu1 %v775_v52  ;;  %v1700_v52 = vld [vmem:[#allocation9 + $0x48] sm:$0xf0] }
 0x21a   : > { %1342 = vmatpush.bf16.msrb.mxu1 %v1851_v8  ;;  %v1703_v59 = vor.u32 %v1896_v51, %v1700_v52  ;;  %v1682_v52 = vld [vmem:[#allocation9 + $0x8] sm:$0xf] }
 0x255   : > { %v645_v16 = vpop.xlane.xlu2 %644 }
 0x256   : > { %v685_v17 = vpop.xlane.xlu1 %684 }
 0x257   : > { %2057 = vrcp.f32 %v685_v17  ;;  %v1826_v17 = vld [vmem:[#allocation9 + $0x128] sm:$0xf] }
 0x258   : > { %2059 = vrcp.f32 %v645_v16  ;;  %v1799_v16 = vor.u32 %v1920_v4, %v1796_v5  ;;  %v1783_v4 = vor.u32 %v1915_v1, %v1780_v3  ;;  %v1674_v5 = vld [vmem:[#allocation9] sm:$0xf]  ;;  %v1910_v1 = vld [vmem:[#allocation9 + $0xa4] sm:$0xf]  ;;  %v1764_v3 = vld [vmem:[#allocation9 + $0xb8] sm:$0xf0] }
 0x259   : > { %v1675_v8 = vor.u32 %v1893_v6, %v1674_v5  ;;  %v1907_v5 = vld [vmem:[#allocation9 + $0x84] sm:$0xf0]  ;;  %v1767_v6 = vor.u32 %v1910_v1, %v1764_v3 }
 0x25a   : > { %1331 = vmatpush.bf16.msrb.mxu0 %v1799_v16  ;;  %v1756_v16 = vld [vmem:[#allocation9 + $0xb0] sm:$0xf0] }
 0x25d   : > { %v2058_v19 = vpop.eup %2057 }
 0x25e   : > { %v725_v21 = vpop.xlane.xlu2 %724  ;;  %v2060_v23 = vpop.eup %2059 }
 0x25f   : > { %2061 = vrcp.f32 %v725_v21  ;;  %v1914_v21 = vld [vmem:[#allocation9 + $0xc4] sm:$0xf] }
 0x262   : > { %v2535_v11 = vpop.f32.mrf.mxu1 }
 0x263   : > { %v2549_v36 = vpop.f32.mrf.mxu0 }
 0x265   : > { %v2062_v28 = vpop.eup %2061 }
 0x26a   : > { %v624_v15 = vpop.f32.mrf.mxu1 }
 0x26b   : > { %v1855_v15 = vor.u32 %v1933_v9, %v1852_v10  ;;  %v1676_v9 = vld [vmem:[#allocation9 + $0x18] sm:$0xf0]  ;;  %v1754_v10 = vld [vmem:[#allocation9 + $0x98] sm:$0xf] }
 0x26d   : > { %1355 = vmatpush.bf16.msra.mxu2 %v1855_v15  ;;  %v1909_v15 = vld [vmem:[#allocation9 + $0x9c] sm:$0xf] }
 0x26f   : > { %v742_v18 = vpop.f32.mrf.mxu3 }
 0x270   : > { %v747_v30 = vmul.f32 %v2062_v28, %v742_v18  ;;  %v1930_v18 = vld [vmem:[#allocation9 + $0x13c] sm:$0xf0]  ;;  %v1924_v28 = vld [vmem:[#allocation9 + $0x10c] sm:$0xf0] }
 0x274   : > { %v702_v20 = vpop.f32.mrf.mxu2 }
 0x275   : > { %v707_v22 = vmul.f32 %v2058_v19, %v702_v20  ;;  %v1927_v19 = vld [vmem:[#allocation9 + $0x12c] sm:$0xf]  ;;  %v602_v20 = vpop.xlane.xlu1 %601 }
 0x276   : > { %v662_v24 = vpop.f32.mrf.mxu1  ;;  %2063 = vrcp.f32 %v602_v20  ;;  %v1934_v20 = vld [vmem:[#allocation9 + $0x164] sm:$0xf] }
 0x277   : > { %v667_v25 = vmul.f32 %v2060_v23, %v662_v24  ;;  %v744_v26 = vpop.f32.mrf.mxu3  ;;  %753 = vrot.lane.b32.xlu1 %v707_v22, %s2307_s14  ;;  %v1772_v22 = vld [vmem:[#allocation9 + $0xd8] sm:$0xf0]  ;;  %v1827_v23 = vor.u32 %v1930_v18, %v1826_v17  ;;  %v1828_v24 = vld [vmem:[#allocation9 + $0x140] sm:$0xf0]  ;;  %v1858_v17 = vld [vmem:[#allocation9 + $0x160] sm:$0xf]  ;;  %v1759_v18 = vor.u32 %v1909_v15, %v1756_v16 }
 0x278   : > { %v1802_v26 = vld [vmem:[#allocation9 + $0xf8] sm:$0xf]  ;;  %v1775_v31 = vor.u32 %v1914_v21, %v1772_v22  ;;  %v1860_v21 = vld [vmem:[#allocation9 + $0x178] sm:$0xf0] }
 0x279   : > { %749 = vrot.lane.b32.xlu2 %v667_v25, %s2309_s20  ;;  %v1831_v25 = vor.u32 %v1927_v19, %v1828_v24  ;;  %1343 = vmatpush.bf16.msrb.mxu1 %v1827_v23  ;;  %v1803_v34 = vor.u32 %v1924_v28, %v1802_v26  ;;  %v1937_v19 = vld [vmem:[#allocation9 + $0x174] sm:$0xf0]  ;;  %v1863_v23 = vor.u32 %v1934_v20, %v1860_v21  ;;  %v1730_v24 = vld [vmem:[#allocation9 + $0x68] sm:$0xf]  ;;  %v1903_v26 = vld [vmem:[#allocation9 + $0x6c] sm:$0xf] }
 0x27a   : > { %1332 = vmatpush.bf16.msrb.mxu0 %v1775_v31  ;;  %v1859_v22 = vor.u32 %v1937_v19, %v1858_v17  ;;  %v1732_v28 = vld [vmem:[#allocation9 + $0x80] sm:$0xf0]  ;;  %v1716_v15 = vld [vmem:[#allocation9 + $0x58] sm:$0xf0]  ;;  %v1895_v19 = vld [vmem:[#allocation9 + $0x24] sm:$0xf0] }
 0x27b   : > { %1356 = vmatpush.bf16.msra.mxu2 %v1831_v25  ;;  %v1906_v25 = vld [vmem:[#allocation9 + $0x7c] sm:$0xf0]  ;;  %v1735_v31 = vor.u32 %v1903_v26, %v1732_v28  ;;  %v1892_v20 = vld [vmem:[#allocation9 + $0x14] sm:$0xf]  ;;  %v1692_v21 = vld [vmem:[#allocation9 + $0x28] sm:$0xf0] }
 0x27c   : > { %v704_v27 = vpop.f32.mrf.mxu2  ;;  %v2064_v45 = vpop.eup %2063 }
 0x27d   : > { %v1771_v27 = vor.u32 %v1917_v14, %v1770_v13  ;;  %1344 = vmatpush.bf16.msrb.mxu1 %v1803_v34  ;;  %v627_v50 = vmul.f32 %v2064_v45, %v2535_v11  ;;  %v1778_v11 = vld [vmem:[#allocation9 + $0xc8] sm:$0xf]  ;;  %v1679_v13 = vor.u32 %v1890_v7, %v1676_v9  ;;  %v1755_v14 = vor.u32 %v1912_v12, %v1754_v10  ;;  %v1836_v34 = vld [vmem:[#allocation9 + $0x148] sm:$0xf0]  ;;  %v1810_v45 = vld [vmem:[#allocation9 + $0x100] sm:$0xf] }
 0x27e   : > { %v664_v29 = vpop.f32.mrf.mxu1  ;;  %1333 = vmatpush.bf16.msrb.mxu0 %v1751_v40  ;;  %v1779_v2 = vor.u32 %v1918_v0, %v1778_v11  ;;  %v1839_v35 = vor.u32 %v1928_v33, %v1836_v34  ;;  %v1900_v40 = vld [vmem:[#allocation9 + $0x4c] sm:$0xf0]  ;;  %v1762_v11 = vld [vmem:[#allocation9 + $0xa0] sm:$0xf]  ;;  %v1913_v0 = vld [vmem:[#allocation9 + $0xb4] sm:$0xf0] }
 0x27f   : > { %v1921_v29 = vld [vmem:[#allocation9 + $0xfc] sm:$0xf]  ;;  %1319 = vmatpush.bf16.msrb.mxu3 %v1771_v27  ;;  %v1731_v27 = vor.u32 %v1906_v25, %v1730_v24  ;;  %v1904_v7 = vld [vmem:[#allocation9 + $0x74] sm:$0xf]  ;;  %v1714_v12 = vld [vmem:[#allocation9 + $0x40] sm:$0xf] }
 0x280   : > { %v2048_v24 = vld [vmem:[#allocation7] ss:$0 sm:$0xff] }
 0x281   : > { %757 = vrot.lane.b32.xlu2 %v747_v30, %s2308_s16  ;;  %v1804_v30 = vld [vmem:[#allocation9 + $0x110] sm:$0xf0]  ;;  %1345 = vmatpush.bf16.msrb.mxu1 %v1779_v2  ;;  %v1763_v2 = vor.u32 %v1913_v0, %v1762_v11  ;;  %v983_v25 = vadd.f32 %v2048_v24, %v2549_v36 }
 0x282   : > { %v1807_v37 = vor.u32 %v1921_v29, %v1804_v30  ;;  %1334 = vmatpush.bf16.msrb.mxu0 %v1727_v47  ;;  %v1834_v29 = vld [vmem:[#allocation9 + $0x130] sm:$0xf]  ;;  %v1931_v30 = vld [vmem:[#allocation9 + $0x144] sm:$0xf0]  ;;  %v1711_v47 = vor.u32 %v1897_v41, %v1708_v44 }
 0x283   : > { %1320 = vmatpush.bf16.msrb.mxu3 %v1747_v39  ;;  %v1835_v32 = vor.u32 %v1931_v30, %v1834_v29  ;;  %v1706_v39 = vld [vmem:[#allocation9 + $0x38] sm:$0xf] }
 0x284   : > { %1357 = vmatpush.bf16.msra.mxu2 %v1807_v37  ;;  %v1707_v43 = vor.u32 %v1900_v40, %v1706_v39 }
 0x285   : > { %1346 = vmatpush.bf16.msrb.mxu1 %v1755_v14  ;;  %v1898_v14 = vld [vmem:[#allocation9 + $0x44] sm:$0xf] }
 0x286   : > { %1335 = vmatpush.bf16.msrb.mxu0 %v1703_v59  ;;  %v1719_v17 = vor.u32 %v1898_v14, %v1716_v15 }
 0x287   : > { %1321 = vmatpush.bf16.msrb.mxu3 %v1723_v46  ;;  %v1925_v46 = vld [vmem:[#allocation9 + $0x114] sm:$0xf0] }
 0x288   : > { %1358 = vmatpush.bf16.msra.mxu2 %v1783_v4  ;;  %v1811_v48 = vor.u32 %v1925_v46, %v1810_v45  ;;  %v1738_v4 = vld [vmem:[#allocation9 + $0x70] sm:$0xf] }
 0x289   : > { %1347 = vmatpush.bf16.msrb.mxu1 %v1731_v27  ;;  %v1739_v9 = vor.u32 %v1907_v5, %v1738_v4 }
 0x28a   : > { %1336 = vmatpush.bf16.msrb.mxu0 %v1679_v13  ;;  %v1901_v13 = vld [vmem:[#allocation9 + $0x54] sm:$0xf0] }
 0x28b   : > { %1322 = vmatpush.bf16.msrb.mxu3 %v1699_v56  ;;  %v1684_v56 = vld [vmem:[#allocation9 + $0x20] sm:$0xf0]  ;;  %v1715_v16 = vor.u32 %v1901_v13, %v1714_v12 }
 0x28c   : > { %1359 = vmatpush.bf16.msra.mxu2 %v1759_v18  ;;  %v1690_v18 = vld [vmem:[#allocation9 + $0x10] sm:$0xf] }
 0x28d   : > { %1348 = vmatpush.bf16.msrb.mxu1 %v1707_v43 }
 0x28e   : > { %1381 = vmatpush.bf16.msra.mxu0 %v1863_v23  ;;  %v1695_v23 = vor.u32 %v1892_v20, %v1692_v21 }
 0x28f   : > { %1323 = vmatpush.bf16.msrb.mxu3 %v1675_v8  ;;  %v1740_v8 = vld [vmem:[#allocation9 + $0x88] sm:$0xf0] }
 0x290   : > { %1360 = vmatpush.bf16.msra.mxu2 %v1735_v31  ;;  %v1743_v10 = vor.u32 %v1904_v7, %v1740_v8 }
 0x292   : > { %1382 = vmatpush.bf16.msra.mxu0 %v1839_v35 }
 0x293   : > { %1368 = vmatpush.bf16.msra.mxu3 %v1859_v22  ;;  %v1691_v22 = vor.u32 %v1895_v19, %v1690_v18 }
 0x294   : > { %1361 = vmatpush.bf16.msra.mxu2 %v1711_v47 }
 0x296   : > { %v2551_v37 = vpop.f32.mrf.mxu1 }
 0x297   : > { %1369 = vmatpush.bf16.msra.mxu3 %v1835_v32  ;;  %v996_v26 = vadd.f32 %v2551_v37, %v983_v25  ;;  %v1062_v32 = vld [vmem:[#allocation10] sm:$0x3f] }
 0x298   : > { %v1065_v33 = vperm.slane %v1062_v32, 1  ;;  %v1066_v34 = vperm.slane %v1062_v32, 2  ;;  %v1064_v39 = vperm.slane %v1062_v32, 0  ;;  %v1067_v40 = vperm.slane %v1062_v32, 3 }
 0x299   : > { %v1069_v47 = vperm.slane %v1062_v32, 5 }
 0x29b   : > { %1370 = vmatpush.bf16.msra.mxu3 %v1811_v48 }
 0x29e   : > { %v997_v42 = vpop.f32.mrf.mxu1 }
 0x2d3   : > { %v750_v38 = vpop.permute.xlu2 %749 }
 0x2d4   : > { %v761_v54 = vsel %vm760_vm1, %v627_v50, %v750_v38  ;;  %v984_v38 = vpop.f32.mrf.mxu0  ;;  %v1812_v50 = vld [vmem:[#allocation9 + $0x118] sm:$0xf0] }
 0x2d5   : > { %v1815_v51 = vor.u32 %v1922_v49, %v1812_v50 }
 0x2d7   : > { %1383 = vmatpush.bf16.msra.mxu0 %v1815_v51 }
 0x2db   : > { %v758_v57 = vpop.permute.xlu2 %757 }
 0x2e9   : > { %v754_v55 = vpop.permute.xlu1 %753 }
 0x2ea   : > { %v763_v58 = vsel %vm762_vm2, %v761_v54, %v754_v55  ;;  %v1891_v54 = vld [vmem:[#allocation9 + $0xc] sm:$0xf] }
 0x2eb   : > { %v765_v60 = vsel %vm764_vm3, %v763_v58, %v758_v57  ;;  %v1786_v57 = vld [vmem:[#allocation9 + $0xd0] sm:$0xf]  ;;  %v1919_v58 = vld [vmem:[#allocation9 + $0xe4] sm:$0xf0]  ;;  %v1687_v59 = vor.u32 %v1891_v54, %v1684_v56 }
 0x2ec   : > { %v770_v61 = vadd.f32 %v2047_v53, %v765_v60  ;;  %v1894_v53 = vld [vmem:[#allocation9 + $0x1c] sm:$0xf0]  ;;  %v1787_v60 = vor.u32 %v1919_v58, %v1786_v57 }
 0x2ed   : > { %v1683_v55 = vor.u32 %v1894_v53, %v1682_v52  ;;  %1362 = vmatpush.bf16.msra.mxu2 %v1687_v59  ;;  %v1068_v52 = vperm.slane %v1062_v32, 4 }
 0x2ee   : > { %v771_v62 = vmax.f32 %v770_v61, 0.0  ;;  %v1916_v61 = vld [vmem:[#allocation9 + $0xd4] sm:$0xf]  ;;  %1371 = vmatpush.bf16.msra.mxu3 %v1787_v60 }
 0x2ef   : > { %1349 = vmatpush.bf16.msrb.mxu1 %v1683_v55 }
 0x2f0   : > { %v776_v63 = vpack.c.bf16 %v771_v62, %v771_v62  ;;  %v1788_v62 = vld [vmem:[#allocation9 + $0xe8] sm:$0xf0] }
 0x2f2   : > { %1007 = vmatmul.bf16.vlgmr.msrb.gmra.mxu2 %v776_v63  ;;  %v1791_v63 = vor.u32 %v1916_v61, %v1788_v62  ;;  %1372 = vmatpush.bf16.msra.mxu3 %v1763_v2 }
 0x2f4   : > { %1384 = vmatpush.bf16.msra.mxu0 %v1791_v63 }
 0x2f6   : > { %1373 = vmatpush.bf16.msra.mxu3 %v1739_v9 }
 0x2f8   : > { %1385 = vmatpush.bf16.msra.mxu0 %v1767_v6 }
 0x2fa   : > { %1374 = vmatpush.bf16.msra.mxu3 %v1715_v16 }
 0x2fc   : > { %1386 = vmatpush.bf16.msra.mxu0 %v1743_v10 }
 0x2fe   : > { %1375 = vmatpush.bf16.msra.mxu3 %v1691_v22 }
 0x300   : > { %1387 = vmatpush.bf16.msra.mxu0 %v1719_v17 }
 0x304   : > { %1388 = vmatpush.bf16.msra.mxu0 %v1695_v23 }
 0x375   : > { %v1008_v27 = vpop.f32.mrf.mxu2 }
 0x376   : > { %v1009_v28 = vadd.f32 %v1008_v27, %v996_v26 }
 0x378   : > { %v1012_v29 = vmax.f32 %v1009_v28, 0.0 }
 0x37a   : > { %v1013_v30 = vpack.c.bf16 %v1012_v29, %v1012_v29 }
 0x37c   : > { %1324 = vmatmul.bf16.vlgmr.msrb.gmra.mxu3 %v1013_v30  ;;  %1337 = vmatmul.bf16.vlgmr.msrb.gmra.mxu0 %v1013_v30 }
 0x37d   : > { %1350 = vmatmul.bf16.vlgmr.msrb.gmra.mxu1 %v1013_v30  ;;  %1363 = vmatmul.bf16.vlgmr.msra.gmra.mxu2 %v1013_v30  ;;  %v1010_v31 = vpop.f32.mrf.mxu2 }
 0x38c   : > { %1376 = vmatmul.bf16.vlgmr.msra.gmra.mxu3 %v1013_v30  ;;  %1389 = vmatmul.bf16.vlgmr.msra.gmra.mxu0 %v1013_v30 }
 0x3f9   : > { %v1338_v35 = vpop.f32.mrf.mxu0 }
 0x3fa   : > { %v1339_v36 = vadd.f32 %v1338_v35, %v1065_v33  ;;  %v1351_v37 = vpop.f32.mrf.mxu1 }
 0x3fb   : > { %v1352_v38 = vadd.f32 %v1351_v37, %v1066_v34 }
 0x3fc   : > { %1395 = vst [vmem:[%s533_s23 + $0x8] sm:$0xff] %v1339_v36 }
 0x3fd   : > { %1396 = vst [vmem:[%s533_s23 + $0x10] sm:$0xff] %v1352_v38 }
 0x3ff   : > { %v1325_v41 = vpop.f32.mrf.mxu3 }
 0x400   : > { %v1326_v42 = vadd.f32 %v1325_v41, %v1064_v39  ;;  %v1364_v43 = vpop.f32.mrf.mxu2 }
 0x401   : > { %v1365_v44 = vadd.f32 %v1364_v43, %v1067_v40  ;;  %v1340_v45 = vpop.f32.mrf.mxu0 }
 0x402   : > { %1394 = vst [vmem:[%s533_s23] sm:$0xff] %v1326_v42  ;;  %v1353_v46 = vpop.f32.mrf.mxu1 }
 0x403   : > { %1397 = vst [vmem:[%s533_s23 + $0x18] sm:$0xff] %v1365_v44 }
 0x407   : > { %v1327_v48 = vpop.f32.mrf.mxu3 }
 0x408   : > { %v1366_v49 = vpop.f32.mrf.mxu2 }
 0x409   : > { %v1390_v50 = vpop.f32.mrf.mxu0 }
 0x40a   : > { %v1391_v51 = vadd.f32 %v1390_v50, %v1069_v47 }
 0x40c   : > { %1399 = vst [vmem:[%s533_s23 + $0x28] sm:$0xff] %v1391_v51 }
 0x40f   : > { %v1377_v53 = vpop.f32.mrf.mxu3 }
 0x410   : > { %v1378_v54 = vadd.f32 %v1377_v53, %v1068_v52 }
 0x411   : > { %v1392_v55 = vpop.f32.mrf.mxu0 }
 0x412   : > { %1398 = vst [vmem:[%s533_s23 + $0x20] sm:$0xff] %v1378_v54 }
 0x417   : > { %v1379_v56 = vpop.f32.mrf.mxu3 }
 0x418 PF: > { %p24_p1 = scmp.ge.s32.totalorder %s2434_s26, 4   ;;  %s2592_s17 = smov %s2283_s18 }
 0x419   : > { %s2593_s18 = smov %s2287_s19  ;;  %s2594_s19 = smov %s2445_s4 }
 0x41a   : > { %s2595_s20 = smov %s2434_s26  ;;  %26 = sbr.rel (!%p24_p1) target bundleno = 9 (0x9), region = 133 }
 0x41f   :  { %1421 = vsyncpa [#allocation3], 1 }
 0x420   :  { %1423 = vsyncpa [#allocation3 + $0x1], 1 }
 0x421   :  { %1424 = vsyncpa [#allocation5], 1 }
 0x422   :  { %1425 = vsyncpa [#allocation8], 1 }
 0x423   :  { %1426 = vsyncpa [#allocation11], 1 }

// kernel: gat_forward.11
= control target key start
LH: loop header
LB: loop body
LE: loop exit
PB: predicated region body
PF: predicated region fallthrough
CT: control target
= control target key end

     0   :  { %s316_s21 = smov [#allocation3]   ;;  %s317_s22 = smov [#allocation4]   ;;  %s369_s0 = inlined_call_operand.hbm [shape: s32[18], index: 0, kind: input, shape index: {}]   ;;  %s370_s2 = inlined_call_operand.vmem [shape: f32[16,1,768], index: 2, kind: input, shape index: {}]   ;;  %s371_s3 = inlined_call_operand.vmem [shape: f32[16,1,768], index: 3, kind: input, shape index: {}]   ;;  %s372_s4 = inlined_call_operand.vmem [shape: f32[18,1,768], index: 4, kind: output, shape index: {}]   ;;  %s373_s1 = inlined_call_operand.hbm [shape: s32[18], index: 1, kind: input, shape index: {}]  }
   0x1   :  { %s10_s17 = sshll.u32 %s369_s0, 4  ;;  %s15_s20 = sshll.u32 %s373_s1, 4  ;;  %s11_s17 = int_to_ptr.hbm [resolvable:$true] %s10_s17  ;;  %s16_s20 = int_to_ptr.hbm [resolvable:$true] %s15_s20 }
   0x2   :  { %13 = dma.hbm_to_smem %s11_s17, 16, %s316_s21, [#allocation2] }
   0x3   :  { %18 = dma.hbm_to_smem %s16_s20, 16, %s317_s22, [#allocation2] }
   0x4   :  { %310 = dma.done.wait [#allocation2], 32 }
   0x5   :  { %311 = vsyncadd [#allocation2], 4294967264 }
   0x6   :  { %21 = sfence }
   0x7   :  { %s349_s23 = smov 0  }
   0x8 LB: > { %s262_s0 = sadd.s32 4294967295, %s314_s23   ;;  %p266_p0 = scmp.ge.s32.totalorder %s314_s23, 1  ;;  %s314_s23 = sphi %s349_s23, %s27_s23  }
   0x9   : > { %p143_p1 = scmp.lt.s32.totalorder %s314_s23, 19 }
   0xb   : > { %p144_p2 = pnand %p266_p0, %p143_p1 }
   0xc   : > { %s169_s1 = sld [smem:[#allocation3 + %s262_s0]] (!%p144_p2)  ;;  %p181_p3 = scmp.lt.s32.totalorder (!%p144_p2), %s262_s0, 17 }
   0xd   : > { %147 = sbr.rel (%p144_p2) target bundleno = 31 (0x1f), region = 28  ;;  %s175_s24 = sld [smem:[#allocation3 + %s262_s0]] (!%p144_p2) }
   0xe   : > { %s185_s25 = sld [smem:[#allocation4 + %s262_s0]] (!%p144_p2) }
  0x12   : > { %s375_s0 = smov (!%p181_p3, %s262_s0), 17  ;;  %p170_p4 = scmp.lt.s32.totalorder %s169_s1, 15  ;;  %v192_v0 = vlaneseq }
  0x13   : > { %p176_p5 = scmp.lt.s32.totalorder %s175_s24, 15  ;;  %s271_s6 = smul.u32 6, %s375_s0 }
  0x14   : > { %s377_s1 = smov (!%p170_p4, %s169_s1), 15  ;;  %s189_s27 = scvt.s32.f32 %s185_s25  ;;  %vm194_vm0 = vcmp.lt.s32.totalorder %v192_v0, 768 }
  0x15   : > { %s379_s24 = smov (!%p176_p5, %s175_s24), 15  ;;  %s269_s26 = smul.u32 6, %s377_s1 }
  0x16   : > { %s270_s28 = smul.u32 6, %s379_s24  ;;  %v190_v3 = vstv %s189_s27  ;;  %s184_s12 = scalar_lea.vmem %s372_s4, %s271_s6 }
  0x17   : > { %s173_s5 = scalar_lea.vmem %s370_s2, %s269_s26 }
  0x18   : > { %s179_s9 = scalar_lea.vmem %s371_s3, %s270_s28  ;;  %v186_v1 = vld [vmem:[%s173_s5] sm:$0x3f] }
  0x19   : > { %v187_v2 = vld [vmem:[%s179_s9] sm:$0x3f] }
  0x1a   : > { %v188_v4 = vadd.f32 %v187_v2, %v186_v1 }
  0x1c   : > { %v191_v5 = vmul.f32 %v190_v3, %v188_v4 }
  0x1e   : > { %196 = vst.msk [vmem:[%s184_s12] sm:$0x3f] %vm194_vm0, %v191_v5 }
  0x1f PF: > { %s27_s23 = sadd.s32 1, %s314_s23  }
  0x20   : > { %p24_p6 = scmp.ge.s32.totalorder %s27_s23, 20  }
  0x22   :  { %26 = sbr.rel (!%p24_p6) target bundleno = 8 (0x8), region = 61 }

// kernel: gat_forward.6
= control target key start
LH: loop header
LB: loop body
LE: loop exit
PB: predicated region body
PF: predicated region fallthrough
CT: control target
= control target key end

     0   :  { %12 = vsyncpa [#allocation3], 0  ;;  %s9270_s0 = inlined_call_operand.hbm [shape: f32[16,1536], index: 0, kind: input, shape index: {}]   ;;  %s9271_s1 = inlined_call_operand.hbm [shape: bf16[1536,768], index: 1, kind: input, shape index: {}]   ;;  %s9272_s2 = inlined_call_operand.hbm [shape: f32[1,768], index: 2, kind: input, shape index: {}]   ;;  %s9273_s3 = inlined_call_operand.hbm [shape: bf16[768,128], index: 3, kind: input, shape index: {}]   ;;  %s9274_s4 = inlined_call_operand.hbm [shape: bf16[128,128], index: 4, kind: input, shape index: {}]   ;;  %s9275_s5 = inlined_call_operand.vmem [shape: f32[16,128], index: 5, kind: output, shape index: {0}]   ;;  %s9276_s6 = inlined_call_operand.vmem [shape: f32[16,128], index: 6, kind: output, shape index: {1}]  }
   0x1   :  { %14 = vsyncpa [#allocation3 + $0x1], 0 }
   0x2   :  { %15 = vsyncpa [#allocation5], 0 }
   0x3   :  { %16 = vsyncpa [#allocation8], 0  ;;  %s8966_s21 = smov 0   ;;  %s8968_s22 = smov 0  }
   0x4   :  { %s8970_s23 = smov 0   ;;  %s8972_s24 = smov 0  }
   0x5 LB: > { %s200_s27 = sshll.u32 %s9271_s1, 4  ;;  %s8990_s28 = sadd.s32 4294967295, %s8921_s24   ;;  %s8921_s24 = sphi %s8972_s24, %s9284_s24   ;;  %s8917_s23 = sphi %s8970_s23, %s9283_s23   ;;  %s8913_s22 = sphi %s8968_s22, %s9282_s22   ;;  %s8909_s21 = sphi %s8966_s21, %s9281_s21   ;;  %s201_s27 = int_to_ptr.hbm [resolvable:$true] %s200_s27 }
   0x6   : > { %p5464_p0 = scmp.ge.s32.totalorder %s8921_s24, 1  ;;  %p43_p1 = scmp.eq.s32.totalorder %s8990_s28, 0 }
   0x7   : > { %p189_p2 = scmp.lt.s32.totalorder %s8921_s24, 3  ;;  %s8923_s30 = smov [#allocation4]  }
   0x8   : > { %s202_s7 = sshll.u32 %s8923_s30, 4  ;;  %s226_s10 = sshll.u32 %s9273_s3, 4  ;;  %s203_s7 = int_to_ptr.vmem [resolvable:$true] %s202_s7  ;;  %s227_s10 = int_to_ptr.hbm [resolvable:$true] %s226_s10 }
   0x9   : > { %p8995_p3 = pnand %p5464_p0, %p189_p2  ;;  %s8924_s12 = smov [#allocation7]  }
   0xa   : > { %s228_s13 = sshll.u32 %s8924_s12, 4  ;;  %s8925_s14 = smov 384   ;;  %s229_s13 = int_to_ptr.vmem [resolvable:$true] %s228_s13 }
   0xb   : > { %p8661_p4 = pneg %p8995_p3  ;;  %s8926_s15 = smov 24  }
   0xc   : > { %s8927_s16 = smov 64   ;;  %s8928_s17 = smov 4  }
   0xd   : > { %p9006_p5 = pnand %p8661_p4, %p43_p1  ;;  %s215_s20 = sshll.u32 %s9272_s2, 4  ;;  %s216_s20 = int_to_ptr.hbm [resolvable:$true] %s215_s20 }
   0xe   : > { %s8929_s25 = smov [#allocation6]   ;;  %s8930_s8 = smov [#allocation9]  }
   0xf   : > { %8664 = dma.hbm_to_vmem [thread:$0]  (!%p9006_p5), %s201_s27, 73728, %s203_s7, [#allocation5], %s8925_s14, %s8925_s14, %s8926_s15  }
  0x10   : > { %8670 = dma.hbm_to_vmem [thread:$0]  (!%p9006_p5), %s227_s10, 6144, %s229_s13, [#allocation8], %s8927_s16, %s8927_s16, %s8928_s17  }
  0x11   : > { %s217_s26 = sshll.u32 %s8929_s25, 4  ;;  %s240_s7 = sshll.u32 %s9274_s4, 4  ;;  %s218_s26 = int_to_ptr.vmem [resolvable:$true] %s217_s26  ;;  %s241_s7 = int_to_ptr.hbm [resolvable:$true] %s240_s7 }
  0x12   : > { %8667 = dma.hbm_to_vmem [thread:$0]  (!%p9006_p5), %s216_s20, 96, %s218_s26, [#allocation5]  }
  0x13   : > { %s242_s9 = sshll.u32 %s8930_s8, 4  ;;  %s9025_s10 = sadd.s32 1, %s8921_s24   ;;  %s243_s9 = int_to_ptr.vmem [resolvable:$true] %s242_s9 }
  0x14   : > { %8673 = dma.hbm_to_vmem [thread:$0]  (!%p9006_p5), %s241_s7, 1024, %s243_s9, [#allocation8], %s8927_s16, %s8927_s16, %s8928_s17  }
  0x15   : > { %s29_s12 = sadd.s32 1, %s8917_s23  ;;  %s26_s13 = ssub.s32 %s8921_s24, %s9025_s10 }
  0x16   : > { %p36_p6 = scmp.ne.s32.totalorder %s8917_s23, %s8913_s22  ;;  %p27_p7 = scmp.eq.s32.totalorder %s26_s13, 0 }
  0x17   : > { %p37_p8 = scmp.eq.s32.totalorder %s8921_s24, 0  ;;  %p42_p9 = scmp.ne.s32.totalorder %s8913_s22, %s8909_s21 }
  0x18   : > { %p8682_p10 = scmp.lt.s32.totalorder %s8921_s24, 2  ;;  %s256_s11 = sand.u32 1, %s8917_s23  }
  0x19   : > { %s9037_s14 = scalar_select %p27_p7, %s8917_s23, %s29_s12  }
  0x1a   : > { %p38_p11 = por %p37_p8, %p36_p6  ;;  %p9041_p12 = por %p43_p1, %p42_p9 }
  0x1b   : > { %s8641_s16 = smul.u32 96, %s8921_s24  ;;  %s257_s30 = scalar_lea.sflag [#allocation3], %s256_s11 }
  0x1c   : > { %s8640_s17 = smul.u32 96, %s256_s11  ;;  %p9050_p13 = pnand %p8682_p10, %p38_p11 }
  0x1d   : > { %s265_s20 = scalar_lea.hbm %s9270_s0, %s8641_s16  ;;  %s8856_s12 = scalar_lea.hbm %s9270_s0, 192 }
  0x1e   : > { %s267_s21 = sshll.u32 %s265_s20, 4  ;;  %s260_s26 = scalar_lea.vmem [#allocation2], %s8640_s17  ;;  %s268_s21 = int_to_ptr.hbm [resolvable:$true] %s267_s21 }
  0x1f   : > { %s269_s27 = sshll.u32 %s260_s26, 4  ;;  %s8849_s7 = sshra.s32 %s268_s21, 4  ;;  %s270_s27 = int_to_ptr.vmem [resolvable:$true] %s269_s27  ;;  %s8850_s7 = int_to_ptr.hbm [resolvable:$true] %s8849_s7 }
  0x20   : > { %s8851_s8 = scalar_lea.hbm %s8850_s7, 96  ;;  %p8853_p2 = pneg %p9050_p13 }
  0x21   : > { %p8852_p0 = scmp.ne.s32.totalorder %s8850_s7, %s8851_s8  ;;  %p8857_p6 = scmp.lt.s32.totalorder %s8850_s7, %s9270_s0 }
  0x22   : > { %p8858_p7 = scmp.lt.s32.totalorder %s8856_s12, %s8851_s8 }
  0x23   : > { %p8854_p4 = pnand %p8853_p2, %p8852_p0 }
  0x24   : > { %p8859_p8 = por %p8858_p7, %p8857_p6 }
  0x25   : > { %p8855_p5 = pneg %p8854_p4 }
  0x27   : > { %p8860_p9 = pnand %p8859_p8, %p8855_p5 }
  0x29   : > { %8863 = shalt.err (!%p8860_p9)
}
  0x2a   : > { %8677 = dma.hbm_to_vmem [thread:$0]  (!%p9050_p13), %s268_s21, 1536, %s270_s27, %s257_s30  }
  0x2b   : > { %278 = sbr.rel (%p8995_p3) target bundleno = 1043 (0x413), region = 40  ;;  %s280_s11 = sand.u32 (!%p8995_p3), 1, %s8913_s22  }
  0x2c   : > { %s8642_s17 = smul.u32 (!%p8995_p3), 96, %s280_s11  ;;  %s281_s18 = scalar_lea.sflag (!%p8995_p3), [#allocation3], %s280_s11 }
  0x2e   : > { %s9067_s19 = scalar_lea.vmem (!%p8995_p3), [#allocation2], %s8642_s17 }
  0x30   : > { %8896 = dma.done.wait (%p9041_p12), %s281_s18, 1536  }
  0x31   : > { %8898 = vsyncadd (%p9041_p12), %s281_s18, 4294965760 }
  0x32   : > { %8900 = dma.done.wait (%p43_p1), [#allocation5], 73824  }
  0x33   : > { %8902 = vsyncadd (%p43_p1), [#allocation5], 4294893472 }
  0x34   : > { %8904 = dma.done.wait (%p43_p1), [#allocation8], 7168  }
  0x35   : > { %8906 = vsyncadd (%p43_p1), [#allocation8], 4294960128  ;;  %v5648_v0 = vld [vmem:[#allocation4 + $0x150] sm:$0xf]  ;;  %v8053_v1 = vld [vmem:[#allocation4 + $0x164] sm:$0xf0] }
  0x36   : > { %v5840_v2 = vld [vmem:[#allocation4 + $0x2d0] sm:$0xf]  ;;  %v5649_v3 = vor.u32 %v8053_v1, %v5648_v0  ;;  %v8101_v4 = vld [vmem:[#allocation4 + $0x2e4] sm:$0xf0]  ;;  %v5624_v11 = vld [vmem:[#allocation4 + $0x120] sm:$0xf] }
  0x37   : > { %v6032_v5 = vld [vmem:[#allocation4 + $0x450] sm:$0xf]  ;;  %v8149_v6 = vld [vmem:[#allocation4 + $0x464] sm:$0xf0]  ;;  %v5841_v7 = vor.u32 %v8101_v4, %v5840_v2  ;;  %v8047_v13 = vld [vmem:[#allocation4 + $0x134] sm:$0xf0] }
  0x38   : > { %v6033_v8 = vor.u32 %v8149_v6, %v6032_v5  ;;  %v6224_v9 = vld [vmem:[#allocation4 + $0x5d0] sm:$0xf]  ;;  %v8197_v10 = vld [vmem:[#allocation4 + $0x5e4] sm:$0xf0]  ;;  %3839 = vmatpush.bf16.msra.mxu0 %v5649_v3  ;;  %v5816_v14 = vld [vmem:[#allocation4 + $0x2a0] sm:$0xf]  ;;  %v5625_v16 = vor.u32 %v8047_v13, %v5624_v11 }
  0x39   : > { %v6225_v12 = vor.u32 %v8197_v10, %v6224_v9  ;;  %v8095_v15 = vld [vmem:[#allocation4 + $0x2b4] sm:$0xf0]  ;;  %3852 = vmatpush.bf16.msra.mxu1 %v5841_v7  ;;  %v6008_v18 = vld [vmem:[#allocation4 + $0x420] sm:$0xf]  ;;  %v5600_v23 = vld [vmem:[#allocation4 + $0xf0] sm:$0xf] }
  0x3a   : > { %3865 = vmatpush.bf16.msra.mxu2 %v6033_v8  ;;  %v5817_v17 = vor.u32 %v8095_v15, %v5816_v14  ;;  %v8143_v19 = vld [vmem:[#allocation4 + $0x434] sm:$0xf0]  ;;  %v6200_v20 = vld [vmem:[#allocation4 + $0x5a0] sm:$0xf]  ;;  %v8041_v24 = vld [vmem:[#allocation4 + $0x104] sm:$0xf0] }
  0x3b   : > { %3878 = vmatpush.bf16.msra.mxu3 %v6225_v12  ;;  %v6009_v21 = vor.u32 %v8143_v19, %v6008_v18  ;;  %v8191_v22 = vld [vmem:[#allocation4 + $0x5b4] sm:$0xf0]  ;;  %v5792_v26 = vld [vmem:[#allocation4 + $0x270] sm:$0xf]  ;;  %v8089_v27 = vld [vmem:[#allocation4 + $0x284] sm:$0xf0]  ;;  %v5601_v29 = vor.u32 %v8041_v24, %v5600_v23 }
  0x3c   : > { %v6201_v25 = vor.u32 %v8191_v22, %v6200_v20  ;;  %v5984_v28 = vld [vmem:[#allocation4 + $0x3f0] sm:$0xf]  ;;  %3840 = vmatpush.bf16.msra.mxu0 %v5625_v16  ;;  %v8137_v30 = vld [vmem:[#allocation4 + $0x404] sm:$0xf0]  ;;  %v5793_v33 = vor.u32 %v8089_v27, %v5792_v26  ;;  %v5576_v35 = vld [vmem:[#allocation4 + $0xc0] sm:$0xf] }
  0x3d   : > { %v6176_v31 = vld [vmem:[#allocation4 + $0x570] sm:$0xf]  ;;  %v8185_v32 = vld [vmem:[#allocation4 + $0x584] sm:$0xf0]  ;;  %3853 = vmatpush.bf16.msra.mxu1 %v5817_v17  ;;  %v5985_v34 = vor.u32 %v8137_v30, %v5984_v28  ;;  %v8035_v36 = vld [vmem:[#allocation4 + $0xd4] sm:$0xf0] }
  0x3e   : > { %3866 = vmatpush.bf16.msra.mxu2 %v6009_v21  ;;  %v5768_v37 = vld [vmem:[#allocation4 + $0x240] sm:$0xf]  ;;  %v6177_v38 = vor.u32 %v8185_v32, %v6176_v31  ;;  %v8083_v39 = vld [vmem:[#allocation4 + $0x254] sm:$0xf0]  ;;  %v5577_v44 = vor.u32 %v8035_v36, %v5576_v35  ;;  %v5552_v47 = vld [vmem:[#allocation4 + $0x90] sm:$0xf] }
  0x3f   : > { %3879 = vmatpush.bf16.msra.mxu3 %v6201_v25  ;;  %v5960_v40 = vld [vmem:[#allocation4 + $0x3c0] sm:$0xf]  ;;  %v8131_v41 = vld [vmem:[#allocation4 + $0x3d4] sm:$0xf0]  ;;  %v5769_v45 = vor.u32 %v8083_v39, %v5768_v37  ;;  %v8029_v48 = vld [vmem:[#allocation4 + $0xa4] sm:$0xf0] }
  0x40   : > { %v6152_v42 = vld [vmem:[#allocation4 + $0x540] sm:$0xf]  ;;  %v8179_v43 = vld [vmem:[#allocation4 + $0x554] sm:$0xf0]  ;;  %3841 = vmatpush.bf16.msra.mxu0 %v5601_v29  ;;  %v5961_v46 = vor.u32 %v8131_v41, %v5960_v40  ;;  %v5744_v49 = vld [vmem:[#allocation4 + $0x210] sm:$0xf]  ;;  %v5553_v56 = vor.u32 %v8029_v48, %v5552_v47 }
  0x41   : > { %3854 = vmatpush.bf16.msra.mxu1 %v5793_v33  ;;  %v6153_v50 = vor.u32 %v8179_v43, %v6152_v42  ;;  %v8077_v51 = vld [vmem:[#allocation4 + $0x224] sm:$0xf0]  ;;  %v5936_v52 = vld [vmem:[#allocation4 + $0x390] sm:$0xf]  ;;  %v5528_v59 = vld [vmem:[#allocation4 + $0x60] sm:$0xf] }
  0x42   : > { %3867 = vmatpush.bf16.msra.mxu2 %v5985_v34  ;;  %v8125_v53 = vld [vmem:[#allocation4 + $0x3a4] sm:$0xf0]  ;;  %v6128_v54 = vld [vmem:[#allocation4 + $0x510] sm:$0xf]  ;;  %v5745_v57 = vor.u32 %v8077_v51, %v5744_v49  ;;  %v8023_v60 = vld [vmem:[#allocation4 + $0x74] sm:$0xf0] }
  0x43   : > { %3880 = vmatpush.bf16.msra.mxu3 %v6177_v38  ;;  %v8173_v55 = vld [vmem:[#allocation4 + $0x524] sm:$0xf0]  ;;  %v5937_v58 = vor.u32 %v8125_v53, %v5936_v52  ;;  %v5720_v61 = vld [vmem:[#allocation4 + $0x1e0] sm:$0xf]  ;;  %v8071_v63 = vld [vmem:[#allocation4 + $0x1f4] sm:$0xf0]  ;;  %v5529_v4 = vor.u32 %v8023_v60, %v5528_v59 }
  0x44   : > { %3842 = vmatpush.bf16.msra.mxu0 %v5577_v44  ;;  %v6129_v62 = vor.u32 %v8173_v55, %v6128_v54  ;;  %v5912_v0 = vld [vmem:[#allocation4 + $0x360] sm:$0xf]  ;;  %v8119_v1 = vld [vmem:[#allocation4 + $0x374] sm:$0xf0]  ;;  %v5721_v5 = vor.u32 %v8071_v63, %v5720_v61  ;;  %v5504_v7 = vld [vmem:[#allocation4 + $0x30] sm:$0xf] }
  0x45   : > { %3855 = vmatpush.bf16.msra.mxu1 %v5769_v45  ;;  %v6104_v2 = vld [vmem:[#allocation4 + $0x4e0] sm:$0xf]  ;;  %v8167_v3 = vld [vmem:[#allocation4 + $0x4f4] sm:$0xf0]  ;;  %v5913_v6 = vor.u32 %v8119_v1, %v5912_v0  ;;  %v8017_v8 = vld [vmem:[#allocation4 + $0x44] sm:$0xf0] }
  0x46   : > { %3868 = vmatpush.bf16.msra.mxu2 %v5961_v46  ;;  %v5696_v9 = vld [vmem:[#allocation4 + $0x1b0] sm:$0xf]  ;;  %v6105_v10 = vor.u32 %v8167_v3, %v6104_v2  ;;  %v8065_v11 = vld [vmem:[#allocation4 + $0x1c4] sm:$0xf0]  ;;  %v5505_v16 = vor.u32 %v8017_v8, %v5504_v7  ;;  %v5480_v17 = vld [vmem:[#allocation4] sm:$0xf] }
  0x47   : > { %3881 = vmatpush.bf16.msra.mxu3 %v6153_v50  ;;  %v5888_v12 = vld [vmem:[#allocation4 + $0x330] sm:$0xf]  ;;  %v8113_v13 = vld [vmem:[#allocation4 + $0x344] sm:$0xf0]  ;;  %v8011_v18 = vld [vmem:[#allocation4 + $0x14] sm:$0xf0]  ;;  %v5697_v19 = vor.u32 %v8065_v11, %v5696_v9 }
  0x48   : > { %3843 = vmatpush.bf16.msra.mxu0 %v5553_v56  ;;  %v6080_v14 = vld [vmem:[#allocation4 + $0x4b0] sm:$0xf]  ;;  %v8161_v15 = vld [vmem:[#allocation4 + $0x4c4] sm:$0xf0]  ;;  %v5889_v20 = vor.u32 %v8113_v13, %v5888_v12  ;;  %v5672_v21 = vld [vmem:[#allocation4 + $0x180] sm:$0xf]  ;;  %v5481_v31 = vor.u32 %v8011_v18, %v5480_v17 }
  0x49   : > { %3856 = vmatpush.bf16.msra.mxu1 %v5745_v57  ;;  %v8059_v22 = vld [vmem:[#allocation4 + $0x194] sm:$0xf0]  ;;  %v5864_v23 = vld [vmem:[#allocation4 + $0x300] sm:$0xf]  ;;  %v6081_v24 = vor.u32 %v8161_v15, %v6080_v14  ;;  %v6416_v28 = vld [vmem:[#allocation4 + $0x750] sm:$0xf] }
  0x4a   : > { %3869 = vmatpush.bf16.msra.mxu2 %v5937_v58  ;;  %v8107_v25 = vld [vmem:[#allocation4 + $0x314] sm:$0xf0]  ;;  %v6056_v26 = vld [vmem:[#allocation4 + $0x480] sm:$0xf]  ;;  %v8245_v29 = vld [vmem:[#allocation4 + $0x764] sm:$0xf0]  ;;  %v5673_v35 = vor.u32 %v8059_v22, %v5672_v21 }
  0x4b   : > { %3882 = vmatpush.bf16.msra.mxu3 %v6129_v62  ;;  %v8155_v27 = vld [vmem:[#allocation4 + $0x494] sm:$0xf0]  ;;  %v6608_v30 = vld [vmem:[#allocation4 + $0x8d0] sm:$0xf]  ;;  %v8293_v32 = vld [vmem:[#allocation4 + $0x8e4] sm:$0xf0]  ;;  %v5865_v36 = vor.u32 %v8107_v25, %v5864_v23  ;;  %v6417_v40 = vor.u32 %v8245_v29, %v6416_v28 }
  0x4c   : > { %3844 = vmatpush.bf16.msra.mxu0 %v5529_v4  ;;  %v6800_v33 = vld [vmem:[#allocation4 + $0xa50] sm:$0xf]  ;;  %v8341_v34 = vld [vmem:[#allocation4 + $0xa64] sm:$0xf0]  ;;  %v6057_v39 = vor.u32 %v8155_v27, %v6056_v26  ;;  %v6609_v41 = vor.u32 %v8293_v32, %v6608_v30  ;;  %v6392_v43 = vld [vmem:[#allocation4 + $0x720] sm:$0xf] }
  0x4d   : > { %3857 = vmatpush.bf16.msra.mxu1 %v5721_v5  ;;  %v6992_v37 = vld [vmem:[#allocation4 + $0xbd0] sm:$0xf]  ;;  %v8389_v38 = vld [vmem:[#allocation4 + $0xbe4] sm:$0xf0]  ;;  %v6801_v42 = vor.u32 %v8341_v34, %v6800_v33  ;;  %v8239_v44 = vld [vmem:[#allocation4 + $0x734] sm:$0xf0] }
  0x4e   : > { %3870 = vmatpush.bf16.msra.mxu2 %v5913_v6  ;;  %v6584_v45 = vld [vmem:[#allocation4 + $0x8a0] sm:$0xf]  ;;  %v6993_v46 = vor.u32 %v8389_v38, %v6992_v37  ;;  %v8287_v47 = vld [vmem:[#allocation4 + $0x8b4] sm:$0xf0]  ;;  %v6393_v52 = vor.u32 %v8239_v44, %v6392_v43  ;;  %v6368_v53 = vld [vmem:[#allocation4 + $0x6f0] sm:$0xf] }
  0x4f   : > { %3883 = vmatpush.bf16.msra.mxu3 %v6105_v10  ;;  %v6776_v48 = vld [vmem:[#allocation4 + $0xa20] sm:$0xf]  ;;  %v8335_v49 = vld [vmem:[#allocation4 + $0xa34] sm:$0xf0]  ;;  %v6585_v54 = vor.u32 %v8287_v47, %v6584_v45  ;;  %v8233_v56 = vld [vmem:[#allocation4 + $0x704] sm:$0xf0] }
  0x50   : > { %3845 = vmatpush.bf16.msra.mxu0 %v5505_v16  ;;  %v6968_v50 = vld [vmem:[#allocation4 + $0xba0] sm:$0xf]  ;;  %v8383_v51 = vld [vmem:[#allocation4 + $0xbb4] sm:$0xf0]  ;;  %v6777_v55 = vor.u32 %v8335_v49, %v6776_v48  ;;  %v6560_v57 = vld [vmem:[#allocation4 + $0x870] sm:$0xf]  ;;  %v6369_v0 = vor.u32 %v8233_v56, %v6368_v53 }
  0x51   : > { %3858 = vmatpush.bf16.msra.mxu1 %v5697_v19  ;;  %v8281_v58 = vld [vmem:[#allocation4 + $0x884] sm:$0xf0]  ;;  %v6969_v59 = vor.u32 %v8383_v51, %v6968_v50  ;;  %v6752_v60 = vld [vmem:[#allocation4 + $0x9f0] sm:$0xf]  ;;  %v6344_v2 = vld [vmem:[#allocation4 + $0x6c0] sm:$0xf] }
  0x52   : > { %3871 = vmatpush.bf16.msra.mxu2 %v5889_v20  ;;  %v8329_v61 = vld [vmem:[#allocation4 + $0xa04] sm:$0xf0]  ;;  %v6944_v62 = vld [vmem:[#allocation4 + $0xb70] sm:$0xf]  ;;  %v6561_v1 = vor.u32 %v8281_v58, %v6560_v57  ;;  %v345_v4 = vld [vmem:[%s9067_s19] sm:$0xff]  ;;  %p337_p1 = scmp.lt.s32.totalorder %s8990_s28, 1 }
  0x53   : > { %3884 = vmatpush.bf16.msra.mxu3 %v6081_v24  ;;  %v8377_v63 = vld [vmem:[#allocation4 + $0xb84] sm:$0xf0]  ;;  %v347_v3 = vld [vmem:[%s9067_s19 + $0x10] sm:$0xff]  ;;  %v6753_v5 = vor.u32 %v8329_v61, %v6752_v60  ;;  %v8227_v6 = vld [vmem:[#allocation4 + $0x6d4] sm:$0xf0]  ;;  %v9085_v9 = vpack.c.bf16 %v345_v4, %v345_v4 }
  0x54   : > { %3846 = vmatpush.bf16.msra.mxu0 %v5481_v31  ;;  %v6536_v7 = vld [vmem:[#allocation4 + $0x840] sm:$0xf]  ;;  %v9083_v8 = vpack.c.bf16 %v347_v3, %v347_v3  ;;  %v348_v10 = vld [vmem:[%s9067_s19 + $0x18] sm:$0xff]  ;;  %v6945_v11 = vor.u32 %v8377_v63, %v6944_v62  ;;  %v6345_v18 = vor.u32 %v8227_v6, %v6344_v2  ;;  %v346_v19 = vld [vmem:[%s9067_s19 + $0x8] sm:$0xff]  ;;  %s9286_s28 = smov (!%p337_p1, %s8990_s28), 1 }
  0x55   : > { %3859 = vmatpush.bf16.msra.mxu1 %v5673_v35  ;;  %v8275_v12 = vld [vmem:[#allocation4 + $0x854] sm:$0xf0]  ;;  %v6728_v13 = vld [vmem:[#allocation4 + $0x9c0] sm:$0xf]  ;;  %v9088_v15 = vpack.c.bf16 %v348_v10, %v348_v10  ;;  %v6320_v22 = vld [vmem:[#allocation4 + $0x690] sm:$0xf]  ;;  %v9094_v25 = vpack.c.bf16 %v346_v19, %v346_v19 }
  0x56   : > { %3872 = vmatpush.bf16.msra.mxu2 %v5865_v36  ;;  %v8323_v14 = vld [vmem:[#allocation4 + $0x9d4] sm:$0xf0]  ;;  %v6920_v16 = vld [vmem:[#allocation4 + $0xb40] sm:$0xf]  ;;  %v6537_v20 = vor.u32 %v8275_v12, %v6536_v7  ;;  %v8221_v23 = vld [vmem:[#allocation4 + $0x6a4] sm:$0xf0] }
  0x57   : > { %3885 = vmatpush.bf16.msra.mxu3 %v6057_v39  ;;  %v8371_v17 = vld [vmem:[#allocation4 + $0xb54] sm:$0xf0]  ;;  %3847 = vmatmul.bf16.vlgmr.msra.gmra.mxu0 %v9085_v9  ;;  %v6729_v21 = vor.u32 %v8323_v14, %v6728_v13  ;;  %v6512_v24 = vld [vmem:[#allocation4 + $0x810] sm:$0xf]  ;;  %v8269_v27 = vld [vmem:[#allocation4 + $0x824] sm:$0xf0]  ;;  %v6321_v32 = vor.u32 %v8221_v23, %v6320_v22 }
  0x58   : > { %3891 = vmatpush.bf16.msrb.mxu0 %v6417_v40  ;;  %v6921_v26 = vor.u32 %v8371_v17, %v6920_v16  ;;  %v6704_v28 = vld [vmem:[#allocation4 + $0x990] sm:$0xf]  ;;  %v8317_v29 = vld [vmem:[#allocation4 + $0x9a4] sm:$0xf0]  ;;  %3860 = vmatmul.bf16.vlgmr.msra.gmra.mxu1 %v9094_v25  ;;  %v6513_v33 = vor.u32 %v8269_v27, %v6512_v24  ;;  %v6296_v35 = vld [vmem:[#allocation4 + $0x660] sm:$0xf] }
  0x59   : > { %3904 = vmatpush.bf16.msrb.mxu1 %v6609_v41  ;;  %3873 = vmatmul.bf16.vlgmr.msra.gmra.mxu2 %v9083_v8  ;;  %v6896_v30 = vld [vmem:[#allocation4 + $0xb10] sm:$0xf]  ;;  %v8365_v31 = vld [vmem:[#allocation4 + $0xb24] sm:$0xf0]  ;;  %v6705_v34 = vor.u32 %v8317_v29, %v6704_v28  ;;  %v8215_v36 = vld [vmem:[#allocation4 + $0x674] sm:$0xf0] }
  0x5a   : > { %3917 = vmatpush.bf16.msrb.mxu2 %v6801_v42  ;;  %3886 = vmatmul.bf16.vlgmr.msra.gmra.mxu3 %v9088_v15  ;;  %v6488_v37 = vld [vmem:[#allocation4 + $0x7e0] sm:$0xf]  ;;  %v6897_v38 = vor.u32 %v8365_v31, %v6896_v30  ;;  %v8263_v39 = vld [vmem:[#allocation4 + $0x7f4] sm:$0xf0]  ;;  %v6297_v44 = vor.u32 %v8215_v36, %v6296_v35  ;;  %v6272_v47 = vld [vmem:[#allocation4 + $0x630] sm:$0xf] }
  0x5b   : > { %3930 = vmatpush.bf16.msrb.mxu3 %v6993_v46  ;;  %v6680_v40 = vld [vmem:[#allocation4 + $0x960] sm:$0xf]  ;;  %v8311_v41 = vld [vmem:[#allocation4 + $0x974] sm:$0xf0]  ;;  %v6489_v45 = vor.u32 %v8263_v39, %v6488_v37  ;;  %v8209_v48 = vld [vmem:[#allocation4 + $0x644] sm:$0xf0] }
  0x5c   : > { %3892 = vmatpush.bf16.msrb.mxu0 %v6393_v52  ;;  %v6872_v42 = vld [vmem:[#allocation4 + $0xae0] sm:$0xf]  ;;  %v8359_v43 = vld [vmem:[#allocation4 + $0xaf4] sm:$0xf0]  ;;  %v6681_v46 = vor.u32 %v8311_v41, %v6680_v40  ;;  %v6464_v49 = vld [vmem:[#allocation4 + $0x7b0] sm:$0xf]  ;;  %v6273_v56 = vor.u32 %v8209_v48, %v6272_v47 }
  0x5d   : > { %3905 = vmatpush.bf16.msrb.mxu1 %v6585_v54  ;;  %v6873_v50 = vor.u32 %v8359_v43, %v6872_v42  ;;  %v8257_v51 = vld [vmem:[#allocation4 + $0x7c4] sm:$0xf0]  ;;  %v6656_v52 = vld [vmem:[#allocation4 + $0x930] sm:$0xf]  ;;  %v6248_v57 = vld [vmem:[#allocation4 + $0x600] sm:$0xf] }
  0x5e   : > { %3918 = vmatpush.bf16.msrb.mxu2 %v6777_v55  ;;  %v8305_v53 = vld [vmem:[#allocation4 + $0x944] sm:$0xf0]  ;;  %v6848_v54 = vld [vmem:[#allocation4 + $0xab0] sm:$0xf]  ;;  %v8203_v58 = vld [vmem:[#allocation4 + $0x614] sm:$0xf0] }
  0x5f   : > { %3931 = vmatpush.bf16.msrb.mxu3 %v6969_v59  ;;  %v8353_v55 = vld [vmem:[#allocation4 + $0xac4] sm:$0xf0]  ;;  %v6465_v59 = vor.u32 %v8257_v51, %v6464_v49  ;;  %v6657_v60 = vor.u32 %v8305_v53, %v6656_v52  ;;  %v6440_v61 = vld [vmem:[#allocation4 + $0x780] sm:$0xf]  ;;  %v8251_v62 = vld [vmem:[#allocation4 + $0x794] sm:$0xf0]  ;;  %v6249_v7 = vor.u32 %v8203_v58, %v6248_v57 }
  0x60   : > { %3893 = vmatpush.bf16.msrb.mxu0 %v6369_v0  ;;  %v6632_v63 = vld [vmem:[#allocation4 + $0x900] sm:$0xf]  ;;  %v6849_v0 = vor.u32 %v8353_v55, %v6848_v54  ;;  %v8347_v3 = vld [vmem:[#allocation4 + $0xa94] sm:$0xf0]  ;;  %v7184_v4 = vld [vmem:[#allocation4 + $0xd50] sm:$0xf]  ;;  %v6441_v13 = vor.u32 %v8251_v62, %v6440_v61 }
  0x61   : > { %3906 = vmatpush.bf16.msrb.mxu1 %v6561_v1  ;;  %v8299_v1 = vld [vmem:[#allocation4 + $0x914] sm:$0xf0]  ;;  %v6824_v2 = vld [vmem:[#allocation4 + $0xa80] sm:$0xf]  ;;  %v7376_v6 = vld [vmem:[#allocation4 + $0xed0] sm:$0xf] }
  0x62   : > { %3919 = vmatpush.bf16.msrb.mxu2 %v6753_v5  ;;  %v8437_v5 = vld [vmem:[#allocation4 + $0xd64] sm:$0xf0]  ;;  %v6633_v14 = vor.u32 %v8299_v1, %v6632_v63  ;;  %v7760_v16 = vld [vmem:[#allocation4 + $0x11d0] sm:$0xf]  ;;  %v6825_v19 = vor.u32 %v8347_v3, %v6824_v2  ;;  %v349_v22 = vld [vmem:[%s9067_s19 + $0x20] sm:$0xff]  ;;  %s5476_s29 = sshll.u32 %s9286_s28, 3 }
  0x63   : > { %3932 = vmatpush.bf16.msrb.mxu3 %v6945_v11  ;;  %v8485_v10 = vld [vmem:[#allocation4 + $0xee4] sm:$0xf0]  ;;  %v7568_v11 = vld [vmem:[#allocation4 + $0x1050] sm:$0xf]  ;;  %v352_v23 = vld [vmem:[%s9067_s19 + $0x38] sm:$0xff]  ;;  %v9103_v37 = vpack.c.bf16 %v349_v22, %v349_v22  ;;  %s340_s25 = scalar_lea.vmem %s9275_s5, %s5476_s29  ;;  %s344_s27 = scalar_lea.vmem %s9276_s6, %s5476_s29 }
  0x64   : > { %3894 = vmatpush.bf16.msrb.mxu0 %v6345_v18  ;;  %v8533_v12 = vld [vmem:[#allocation4 + $0x1064] sm:$0xf0]  ;;  %v351_v18 = vld [vmem:[%s9067_s19 + $0x30] sm:$0xff]  ;;  %v7377_v24 = vor.u32 %v8485_v10, %v7376_v6  ;;  %v8431_v27 = vld [vmem:[#allocation4 + $0xd34] sm:$0xf0] }
  0x65   : > { %3907 = vmatpush.bf16.msrb.mxu1 %v6537_v20  ;;  %v8581_v17 = vld [vmem:[#allocation4 + $0x11e4] sm:$0xf0]  ;;  %v7185_v20 = vor.u32 %v8437_v5, %v7184_v4  ;;  %v7352_v28 = vld [vmem:[#allocation4 + $0xea0] sm:$0xf]  ;;  %v8479_v31 = vld [vmem:[#allocation4 + $0xeb4] sm:$0xf0] }
  0x66   : > { %3920 = vmatpush.bf16.msrb.mxu2 %v6729_v21  ;;  %v7160_v21 = vld [vmem:[#allocation4 + $0xd20] sm:$0xf]  ;;  %v350_v29 = vld [vmem:[%s9067_s19 + $0x28] sm:$0xff]  ;;  %v7761_v30 = vor.u32 %v8581_v17, %v7760_v16  ;;  %v8575_v36 = vld [vmem:[#allocation4 + $0x11b4] sm:$0xf0]  ;;  %v7353_v41 = vor.u32 %v8479_v31, %v7352_v28 }
  0x67   : > { %3933 = vmatpush.bf16.msrb.mxu3 %v6921_v26  ;;  %v7569_v26 = vor.u32 %v8533_v12, %v7568_v11  ;;  %v7736_v35 = vld [vmem:[#allocation4 + $0x11a0] sm:$0xf]  ;;  %v7161_v39 = vor.u32 %v8431_v27, %v7160_v21  ;;  %v9107_v40 = vpack.c.bf16 %v350_v29, %v350_v29  ;;  %v7136_v43 = vld [vmem:[#allocation4 + $0xcf0] sm:$0xf]  ;;  %v8473_v47 = vld [vmem:[#allocation4 + $0xe84] sm:$0xf0] }
  0x68   : > { %3895 = vmatpush.bf16.msrb.mxu0 %v6321_v32  ;;  %v7544_v32 = vld [vmem:[#allocation4 + $0x1020] sm:$0xf]  ;;  %v7520_v48 = vld [vmem:[#allocation4 + $0xff0] sm:$0xf]  ;;  %v8521_v49 = vld [vmem:[#allocation4 + $0x1004] sm:$0xf0] }
  0x69   : > { %3908 = vmatpush.bf16.msrb.mxu1 %v6513_v33  ;;  %v8527_v33 = vld [vmem:[#allocation4 + $0x1034] sm:$0xf0]  ;;  %v8569_v51 = vld [vmem:[#allocation4 + $0x1184] sm:$0xf0]  ;;  %v7521_v54 = vor.u32 %v8521_v49, %v7520_v48  ;;  %v7112_v55 = vld [vmem:[#allocation4 + $0xcc0] sm:$0xf] }
  0x6a   : > { %3921 = vmatpush.bf16.msrb.mxu2 %v6705_v34  ;;  %v9101_v34 = vpack.c.bf16 %v351_v18, %v351_v18  ;;  %v7545_v42 = vor.u32 %v8527_v33, %v7544_v32  ;;  %v7304_v57 = vld [vmem:[#allocation4 + $0xe40] sm:$0xf]  ;;  %v8515_v61 = vld [vmem:[#allocation4 + $0xfd4] sm:$0xf0]  ;;  %v7088_v3 = vld [vmem:[#allocation4 + $0xc90] sm:$0xf] }
  0x6b   : > { %3934 = vmatpush.bf16.msrb.mxu3 %v6897_v38  ;;  %v9105_v38 = vpack.c.bf16 %v352_v23, %v352_v23  ;;  %v7688_v62 = vld [vmem:[#allocation4 + $0x1140] sm:$0xf]  ;;  %v8563_v63 = vld [vmem:[#allocation4 + $0x1154] sm:$0xf0]  ;;  %v8413_v4 = vld [vmem:[#allocation4 + $0xca4] sm:$0xf0] }
  0x6c   : > { %3896 = vmatpush.bf16.msrb.mxu0 %v6297_v44  ;;  %v8425_v44 = vld [vmem:[#allocation4 + $0xd04] sm:$0xf0]  ;;  %v7280_v5 = vld [vmem:[#allocation4 + $0xe10] sm:$0xf]  ;;  %v7689_v6 = vor.u32 %v8563_v63, %v7688_v62  ;;  %v7064_v18 = vld [vmem:[#allocation4 + $0xc60] sm:$0xf] }
  0x6d   : > { %3909 = vmatpush.bf16.msrb.mxu1 %v6489_v45  ;;  %v7328_v45 = vld [vmem:[#allocation4 + $0xe70] sm:$0xf]  ;;  %v7137_v52 = vor.u32 %v8425_v44, %v7136_v43  ;;  %v8509_v11 = vld [vmem:[#allocation4 + $0xfa4] sm:$0xf0]  ;;  %v8455_v22 = vld [vmem:[#allocation4 + $0xdf4] sm:$0xf0] }
  0x6e   : > { %3922 = vmatpush.bf16.msrb.mxu2 %v6681_v46  ;;  %v7737_v46 = vor.u32 %v8575_v36, %v7736_v35  ;;  %v7329_v53 = vor.u32 %v8473_v47, %v7328_v45  ;;  %v7472_v10 = vld [vmem:[#allocation4 + $0xf90] sm:$0xf]  ;;  %v7448_v23 = vld [vmem:[#allocation4 + $0xf60] sm:$0xf]  ;;  %v8551_v27 = vld [vmem:[#allocation4 + $0x10f4] sm:$0xf0] }
  0x6f   : > { %3935 = vmatpush.bf16.msrb.mxu3 %v6873_v50  ;;  %v7712_v50 = vld [vmem:[#allocation4 + $0x1170] sm:$0xf]  ;;  %v7473_v17 = vor.u32 %v8509_v11, %v7472_v10  ;;  %v8401_v32 = vld [vmem:[#allocation4 + $0xc44] sm:$0xf0]  ;;  %v7016_v45 = vld [vmem:[#allocation4 + $0xc00] sm:$0xf] }
  0x70   : > { %3897 = vmatpush.bf16.msrb.mxu0 %v6273_v56  ;;  %v8419_v56 = vld [vmem:[#allocation4 + $0xcd4] sm:$0xf0]  ;;  %v7713_v58 = vor.u32 %v8569_v51, %v7712_v50  ;;  %v7664_v12 = vld [vmem:[#allocation4 + $0x1110] sm:$0xf]  ;;  %v8449_v36 = vld [vmem:[#allocation4 + $0xdc4] sm:$0xf0] }
  0x71   : > { %3910 = vmatpush.bf16.msrb.mxu1 %v6465_v59  ;;  %v8467_v59 = vld [vmem:[#allocation4 + $0xe54] sm:$0xf0]  ;;  %v7040_v31 = vld [vmem:[#allocation4 + $0xc30] sm:$0xf]  ;;  %v8545_v43 = vld [vmem:[#allocation4 + $0x10c4] sm:$0xf0] }
  0x72   : > { %3923 = vmatpush.bf16.msrb.mxu2 %v6657_v60  ;;  %v7496_v60 = vld [vmem:[#allocation4 + $0xfc0] sm:$0xf]  ;;  %v7305_v1 = vor.u32 %v8467_v59, %v7304_v57  ;;  %v7232_v33 = vld [vmem:[#allocation4 + $0xdb0] sm:$0xf]  ;;  %v7041_v44 = vor.u32 %v8401_v32, %v7040_v31  ;;  %v8443_v50 = vld [vmem:[#allocation4 + $0xd94] sm:$0xf0] }
  0x73   : > { %3936 = vmatpush.bf16.msrb.mxu3 %v6849_v0  ;;  %v7113_v0 = vor.u32 %v8419_v56, %v7112_v55  ;;  %v7497_v2 = vor.u32 %v8515_v61, %v7496_v60  ;;  %v7233_v47 = vor.u32 %v8449_v36, %v7232_v33  ;;  %v7208_v49 = vld [vmem:[#allocation4 + $0xd80] sm:$0xf]  ;;  %v8539_v55 = vld [vmem:[#allocation4 + $0x1094] sm:$0xf0]  ;;  %v8050_v56 = vld [vmem:[#allocation4 + $0x154] sm:$0xf] }
  0x74   : > { %3898 = vmatpush.bf16.msrb.mxu0 %v6249_v7  ;;  %v8461_v7 = vld [vmem:[#allocation4 + $0xe24] sm:$0xf0]  ;;  %v7400_v51 = vld [vmem:[#allocation4 + $0xf00] sm:$0xf]  ;;  %v5650_v57 = vld [vmem:[#allocation4 + $0x168] sm:$0xf0]  ;;  %v7209_v63 = vor.u32 %v8443_v50, %v7208_v49 }
  0x75   : > { %3911 = vmatpush.bf16.msrb.mxu1 %v6441_v13  ;;  %v8557_v13 = vld [vmem:[#allocation4 + $0x1124] sm:$0xf0]  ;;  %v7281_v16 = vor.u32 %v8461_v7, %v7280_v5  ;;  %v5842_v60 = vld [vmem:[#allocation4 + $0x2e8] sm:$0xf0]  ;;  %v8146_v61 = vld [vmem:[#allocation4 + $0x454] sm:$0xf]  ;;  %v5653_v5 = vor.u32 %v8050_v56, %v5650_v57 }
  0x76   : > { %3924 = vmatpush.bf16.msrb.mxu2 %v6633_v14  ;;  %v7089_v14 = vor.u32 %v8413_v4, %v7088_v3  ;;  %v7665_v21 = vor.u32 %v8557_v13, %v7664_v12  ;;  %v6034_v62 = vld [vmem:[#allocation4 + $0x468] sm:$0xf0]  ;;  %v353_v3 = vld [vmem:[%s9067_s19 + $0x40] sm:$0xff]  ;;  %v356_v10 = vld [vmem:[%s9067_s19 + $0x58] sm:$0xff] }
  0x77   : > { %3937 = vmatpush.bf16.msrb.mxu3 %v6825_v19  ;;  %3899 = vmatmul.bf16.vlgmr.msrb.gmra.mxu0 %v9103_v37  ;;  %v8407_v19 = vld [vmem:[#allocation4 + $0xc74] sm:$0xf0]  ;;  %v354_v7 = vld [vmem:[%s9067_s19 + $0x48] sm:$0xff]  ;;  %v6037_v12 = vor.u32 %v8146_v61, %v6034_v62  ;;  %v8044_v13 = vld [vmem:[#allocation4 + $0x124] sm:$0xf] }
  0x78   : > { %3943 = vmatpush.bf16.msra.mxu0 %v7185_v20  ;;  %3912 = vmatmul.bf16.vlgmr.msrb.gmra.mxu1 %v9107_v40  ;;  %v7256_v20 = vld [vmem:[#allocation4 + $0xde0] sm:$0xf]  ;;  %v7065_v28 = vor.u32 %v8407_v19, %v7064_v18  ;;  %v9117_v18 = vpack.c.bf16 %v353_v3, %v353_v3  ;;  %v5818_v19 = vld [vmem:[#allocation4 + $0x2b8] sm:$0xf0]  ;;  %v8038_v31 = vld [vmem:[#allocation4 + $0xf4] sm:$0xf] }
  0x79   : > { %3956 = vmatpush.bf16.msra.mxu1 %v7377_v24  ;;  %3925 = vmatmul.bf16.vlgmr.msrb.gmra.mxu2 %v9101_v34  ;;  %v8503_v24 = vld [vmem:[#allocation4 + $0xf74] sm:$0xf0]  ;;  %v7257_v29 = vor.u32 %v8455_v22, %v7256_v20  ;;  %v8140_v20 = vld [vmem:[#allocation4 + $0x424] sm:$0xf]  ;;  %v5602_v32 = vld [vmem:[#allocation4 + $0x108] sm:$0xf0] }
  0x7a   : > { %3969 = vmatpush.bf16.msra.mxu2 %v7569_v26  ;;  %3938 = vmatmul.bf16.vlgmr.msrb.gmra.mxu3 %v9105_v38  ;;  %v7640_v26 = vld [vmem:[#allocation4 + $0x10e0] sm:$0xf]  ;;  %v8086_v33 = vld [vmem:[#allocation4 + $0x274] sm:$0xf]  ;;  %v5794_v36 = vld [vmem:[#allocation4 + $0x288] sm:$0xf0] }
  0x7b   : > { %3982 = vmatpush.bf16.msra.mxu3 %v7761_v30  ;;  %v7449_v30 = vor.u32 %v8503_v24, %v7448_v23  ;;  %v7641_v35 = vor.u32 %v8551_v27, %v7640_v26  ;;  %v9121_v23 = vpack.c.bf16 %v354_v7, %v354_v7  ;;  %v8188_v24 = vld [vmem:[#allocation4 + $0x5a4] sm:$0xf]  ;;  %v6202_v26 = vld [vmem:[#allocation4 + $0x5b8] sm:$0xf0]  ;;  %v9123_v27 = vpack.c.bf16 %v356_v10, %v356_v10  ;;  %v8074_v61 = vld [vmem:[#allocation4 + $0x214] sm:$0xf] }
  0x7c   : > { %3944 = vmatpush.bf16.msra.mxu0 %v7161_v39  ;;  %v7424_v39 = vld [vmem:[#allocation4 + $0xf30] sm:$0xf]  ;;  %v8080_v49 = vld [vmem:[#allocation4 + $0x244] sm:$0xf]  ;;  %v6130_v3 = vld [vmem:[#allocation4 + $0x528] sm:$0xf0] }
  0x7d   : > { %3957 = vmatpush.bf16.msra.mxu1 %v7353_v41  ;;  %v8497_v41 = vld [vmem:[#allocation4 + $0xf44] sm:$0xf0]  ;;  %v8020_v7 = vld [vmem:[#allocation4 + $0x64] sm:$0xf]  ;;  %v5530_v10 = vld [vmem:[#allocation4 + $0x78] sm:$0xf0] }
  0x7e   : > { %3970 = vmatpush.bf16.msra.mxu2 %v7545_v42  ;;  %v7616_v42 = vld [vmem:[#allocation4 + $0x10b0] sm:$0xf]  ;;  %v7425_v48 = vor.u32 %v8497_v41, %v7424_v39  ;;  %v8134_v39 = vld [vmem:[#allocation4 + $0x3f4] sm:$0xf]  ;;  %v5986_v41 = vld [vmem:[#allocation4 + $0x408] sm:$0xf0] }
  0x7f   : > { %3983 = vmatpush.bf16.msra.mxu3 %v7737_v46  ;;  %v8395_v46 = vld [vmem:[#allocation4 + $0xc14] sm:$0xf0] }
  0x80   : > { %3945 = vmatpush.bf16.msra.mxu0 %v7137_v52  ;;  %v7617_v52 = vor.u32 %v8545_v43, %v7616_v42  ;;  %v7017_v59 = vor.u32 %v8395_v46, %v7016_v45  ;;  %v8182_v42 = vld [vmem:[#allocation4 + $0x574] sm:$0xf]  ;;  %v6178_v43 = vld [vmem:[#allocation4 + $0x588] sm:$0xf0]  ;;  %v5797_v45 = vor.u32 %v8086_v33, %v5794_v36  ;;  %v5989_v46 = vor.u32 %v8134_v39, %v5986_v41  ;;  %v8008_v41 = vld [vmem:[#allocation4 + $0x4] sm:$0xf] }
  0x81   : > { %3958 = vmatpush.bf16.msra.mxu1 %v7329_v53  ;;  %v8491_v53 = vld [vmem:[#allocation4 + $0xf14] sm:$0xf0]  ;;  %v6181_v50 = vor.u32 %v8182_v42, %v6178_v43  ;;  %v5890_v33 = vld [vmem:[#allocation4 + $0x348] sm:$0xf0]  ;;  %v5482_v42 = vld [vmem:[#allocation4 + $0x18] sm:$0xf0] }
  0x82   : > { %3971 = vmatpush.bf16.msra.mxu2 %v7521_v54  ;;  %v7592_v54 = vld [vmem:[#allocation4 + $0x1080] sm:$0xf]  ;;  %v6082_v36 = vld [vmem:[#allocation4 + $0x4c8] sm:$0xf0] }
  0x83   : > { %3984 = vmatpush.bf16.msra.mxu3 %v7713_v58  ;;  %v8098_v58 = vld [vmem:[#allocation4 + $0x2d4] sm:$0xf]  ;;  %v7593_v4 = vor.u32 %v8539_v55, %v7592_v54  ;;  %v8176_v54 = vld [vmem:[#allocation4 + $0x544] sm:$0xf]  ;;  %v6154_v55 = vld [vmem:[#allocation4 + $0x558] sm:$0xf0] }
  0x84   : > { %3946 = vmatpush.bf16.msra.mxu0 %v7113_v0  ;;  %v7401_v0 = vor.u32 %v8491_v53, %v7400_v51  ;;  %v5845_v11 = vor.u32 %v8098_v58, %v5842_v60  ;;  %v5770_v51 = vld [vmem:[#allocation4 + $0x258] sm:$0xf0]  ;;  %v5554_v60 = vld [vmem:[#allocation4 + $0xa8] sm:$0xf0]  ;;  %v6157_v62 = vor.u32 %v8176_v54, %v6154_v55  ;;  %v8290_v54 = vld [vmem:[#allocation4 + $0x8d4] sm:$0xf]  ;;  %v5485_v55 = vor.u32 %v8008_v41, %v5482_v42 }
  0x85   : > { %3959 = vmatpush.bf16.msra.mxu1 %v7305_v1  ;;  %v8194_v1 = vld [vmem:[#allocation4 + $0x5d4] sm:$0xf]  ;;  %v5962_v53 = vld [vmem:[#allocation4 + $0x3d8] sm:$0xf0]  ;;  %v5773_v57 = vor.u32 %v8080_v49, %v5770_v51  ;;  %v8272_v41 = vld [vmem:[#allocation4 + $0x844] sm:$0xf] }
  0x86   : > { %3972 = vmatpush.bf16.msra.mxu2 %v7497_v2  ;;  %v6226_v2 = vld [vmem:[#allocation4 + $0x5e8] sm:$0xf0]  ;;  %v5866_v49 = vld [vmem:[#allocation4 + $0x318] sm:$0xf0] }
  0x87   : > { %3985 = vmatpush.bf16.msra.mxu3 %v7689_v6  ;;  %v355_v6 = vld [vmem:[%s9067_s19 + $0x50] sm:$0xff]  ;;  %v6058_v51 = vld [vmem:[#allocation4 + $0x498] sm:$0xf0] }
  0x88   : > { %3947 = vmatpush.bf16.msra.mxu0 %v7089_v14  ;;  %v5626_v14 = vld [vmem:[#allocation4 + $0x138] sm:$0xf0]  ;;  %v9119_v22 = vpack.c.bf16 %v355_v6, %v355_v6 }
  0x89   : > { %3960 = vmatpush.bf16.msra.mxu1 %v7281_v16  ;;  %v8092_v16 = vld [vmem:[#allocation4 + $0x2a4] sm:$0xf] }
  0x8a   : > { %3973 = vmatpush.bf16.msra.mxu2 %v7473_v17  ;;  %v6229_v17 = vor.u32 %v8194_v1, %v6226_v2  ;;  %v5938_v1 = vld [vmem:[#allocation4 + $0x3a8] sm:$0xf0]  ;;  %v8170_v2 = vld [vmem:[#allocation4 + $0x514] sm:$0xf] }
  0x8b   : > { %3986 = vmatpush.bf16.msra.mxu3 %v7665_v21  ;;  %v6010_v21 = vld [vmem:[#allocation4 + $0x438] sm:$0xf0] }
  0x8c   : > { %3948 = vmatpush.bf16.msra.mxu0 %v7065_v28  ;;  %v5629_v28 = vor.u32 %v8044_v13, %v5626_v14  ;;  %v5722_v13 = vld [vmem:[#allocation4 + $0x1f8] sm:$0xf0]  ;;  %v8116_v14 = vld [vmem:[#allocation4 + $0x364] sm:$0xf] }
  0x8d   : > { %3961 = vmatpush.bf16.msra.mxu1 %v7257_v29  ;;  %v5821_v29 = vor.u32 %v8092_v16, %v5818_v19  ;;  %v5914_v16 = vld [vmem:[#allocation4 + $0x378] sm:$0xf0] }
  0x8e   : > { %3974 = vmatpush.bf16.msra.mxu2 %v7449_v30  ;;  %v6013_v30 = vor.u32 %v8140_v20, %v6010_v21  ;;  %v6106_v19 = vld [vmem:[#allocation4 + $0x4f8] sm:$0xf0]  ;;  %v5533_v20 = vor.u32 %v8020_v7, %v5530_v10  ;;  %v8332_v10 = vld [vmem:[#allocation4 + $0xa24] sm:$0xf] }
  0x8f   : > { %3987 = vmatpush.bf16.msra.mxu3 %v7641_v35  ;;  %v6205_v35 = vor.u32 %v8188_v24, %v6202_v26  ;;  %v5917_v24 = vor.u32 %v8116_v14, %v5914_v16  ;;  %v8014_v26 = vld [vmem:[#allocation4 + $0x34] sm:$0xf]  ;;  %v6586_v7 = vld [vmem:[#allocation4 + $0x8b8] sm:$0xf0] }
  0x90   : > { %3949 = vmatpush.bf16.msra.mxu0 %v7041_v44  ;;  %v5605_v44 = vor.u32 %v8038_v31, %v5602_v32  ;;  %v5698_v31 = vld [vmem:[#allocation4 + $0x1c8] sm:$0xf0]  ;;  %v8110_v32 = vld [vmem:[#allocation4 + $0x334] sm:$0xf] }
  0x91   : > { %3962 = vmatpush.bf16.msra.mxu1 %v7233_v47  ;;  %v8032_v47 = vld [vmem:[#allocation4 + $0xc4] sm:$0xf] }
  0x92   : > { %3975 = vmatpush.bf16.msra.mxu2 %v7425_v48  ;;  %v5578_v48 = vld [vmem:[#allocation4 + $0xd8] sm:$0xf0] }
  0x93   : > { %3988 = vmatpush.bf16.msra.mxu3 %v7617_v52  ;;  %v8128_v52 = vld [vmem:[#allocation4 + $0x3c4] sm:$0xf]  ;;  %v5581_v56 = vor.u32 %v8032_v47, %v5578_v48 }
  0x94   : > { %3950 = vmatpush.bf16.msra.mxu0 %v7017_v59  ;;  %v5965_v58 = vor.u32 %v8128_v52, %v5962_v53  ;;  %v8026_v59 = vld [vmem:[#allocation4 + $0x94] sm:$0xf]  ;;  %v8104_v47 = vld [vmem:[#allocation4 + $0x304] sm:$0xf]  ;;  %v6418_v53 = vld [vmem:[#allocation4 + $0x768] sm:$0xf0] }
  0x95   : > { %3963 = vmatpush.bf16.msra.mxu1 %v7209_v63  ;;  %v5746_v63 = vld [vmem:[#allocation4 + $0x228] sm:$0xf0]  ;;  %v8242_v52 = vld [vmem:[#allocation4 + $0x754] sm:$0xf] }
  0x96   : > { %3976 = vmatpush.bf16.msra.mxu2 %v7401_v0  ;;  %v8122_v0 = vld [vmem:[#allocation4 + $0x394] sm:$0xf] }
  0x97   : > { %3989 = vmatpush.bf16.msra.mxu3 %v7593_v4  ;;  %3951 = vmatmul.bf16.vlgmr.msra.gmra.mxu0 %v9117_v18  ;;  %v5557_v4 = vor.u32 %v8026_v59, %v5554_v60  ;;  %v5941_v6 = vor.u32 %v8122_v0, %v5938_v1  ;;  %v5869_v60 = vor.u32 %v8104_v47, %v5866_v49  ;;  %v6922_v47 = vld [vmem:[#allocation4 + $0xb58] sm:$0xf0] }
  0x98   : > { %3995 = vmatpush.bf16.msrb.mxu0 %v5653_v5  ;;  %3964 = vmatmul.bf16.vlgmr.msra.gmra.mxu1 %v9121_v23  ;;  %v5749_v5 = vor.u32 %v8074_v61, %v5746_v63  ;;  %v8386_v61 = vld [vmem:[#allocation4 + $0xbd4] sm:$0xf]  ;;  %v6421_v0 = vor.u32 %v8242_v52, %v6418_v53  ;;  %v6322_v52 = vld [vmem:[#allocation4 + $0x6a8] sm:$0xf0] }
  0x99   : > { %4008 = vmatpush.bf16.msrb.mxu1 %v5845_v11  ;;  %3977 = vmatmul.bf16.vlgmr.msra.gmra.mxu2 %v9119_v22  ;;  %v8068_v11 = vld [vmem:[#allocation4 + $0x1e4] sm:$0xf]  ;;  %v8266_v53 = vld [vmem:[#allocation4 + $0x814] sm:$0xf] }
  0x9a   : > { %4021 = vmatpush.bf16.msrb.mxu2 %v6037_v12  ;;  %3990 = vmatmul.bf16.vlgmr.msra.gmra.mxu3 %v9123_v27  ;;  %v6133_v12 = vor.u32 %v8170_v2, %v6130_v3  ;;  %v5725_v21 = vor.u32 %v8068_v11, %v5722_v13  ;;  %v8236_v3 = vld [vmem:[#allocation4 + $0x724] sm:$0xf]  ;;  %v6778_v11 = vld [vmem:[#allocation4 + $0xa38] sm:$0xf0] }
  0x9b   : > { %4034 = vmatpush.bf16.msrb.mxu3 %v6229_v17  ;;  %v8164_v17 = vld [vmem:[#allocation4 + $0x4e4] sm:$0xf]  ;;  %v6970_v13 = vld [vmem:[#allocation4 + $0xbb8] sm:$0xf0] }
  0x9c   : > { %3996 = vmatpush.bf16.msrb.mxu0 %v5629_v28  ;;  %v5506_v28 = vld [vmem:[#allocation4 + $0x48] sm:$0xf0] }
  0x9d   : > { %4009 = vmatpush.bf16.msrb.mxu1 %v5821_v29  ;;  %v8062_v29 = vld [vmem:[#allocation4 + $0x1b4] sm:$0xf]  ;;  %v5509_v39 = vor.u32 %v8014_v26, %v5506_v28  ;;  %v6562_v26 = vld [vmem:[#allocation4 + $0x888] sm:$0xf0] }
  0x9e   : > { %4022 = vmatpush.bf16.msrb.mxu2 %v6013_v30  ;;  %v6109_v30 = vor.u32 %v8164_v17, %v6106_v19  ;;  %v5701_v43 = vor.u32 %v8062_v29, %v5698_v31  ;;  %v6781_v17 = vor.u32 %v8332_v10, %v6778_v11  ;;  %v8230_v19 = vld [vmem:[#allocation4 + $0x6f4] sm:$0xf]  ;;  %v6754_v29 = vld [vmem:[#allocation4 + $0xa08] sm:$0xf0] }
  0x9f   : > { %4035 = vmatpush.bf16.msrb.mxu3 %v6205_v35  ;;  %v8158_v35 = vld [vmem:[#allocation4 + $0x4b4] sm:$0xf]  ;;  %v6946_v31 = vld [vmem:[#allocation4 + $0xb88] sm:$0xf0] }
  0xa0   : > { %3997 = vmatpush.bf16.msrb.mxu0 %v5605_v44  ;;  %v5893_v44 = vor.u32 %v8110_v32, %v5890_v33  ;;  %v6085_v48 = vor.u32 %v8158_v35, %v6082_v36  ;;  %v8326_v28 = vld [vmem:[#allocation4 + $0x9f4] sm:$0xf]  ;;  %v8224_v36 = vld [vmem:[#allocation4 + $0x6c4] sm:$0xf] }
  0xa1   : > { %4010 = vmatpush.bf16.msrb.mxu1 %v5797_v45  ;;  %v8056_v45 = vld [vmem:[#allocation4 + $0x184] sm:$0xf]  ;;  %v6757_v35 = vor.u32 %v8326_v28, %v6754_v29 }
  0xa2   : > { %4023 = vmatpush.bf16.msrb.mxu2 %v5989_v46  ;;  %v5674_v46 = vld [vmem:[#allocation4 + $0x198] sm:$0xf0]  ;;  %v8200_v29 = vld [vmem:[#allocation4 + $0x604] sm:$0xf] }
  0xa3   : > { %4036 = vmatpush.bf16.msrb.mxu3 %v6181_v50  ;;  %v8152_v50 = vld [vmem:[#allocation4 + $0x484] sm:$0xf]  ;;  %v5677_v59 = vor.u32 %v8056_v45, %v5674_v46  ;;  %v6730_v45 = vld [vmem:[#allocation4 + $0x9d8] sm:$0xf0] }
  0xa4   : > { %3998 = vmatpush.bf16.msrb.mxu0 %v5581_v56  ;;  %v6610_v56 = vld [vmem:[#allocation4 + $0x8e8] sm:$0xf0]  ;;  %v6061_v63 = vor.u32 %v8152_v50, %v6058_v51  ;;  %v8368_v46 = vld [vmem:[#allocation4 + $0xb44] sm:$0xf]  ;;  %v8218_v51 = vld [vmem:[#allocation4 + $0x694] sm:$0xf] }
  0xa5   : > { %4011 = vmatpush.bf16.msrb.mxu1 %v5773_v57  ;;  %v8338_v57 = vld [vmem:[#allocation4 + $0xa54] sm:$0xf]  ;;  %v6613_v1 = vor.u32 %v8290_v54, %v6610_v56  ;;  %v6925_v54 = vor.u32 %v8368_v46, %v6922_v47 }
  0xa6   : > { %4024 = vmatpush.bf16.msrb.mxu2 %v5965_v58  ;;  %v6802_v58 = vld [vmem:[#allocation4 + $0xa68] sm:$0xf0]  ;;  %v8314_v56 = vld [vmem:[#allocation4 + $0x994] sm:$0xf] }
  0xa7   : > { %4037 = vmatpush.bf16.msrb.mxu3 %v6157_v62  ;;  %v6994_v62 = vld [vmem:[#allocation4 + $0xbe8] sm:$0xf0]  ;;  %v6805_v2 = vor.u32 %v8338_v57, %v6802_v58  ;;  %v8362_v58 = vld [vmem:[#allocation4 + $0xb14] sm:$0xf] }
  0xa8   : > { %3999 = vmatpush.bf16.msrb.mxu0 %v5557_v4  ;;  %v6394_v4 = vld [vmem:[#allocation4 + $0x738] sm:$0xf0]  ;;  %v6706_v57 = vld [vmem:[#allocation4 + $0x9a8] sm:$0xf0]  ;;  %v8482_v46 = vld [vmem:[#allocation4 + $0xed4] sm:$0xf] }
  0xa9   : > { %4012 = vmatpush.bf16.msrb.mxu1 %v5749_v5  ;;  %v8284_v5 = vld [vmem:[#allocation4 + $0x8a4] sm:$0xf]  ;;  %v6397_v14 = vor.u32 %v8236_v3, %v6394_v4  ;;  %v6490_v3 = vld [vmem:[#allocation4 + $0x7f8] sm:$0xf0] }
  0xaa   : > { %4025 = vmatpush.bf16.msrb.mxu2 %v5941_v6  ;;  %v6997_v6 = vor.u32 %v8386_v61, %v6994_v62  ;;  %v6589_v16 = vor.u32 %v8284_v5, %v6586_v7  ;;  %v6709_v62 = vor.u32 %v8314_v56, %v6706_v57  ;;  %v8308_v4 = vld [vmem:[#allocation4 + $0x964] sm:$0xf]  ;;  %v6682_v5 = vld [vmem:[#allocation4 + $0x978] sm:$0xf0] }
  0xab   : > { %4038 = vmatpush.bf16.msrb.mxu3 %v6133_v12  ;;  %v8380_v12 = vld [vmem:[#allocation4 + $0xba4] sm:$0xf]  ;;  %v6874_v7 = vld [vmem:[#allocation4 + $0xaf8] sm:$0xf0] }
  0xac   : > { %4000 = vmatpush.bf16.msrb.mxu0 %v5533_v20  ;;  %v6370_v20 = vld [vmem:[#allocation4 + $0x708] sm:$0xf0] }
  0xad   : > { %4013 = vmatpush.bf16.msrb.mxu1 %v5725_v21  ;;  %v8278_v21 = vld [vmem:[#allocation4 + $0x874] sm:$0xf]  ;;  %v6373_v32 = vor.u32 %v8230_v19, %v6370_v20  ;;  %v6466_v19 = vld [vmem:[#allocation4 + $0x7c8] sm:$0xf0] }
  0xae   : > { %4026 = vmatpush.bf16.msrb.mxu2 %v5917_v24  ;;  %v6973_v24 = vor.u32 %v8380_v12, %v6970_v13  ;;  %v6565_v33 = vor.u32 %v8278_v21, %v6562_v26  ;;  %v6685_v12 = vor.u32 %v8308_v4, %v6682_v5  ;;  %v8206_v13 = vld [vmem:[#allocation4 + $0x634] sm:$0xf]  ;;  %v6658_v21 = vld [vmem:[#allocation4 + $0x948] sm:$0xf0] }
  0xaf   : > { %4039 = vmatpush.bf16.msrb.mxu3 %v6109_v30  ;;  %v8374_v30 = vld [vmem:[#allocation4 + $0xb74] sm:$0xf]  ;;  %v6850_v26 = vld [vmem:[#allocation4 + $0xac8] sm:$0xf0] }
  0xb0   : > { %4001 = vmatpush.bf16.msrb.mxu0 %v5509_v39  ;;  %v6346_v39 = vld [vmem:[#allocation4 + $0x6d8] sm:$0xf0]  ;;  %v6949_v42 = vor.u32 %v8374_v30, %v6946_v31  ;;  %v8302_v20 = vld [vmem:[#allocation4 + $0x934] sm:$0xf] }
  0xb1   : > { %4014 = vmatpush.bf16.msrb.mxu1 %v5701_v43  ;;  %v6538_v43 = vld [vmem:[#allocation4 + $0x858] sm:$0xf0] }
  0xb2   : > { %4027 = vmatpush.bf16.msrb.mxu2 %v5893_v44  ;;  %v8320_v44 = vld [vmem:[#allocation4 + $0x9c4] sm:$0xf]  ;;  %v6541_v49 = vor.u32 %v8272_v41, %v6538_v43  ;;  %v6250_v30 = vld [vmem:[#allocation4 + $0x618] sm:$0xf0] }
  0xb3   : > { %4040 = vmatpush.bf16.msrb.mxu3 %v6085_v48  ;;  %v6349_v48 = vor.u32 %v8224_v36, %v6346_v39  ;;  %v6733_v50 = vor.u32 %v8320_v44, %v6730_v45  ;;  %v8296_v36 = vld [vmem:[#allocation4 + $0x904] sm:$0xf]  ;;  %v6634_v41 = vld [vmem:[#allocation4 + $0x918] sm:$0xf0]  ;;  %v8434_v44 = vld [vmem:[#allocation4 + $0xd54] sm:$0xf]  ;;  %v6253_v47 = vor.u32 %v8200_v29, %v6250_v30 }
  0xb4   : > { %4002 = vmatpush.bf16.msrb.mxu0 %v5485_v55  ;;  %v6514_v55 = vld [vmem:[#allocation4 + $0x828] sm:$0xf0]  ;;  %v6826_v43 = vld [vmem:[#allocation4 + $0xa98] sm:$0xf0]  ;;  %v8464_v29 = vld [vmem:[#allocation4 + $0xe44] sm:$0xf] }
  0xb5   : > { %4015 = vmatpush.bf16.msrb.mxu1 %v5677_v59  ;;  %v6898_v59 = vld [vmem:[#allocation4 + $0xb28] sm:$0xf0]  ;;  %v6517_v61 = vor.u32 %v8266_v53, %v6514_v55  ;;  %v8578_v53 = vld [vmem:[#allocation4 + $0x11d4] sm:$0xf]  ;;  %v7306_v30 = vld [vmem:[#allocation4 + $0xe58] sm:$0xf0] }
  0xb6   : > { %4028 = vmatpush.bf16.msrb.mxu2 %v5869_v60  ;;  %v6325_v60 = vor.u32 %v8218_v51, %v6322_v52  ;;  %v7186_v45 = vld [vmem:[#allocation4 + $0xd68] sm:$0xf0]  ;;  %v6637_v52 = vor.u32 %v8296_v36, %v6634_v41  ;;  %v8560_v36 = vld [vmem:[#allocation4 + $0x1144] sm:$0xf] }
  0xb7   : > { %4041 = vmatpush.bf16.msrb.mxu3 %v6061_v63  ;;  %4003 = vmatmul.bf16.vlgmr.msrb.gmra.mxu0 %v9085_v9  ;;  %v8212_v63 = vld [vmem:[#allocation4 + $0x664] sm:$0xf]  ;;  %v7189_v56 = vor.u32 %v8434_v44, %v7186_v45  ;;  %v7090_v45 = vld [vmem:[#allocation4 + $0xca8] sm:$0xf0] }
  0xb8   : > { %4047 = vmatpush.bf16.msra.mxu0 %v6421_v0  ;;  %4016 = vmatmul.bf16.vlgmr.msrb.gmra.mxu1 %v9094_v25  ;;  %v6298_v0 = vld [vmem:[#allocation4 + $0x678] sm:$0xf0] }
  0xb9   : > { %4060 = vmatpush.bf16.msra.mxu1 %v6613_v1  ;;  %4029 = vmatmul.bf16.vlgmr.msrb.gmra.mxu2 %v9083_v8  ;;  %v8260_v1 = vld [vmem:[#allocation4 + $0x7e4] sm:$0xf]  ;;  %v6301_v10 = vor.u32 %v8212_v63, %v6298_v0  ;;  %v7354_v63 = vld [vmem:[#allocation4 + $0xeb8] sm:$0xf0] }
  0xba   : > { %4073 = vmatpush.bf16.msra.mxu2 %v6805_v2  ;;  %4042 = vmatmul.bf16.vlgmr.msrb.gmra.mxu3 %v9088_v15  ;;  %v6901_v2 = vor.u32 %v8362_v58, %v6898_v59  ;;  %v6493_v11 = vor.u32 %v8260_v1, %v6490_v3  ;;  %v8428_v59 = vld [vmem:[#allocation4 + $0xd24] sm:$0xf]  ;;  %v7546_v1 = vld [vmem:[#allocation4 + $0x1038] sm:$0xf0] }
  0xbb   : > { %4086 = vmatpush.bf16.msra.mxu3 %v6997_v6  ;;  %v8356_v6 = vld [vmem:[#allocation4 + $0xae4] sm:$0xf]  ;;  %v7738_v3 = vld [vmem:[#allocation4 + $0x11b8] sm:$0xf0] }
  0xbc   : > { %4048 = vmatpush.bf16.msra.mxu0 %v6397_v14  ;;  %v6274_v14 = vld [vmem:[#allocation4 + $0x648] sm:$0xf0]  ;;  %v8524_v0 = vld [vmem:[#allocation4 + $0x1024] sm:$0xf] }
  0xbd   : > { %4061 = vmatpush.bf16.msra.mxu1 %v6589_v16  ;;  %v8254_v16 = vld [vmem:[#allocation4 + $0x7b4] sm:$0xf]  ;;  %v6277_v28 = vor.u32 %v8206_v13, %v6274_v14  ;;  %v7330_v13 = vld [vmem:[#allocation4 + $0xe88] sm:$0xf0] }
  0xbe   : > { %4074 = vmatpush.bf16.msra.mxu2 %v6781_v17  ;;  %v6877_v17 = vor.u32 %v8356_v6, %v6874_v7  ;;  %v6469_v31 = vor.u32 %v8254_v16, %v6466_v19  ;;  %v7549_v6 = vor.u32 %v8524_v0, %v7546_v1  ;;  %v8422_v7 = vld [vmem:[#allocation4 + $0xcf4] sm:$0xf]  ;;  %v7522_v16 = vld [vmem:[#allocation4 + $0x1008] sm:$0xf0]  ;;  %v8500_v0 = vld [vmem:[#allocation4 + $0xf64] sm:$0xf] }
  0xbf   : > { %4087 = vmatpush.bf16.msra.mxu3 %v6973_v24  ;;  %v8350_v24 = vld [vmem:[#allocation4 + $0xab4] sm:$0xf]  ;;  %v7714_v19 = vld [vmem:[#allocation4 + $0x1188] sm:$0xf0]  ;;  %v7450_v1 = vld [vmem:[#allocation4 + $0xf78] sm:$0xf0] }
  0xc0   : > { %4049 = vmatpush.bf16.msra.mxu0 %v6373_v32  ;;  %v6661_v32 = vor.u32 %v8302_v20, %v6658_v21  ;;  %v6853_v39 = vor.u32 %v8350_v24, %v6850_v26  ;;  %v8518_v14 = vld [vmem:[#allocation4 + $0xff4] sm:$0xf]  ;;  %v8416_v21 = vld [vmem:[#allocation4 + $0xcc4] sm:$0xf] }
  0xc1   : > { %4062 = vmatpush.bf16.msra.mxu1 %v6565_v33  ;;  %v8248_v33 = vld [vmem:[#allocation4 + $0x784] sm:$0xf]  ;;  %v7525_v26 = vor.u32 %v8518_v14, %v7522_v16  ;;  %v7234_v16 = vld [vmem:[#allocation4 + $0xdc8] sm:$0xf0] }
  0xc2   : > { %4075 = vmatpush.bf16.msra.mxu2 %v6757_v35  ;;  %v6442_v35 = vld [vmem:[#allocation4 + $0x798] sm:$0xf0] }
  0xc3   : > { %4088 = vmatpush.bf16.msra.mxu3 %v6949_v42  ;;  %v8344_v42 = vld [vmem:[#allocation4 + $0xa84] sm:$0xf]  ;;  %v6445_v51 = vor.u32 %v8248_v33, %v6442_v35  ;;  %v7498_v33 = vld [vmem:[#allocation4 + $0xfd8] sm:$0xf0] }
  0xc4   : > { %4050 = vmatpush.bf16.msra.mxu0 %v6349_v48  ;;  %v7378_v48 = vld [vmem:[#allocation4 + $0xee8] sm:$0xf0]  ;;  %v6829_v55 = vor.u32 %v8344_v42, %v6826_v43  ;;  %v9137_v35 = vld [vmem:[#allocation6] sm:$0x3f]  ;;  %v8410_v42 = vld [vmem:[#allocation4 + $0xc94] sm:$0xf]  ;;  %v7309_v43 = vor.u32 %v8464_v29, %v7306_v30 }
  0xc5   : > { %4063 = vmatpush.bf16.msra.mxu1 %v6541_v49  ;;  %v8530_v49 = vld [vmem:[#allocation4 + $0x1054] sm:$0xf]  ;;  %v7381_v57 = vor.u32 %v8482_v46, %v7378_v48  ;;  %v8392_v30 = vld [vmem:[#allocation4 + $0xc04] sm:$0xf] }
  0xc6   : > { %4076 = vmatpush.bf16.msra.mxu2 %v6733_v50  ;;  %v7570_v50 = vld [vmem:[#allocation4 + $0x1068] sm:$0xf0]  ;;  %v8458_v46 = vld [vmem:[#allocation4 + $0xe14] sm:$0xf] }
  0xc7   : > { %4089 = vmatpush.bf16.msra.mxu3 %v6925_v54  ;;  %v7762_v54 = vld [vmem:[#allocation4 + $0x11e8] sm:$0xf0]  ;;  %v7573_v58 = vor.u32 %v8530_v49, %v7570_v50  ;;  %v8506_v50 = vld [vmem:[#allocation4 + $0xf94] sm:$0xf] }
  0xc8   : > { %4051 = vmatpush.bf16.msra.mxu0 %v6325_v60  ;;  %v7162_v60 = vld [vmem:[#allocation4 + $0xd38] sm:$0xf0]  ;;  %v7282_v49 = vld [vmem:[#allocation4 + $0xe28] sm:$0xf0] }
  0xc9   : > { %4064 = vmatpush.bf16.msra.mxu1 %v6517_v61  ;;  %v8476_v61 = vld [vmem:[#allocation4 + $0xea4] sm:$0xf]  ;;  %v7165_v4 = vor.u32 %v8428_v59, %v7162_v60  ;;  %v7066_v59 = vld [vmem:[#allocation4 + $0xc78] sm:$0xf0] }
  0xca   : > { %4077 = vmatpush.bf16.msra.mxu2 %v6709_v62  ;;  %v7765_v62 = vor.u32 %v8578_v53, %v7762_v54  ;;  %v7357_v5 = vor.u32 %v8476_v61, %v7354_v63  ;;  %v7666_v53 = vld [vmem:[#allocation4 + $0x1128] sm:$0xf0]  ;;  %v7093_v54 = vor.u32 %v8410_v42, %v7090_v45  ;;  %v8452_v60 = vld [vmem:[#allocation4 + $0xde4] sm:$0xf]  ;;  %v7258_v63 = vld [vmem:[#allocation4 + $0xdf8] sm:$0xf0] }
  0xcb   : > { %4090 = vmatpush.bf16.msra.mxu3 %v6901_v2  ;;  %v8572_v2 = vld [vmem:[#allocation4 + $0x11a4] sm:$0xf]  ;;  %v7402_v45 = vld [vmem:[#allocation4 + $0xf18] sm:$0xf0] }
  0xcc   : > { %4052 = vmatpush.bf16.msra.mxu0 %v6301_v10  ;;  %v7138_v10 = vld [vmem:[#allocation4 + $0xd08] sm:$0xf0]  ;;  %v8488_v42 = vld [vmem:[#allocation4 + $0xf04] sm:$0xf] }
  0xcd   : > { %4065 = vmatpush.bf16.msra.mxu1 %v6493_v11  ;;  %v8470_v11 = vld [vmem:[#allocation4 + $0xe74] sm:$0xf]  ;;  %v7141_v20 = vor.u32 %v8422_v7, %v7138_v10  ;;  %v7453_v7 = vor.u32 %v8500_v0, %v7450_v1  ;;  %v5632_v1 = vld [vmem:[#allocation4 + $0x128] sm:$0xf] }
  0xce   : > { %4078 = vmatpush.bf16.msra.mxu2 %v6685_v12  ;;  %v7741_v12 = vor.u32 %v8572_v2, %v7738_v3  ;;  %v7333_v24 = vor.u32 %v8470_v11, %v7330_v13  ;;  %v8548_v2 = vld [vmem:[#allocation4 + $0x10e4] sm:$0xf]  ;;  %v7642_v3 = vld [vmem:[#allocation4 + $0x10f8] sm:$0xf0]  ;;  %v8398_v10 = vld [vmem:[#allocation4 + $0xc34] sm:$0xf] }
  0xcf   : > { %4091 = vmatpush.bf16.msra.mxu3 %v6877_v17  ;;  %v8566_v17 = vld [vmem:[#allocation4 + $0x1174] sm:$0xf]  ;;  %v7042_v11 = vld [vmem:[#allocation4 + $0xc48] sm:$0xf0]  ;;  %v7645_v14 = vor.u32 %v8548_v2, %v7642_v3  ;;  %v8048_v2 = vld [vmem:[#allocation4 + $0x13c] sm:$0xf0] }
  0xd0   : > { %4053 = vmatpush.bf16.msra.mxu0 %v6277_v28  ;;  %v7114_v28 = vld [vmem:[#allocation4 + $0xcd8] sm:$0xf0]  ;;  %v7045_v29 = vor.u32 %v8398_v10, %v7042_v11  ;;  %v5824_v3 = vld [vmem:[#allocation4 + $0x2a8] sm:$0xf]  ;;  %v8144_v10 = vld [vmem:[#allocation4 + $0x43c] sm:$0xf0] }
  0xd1   : > { %4066 = vmatpush.bf16.msra.mxu1 %v6469_v31  ;;  %v7717_v31 = vor.u32 %v8566_v17, %v7714_v19  ;;  %v7117_v41 = vor.u32 %v8416_v21, %v7114_v28  ;;  %v8494_v17 = vld [vmem:[#allocation4 + $0xf34] sm:$0xf]  ;;  %v7426_v19 = vld [vmem:[#allocation4 + $0xf48] sm:$0xf0]  ;;  %v6208_v11 = vld [vmem:[#allocation4 + $0x5a8] sm:$0xf] }
  0xd2   : > { %4079 = vmatpush.bf16.msra.mxu2 %v6661_v32  ;;  %v8512_v32 = vld [vmem:[#allocation4 + $0xfc4] sm:$0xf]  ;;  %v8542_v21 = vld [vmem:[#allocation4 + $0x10b4] sm:$0xf] }
  0xd3   : > { %4092 = vmatpush.bf16.msra.mxu3 %v6853_v39  ;;  %v7690_v39 = vld [vmem:[#allocation4 + $0x1158] sm:$0xf0]  ;;  %v7501_v44 = vor.u32 %v8512_v32, %v7498_v33 }
  0xd4   : > { %4054 = vmatpush.bf16.msra.mxu0 %v6253_v47  ;;  %v947_v47 = vperm.slane %v9137_v35, 0  ;;  %v7693_v48 = vor.u32 %v8560_v36, %v7690_v39  ;;  %v7429_v36 = vor.u32 %v8494_v17, %v7426_v19  ;;  %v8440_v39 = vld [vmem:[#allocation4 + $0xd84] sm:$0xf]  ;;  %v5608_v17 = vld [vmem:[#allocation4 + $0xf8] sm:$0xf] }
  0xd5   : > { %4067 = vmatpush.bf16.msra.mxu1 %v6445_v51  ;;  %v7474_v51 = vld [vmem:[#allocation4 + $0xfa8] sm:$0xf0]  ;;  %v8042_v19 = vld [vmem:[#allocation4 + $0x10c] sm:$0xf0] }
  0xd6   : > { %4080 = vmatpush.bf16.msra.mxu2 %v6637_v52  ;;  %v8554_v52 = vld [vmem:[#allocation4 + $0x1114] sm:$0xf] }
  0xd7   : > { %4093 = vmatpush.bf16.msra.mxu3 %v6829_v55  ;;  %4055 = vmatmul.bf16.vlgmr.msra.gmra.mxu0 %v9103_v37  ;;  %v3848_v55 = vpop.f32.mrf.mxu0 }
  0xd8   : > { %4099 = vmatpush.bf16.msrb.mxu0 %v7189_v56  ;;  %4068 = vmatmul.bf16.vlgmr.msra.gmra.mxu1 %v9107_v40  ;;  %v7285_v56 = vor.u32 %v8458_v46, %v7282_v49  ;;  %v3849_v61 = vadd.f32 %v3848_v55, %v947_v47  ;;  %v8536_v46 = vld [vmem:[#allocation4 + $0x1084] sm:$0xf]  ;;  %v7594_v47 = vld [vmem:[#allocation4 + $0x1098] sm:$0xf0]  ;;  %v8054_v49 = vld [vmem:[#allocation4 + $0x16c] sm:$0xf0] }
  0xd9   : > { %4112 = vmatpush.bf16.msrb.mxu1 %v7381_v57  ;;  %4081 = vmatmul.bf16.vlgmr.msra.gmra.mxu2 %v9101_v34  ;;  %v7477_v57 = vor.u32 %v8506_v50, %v7474_v51  ;;  %v5848_v50 = vld [vmem:[#allocation4 + $0x2d8] sm:$0xf] }
  0xda   : > { %4125 = vmatpush.bf16.msrb.mxu2 %v7573_v58  ;;  %4094 = vmatmul.bf16.vlgmr.msra.gmra.mxu3 %v9105_v38  ;;  %v8404_v58 = vld [vmem:[#allocation4 + $0xc64] sm:$0xf] }
  0xdb   : > { %4138 = vmatpush.bf16.msrb.mxu3 %v7765_v62  ;;  %v7669_v62 = vor.u32 %v8554_v52, %v7666_v53  ;;  %v8102_v52 = vld [vmem:[#allocation4 + $0x2ec] sm:$0xf0]  ;;  %v6040_v53 = vld [vmem:[#allocation4 + $0x458] sm:$0xf] }
  0xdc   : > { %4100 = vmatpush.bf16.msrb.mxu0 %v7165_v4  ;;  %v7069_v4 = vor.u32 %v8404_v58, %v7066_v59  ;;  %v6232_v58 = vld [vmem:[#allocation4 + $0x5d8] sm:$0xf]  ;;  %v8198_v59 = vld [vmem:[#allocation4 + $0x5ec] sm:$0xf0] }
  0xdd   : > { %4113 = vmatpush.bf16.msrb.mxu1 %v7357_v5  ;;  %v3861_v5 = vpop.f32.mrf.mxu1  ;;  %v3887_v28 = vpop.f32.mrf.mxu3 }
  0xde   : > { %4126 = vmatpush.bf16.msrb.mxu2 %v7549_v6  ;;  %v7261_v6 = vor.u32 %v8452_v60, %v7258_v63  ;;  %v3862_v13 = vadd.f32 %v3861_v5, %v3849_v61  ;;  %v7597_v60 = vor.u32 %v8536_v46, %v7594_v47  ;;  %v5849_v63 = vor.u32 %v8102_v52, %v5848_v50  ;;  %v8132_v46 = vld [vmem:[#allocation4 + $0x3dc] sm:$0xf0]  ;;  %v6160_v47 = vld [vmem:[#allocation4 + $0x548] sm:$0xf] }
  0xdf   : > { %4139 = vmatpush.bf16.msrb.mxu3 %v7741_v12  ;;  %v8446_v12 = vld [vmem:[#allocation4 + $0xdb4] sm:$0xf]  ;;  %v3850_v32 = vpop.f32.mrf.mxu0  ;;  %v6233_v5 = vor.u32 %v8198_v59, %v6232_v58  ;;  %v8078_v59 = vld [vmem:[#allocation4 + $0x22c] sm:$0xf0] }
  0xe0   : > { %4101 = vmatpush.bf16.msrb.mxu0 %v7141_v20  ;;  %v3874_v20 = vpop.f32.mrf.mxu2  ;;  %v7237_v33 = vor.u32 %v8446_v12, %v7234_v16  ;;  %v8192_v12 = vld [vmem:[#allocation4 + $0x5bc] sm:$0xf0] }
  0xe1   : > { %4114 = vmatpush.bf16.msrb.mxu1 %v7333_v24  ;;  %v7618_v24 = vld [vmem:[#allocation4 + $0x10c8] sm:$0xf0] }
  0xe2   : > { %4127 = vmatpush.bf16.msrb.mxu2 %v7525_v26  ;;  %v3875_v26 = vadd.f32 %v3874_v20, %v3862_v13  ;;  %v5633_v13 = vor.u32 %v8048_v2, %v5632_v1  ;;  %v5800_v20 = vld [vmem:[#allocation4 + $0x278] sm:$0xf] }
  0xe3   : > { %4140 = vmatpush.bf16.msrb.mxu3 %v7717_v31  ;;  %v7018_v31 = vld [vmem:[#allocation4 + $0xc18] sm:$0xf0] }
  0xe4   : > { %4102 = vmatpush.bf16.msrb.mxu0 %v7117_v41  ;;  %v7210_v41 = vld [vmem:[#allocation4 + $0xd98] sm:$0xf0]  ;;  %v7021_v51 = vor.u32 %v8392_v30, %v7018_v31  ;;  %v8186_v30 = vld [vmem:[#allocation4 + $0x58c] sm:$0xf0]  ;;  %v5609_v31 = vor.u32 %v8042_v19, %v5608_v17  ;;  %v8168_v17 = vld [vmem:[#allocation4 + $0x4fc] sm:$0xf0] }
  0xe5   : > { %4115 = vmatpush.bf16.msrb.mxu1 %v7309_v43  ;;  %v9140_v43 = vadd.f32 %v3887_v28, %v3875_v26  ;;  %v3863_v55 = vpop.f32.mrf.mxu1  ;;  %v5992_v26 = vld [vmem:[#allocation4 + $0x3f8] sm:$0xf]  ;;  %v8138_v28 = vld [vmem:[#allocation4 + $0x40c] sm:$0xf0] }
  0xe6   : > { %4128 = vmatpush.bf16.msrb.mxu2 %v7501_v44  ;;  %v7621_v44 = vor.u32 %v8542_v21, %v7618_v24  ;;  %v6209_v21 = vor.u32 %v8192_v12, %v6208_v11  ;;  %v8090_v24 = vld [vmem:[#allocation4 + $0x28c] sm:$0xf0]  ;;  %v5752_v55 = vld [vmem:[#allocation4 + $0x218] sm:$0xf]  ;;  %v5920_v11 = vld [vmem:[#allocation4 + $0x368] sm:$0xf] }
  0xe7   : > { %4141 = vmatpush.bf16.msrb.mxu3 %v7693_v48  ;;  %v5656_v48 = vld [vmem:[#allocation4 + $0x158] sm:$0xf]  ;;  %v5801_v32 = vor.u32 %v8090_v24, %v5800_v20  ;;  %v5753_v2 = vor.u32 %v8078_v59, %v5752_v55  ;;  %v8120_v12 = vld [vmem:[#allocation4 + $0x37c] sm:$0xf0]  ;;  %v6064_v55 = vld [vmem:[#allocation4 + $0x488] sm:$0xf] }
  0xe8   : > { %4103 = vmatpush.bf16.msrb.mxu0 %v7093_v54  ;;  %v8150_v54 = vld [vmem:[#allocation4 + $0x46c] sm:$0xf0]  ;;  %v5657_v61 = vor.u32 %v8054_v49, %v5656_v48  ;;  %v8180_v48 = vld [vmem:[#allocation4 + $0x55c] sm:$0xf0] }
  0xe9   : > { %4116 = vmatpush.bf16.msrb.mxu1 %v7285_v56  ;;  %v7213_v56 = vor.u32 %v8440_v39, %v7210_v41  ;;  %v6041_v0 = vor.u32 %v8150_v54, %v6040_v53  ;;  %v8036_v39 = vld [vmem:[#allocation4 + $0xdc] sm:$0xf0]  ;;  %v5776_v41 = vld [vmem:[#allocation4 + $0x248] sm:$0xf]  ;;  %v5560_v53 = vld [vmem:[#allocation4 + $0x98] sm:$0xf]  ;;  %v6161_v58 = vor.u32 %v8180_v48, %v6160_v47 }
  0xea   : > { %4129 = vmatpush.bf16.msrb.mxu2 %v7477_v57  ;;  %v7405_v57 = vor.u32 %v8488_v42, %v7402_v45  ;;  %v5968_v45 = vld [vmem:[#allocation4 + $0x3c8] sm:$0xf]  ;;  %v8030_v54 = vld [vmem:[#allocation4 + $0xac] sm:$0xf0] }
  0xeb   : > { %4142 = vmatpush.bf16.msrb.mxu3 %v7669_v62  ;;  %v3876_v62 = vpop.f32.mrf.mxu2  ;;  %v5969_v52 = vor.u32 %v8132_v46, %v5968_v45  ;;  %v5561_v1 = vor.u32 %v8030_v54, %v5560_v53  ;;  %v5488_v45 = vld [vmem:[#allocation4 + $0x8] sm:$0xf]  ;;  %v8012_v46 = vld [vmem:[#allocation4 + $0x1c] sm:$0xf0]  ;;  %v8246_v59 = vld [vmem:[#allocation4 + $0x76c] sm:$0xf0] }
  0xec   : > { %4104 = vmatpush.bf16.msrb.mxu0 %v7069_v4  ;;  %v3889_v4 = vpop.f32.mrf.mxu3  ;;  %v6136_v62 = vld [vmem:[#allocation4 + $0x518] sm:$0xf]  ;;  %v8108_v54 = vld [vmem:[#allocation4 + $0x31c] sm:$0xf0] }
  0xed   : > { %4117 = vmatpush.bf16.msrb.mxu1 %v7261_v6  ;;  %v8096_v6 = vld [vmem:[#allocation4 + $0x2bc] sm:$0xf0]  ;;  %v5536_v4 = vld [vmem:[#allocation4 + $0x68] sm:$0xf] }
  0xee   : > { %4130 = vmatpush.bf16.msrb.mxu2 %v7453_v7  ;;  %v6016_v7 = vld [vmem:[#allocation4 + $0x428] sm:$0xf] }
  0xef   : > { %4143 = vmatpush.bf16.msrb.mxu3 %v7645_v14  ;;  %v5825_v14 = vor.u32 %v8096_v6, %v5824_v3  ;;  %v6017_v16 = vor.u32 %v8144_v10, %v6016_v7  ;;  %v5728_v6 = vld [vmem:[#allocation4 + $0x1e8] sm:$0xf]  ;;  %v8072_v10 = vld [vmem:[#allocation4 + $0x1fc] sm:$0xf0] }
  0xf0   : > { %4105 = vmatpush.bf16.msrb.mxu0 %v7045_v29  ;;  %v6184_v29 = vld [vmem:[#allocation4 + $0x578] sm:$0xf]  ;;  %v5729_v24 = vor.u32 %v8072_v10, %v5728_v6  ;;  %v6400_v10 = vld [vmem:[#allocation4 + $0x728] sm:$0xf] }
  0xf1   : > { %4118 = vmatpush.bf16.msrb.mxu1 %v7237_v33  ;;  %v5993_v33 = vor.u32 %v8138_v28, %v5992_v26  ;;  %v6185_v42 = vor.u32 %v8186_v30, %v6184_v29  ;;  %v5921_v26 = vor.u32 %v8120_v12, %v5920_v11  ;;  %v5512_v28 = vld [vmem:[#allocation4 + $0x38] sm:$0xf]  ;;  %v8018_v29 = vld [vmem:[#allocation4 + $0x4c] sm:$0xf0]  ;;  %v8240_v11 = vld [vmem:[#allocation4 + $0x73c] sm:$0xf0] }
  0xf2   : > { %4131 = vmatpush.bf16.msrb.mxu2 %v7429_v36  ;;  %v5584_v36 = vld [vmem:[#allocation4 + $0xc8] sm:$0xf]  ;;  %v5704_v30 = vld [vmem:[#allocation4 + $0x1b8] sm:$0xf] }
  0xf3   : > { %4144 = vmatpush.bf16.msrb.mxu3 %v7621_v44  ;;  %v8084_v44 = vld [vmem:[#allocation4 + $0x25c] sm:$0xf0]  ;;  %v5585_v49 = vor.u32 %v8036_v39, %v5584_v36  ;;  %v5896_v36 = vld [vmem:[#allocation4 + $0x338] sm:$0xf]  ;;  %v8114_v39 = vld [vmem:[#allocation4 + $0x34c] sm:$0xf0] }
  0xf4   : > { %4106 = vmatpush.bf16.msrb.mxu0 %v7021_v51  ;;  %v3900_v50 = vpop.f32.mrf.mxu0  ;;  %v5777_v51 = vor.u32 %v8084_v44, %v5776_v41  ;;  %v6088_v41 = vld [vmem:[#allocation4 + $0x4b8] sm:$0xf]  ;;  %v5513_v44 = vor.u32 %v8018_v29, %v5512_v28  ;;  %v5897_v48 = vor.u32 %v8114_v39, %v5896_v36  ;;  %v6592_v12 = vld [vmem:[#allocation4 + $0x8a8] sm:$0xf]  ;;  %v8330_v39 = vld [vmem:[#allocation4 + $0xa0c] sm:$0xf0] }
  0xf5   : > { %4119 = vmatpush.bf16.msrb.mxu1 %v7213_v56  ;;  %v3901_v56 = vadd.f32 %v3900_v50, %v9140_v43  ;;  %v8060_v50 = vld [vmem:[#allocation4 + $0x19c] sm:$0xf0]  ;;  %v6376_v29 = vld [vmem:[#allocation4 + $0x6f8] sm:$0xf] }
  0xf6   : > { %4132 = vmatpush.bf16.msrb.mxu2 %v7405_v57  ;;  %v3913_v57 = vpop.f32.mrf.mxu1  ;;  %v6760_v36 = vld [vmem:[#allocation4 + $0x9f8] sm:$0xf] }
  0xf7   : > { %4145 = vmatpush.bf16.msrb.mxu3 %v7597_v60  ;;  %4107 = vmatmul.bf16.vlgmr.msrb.gmra.mxu0 %v9117_v18  ;;  %v5944_v60 = vld [vmem:[#allocation4 + $0x398] sm:$0xf] }
  0xf8   : > { %4151 = vmatpush.bf16.msra.mxu0 %v5657_v61  ;;  %4120 = vmatmul.bf16.vlgmr.msrb.gmra.mxu1 %v9121_v23  ;;  %v8126_v61 = vld [vmem:[#allocation4 + $0x3ac] sm:$0xf0] }
  0xf9   : > { %4164 = vmatpush.bf16.msra.mxu1 %v5849_v63  ;;  %4133 = vmatmul.bf16.vlgmr.msrb.gmra.mxu2 %v9119_v22  ;;  %v8174_v63 = vld [vmem:[#allocation4 + $0x52c] sm:$0xf0]  ;;  %v5945_v3 = vor.u32 %v8126_v61, %v5944_v60  ;;  %v6616_v60 = vld [vmem:[#allocation4 + $0x8d8] sm:$0xf]  ;;  %v5489_v61 = vor.u32 %v8012_v46, %v5488_v45  ;;  %v6761_v46 = vor.u32 %v8330_v39, %v6760_v36 }
  0xfa   : > { %4177 = vmatpush.bf16.msra.mxu2 %v6041_v0  ;;  %4146 = vmatmul.bf16.vlgmr.msrb.gmra.mxu3 %v9123_v27  ;;  %v3914_v0 = vadd.f32 %v3913_v57, %v3901_v56  ;;  %v6137_v43 = vor.u32 %v8174_v63, %v6136_v62  ;;  %v8156_v56 = vld [vmem:[#allocation4 + $0x49c] sm:$0xf0]  ;;  %v8294_v62 = vld [vmem:[#allocation4 + $0x8ec] sm:$0xf0]  ;;  %v6808_v63 = vld [vmem:[#allocation4 + $0xa58] sm:$0xf] }
  0xfb   : > { %4190 = vmatpush.bf16.msra.mxu3 %v6233_v5  ;;  %v8024_v5 = vld [vmem:[#allocation4 + $0x7c] sm:$0xf0] }
  0xfc   : > { %4152 = vmatpush.bf16.msra.mxu0 %v5633_v13  ;;  %v3926_v7 = vpop.f32.mrf.mxu2  ;;  %v5537_v19 = vor.u32 %v8024_v5, %v5536_v4  ;;  %v8390_v4 = vld [vmem:[#allocation4 + $0xbec] sm:$0xf0]  ;;  %v6065_v5 = vor.u32 %v8156_v56, %v6064_v55  ;;  %v6928_v55 = vld [vmem:[#allocation4 + $0xb48] sm:$0xf]  ;;  %v8372_v56 = vld [vmem:[#allocation4 + $0xb5c] sm:$0xf0] }
  0xfd   : > { %4165 = vmatpush.bf16.msra.mxu1 %v5825_v14  ;;  %v3927_v13 = vadd.f32 %v3926_v7, %v3914_v0  ;;  %v3939_v14 = vpop.f32.mrf.mxu3  ;;  %v8342_v0 = vld [vmem:[#allocation4 + $0xa6c] sm:$0xf0]  ;;  %v6617_v7 = vor.u32 %v8294_v62, %v6616_v60  ;;  %v6328_v62 = vld [vmem:[#allocation4 + $0x698] sm:$0xf] }
  0xfe   : > { %4178 = vmatpush.bf16.msra.mxu2 %v6017_v16  ;;  %v6112_v16 = vld [vmem:[#allocation4 + $0x4e8] sm:$0xf] }
  0xff   : > { %4191 = vmatpush.bf16.msra.mxu3 %v6209_v21  ;;  %v9147_v20 = vadd.f32 %v3939_v14, %v3927_v13  ;;  %v3902_v21 = vpop.f32.mrf.mxu0  ;;  %v8288_v14 = vld [vmem:[#allocation4 + $0x8bc] sm:$0xf0] }
 0x100   : > { %4153 = vmatpush.bf16.msra.mxu0 %v5609_v31  ;;  %v3915_v31 = vpop.f32.mrf.mxu1  ;;  %v8384_v21 = vld [vmem:[#allocation4 + $0xbbc] sm:$0xf0] }
 0x101   : > { %4166 = vmatpush.bf16.msra.mxu1 %v5801_v32  ;;  %v6113_v32 = vor.u32 %v8168_v17, %v6112_v16  ;;  %v6784_v16 = vld [vmem:[#allocation4 + $0xa28] sm:$0xf]  ;;  %v8336_v17 = vld [vmem:[#allocation4 + $0xa3c] sm:$0xf0]  ;;  %v6568_v31 = vld [vmem:[#allocation4 + $0x878] sm:$0xf] }
 0x102   : > { %4179 = vmatpush.bf16.msra.mxu2 %v5993_v33  ;;  %v8066_v33 = vld [vmem:[#allocation4 + $0x1cc] sm:$0xf0]  ;;  %v6785_v28 = vor.u32 %v8336_v17, %v6784_v16  ;;  %v8264_v17 = vld [vmem:[#allocation4 + $0x7fc] sm:$0xf0] }
 0x103   : > { %4192 = vmatpush.bf16.msra.mxu3 %v6185_v42  ;;  %v8162_v42 = vld [vmem:[#allocation4 + $0x4cc] sm:$0xf0]  ;;  %v5705_v47 = vor.u32 %v8066_v33, %v5704_v30 }
 0x104   : > { %4154 = vmatpush.bf16.msra.mxu0 %v5585_v49  ;;  %v5680_v49 = vld [vmem:[#allocation4 + $0x188] sm:$0xf]  ;;  %v6089_v53 = vor.u32 %v8162_v42, %v6088_v41  ;;  %v8234_v30 = vld [vmem:[#allocation4 + $0x70c] sm:$0xf0]  ;;  %v6952_v41 = vld [vmem:[#allocation4 + $0xb78] sm:$0xf] }
 0x105   : > { %4167 = vmatpush.bf16.msra.mxu1 %v5777_v51  ;;  %v5872_v51 = vld [vmem:[#allocation4 + $0x308] sm:$0xf]  ;;  %v3941_v57 = vpop.f32.mrf.mxu3  ;;  %v8282_v33 = vld [vmem:[#allocation4 + $0x88c] sm:$0xf0] }
 0x106   : > { %4180 = vmatpush.bf16.msra.mxu2 %v5969_v52  ;;  %v3928_v52 = vpop.f32.mrf.mxu2  ;;  %v8378_v42 = vld [vmem:[#allocation4 + $0xb8c] sm:$0xf0]  ;;  %v6569_v45 = vor.u32 %v8282_v33, %v6568_v31 }
 0x107   : > { %4193 = vmatpush.bf16.msra.mxu3 %v6161_v58  ;;  %v6424_v58 = vld [vmem:[#allocation4 + $0x758] sm:$0xf]  ;;  %v6736_v52 = vld [vmem:[#allocation4 + $0x9c8] sm:$0xf] }
 0x108   : > { %4155 = vmatpush.bf16.msra.mxu0 %v5561_v1  ;;  %v5681_v1 = vor.u32 %v8060_v50, %v5680_v49  ;;  %v6425_v6 = vor.u32 %v8246_v59, %v6424_v58  ;;  %v6544_v49 = vld [vmem:[#allocation4 + $0x848] sm:$0xf]  ;;  %v6953_v50 = vor.u32 %v8378_v42, %v6952_v41  ;;  %v6280_v41 = vld [vmem:[#allocation4 + $0x638] sm:$0xf]  ;;  %v8210_v42 = vld [vmem:[#allocation4 + $0x64c] sm:$0xf0] }
 0x109   : > { %4168 = vmatpush.bf16.msra.mxu1 %v5753_v2  ;;  %v5873_v2 = vor.u32 %v8108_v54, %v5872_v51  ;;  %v8276_v51 = vld [vmem:[#allocation4 + $0x85c] sm:$0xf0] }
 0x10a   : > { %4181 = vmatpush.bf16.msra.mxu2 %v5945_v3  ;;  %v7000_v3 = vld [vmem:[#allocation4 + $0xbd8] sm:$0xf]  ;;  %v6545_v60 = vor.u32 %v8276_v51, %v6544_v49  ;;  %v6281_v51 = vor.u32 %v8210_v42, %v6280_v41  ;;  %v8426_v42 = vld [vmem:[#allocation4 + $0xd0c] sm:$0xf0] }
 0x10b   : > { %4194 = vmatpush.bf16.msra.mxu3 %v6137_v43  ;;  %v6809_v43 = vor.u32 %v8342_v0, %v6808_v63  ;;  %v7001_v13 = vor.u32 %v8390_v4, %v7000_v3  ;;  %v8222_v63 = vld [vmem:[#allocation4 + $0x6ac] sm:$0xf0]  ;;  %v6520_v0 = vld [vmem:[#allocation4 + $0x818] sm:$0xf] }
 0x10c   : > { %4156 = vmatpush.bf16.msra.mxu0 %v5537_v19  ;;  %v6976_v19 = vld [vmem:[#allocation4 + $0xba8] sm:$0xf]  ;;  %v8270_v3 = vld [vmem:[#allocation4 + $0x82c] sm:$0xf0]  ;;  %v6712_v4 = vld [vmem:[#allocation4 + $0x998] sm:$0xf] }
 0x10d   : > { %4169 = vmatpush.bf16.msra.mxu1 %v5729_v24  ;;  %v6401_v24 = vor.u32 %v8240_v11, %v6400_v10  ;;  %v6304_v11 = vld [vmem:[#allocation4 + $0x668] sm:$0xf]  ;;  %v6856_v49 = vld [vmem:[#allocation4 + $0xab8] sm:$0xf] }
 0x10e   : > { %4182 = vmatpush.bf16.msra.mxu2 %v5921_v26  ;;  %v6593_v26 = vor.u32 %v8288_v14, %v6592_v12  ;;  %v8216_v12 = vld [vmem:[#allocation4 + $0x67c] sm:$0xf0]  ;;  %v7144_v41 = vld [vmem:[#allocation4 + $0xcf8] sm:$0xf] }
 0x10f   : > { %4195 = vmatpush.bf16.msra.mxu3 %v6113_v32  ;;  %v6977_v32 = vor.u32 %v8384_v21, %v6976_v19  ;;  %v6688_v19 = vld [vmem:[#allocation4 + $0x968] sm:$0xf]  ;;  %v8312_v21 = vld [vmem:[#allocation4 + $0x97c] sm:$0xf0]  ;;  %v6305_v31 = vor.u32 %v8216_v12, %v6304_v11  ;;  %v8582_v11 = vld [vmem:[#allocation4 + $0x11ec] sm:$0xf0] }
 0x110   : > { %4157 = vmatpush.bf16.msra.mxu0 %v5513_v44  ;;  %v6377_v44 = vor.u32 %v8234_v30, %v6376_v29  ;;  %v8360_v29 = vld [vmem:[#allocation4 + $0xafc] sm:$0xf0]  ;;  %v6689_v39 = vor.u32 %v8312_v21, %v6688_v19  ;;  %v7360_v21 = vld [vmem:[#allocation4 + $0xea8] sm:$0xf] }
 0x111   : > { %4170 = vmatpush.bf16.msra.mxu1 %v5705_v47  ;;  %v6352_v47 = vld [vmem:[#allocation4 + $0x6c8] sm:$0xf]  ;;  %v8432_v19 = vld [vmem:[#allocation4 + $0xd3c] sm:$0xf0] }
 0x112   : > { %4183 = vmatpush.bf16.msra.mxu2 %v5897_v48  ;;  %v8228_v48 = vld [vmem:[#allocation4 + $0x6dc] sm:$0xf0] }
 0x113   : > { %4196 = vmatpush.bf16.msra.mxu3 %v6089_v53  ;;  %v8324_v53 = vld [vmem:[#allocation4 + $0x9dc] sm:$0xf0]  ;;  %v6353_v58 = vor.u32 %v8228_v48, %v6352_v47  ;;  %v6664_v47 = vld [vmem:[#allocation4 + $0x938] sm:$0xf]  ;;  %v8306_v48 = vld [vmem:[#allocation4 + $0x94c] sm:$0xf0] }
 0x114   : > { %4158 = vmatpush.bf16.msra.mxu0 %v5489_v61  ;;  %v3952_v54 = vpop.f32.mrf.mxu0  ;;  %v6737_v61 = vor.u32 %v8324_v53, %v6736_v52  ;;  %v6256_v52 = vld [vmem:[#allocation4 + $0x608] sm:$0xf]  ;;  %v8204_v53 = vld [vmem:[#allocation4 + $0x61c] sm:$0xf0] }
 0x115   : > { %4171 = vmatpush.bf16.msra.mxu1 %v5681_v1  ;;  %v3953_v57 = vadd.f32 %v3952_v54, %v9147_v20  ;;  %v3965_v59 = vpop.f32.mrf.mxu1  ;;  %v6929_v1 = vor.u32 %v8372_v56, %v6928_v55  ;;  %v6521_v20 = vor.u32 %v8270_v3, %v6520_v0  ;;  %v6665_v55 = vor.u32 %v8306_v48, %v6664_v47  ;;  %v6448_v56 = vld [vmem:[#allocation4 + $0x788] sm:$0xf]  ;;  %v7192_v0 = vld [vmem:[#allocation4 + $0xd58] sm:$0xf]  ;;  %v8522_v48 = vld [vmem:[#allocation4 + $0x100c] sm:$0xf0] }
 0x116   : > { %4184 = vmatpush.bf16.msra.mxu2 %v5873_v2  ;;  %v7528_v47 = vld [vmem:[#allocation4 + $0xff8] sm:$0xf] }
 0x117   : > { %4197 = vmatpush.bf16.msra.mxu3 %v6065_v5  ;;  %4159 = vmatmul.bf16.vlgmr.msra.gmra.mxu0 %v9085_v9  ;;  %v3966_v2 = vadd.f32 %v3965_v59, %v3953_v57  ;;  %v8318_v5 = vld [vmem:[#allocation4 + $0x9ac] sm:$0xf0]  ;;  %v8252_v57 = vld [vmem:[#allocation4 + $0x79c] sm:$0xf0] }
 0x118   : > { %4203 = vmatpush.bf16.msrb.mxu0 %v6425_v6  ;;  %4172 = vmatmul.bf16.vlgmr.msra.gmra.mxu1 %v9094_v25  ;;  %v6904_v6 = vld [vmem:[#allocation4 + $0xb18] sm:$0xf]  ;;  %v6713_v10 = vor.u32 %v8318_v5, %v6712_v4  ;;  %v6257_v4 = vor.u32 %v8204_v53, %v6256_v52  ;;  %v8486_v5 = vld [vmem:[#allocation4 + $0xeec] sm:$0xf0]  ;;  %v7120_v52 = vld [vmem:[#allocation4 + $0xcc8] sm:$0xf] }
 0x119   : > { %4216 = vmatpush.bf16.msrb.mxu1 %v6617_v7  ;;  %4185 = vmatmul.bf16.vlgmr.msra.gmra.mxu2 %v9083_v8  ;;  %v8366_v7 = vld [vmem:[#allocation4 + $0xb2c] sm:$0xf0] }
 0x11a   : > { %4229 = vmatpush.bf16.msrb.mxu2 %v6809_v43  ;;  %4198 = vmatmul.bf16.vlgmr.msra.gmra.mxu3 %v9088_v15  ;;  %v6329_v43 = vor.u32 %v8222_v63, %v6328_v62  ;;  %v6905_v14 = vor.u32 %v8366_v7, %v6904_v6  ;;  %v8348_v62 = vld [vmem:[#allocation4 + $0xa9c] sm:$0xf0]  ;;  %v7576_v6 = vld [vmem:[#allocation4 + $0x1058] sm:$0xf]  ;;  %v8534_v7 = vld [vmem:[#allocation4 + $0x106c] sm:$0xf0] }
 0x11b   : > { %4242 = vmatpush.bf16.msrb.mxu3 %v7001_v13  ;;  %v6496_v13 = vld [vmem:[#allocation4 + $0x7e8] sm:$0xf] }
 0x11c   : > { %4204 = vmatpush.bf16.msrb.mxu0 %v6401_v24  ;;  %v3978_v16 = vpop.f32.mrf.mxu2  ;;  %v3954_v30 = vpop.f32.mrf.mxu0  ;;  %v6497_v36 = vor.u32 %v8264_v17, %v6496_v13  ;;  %v7168_v17 = vld [vmem:[#allocation4 + $0xd28] sm:$0xf] }
 0x11d   : > { %4217 = vmatpush.bf16.msrb.mxu1 %v6593_v26  ;;  %v3979_v24 = vadd.f32 %v3978_v16, %v3966_v2  ;;  %v3991_v26 = vpop.f32.mrf.mxu3  ;;  %v7384_v2 = vld [vmem:[#allocation4 + $0xed8] sm:$0xf]  ;;  %v7577_v16 = vor.u32 %v8534_v7, %v7576_v6  ;;  %v7744_v30 = vld [vmem:[#allocation4 + $0x11a8] sm:$0xf] }
 0x11e   : > { %4230 = vmatpush.bf16.msrb.mxu2 %v6785_v28  ;;  %v6880_v28 = vld [vmem:[#allocation4 + $0xae8] sm:$0xf]  ;;  %v7288_v6 = vld [vmem:[#allocation4 + $0xe18] sm:$0xf] }
 0x11f   : > { %4243 = vmatpush.bf16.msrb.mxu3 %v6977_v32  ;;  %v3967_v32 = vpop.f32.mrf.mxu1  ;;  %v9154_v33 = vadd.f32 %v3991_v26, %v3979_v24  ;;  %v8480_v26 = vld [vmem:[#allocation4 + $0xebc] sm:$0xf0] }
 0x120   : > { %4205 = vmatpush.bf16.msrb.mxu0 %v6377_v44  ;;  %v6472_v44 = vld [vmem:[#allocation4 + $0x7b8] sm:$0xf]  ;;  %v7169_v32 = vor.u32 %v8432_v19, %v7168_v17 }
 0x121   : > { %4218 = vmatpush.bf16.msrb.mxu1 %v6569_v45  ;;  %v6881_v45 = vor.u32 %v8360_v29, %v6880_v28  ;;  %v7552_v28 = vld [vmem:[#allocation4 + $0x1028] sm:$0xf]  ;;  %v8528_v29 = vld [vmem:[#allocation4 + $0x103c] sm:$0xf0] }
 0x122   : > { %4231 = vmatpush.bf16.msrb.mxu2 %v6761_v46  ;;  %v8258_v46 = vld [vmem:[#allocation4 + $0x7cc] sm:$0xf0] }
 0x123   : > { %4244 = vmatpush.bf16.msrb.mxu3 %v6953_v50  ;;  %v8354_v50 = vld [vmem:[#allocation4 + $0xacc] sm:$0xf0]  ;;  %v6473_v54 = vor.u32 %v8258_v46, %v6472_v44  ;;  %v7336_v44 = vld [vmem:[#allocation4 + $0xe78] sm:$0xf] }
 0x124   : > { %4206 = vmatpush.bf16.msrb.mxu0 %v6353_v58  ;;  %v6640_v58 = vld [vmem:[#allocation4 + $0x908] sm:$0xf]  ;;  %v6857_v59 = vor.u32 %v8354_v50, %v6856_v49  ;;  %v3980_v63 = vpop.f32.mrf.mxu2  ;;  %v8474_v46 = vld [vmem:[#allocation4 + $0xe8c] sm:$0xf0]  ;;  %v7720_v49 = vld [vmem:[#allocation4 + $0x1178] sm:$0xf] }
 0x125   : > { %4219 = vmatpush.bf16.msrb.mxu1 %v6545_v60  ;;  %v8300_v60 = vld [vmem:[#allocation4 + $0x91c] sm:$0xf0]  ;;  %v3993_v3 = vpop.f32.mrf.mxu3  ;;  %v8570_v50 = vld [vmem:[#allocation4 + $0x118c] sm:$0xf0]  ;;  %v7337_v53 = vor.u32 %v8474_v46, %v7336_v44 }
 0x126   : > { %4232 = vmatpush.bf16.msrb.mxu2 %v6737_v61  ;;  %v6832_v61 = vld [vmem:[#allocation4 + $0xa88] sm:$0xf]  ;;  %v8564_v63 = vld [vmem:[#allocation4 + $0x115c] sm:$0xf0] }
 0x127   : > { %4245 = vmatpush.bf16.msrb.mxu3 %v6929_v1  ;;  %v8438_v1 = vld [vmem:[#allocation4 + $0xd6c] sm:$0xf0]  ;;  %v6833_v12 = vor.u32 %v8348_v62, %v6832_v61  ;;  %v8516_v61 = vld [vmem:[#allocation4 + $0xfdc] sm:$0xf0]  ;;  %v7696_v62 = vld [vmem:[#allocation4 + $0x1148] sm:$0xf] }
 0x128   : > { %4207 = vmatpush.bf16.msrb.mxu0 %v6329_v43  ;;  %v6449_v43 = vor.u32 %v8252_v57, %v6448_v56  ;;  %v7193_v13 = vor.u32 %v8438_v1, %v7192_v0  ;;  %v7312_v56 = vld [vmem:[#allocation4 + $0xe48] sm:$0xf]  ;;  %v948_v57 = vperm.slane %v9137_v35, 1  ;;  %v7697_v35 = vor.u32 %v8564_v63, %v7696_v62 }
 0x129   : > { %4220 = vmatpush.bf16.msrb.mxu1 %v6521_v20  ;;  %v6641_v20 = vor.u32 %v8300_v60, %v6640_v58  ;;  %v7721_v58 = vor.u32 %v8570_v50, %v7720_v49  ;;  %v7504_v60 = vld [vmem:[#allocation4 + $0xfc8] sm:$0xf]  ;;  %v7048_v49 = vld [vmem:[#allocation4 + $0xc38] sm:$0xf]  ;;  %v8402_v50 = vld [vmem:[#allocation4 + $0xc4c] sm:$0xf0] }
 0x12a   : > { %4233 = vmatpush.bf16.msrb.mxu2 %v6713_v10  ;;  %v7768_v10 = vld [vmem:[#allocation4 + $0x11d8] sm:$0xf]  ;;  %v7505_v3 = vor.u32 %v8516_v61, %v7504_v60  ;;  %v7024_v60 = vld [vmem:[#allocation4 + $0xc08] sm:$0xf]  ;;  %v8396_v61 = vld [vmem:[#allocation4 + $0xc1c] sm:$0xf0] }
 0x12b   : > { %4246 = vmatpush.bf16.msrb.mxu3 %v6905_v14  ;;  %v7385_v14 = vor.u32 %v8486_v5, %v7384_v2  ;;  %v7769_v24 = vor.u32 %v8582_v11, %v7768_v10  ;;  %v8414_v5 = vld [vmem:[#allocation4 + $0xcac] sm:$0xf0]  ;;  %v7480_v10 = vld [vmem:[#allocation4 + $0xf98] sm:$0xf] }
 0x12c   : > { %4208 = vmatpush.bf16.msrb.mxu0 %v6305_v31  ;;  %v8576_v31 = vld [vmem:[#allocation4 + $0x11bc] sm:$0xf0]  ;;  %v8510_v11 = vld [vmem:[#allocation4 + $0xfac] sm:$0xf0] }
 0x12d   : > { %4221 = vmatpush.bf16.msrb.mxu1 %v6497_v36  ;;  %v7361_v36 = vor.u32 %v8480_v26, %v7360_v21  ;;  %v7481_v19 = vor.u32 %v8510_v11, %v7480_v10  ;;  %v7072_v21 = vld [vmem:[#allocation4 + $0xc68] sm:$0xf]  ;;  %v8099_v10 = vld [vmem:[#allocation4 + $0x2dc] sm:$0xf]  ;;  %v7025_v11 = vor.u32 %v8396_v61, %v7024_v60 }
 0x12e   : > { %4234 = vmatpush.bf16.msrb.mxu2 %v6689_v39  ;;  %v7553_v39 = vor.u32 %v8528_v29, %v7552_v28  ;;  %v7264_v26 = vld [vmem:[#allocation4 + $0xde8] sm:$0xf] }
 0x12f   : > { %4247 = vmatpush.bf16.msrb.mxu3 %v6881_v45  ;;  %v7745_v45 = vor.u32 %v8576_v31, %v7744_v30  ;;  %v8456_v30 = vld [vmem:[#allocation4 + $0xdfc] sm:$0xf0]  ;;  %v7456_v31 = vld [vmem:[#allocation4 + $0xf68] sm:$0xf] }
 0x130   : > { %4209 = vmatpush.bf16.msrb.mxu0 %v6281_v51  ;;  %v7145_v51 = vor.u32 %v8426_v42, %v7144_v41  ;;  %v7648_v41 = vld [vmem:[#allocation4 + $0x10e8] sm:$0xf]  ;;  %v8552_v42 = vld [vmem:[#allocation4 + $0x10fc] sm:$0xf0] }
 0x131   : > { %4222 = vmatpush.bf16.msrb.mxu1 %v6473_v54  ;;  %v7529_v54 = vor.u32 %v8522_v48, %v7528_v47  ;;  %v7265_v47 = vor.u32 %v8456_v30, %v7264_v26  ;;  %v8045_v30 = vld [vmem:[#allocation4 + $0x12c] sm:$0xf] }
 0x132   : > { %4235 = vmatpush.bf16.msrb.mxu2 %v6665_v55  ;;  %v8420_v55 = vld [vmem:[#allocation4 + $0xcdc] sm:$0xf0] }
 0x133   : > { %4248 = vmatpush.bf16.msrb.mxu3 %v6857_v59  ;;  %v8468_v59 = vld [vmem:[#allocation4 + $0xe5c] sm:$0xf0]  ;;  %v7121_v0 = vor.u32 %v8420_v55, %v7120_v52  ;;  %v7432_v55 = vld [vmem:[#allocation4 + $0xf38] sm:$0xf] }
 0x134   : > { %4210 = vmatpush.bf16.msrb.mxu0 %v6257_v4  ;;  %v4004_v1 = vpop.f32.mrf.mxu0  ;;  %v7313_v2 = vor.u32 %v8468_v59, %v7312_v56  ;;  %v7096_v4 = vld [vmem:[#allocation4 + $0xc98] sm:$0xf]  ;;  %v8498_v56 = vld [vmem:[#allocation4 + $0xf4c] sm:$0xf0]  ;;  %v7049_v59 = vor.u32 %v8402_v50, %v7048_v49  ;;  %v8039_v50 = vld [vmem:[#allocation4 + $0xfc] sm:$0xf] }
 0x135   : > { %4223 = vmatpush.bf16.msrb.mxu1 %v6449_v43  ;;  %v4005_v7 = vadd.f32 %v4004_v1, %v948_v57  ;;  %v4017_v43 = vpop.f32.mrf.mxu1  ;;  %v7624_v57 = vld [vmem:[#allocation4 + $0x10b8] sm:$0xf]  ;;  %v7433_v63 = vor.u32 %v8498_v56, %v7432_v55  ;;  %v8444_v1 = vld [vmem:[#allocation4 + $0xd9c] sm:$0xf0]  ;;  %v8135_v55 = vld [vmem:[#allocation4 + $0x3fc] sm:$0xf] }
 0x136   : > { %4236 = vmatpush.bf16.msrb.mxu2 %v6641_v20  ;;  %v8462_v20 = vld [vmem:[#allocation4 + $0xe2c] sm:$0xf0]  ;;  %v5994_v56 = vld [vmem:[#allocation4 + $0x410] sm:$0xf0] }
 0x137   : > { %4249 = vmatpush.bf16.msrb.mxu3 %v6833_v12  ;;  %4211 = vmatmul.bf16.vlgmr.msrb.gmra.mxu0 %v9103_v37  ;;  %v7672_v12 = vld [vmem:[#allocation4 + $0x1118] sm:$0xf]  ;;  %v7289_v17 = vor.u32 %v8462_v20, %v7288_v6  ;;  %v7600_v6 = vld [vmem:[#allocation4 + $0x1088] sm:$0xf]  ;;  %v5658_v20 = vld [vmem:[#allocation4 + $0x170] sm:$0xf0]  ;;  %v5997_v61 = vor.u32 %v8135_v55, %v5994_v56 }
 0x138   : > { %4255 = vmatpush.bf16.msra.mxu0 %v7193_v13  ;;  %4224 = vmatmul.bf16.vlgmr.msrb.gmra.mxu1 %v9107_v40  ;;  %v8558_v13 = vld [vmem:[#allocation4 + $0x112c] sm:$0xf0]  ;;  %v8015_v56 = vld [vmem:[#allocation4 + $0x3c] sm:$0xf] }
 0x139   : > { %4268 = vmatpush.bf16.msra.mxu1 %v7385_v14  ;;  %4237 = vmatmul.bf16.vlgmr.msrb.gmra.mxu2 %v9101_v34  ;;  %v4018_v14 = vadd.f32 %v4017_v43, %v4005_v7  ;;  %v7673_v29 = vor.u32 %v8558_v13, %v7672_v12  ;;  %v8540_v7 = vld [vmem:[#allocation4 + $0x109c] sm:$0xf0]  ;;  %v5850_v12 = vld [vmem:[#allocation4 + $0x2f0] sm:$0xf0]  ;;  %v8147_v13 = vld [vmem:[#allocation4 + $0x45c] sm:$0xf] }
 0x13a   : > { %4281 = vmatpush.bf16.msra.mxu2 %v7577_v16  ;;  %4250 = vmatmul.bf16.vlgmr.msrb.gmra.mxu3 %v9105_v38  ;;  %v7097_v16 = vor.u32 %v8414_v5, %v7096_v4  ;;  %v8492_v5 = vld [vmem:[#allocation4 + $0xf1c] sm:$0xf0] }
 0x13b   : > { %4294 = vmatpush.bf16.msra.mxu3 %v7769_v24  ;;  %v8408_v24 = vld [vmem:[#allocation4 + $0xc7c] sm:$0xf0] }
 0x13c   : > { %4256 = vmatpush.bf16.msra.mxu0 %v7169_v32  ;;  %v4030_v28 = vpop.f32.mrf.mxu2  ;;  %v8504_v32 = vld [vmem:[#allocation4 + $0xf7c] sm:$0xf0]  ;;  %v7073_v44 = vor.u32 %v8408_v24, %v7072_v21  ;;  %v4006_v46 = vpop.f32.mrf.mxu0  ;;  %v6234_v21 = vld [vmem:[#allocation4 + $0x5f0] sm:$0xf0]  ;;  %v7601_v24 = vor.u32 %v8540_v7, %v7600_v6  ;;  %v6162_v6 = vld [vmem:[#allocation4 + $0x560] sm:$0xf0] }
 0x13d   : > { %4269 = vmatpush.bf16.msra.mxu1 %v7361_v36  ;;  %v4031_v36 = vadd.f32 %v4030_v28, %v4018_v14  ;;  %v7457_v48 = vor.u32 %v8504_v32, %v7456_v31  ;;  %v4019_v52 = vpop.f32.mrf.mxu1  ;;  %v6042_v14 = vld [vmem:[#allocation4 + $0x470] sm:$0xf0]  ;;  %v5853_v28 = vor.u32 %v8099_v10, %v5850_v12  ;;  %v5634_v31 = vld [vmem:[#allocation4 + $0x140] sm:$0xf0]  ;;  %v8093_v32 = vld [vmem:[#allocation4 + $0x2ac] sm:$0xf] }
 0x13e   : > { %4282 = vmatpush.bf16.msra.mxu2 %v7553_v39  ;;  %v4043_v39 = vpop.f32.mrf.mxu3  ;;  %v6210_v46 = vld [vmem:[#allocation4 + $0x5c0] sm:$0xf0]  ;;  %v8087_v52 = vld [vmem:[#allocation4 + $0x27c] sm:$0xf] }
 0x13f   : > { %4295 = vmatpush.bf16.msra.mxu3 %v7745_v45  ;;  %v9161_v45 = vadd.f32 %v4043_v39, %v4031_v36  ;;  %v5826_v39 = vld [vmem:[#allocation4 + $0x2c0] sm:$0xf0]  ;;  %v8027_v10 = vld [vmem:[#allocation4 + $0x9c] sm:$0xf] }
 0x140   : > { %4257 = vmatpush.bf16.msra.mxu0 %v7145_v51  ;;  %v7240_v51 = vld [vmem:[#allocation4 + $0xdb8] sm:$0xf]  ;;  %v8075_v12 = vld [vmem:[#allocation4 + $0x21c] sm:$0xf] }
 0x141   : > { %4270 = vmatpush.bf16.msra.mxu1 %v7337_v53  ;;  %v7649_v53 = vor.u32 %v8552_v42, %v7648_v41  ;;  %v8141_v41 = vld [vmem:[#allocation4 + $0x42c] sm:$0xf]  ;;  %v6018_v42 = vld [vmem:[#allocation4 + $0x440] sm:$0xf0] }
 0x142   : > { %4283 = vmatpush.bf16.msra.mxu2 %v7529_v54  ;;  %v8450_v54 = vld [vmem:[#allocation4 + $0xdcc] sm:$0xf0]  ;;  %v6021_v49 = vor.u32 %v8141_v41, %v6018_v42  ;;  %v5730_v42 = vld [vmem:[#allocation4 + $0x200] sm:$0xf0] }
 0x143   : > { %4296 = vmatpush.bf16.msra.mxu3 %v7721_v58  ;;  %v8546_v58 = vld [vmem:[#allocation4 + $0x10cc] sm:$0xf0]  ;;  %v7241_v62 = vor.u32 %v8450_v54, %v7240_v51  ;;  %v5610_v51 = vld [vmem:[#allocation4 + $0x110] sm:$0xf0] }
 0x144   : > { %4258 = vmatpush.bf16.msra.mxu0 %v7121_v0  ;;  %v7216_v0 = vld [vmem:[#allocation4 + $0xd88] sm:$0xf]  ;;  %v7625_v4 = vor.u32 %v8546_v58, %v7624_v57  ;;  %v5802_v54 = vld [vmem:[#allocation4 + $0x290] sm:$0xf0]  ;;  %v8183_v57 = vld [vmem:[#allocation4 + $0x57c] sm:$0xf] }
 0x145   : > { %4271 = vmatpush.bf16.msra.mxu1 %v7313_v2  ;;  %v7408_v2 = vld [vmem:[#allocation4 + $0xf08] sm:$0xf]  ;;  %v6186_v58 = vld [vmem:[#allocation4 + $0x590] sm:$0xf0]  ;;  %v5805_v60 = vor.u32 %v8087_v52, %v5802_v54 }
 0x146   : > { %4284 = vmatpush.bf16.msra.mxu2 %v7505_v3  ;;  %v4032_v3 = vpop.f32.mrf.mxu2  ;;  %v4045_v43 = vpop.f32.mrf.mxu3 }
 0x147   : > { %4297 = vmatpush.bf16.msra.mxu3 %v7697_v35  ;;  %v8051_v35 = vld [vmem:[#allocation4 + $0x15c] sm:$0xf]  ;;  %v8129_v3 = vld [vmem:[#allocation4 + $0x3cc] sm:$0xf] }
 0x148   : > { %4259 = vmatpush.bf16.msra.mxu0 %v7097_v16  ;;  %v7217_v16 = vor.u32 %v8444_v1, %v7216_v0  ;;  %v5661_v26 = vor.u32 %v8051_v35, %v5658_v20  ;;  %v8081_v0 = vld [vmem:[#allocation4 + $0x24c] sm:$0xf]  ;;  %v6189_v1 = vor.u32 %v8183_v57, %v6186_v58  ;;  %v5514_v57 = vld [vmem:[#allocation4 + $0x50] sm:$0xf0]  ;;  %v8063_v58 = vld [vmem:[#allocation4 + $0x1bc] sm:$0xf] }
 0x149   : > { %4272 = vmatpush.bf16.msra.mxu1 %v7289_v17  ;;  %v7409_v17 = vor.u32 %v8492_v5, %v7408_v2  ;;  %v5778_v2 = vld [vmem:[#allocation4 + $0x260] sm:$0xf0]  ;;  %v8177_v5 = vld [vmem:[#allocation4 + $0x54c] sm:$0xf] }
 0x14a   : > { %4285 = vmatpush.bf16.msra.mxu2 %v7481_v19  ;;  %v8195_v19 = vld [vmem:[#allocation4 + $0x5dc] sm:$0xf]  ;;  %v5781_v35 = vor.u32 %v8081_v0, %v5778_v2  ;;  %v5517_v2 = vor.u32 %v8015_v56, %v5514_v57 }
 0x14b   : > { %4298 = vmatpush.bf16.msra.mxu3 %v7673_v29  ;;  %v6045_v29 = vor.u32 %v8147_v13, %v6042_v14  ;;  %v6237_v36 = vor.u32 %v8195_v19, %v6234_v21  ;;  %v8123_v19 = vld [vmem:[#allocation4 + $0x39c] sm:$0xf]  ;;  %v5946_v21 = vld [vmem:[#allocation4 + $0x3b0] sm:$0xf0] }
 0x14c   : > { %4260 = vmatpush.bf16.msra.mxu0 %v7073_v44  ;;  %v8189_v44 = vld [vmem:[#allocation4 + $0x5ac] sm:$0xf]  ;;  %v8159_v0 = vld [vmem:[#allocation4 + $0x4bc] sm:$0xf] }
 0x14d   : > { %4273 = vmatpush.bf16.msra.mxu1 %v7265_v47  ;;  %v5637_v47 = vor.u32 %v8045_v30, %v5634_v31  ;;  %v5949_v31 = vor.u32 %v8123_v19, %v5946_v21  ;;  %v8291_v19 = vld [vmem:[#allocation4 + $0x8dc] sm:$0xf] }
 0x14e   : > { %4286 = vmatpush.bf16.msra.mxu2 %v7457_v48  ;;  %v5829_v48 = vor.u32 %v8093_v32, %v5826_v39  ;;  %v8021_v32 = vld [vmem:[#allocation4 + $0x6c] sm:$0xf]  ;;  %v8231_v57 = vld [vmem:[#allocation4 + $0x6fc] sm:$0xf] }
 0x14f   : > { %4299 = vmatpush.bf16.msra.mxu3 %v7649_v53  ;;  %v6213_v53 = vor.u32 %v8189_v44, %v6210_v46  ;;  %v8069_v39 = vld [vmem:[#allocation4 + $0x1ec] sm:$0xf]  ;;  %v5922_v46 = vld [vmem:[#allocation4 + $0x380] sm:$0xf0] }
 0x150   : > { %4261 = vmatpush.bf16.msra.mxu0 %v7049_v59  ;;  %v5613_v59 = vor.u32 %v8039_v50, %v5610_v51  ;;  %v8117_v44 = vld [vmem:[#allocation4 + $0x36c] sm:$0xf]  ;;  %v6114_v50 = vld [vmem:[#allocation4 + $0x500] sm:$0xf0]  ;;  %v5733_v54 = vor.u32 %v8069_v39, %v5730_v42 }
 0x151   : > { %4274 = vmatpush.bf16.msra.mxu1 %v7241_v62  ;;  %v8033_v62 = vld [vmem:[#allocation4 + $0xcc] sm:$0xf]  ;;  %v5925_v55 = vor.u32 %v8117_v44, %v5922_v46  ;;  %v6402_v44 = vld [vmem:[#allocation4 + $0x740] sm:$0xf0] }
 0x152   : > { %4287 = vmatpush.bf16.msra.mxu2 %v7433_v63  ;;  %v5586_v63 = vld [vmem:[#allocation4 + $0xe0] sm:$0xf0]  ;;  %v8237_v42 = vld [vmem:[#allocation4 + $0x72c] sm:$0xf] }
 0x153   : > { %4300 = vmatpush.bf16.msra.mxu3 %v7625_v4  ;;  %v5970_v4 = vld [vmem:[#allocation4 + $0x3e0] sm:$0xf0]  ;;  %v5589_v7 = vor.u32 %v8033_v62, %v5586_v63  ;;  %v8111_v62 = vld [vmem:[#allocation4 + $0x33c] sm:$0xf]  ;;  %v5898_v63 = vld [vmem:[#allocation4 + $0x350] sm:$0xf0] }
 0x154   : > { %4262 = vmatpush.bf16.msra.mxu0 %v7025_v11  ;;  %v4056_v43 = vpop.f32.mrf.mxu0  ;;  %v5973_v20 = vor.u32 %v8129_v3, %v5970_v4  ;;  %v5562_v11 = vld [vmem:[#allocation4 + $0xb0] sm:$0xf0]  ;;  %v8009_v3 = vld [vmem:[#allocation4 + $0xc] sm:$0xf]  ;;  %v5490_v4 = vld [vmem:[#allocation4 + $0x20] sm:$0xf0] }
 0x155   : > { %4275 = vmatpush.bf16.msra.mxu1 %v7217_v16  ;;  %v4057_v13 = vadd.f32 %v4056_v43, %v9161_v45  ;;  %v4069_v14 = vpop.f32.mrf.mxu1  ;;  %v6165_v16 = vor.u32 %v8177_v5, %v6162_v6  ;;  %v5901_v6 = vor.u32 %v8111_v62, %v5898_v63  ;;  %v5682_v43 = vld [vmem:[#allocation4 + $0x1a0] sm:$0xf0]  ;;  %v5493_v21 = vor.u32 %v8009_v3, %v5490_v4  ;;  %v8285_v46 = vld [vmem:[#allocation4 + $0x8ac] sm:$0xf]  ;;  %v8327_v62 = vld [vmem:[#allocation4 + $0x9fc] sm:$0xf] }
 0x156   : > { %4288 = vmatpush.bf16.msra.mxu2 %v7409_v17  ;;  %v5754_v17 = vld [vmem:[#allocation4 + $0x230] sm:$0xf0] }
 0x157   : > { %4301 = vmatpush.bf16.msra.mxu3 %v7601_v24  ;;  %4263 = vmatmul.bf16.vlgmr.msra.gmra.mxu0 %v9117_v18  ;;  %v8171_v24 = vld [vmem:[#allocation4 + $0x51c] sm:$0xf]  ;;  %v5757_v30 = vor.u32 %v8075_v12, %v5754_v17  ;;  %v8153_v12 = vld [vmem:[#allocation4 + $0x48c] sm:$0xf]  ;;  %v6426_v17 = vld [vmem:[#allocation4 + $0x770] sm:$0xf0] }
 0x158   : > { %4307 = vmatpush.bf16.msrb.mxu0 %v5661_v26  ;;  %4276 = vmatmul.bf16.vlgmr.msra.gmra.mxu1 %v9121_v23  ;;  %v6138_v26 = vld [vmem:[#allocation4 + $0x530] sm:$0xf0] }
 0x159   : > { %4320 = vmatpush.bf16.msrb.mxu1 %v5853_v28  ;;  %4289 = vmatmul.bf16.vlgmr.msra.gmra.mxu2 %v9119_v22  ;;  %v4070_v28 = vadd.f32 %v4069_v14, %v4057_v13  ;;  %v6141_v45 = vor.u32 %v8171_v24, %v6138_v26  ;;  %v6066_v13 = vld [vmem:[#allocation4 + $0x4a0] sm:$0xf0]  ;;  %v6618_v24 = vld [vmem:[#allocation4 + $0x8f0] sm:$0xf0]  ;;  %v8339_v26 = vld [vmem:[#allocation4 + $0xa5c] sm:$0xf] }
 0x15a   : > { %4333 = vmatpush.bf16.msrb.mxu2 %v6045_v29  ;;  %4302 = vmatmul.bf16.vlgmr.msra.gmra.mxu3 %v9123_v27  ;;  %v5565_v29 = vor.u32 %v8027_v10, %v5562_v11  ;;  %v5874_v11 = vld [vmem:[#allocation4 + $0x320] sm:$0xf0]  ;;  %v6762_v63 = vld [vmem:[#allocation4 + $0xa10] sm:$0xf0] }
 0x15b   : > { %4346 = vmatpush.bf16.msrb.mxu3 %v6237_v36  ;;  %v5538_v36 = vld [vmem:[#allocation4 + $0x80] sm:$0xf0]  ;;  %v6765_v4 = vor.u32 %v8327_v62, %v6762_v63 }
 0x15c   : > { %4308 = vmatpush.bf16.msrb.mxu0 %v5637_v47  ;;  %v4082_v41 = vpop.f32.mrf.mxu2  ;;  %v5541_v51 = vor.u32 %v8021_v32, %v5538_v36  ;;  %v7002_v32 = vld [vmem:[#allocation4 + $0xbf0] sm:$0xf0]  ;;  %v6069_v36 = vor.u32 %v8153_v12, %v6066_v13  ;;  %v8369_v12 = vld [vmem:[#allocation4 + $0xb4c] sm:$0xf]  ;;  %v6930_v13 = vld [vmem:[#allocation4 + $0xb60] sm:$0xf0] }
 0x15d   : > { %4321 = vmatpush.bf16.msrb.mxu1 %v5829_v48  ;;  %v4083_v47 = vadd.f32 %v4082_v41, %v4070_v28  ;;  %v4095_v48 = vpop.f32.mrf.mxu3  ;;  %v6810_v28 = vld [vmem:[#allocation4 + $0xa70] sm:$0xf0]  ;;  %v6621_v41 = vor.u32 %v8291_v19, %v6618_v24  ;;  %v8219_v24 = vld [vmem:[#allocation4 + $0x69c] sm:$0xf] }
 0x15e   : > { %4334 = vmatpush.bf16.msrb.mxu2 %v6021_v49  ;;  %v8165_v49 = vld [vmem:[#allocation4 + $0x4ec] sm:$0xf] }
 0x15f   : > { %4347 = vmatpush.bf16.msrb.mxu3 %v6213_v53  ;;  %v9168_v52 = vadd.f32 %v4095_v48, %v4083_v47  ;;  %v4058_v53 = vpop.f32.mrf.mxu0  ;;  %v6594_v48 = vld [vmem:[#allocation4 + $0x8c0] sm:$0xf0] }
 0x160   : > { %4309 = vmatpush.bf16.msrb.mxu0 %v5613_v59  ;;  %v4071_v59 = vpop.f32.mrf.mxu1  ;;  %v6978_v53 = vld [vmem:[#allocation4 + $0xbc0] sm:$0xf0] }
 0x161   : > { %4322 = vmatpush.bf16.msrb.mxu1 %v5805_v60  ;;  %v6117_v60 = vor.u32 %v8165_v49, %v6114_v50  ;;  %v8333_v49 = vld [vmem:[#allocation4 + $0xa2c] sm:$0xf]  ;;  %v6786_v50 = vld [vmem:[#allocation4 + $0xa40] sm:$0xf0]  ;;  %v8279_v59 = vld [vmem:[#allocation4 + $0x87c] sm:$0xf] }
 0x162   : > { %4335 = vmatpush.bf16.msrb.mxu2 %v5997_v61  ;;  %v5706_v61 = vld [vmem:[#allocation4 + $0x1d0] sm:$0xf0]  ;;  %v6789_v56 = vor.u32 %v8333_v49, %v6786_v50  ;;  %v6498_v50 = vld [vmem:[#allocation4 + $0x800] sm:$0xf0] }
 0x163   : > { %4348 = vmatpush.bf16.msrb.mxu3 %v6189_v1  ;;  %v6090_v1 = vld [vmem:[#allocation4 + $0x4d0] sm:$0xf0]  ;;  %v5709_v5 = vor.u32 %v8063_v58, %v5706_v61 }
 0x164   : > { %4310 = vmatpush.bf16.msrb.mxu0 %v5589_v7  ;;  %v8057_v7 = vld [vmem:[#allocation4 + $0x18c] sm:$0xf]  ;;  %v6093_v10 = vor.u32 %v8159_v0, %v6090_v1  ;;  %v6378_v58 = vld [vmem:[#allocation4 + $0x710] sm:$0xf0]  ;;  %v8375_v0 = vld [vmem:[#allocation4 + $0xb7c] sm:$0xf] }
 0x165   : > { %4323 = vmatpush.bf16.msrb.mxu1 %v5781_v35  ;;  %v8105_v35 = vld [vmem:[#allocation4 + $0x30c] sm:$0xf]  ;;  %v4097_v14 = vpop.f32.mrf.mxu3  ;;  %v6570_v61 = vld [vmem:[#allocation4 + $0x890] sm:$0xf0] }
 0x166   : > { %4336 = vmatpush.bf16.msrb.mxu2 %v5973_v20  ;;  %v4084_v20 = vpop.f32.mrf.mxu2  ;;  %v6954_v1 = vld [vmem:[#allocation4 + $0xb90] sm:$0xf0]  ;;  %v6573_v3 = vor.u32 %v8279_v59, %v6570_v61 }
 0x167   : > { %4349 = vmatpush.bf16.msrb.mxu3 %v6165_v16  ;;  %v8243_v16 = vld [vmem:[#allocation4 + $0x75c] sm:$0xf]  ;;  %v8321_v20 = vld [vmem:[#allocation4 + $0x9cc] sm:$0xf] }
 0x168   : > { %4311 = vmatpush.bf16.msrb.mxu0 %v5565_v29  ;;  %v5685_v29 = vor.u32 %v8057_v7, %v5682_v43  ;;  %v6429_v39 = vor.u32 %v8243_v16, %v6426_v17  ;;  %v8273_v7 = vld [vmem:[#allocation4 + $0x84c] sm:$0xf]  ;;  %v6957_v43 = vor.u32 %v8375_v0, %v6954_v1  ;;  %v8207_v0 = vld [vmem:[#allocation4 + $0x63c] sm:$0xf]  ;;  %v6282_v1 = vld [vmem:[#allocation4 + $0x650] sm:$0xf0] }
 0x169   : > { %4324 = vmatpush.bf16.msrb.mxu1 %v5757_v30  ;;  %v5877_v30 = vor.u32 %v8105_v35, %v5874_v11  ;;  %v6546_v35 = vld [vmem:[#allocation4 + $0x860] sm:$0xf0] }
 0x16a   : > { %4337 = vmatpush.bf16.msrb.mxu2 %v5949_v31  ;;  %v8387_v31 = vld [vmem:[#allocation4 + $0xbdc] sm:$0xf]  ;;  %v6549_v19 = vor.u32 %v8273_v7, %v6546_v35  ;;  %v6285_v35 = vor.u32 %v8207_v0, %v6282_v1  ;;  %v7146_v1 = vld [vmem:[#allocation4 + $0xd10] sm:$0xf0] }
 0x16b   : > { %4350 = vmatpush.bf16.msrb.mxu3 %v6141_v45  ;;  %v6813_v45 = vor.u32 %v8339_v26, %v6810_v28  ;;  %v7005_v47 = vor.u32 %v8387_v31, %v7002_v32  ;;  %v6330_v26 = vld [vmem:[#allocation4 + $0x6b0] sm:$0xf0]  ;;  %v8267_v28 = vld [vmem:[#allocation4 + $0x81c] sm:$0xf] }
 0x16c   : > { %4312 = vmatpush.bf16.msrb.mxu0 %v5541_v51  ;;  %v8381_v51 = vld [vmem:[#allocation4 + $0xbac] sm:$0xf]  ;;  %v6522_v31 = vld [vmem:[#allocation4 + $0x830] sm:$0xf0]  ;;  %v8315_v32 = vld [vmem:[#allocation4 + $0x99c] sm:$0xf] }
 0x16d   : > { %4325 = vmatpush.bf16.msrb.mxu1 %v5733_v54  ;;  %v6405_v54 = vor.u32 %v8237_v42, %v6402_v44  ;;  %v8213_v44 = vld [vmem:[#allocation4 + $0x66c] sm:$0xf]  ;;  %v8351_v7 = vld [vmem:[#allocation4 + $0xabc] sm:$0xf] }
 0x16e   : > { %4338 = vmatpush.bf16.msrb.mxu2 %v5925_v55  ;;  %v6597_v55 = vor.u32 %v8285_v46, %v6594_v48  ;;  %v6306_v46 = vld [vmem:[#allocation4 + $0x680] sm:$0xf0]  ;;  %v8423_v0 = vld [vmem:[#allocation4 + $0xcfc] sm:$0xf] }
 0x16f   : > { %4351 = vmatpush.bf16.msrb.mxu3 %v6117_v60  ;;  %v6981_v60 = vor.u32 %v8381_v51, %v6978_v53  ;;  %v8309_v51 = vld [vmem:[#allocation4 + $0x96c] sm:$0xf]  ;;  %v6690_v53 = vld [vmem:[#allocation4 + $0x980] sm:$0xf0]  ;;  %v6309_v59 = vor.u32 %v8213_v44, %v6306_v46  ;;  %v7770_v44 = vld [vmem:[#allocation4 + $0x11f0] sm:$0xf0] }
 0x170   : > { %4313 = vmatpush.bf16.msrb.mxu0 %v5517_v2  ;;  %v6381_v2 = vor.u32 %v8231_v57, %v6378_v58  ;;  %v6882_v57 = vld [vmem:[#allocation4 + $0xb00] sm:$0xf0]  ;;  %v6693_v63 = vor.u32 %v8309_v51, %v6690_v53  ;;  %v8477_v53 = vld [vmem:[#allocation4 + $0xeac] sm:$0xf] }
 0x171   : > { %4326 = vmatpush.bf16.msrb.mxu1 %v5709_v5  ;;  %v8225_v5 = vld [vmem:[#allocation4 + $0x6cc] sm:$0xf]  ;;  %v7170_v51 = vld [vmem:[#allocation4 + $0xd40] sm:$0xf0] }
 0x172   : > { %4339 = vmatpush.bf16.msrb.mxu2 %v5901_v6  ;;  %v6354_v6 = vld [vmem:[#allocation4 + $0x6e0] sm:$0xf0] }
 0x173   : > { %4352 = vmatpush.bf16.msrb.mxu3 %v6093_v10  ;;  %v6738_v10 = vld [vmem:[#allocation4 + $0x9e0] sm:$0xf0]  ;;  %v6357_v16 = vor.u32 %v8225_v5, %v6354_v6  ;;  %v8303_v5 = vld [vmem:[#allocation4 + $0x93c] sm:$0xf]  ;;  %v6666_v6 = vld [vmem:[#allocation4 + $0x950] sm:$0xf0] }
 0x174   : > { %4314 = vmatpush.bf16.msrb.mxu0 %v5493_v21  ;;  %v4108_v11 = vpop.f32.mrf.mxu0  ;;  %v6741_v21 = vor.u32 %v8321_v20, %v6738_v10  ;;  %v8201_v20 = vld [vmem:[#allocation4 + $0x60c] sm:$0xf]  ;;  %v6258_v10 = vld [vmem:[#allocation4 + $0x620] sm:$0xf0] }
 0x175   : > { %4327 = vmatpush.bf16.msrb.mxu1 %v5685_v29  ;;  %v4109_v14 = vadd.f32 %v4108_v11, %v9168_v52  ;;  %v4121_v17 = vpop.f32.mrf.mxu1  ;;  %v6933_v29 = vor.u32 %v8369_v12, %v6930_v13  ;;  %v6525_v52 = vor.u32 %v8267_v28, %v6522_v31  ;;  %v6669_v12 = vor.u32 %v8303_v5, %v6666_v6  ;;  %v8249_v13 = vld [vmem:[#allocation4 + $0x78c] sm:$0xf]  ;;  %v8435_v28 = vld [vmem:[#allocation4 + $0xd5c] sm:$0xf]  ;;  %v7530_v6 = vld [vmem:[#allocation4 + $0x1010] sm:$0xf0] }
 0x176   : > { %4340 = vmatpush.bf16.msrb.mxu2 %v5877_v30  ;;  %v8519_v5 = vld [vmem:[#allocation4 + $0xffc] sm:$0xf] }
 0x177   : > { %4353 = vmatpush.bf16.msrb.mxu3 %v6069_v36  ;;  %4315 = vmatmul.bf16.vlgmr.msrb.gmra.mxu0 %v9085_v9  ;;  %v4122_v30 = vadd.f32 %v4121_v17, %v4109_v14  ;;  %v6714_v36 = vld [vmem:[#allocation4 + $0x9b0] sm:$0xf0]  ;;  %v6450_v14 = vld [vmem:[#allocation4 + $0x7a0] sm:$0xf0] }
 0x178   : > { %4359 = vmatpush.bf16.msra.mxu0 %v6429_v39  ;;  %4328 = vmatmul.bf16.vlgmr.msrb.gmra.mxu1 %v9094_v25  ;;  %v8363_v39 = vld [vmem:[#allocation4 + $0xb1c] sm:$0xf]  ;;  %v6717_v42 = vor.u32 %v8315_v32, %v6714_v36  ;;  %v6261_v32 = vor.u32 %v8201_v20, %v6258_v10  ;;  %v7386_v36 = vld [vmem:[#allocation4 + $0xef0] sm:$0xf0]  ;;  %v8417_v20 = vld [vmem:[#allocation4 + $0xccc] sm:$0xf] }
 0x179   : > { %4372 = vmatpush.bf16.msra.mxu1 %v6621_v41  ;;  %4341 = vmatmul.bf16.vlgmr.msrb.gmra.mxu2 %v9083_v8  ;;  %v6906_v41 = vld [vmem:[#allocation4 + $0xb30] sm:$0xf0] }
 0x17a   : > { %4385 = vmatpush.bf16.msra.mxu2 %v6813_v45  ;;  %4354 = vmatmul.bf16.vlgmr.msrb.gmra.mxu3 %v9088_v15  ;;  %v6333_v45 = vor.u32 %v8219_v24, %v6330_v26  ;;  %v6909_v48 = vor.u32 %v8363_v39, %v6906_v41  ;;  %v6834_v24 = vld [vmem:[#allocation4 + $0xaa0] sm:$0xf0]  ;;  %v8531_v39 = vld [vmem:[#allocation4 + $0x105c] sm:$0xf]  ;;  %v7578_v41 = vld [vmem:[#allocation4 + $0x1070] sm:$0xf0] }
 0x17b   : > { %4398 = vmatpush.bf16.msra.mxu3 %v7005_v47  ;;  %v8261_v47 = vld [vmem:[#allocation4 + $0x7ec] sm:$0xf] }
 0x17c   : > { %4360 = vmatpush.bf16.msra.mxu0 %v6405_v54  ;;  %v4134_v49 = vpop.f32.mrf.mxu2  ;;  %v4110_v58 = vpop.f32.mrf.mxu0  ;;  %v6501_v62 = vor.u32 %v8261_v47, %v6498_v50  ;;  %v8429_v50 = vld [vmem:[#allocation4 + $0xd2c] sm:$0xf] }
 0x17d   : > { %4373 = vmatpush.bf16.msra.mxu1 %v6597_v55  ;;  %v4135_v54 = vadd.f32 %v4134_v49, %v4122_v30  ;;  %v4147_v55 = vpop.f32.mrf.mxu3  ;;  %v8483_v30 = vld [vmem:[#allocation4 + $0xedc] sm:$0xf]  ;;  %v7581_v49 = vor.u32 %v8531_v39, %v7578_v41  ;;  %v8573_v58 = vld [vmem:[#allocation4 + $0x11ac] sm:$0xf]  ;;  %v7098_v39 = vld [vmem:[#allocation4 + $0xcb0] sm:$0xf0] }
 0x17e   : > { %4386 = vmatpush.bf16.msra.mxu2 %v6789_v56  ;;  %v8357_v56 = vld [vmem:[#allocation4 + $0xaec] sm:$0xf]  ;;  %v8459_v41 = vld [vmem:[#allocation4 + $0xe1c] sm:$0xf] }
 0x17f   : > { %4399 = vmatpush.bf16.msra.mxu3 %v6981_v60  ;;  %v4123_v60 = vpop.f32.mrf.mxu1  ;;  %v9175_v61 = vadd.f32 %v4147_v55, %v4135_v54  ;;  %v7362_v55 = vld [vmem:[#allocation4 + $0xec0] sm:$0xf0] }
 0x180   : > { %4361 = vmatpush.bf16.msra.mxu0 %v6381_v2  ;;  %v8255_v2 = vld [vmem:[#allocation4 + $0x7bc] sm:$0xf]  ;;  %v7173_v60 = vor.u32 %v8429_v50, %v7170_v51 }
 0x181   : > { %4374 = vmatpush.bf16.msra.mxu1 %v6573_v3  ;;  %v6885_v3 = vor.u32 %v8357_v56, %v6882_v57  ;;  %v8525_v56 = vld [vmem:[#allocation4 + $0x102c] sm:$0xf]  ;;  %v7554_v57 = vld [vmem:[#allocation4 + $0x1040] sm:$0xf0] }
 0x182   : > { %4387 = vmatpush.bf16.msra.mxu2 %v6765_v4  ;;  %v6474_v4 = vld [vmem:[#allocation4 + $0x7d0] sm:$0xf0] }
 0x183   : > { %4400 = vmatpush.bf16.msra.mxu3 %v6957_v43  ;;  %v6858_v43 = vld [vmem:[#allocation4 + $0xad0] sm:$0xf0]  ;;  %v6477_v11 = vor.u32 %v8255_v2, %v6474_v4  ;;  %v8471_v2 = vld [vmem:[#allocation4 + $0xe7c] sm:$0xf] }
 0x184   : > { %4362 = vmatpush.bf16.msra.mxu0 %v6357_v16  ;;  %v8297_v16 = vld [vmem:[#allocation4 + $0x90c] sm:$0xf]  ;;  %v6861_v17 = vor.u32 %v8351_v7, %v6858_v43  ;;  %v4136_v26 = vpop.f32.mrf.mxu2  ;;  %v7338_v4 = vld [vmem:[#allocation4 + $0xe90] sm:$0xf0]  ;;  %v8567_v7 = vld [vmem:[#allocation4 + $0x117c] sm:$0xf] }
 0x185   : > { %4375 = vmatpush.bf16.msra.mxu1 %v6549_v19  ;;  %v6642_v19 = vld [vmem:[#allocation4 + $0x920] sm:$0xf0]  ;;  %v4149_v31 = vpop.f32.mrf.mxu3  ;;  %v7722_v43 = vld [vmem:[#allocation4 + $0x1190] sm:$0xf0]  ;;  %v7341_v10 = vor.u32 %v8471_v2, %v7338_v4  ;;  %v8561_v26 = vld [vmem:[#allocation4 + $0x114c] sm:$0xf] }
 0x186   : > { %4388 = vmatpush.bf16.msra.mxu2 %v6741_v21  ;;  %v8345_v21 = vld [vmem:[#allocation4 + $0xa8c] sm:$0xf] }
 0x187   : > { %4401 = vmatpush.bf16.msra.mxu3 %v6933_v29  ;;  %v7194_v29 = vld [vmem:[#allocation4 + $0xd70] sm:$0xf0]  ;;  %v6837_v46 = vor.u32 %v8345_v21, %v6834_v24  ;;  %v8513_v21 = vld [vmem:[#allocation4 + $0xfcc] sm:$0xf]  ;;  %v7506_v24 = vld [vmem:[#allocation4 + $0xfe0] sm:$0xf0] }
 0x188   : > { %4363 = vmatpush.bf16.msra.mxu0 %v6333_v45  ;;  %v6453_v45 = vor.u32 %v8249_v13, %v6450_v14  ;;  %v7197_v47 = vor.u32 %v8435_v28, %v7194_v29  ;;  %v8465_v13 = vld [vmem:[#allocation4 + $0xe4c] sm:$0xf]  ;;  %v9181_v14 = vld [vmem:[#allocation6] sm:$0x3f] }
 0x189   : > { %4376 = vmatpush.bf16.msra.mxu1 %v6525_v52  ;;  %v6645_v52 = vor.u32 %v8297_v16, %v6642_v19  ;;  %v949_v16 = vperm.slane %v9181_v14, 2  ;;  %v7314_v19 = vld [vmem:[#allocation4 + $0xe60] sm:$0xf0]  ;;  %v8549_v2 = vld [vmem:[#allocation4 + $0x10ec] sm:$0xf] }
 0x18a   : > { %4389 = vmatpush.bf16.msra.mxu2 %v6717_v42  ;;  %v8579_v42 = vld [vmem:[#allocation4 + $0x11dc] sm:$0xf]  ;;  %v7698_v28 = vld [vmem:[#allocation4 + $0x1160] sm:$0xf0]  ;;  %v7317_v31 = vor.u32 %v8465_v13, %v7314_v19  ;;  %v7242_v13 = vld [vmem:[#allocation4 + $0xdd0] sm:$0xf0] }
 0x18b   : > { %4402 = vmatpush.bf16.msra.mxu3 %v6909_v48  ;;  %v7389_v48 = vor.u32 %v8483_v30, %v7386_v36  ;;  %v7773_v54 = vor.u32 %v8579_v42, %v7770_v44  ;;  %v8411_v36 = vld [vmem:[#allocation4 + $0xc9c] sm:$0xf]  ;;  %v7701_v42 = vor.u32 %v8561_v26, %v7698_v28  ;;  %v7290_v44 = vld [vmem:[#allocation4 + $0xe30] sm:$0xf0]  ;;  %v8393_v26 = vld [vmem:[#allocation4 + $0xc0c] sm:$0xf] }
 0x18c   : > { %4364 = vmatpush.bf16.msra.mxu0 %v6309_v59  ;;  %v7746_v59 = vld [vmem:[#allocation4 + $0x11c0] sm:$0xf0]  ;;  %v7101_v51 = vor.u32 %v8411_v36, %v7098_v39  ;;  %v8543_v19 = vld [vmem:[#allocation4 + $0x10bc] sm:$0xf]  ;;  %v8489_v36 = vld [vmem:[#allocation4 + $0xf0c] sm:$0xf] }
 0x18d   : > { %4377 = vmatpush.bf16.msra.mxu1 %v6501_v62  ;;  %v7365_v62 = vor.u32 %v8477_v53, %v7362_v55  ;;  %v7293_v53 = vor.u32 %v8459_v41, %v7290_v44  ;;  %v8405_v55 = vld [vmem:[#allocation4 + $0xc6c] sm:$0xf]  ;;  %v7026_v28 = vld [vmem:[#allocation4 + $0xc20] sm:$0xf0] }
 0x18e   : > { %4390 = vmatpush.bf16.msra.mxu2 %v6693_v63  ;;  %v7557_v63 = vor.u32 %v8525_v56, %v7554_v57  ;;  %v7074_v56 = vld [vmem:[#allocation4 + $0xc80] sm:$0xf0]  ;;  %v8453_v57 = vld [vmem:[#allocation4 + $0xdec] sm:$0xf] }
 0x18f   : > { %4403 = vmatpush.bf16.msra.mxu3 %v6885_v3  ;;  %v7749_v3 = vor.u32 %v8573_v58, %v7746_v59  ;;  %v7077_v4 = vor.u32 %v8405_v55, %v7074_v56  ;;  %v6240_v56 = vld [vmem:[#allocation4 + $0x5e0] sm:$0xf] }
 0x190   : > { %4365 = vmatpush.bf16.msra.mxu0 %v6285_v35  ;;  %v7149_v35 = vor.u32 %v8423_v0, %v7146_v1 }
 0x191   : > { %4378 = vmatpush.bf16.msra.mxu1 %v6477_v11  ;;  %v7533_v11 = vor.u32 %v8519_v5, %v7530_v6 }
 0x192   : > { %4391 = vmatpush.bf16.msra.mxu2 %v6669_v12  ;;  %v7122_v12 = vld [vmem:[#allocation4 + $0xce0] sm:$0xf0] }
 0x193   : > { %4404 = vmatpush.bf16.msra.mxu3 %v6861_v17  ;;  %v7725_v17 = vor.u32 %v8567_v7, %v7722_v43  ;;  %v7125_v29 = vor.u32 %v8417_v20, %v7122_v12  ;;  %v7050_v20 = vld [vmem:[#allocation4 + $0xc50] sm:$0xf0] }
 0x194   : > { %4366 = vmatpush.bf16.msra.mxu0 %v6261_v32  ;;  %v4160_v30 = vpop.f32.mrf.mxu0  ;;  %v7509_v32 = vor.u32 %v8513_v21, %v7506_v24  ;;  %v7626_v21 = vld [vmem:[#allocation4 + $0x10d0] sm:$0xf0] }
 0x195   : > { %4379 = vmatpush.bf16.msra.mxu1 %v6453_v45  ;;  %v4161_v45 = vadd.f32 %v4160_v30, %v949_v16  ;;  %v8495_v16 = vld [vmem:[#allocation4 + $0xf3c] sm:$0xf]  ;;  %v7629_v41 = vor.u32 %v8543_v19, %v7626_v21  ;;  %v6000_v19 = vld [vmem:[#allocation4 + $0x400] sm:$0xf]  ;;  %v8139_v21 = vld [vmem:[#allocation4 + $0x414] sm:$0xf0] }
 0x196   : > { %4392 = vmatpush.bf16.msra.mxu2 %v6645_v52  ;;  %v4173_v52 = vpop.f32.mrf.mxu1 }
 0x197   : > { %4405 = vmatpush.bf16.msra.mxu3 %v6837_v46  ;;  %4367 = vmatmul.bf16.vlgmr.msra.gmra.mxu0 %v9103_v37  ;;  %v8507_v46 = vld [vmem:[#allocation4 + $0xf9c] sm:$0xf]  ;;  %v4174_v50 = vadd.f32 %v4173_v52, %v4161_v45  ;;  %v7410_v45 = vld [vmem:[#allocation4 + $0xf20] sm:$0xf0]  ;;  %v8537_v52 = vld [vmem:[#allocation4 + $0x108c] sm:$0xf] }
 0x198   : > { %4411 = vmatpush.bf16.msrb.mxu0 %v7197_v47  ;;  %4380 = vmatmul.bf16.vlgmr.msra.gmra.mxu1 %v9107_v40  ;;  %v7482_v47 = vld [vmem:[#allocation4 + $0xfb0] sm:$0xf0]  ;;  %v7413_v55 = vor.u32 %v8489_v36, %v7410_v45  ;;  %v5784_v36 = vld [vmem:[#allocation4 + $0x250] sm:$0xf] }
 0x199   : > { %4424 = vmatpush.bf16.msrb.mxu1 %v7389_v48  ;;  %4393 = vmatmul.bf16.vlgmr.msra.gmra.mxu2 %v9101_v34  ;;  %v8555_v48 = vld [vmem:[#allocation4 + $0x111c] sm:$0xf]  ;;  %v5976_v45 = vld [vmem:[#allocation4 + $0x3d0] sm:$0xf] }
 0x19a   : > { %4437 = vmatpush.bf16.msrb.mxu2 %v7581_v49  ;;  %4406 = vmatmul.bf16.vlgmr.msra.gmra.mxu3 %v9105_v38  ;;  %v7674_v49 = vld [vmem:[#allocation4 + $0x1130] sm:$0xf0] }
 0x19b   : > { %4450 = vmatpush.bf16.msrb.mxu3 %v7773_v54  ;;  %v7485_v54 = vor.u32 %v8507_v46, %v7482_v47  ;;  %v7677_v59 = vor.u32 %v8555_v48, %v7674_v49  ;;  %v5664_v46 = vld [vmem:[#allocation4 + $0x160] sm:$0xf]  ;;  %v8055_v47 = vld [vmem:[#allocation4 + $0x174] sm:$0xf0]  ;;  %v7029_v49 = vor.u32 %v8393_v26, %v7026_v28 }
 0x19c   : > { %4412 = vmatpush.bf16.msrb.mxu0 %v7173_v60  ;;  %v4186_v58 = vpop.f32.mrf.mxu2  ;;  %v7266_v60 = vld [vmem:[#allocation4 + $0xe00] sm:$0xf0]  ;;  %v4162_v6 = vpop.f32.mrf.mxu0  ;;  %v5856_v48 = vld [vmem:[#allocation4 + $0x2e0] sm:$0xf]  ;;  %v8187_v26 = vld [vmem:[#allocation4 + $0x594] sm:$0xf0] }
 0x19d   : > { %4425 = vmatpush.bf16.msrb.mxu1 %v7365_v62  ;;  %v8501_v62 = vld [vmem:[#allocation4 + $0xf6c] sm:$0xf]  ;;  %v4187_v0 = vadd.f32 %v4186_v58, %v4174_v50  ;;  %v4199_v1 = vpop.f32.mrf.mxu3  ;;  %v7269_v7 = vor.u32 %v8453_v57, %v7266_v60  ;;  %v8103_v50 = vld [vmem:[#allocation4 + $0x2f4] sm:$0xf0]  ;;  %v8145_v6 = vld [vmem:[#allocation4 + $0x444] sm:$0xf0] }
 0x19e   : > { %4438 = vmatpush.bf16.msrb.mxu2 %v7557_v63  ;;  %v7458_v63 = vld [vmem:[#allocation4 + $0xf80] sm:$0xf0]  ;;  %v8199_v57 = vld [vmem:[#allocation4 + $0x5f4] sm:$0xf0]  ;;  %v5857_v60 = vor.u32 %v8103_v50, %v5856_v48  ;;  %v5568_v50 = vld [vmem:[#allocation4 + $0xa0] sm:$0xf] }
 0x19f   : > { %4451 = vmatpush.bf16.msrb.mxu3 %v7749_v3  ;;  %v7650_v3 = vld [vmem:[#allocation4 + $0x1100] sm:$0xf0]  ;;  %v9184_v5 = vadd.f32 %v4199_v1, %v4187_v0  ;;  %v7461_v43 = vor.u32 %v8501_v62, %v7458_v63  ;;  %v5640_v63 = vld [vmem:[#allocation4 + $0x130] sm:$0xf]  ;;  %v8049_v0 = vld [vmem:[#allocation4 + $0x144] sm:$0xf0] }
 0x1a0   : > { %4413 = vmatpush.bf16.msrb.mxu0 %v7149_v35  ;;  %v8399_v35 = vld [vmem:[#allocation4 + $0xc3c] sm:$0xf]  ;;  %v7653_v12 = vor.u32 %v8549_v2, %v7650_v3  ;;  %v5832_v1 = vld [vmem:[#allocation4 + $0x2b0] sm:$0xf]  ;;  %v6241_v2 = vor.u32 %v8199_v57, %v6240_v56  ;;  %v8097_v3 = vld [vmem:[#allocation4 + $0x2c4] sm:$0xf0] }
 0x1a1   : > { %4426 = vmatpush.bf16.msrb.mxu1 %v7341_v10  ;;  %v8447_v10 = vld [vmem:[#allocation4 + $0xdbc] sm:$0xf]  ;;  %v7053_v24 = vor.u32 %v8399_v35, %v7050_v20  ;;  %v5641_v35 = vor.u32 %v8049_v0, %v5640_v63  ;;  %v5833_v20 = vor.u32 %v8097_v3, %v5832_v1  ;;  %v8079_v57 = vld [vmem:[#allocation4 + $0x234] sm:$0xf0]  ;;  %v5544_v3 = vld [vmem:[#allocation4 + $0x70] sm:$0xf] }
 0x1a2   : > { %4439 = vmatpush.bf16.msrb.mxu2 %v7533_v11  ;;  %v4175_v11 = vpop.f32.mrf.mxu1 }
 0x1a3   : > { %4452 = vmatpush.bf16.msrb.mxu3 %v7725_v17  ;;  %v7434_v17 = vld [vmem:[#allocation4 + $0xf50] sm:$0xf0]  ;;  %v5616_v11 = vld [vmem:[#allocation4 + $0x100] sm:$0xf] }
 0x1a4   : > { %4414 = vmatpush.bf16.msrb.mxu0 %v7125_v29  ;;  %v7245_v29 = vor.u32 %v8447_v10, %v7242_v13  ;;  %v7437_v30 = vor.u32 %v8495_v16, %v7434_v17  ;;  %v4188_v39 = vpop.f32.mrf.mxu2  ;;  %v5808_v13 = vld [vmem:[#allocation4 + $0x280] sm:$0xf]  ;;  %v8091_v17 = vld [vmem:[#allocation4 + $0x294] sm:$0xf0] }
 0x1a5   : > { %4427 = vmatpush.bf16.msrb.mxu1 %v7317_v31  ;;  %v8441_v31 = vld [vmem:[#allocation4 + $0xd8c] sm:$0xf]  ;;  %v4201_v44 = vpop.f32.mrf.mxu3 }
 0x1a6   : > { %4440 = vmatpush.bf16.msrb.mxu2 %v7509_v32  ;;  %v7218_v32 = vld [vmem:[#allocation4 + $0xda0] sm:$0xf0]  ;;  %v8181_v44 = vld [vmem:[#allocation4 + $0x564] sm:$0xf0] }
 0x1a7   : > { %4453 = vmatpush.bf16.msrb.mxu3 %v7701_v42  ;;  %v7602_v42 = vld [vmem:[#allocation4 + $0x10a0] sm:$0xf0] }
 0x1a8   : > { %4415 = vmatpush.bf16.msrb.mxu0 %v7101_v51  ;;  %v6048_v51 = vld [vmem:[#allocation4 + $0x460] sm:$0xf]  ;;  %v7605_v58 = vor.u32 %v8537_v52, %v7602_v42  ;;  %v8133_v52 = vld [vmem:[#allocation4 + $0x3e4] sm:$0xf0]  ;;  %v6168_v42 = vld [vmem:[#allocation4 + $0x550] sm:$0xf] }
 0x1a9   : > { %4428 = vmatpush.bf16.msrb.mxu1 %v7293_v53  ;;  %v8151_v53 = vld [vmem:[#allocation4 + $0x474] sm:$0xf0]  ;;  %v6169_v56 = vor.u32 %v8181_v44, %v6168_v42  ;;  %v5496_v42 = vld [vmem:[#allocation4 + $0x10] sm:$0xf]  ;;  %v8013_v44 = vld [vmem:[#allocation4 + $0x24] sm:$0xf0] }
 0x1aa   : > { %4441 = vmatpush.bf16.msrb.mxu2 %v7485_v54  ;;  %v7221_v54 = vor.u32 %v8441_v31, %v7218_v32  ;;  %v6049_v62 = vor.u32 %v8151_v53, %v6048_v51  ;;  %v5592_v31 = vld [vmem:[#allocation4 + $0xd0] sm:$0xf]  ;;  %v8037_v32 = vld [vmem:[#allocation4 + $0xe4] sm:$0xf0]  ;;  %v8031_v51 = vld [vmem:[#allocation4 + $0xb4] sm:$0xf0] }
 0x1ab   : > { %4454 = vmatpush.bf16.msrb.mxu3 %v7677_v59  ;;  %v5665_v59 = vor.u32 %v8055_v47, %v5664_v46  ;;  %v5593_v46 = vor.u32 %v8037_v32, %v5592_v31  ;;  %v5760_v53 = vld [vmem:[#allocation4 + $0x220] sm:$0xf]  ;;  %v5569_v0 = vor.u32 %v8031_v51, %v5568_v50  ;;  %v8067_v32 = vld [vmem:[#allocation4 + $0x1d4] sm:$0xf0]  ;;  %v5880_v50 = vld [vmem:[#allocation4 + $0x310] sm:$0xf] }
 0x1ac   : > { %4416 = vmatpush.bf16.msrb.mxu0 %v7077_v4  ;;  %v6024_v4 = vld [vmem:[#allocation4 + $0x430] sm:$0xf]  ;;  %v5761_v1 = vor.u32 %v8079_v57, %v5760_v53 }
 0x1ad   : > { %4429 = vmatpush.bf16.msrb.mxu1 %v7269_v7  ;;  %v6216_v7 = vld [vmem:[#allocation4 + $0x5b0] sm:$0xf]  ;;  %v6025_v10 = vor.u32 %v8145_v6, %v6024_v4  ;;  %v8025_v4 = vld [vmem:[#allocation4 + $0x84] sm:$0xf0] }
 0x1ae   : > { %4442 = vmatpush.bf16.msrb.mxu2 %v7461_v43  ;;  %v8193_v43 = vld [vmem:[#allocation4 + $0x5c4] sm:$0xf0]  ;;  %v5736_v6 = vld [vmem:[#allocation4 + $0x1f0] sm:$0xf] }
 0x1af   : > { %4455 = vmatpush.bf16.msrb.mxu3 %v7653_v12  ;;  %v8043_v12 = vld [vmem:[#allocation4 + $0x114] sm:$0xf0]  ;;  %v6217_v16 = vor.u32 %v8193_v43, %v6216_v7  ;;  %v8073_v43 = vld [vmem:[#allocation4 + $0x204] sm:$0xf0] }
 0x1b0   : > { %4417 = vmatpush.bf16.msrb.mxu0 %v7053_v24  ;;  %v6192_v24 = vld [vmem:[#allocation4 + $0x580] sm:$0xf]  ;;  %v5617_v28 = vor.u32 %v8043_v12, %v5616_v11  ;;  %v6120_v12 = vld [vmem:[#allocation4 + $0x4f0] sm:$0xf] }
 0x1b1   : > { %4430 = vmatpush.bf16.msrb.mxu1 %v7245_v29  ;;  %v5809_v29 = vor.u32 %v8091_v17, %v5808_v13  ;;  %v6193_v39 = vor.u32 %v8187_v26, %v6192_v24  ;;  %v8169_v13 = vld [vmem:[#allocation4 + $0x504] sm:$0xf0]  ;;  %v5520_v26 = vld [vmem:[#allocation4 + $0x40] sm:$0xf] }
 0x1b2   : > { %4443 = vmatpush.bf16.msrb.mxu2 %v7437_v30  ;;  %v6001_v30 = vor.u32 %v8139_v21, %v6000_v19  ;;  %v5737_v21 = vor.u32 %v8073_v43, %v5736_v6  ;;  %v6121_v31 = vor.u32 %v8169_v13, %v6120_v12  ;;  %v8391_v6 = vld [vmem:[#allocation4 + $0xbf4] sm:$0xf0]  ;;  %v8289_v13 = vld [vmem:[#allocation4 + $0x8c4] sm:$0xf0] }
 0x1b3   : > { %4456 = vmatpush.bf16.msrb.mxu3 %v7629_v41  ;;  %v8085_v41 = vld [vmem:[#allocation4 + $0x264] sm:$0xf0] }
 0x1b4   : > { %4418 = vmatpush.bf16.msrb.mxu0 %v7029_v49  ;;  %v4212_v47 = vpop.f32.mrf.mxu0  ;;  %v5785_v48 = vor.u32 %v8085_v41, %v5784_v36  ;;  %v5977_v49 = vor.u32 %v8133_v52, %v5976_v45  ;;  %v5904_v36 = vld [vmem:[#allocation4 + $0x340] sm:$0xf]  ;;  %v8163_v45 = vld [vmem:[#allocation4 + $0x4d4] sm:$0xf0] }
 0x1b5   : > { %4431 = vmatpush.bf16.msrb.mxu1 %v7221_v54  ;;  %v4213_v54 = vadd.f32 %v4212_v47, %v9184_v5  ;;  %v6096_v41 = vld [vmem:[#allocation4 + $0x4c0] sm:$0xf] }
 0x1b6   : > { %4444 = vmatpush.bf16.msrb.mxu2 %v7413_v55  ;;  %v4225_v55 = vpop.f32.mrf.mxu1  ;;  %v6097_v53 = vor.u32 %v8163_v45, %v6096_v41  ;;  %v6768_v41 = vld [vmem:[#allocation4 + $0xa00] sm:$0xf]  ;;  %v8331_v45 = vld [vmem:[#allocation4 + $0xa14] sm:$0xf0] }
 0x1b7   : > { %4457 = vmatpush.bf16.msrb.mxu3 %v7605_v58  ;;  %4419 = vmatmul.bf16.vlgmr.msrb.gmra.mxu0 %v9117_v18  ;;  %v5952_v58 = vld [vmem:[#allocation4 + $0x3a0] sm:$0xf]  ;;  %v4226_v63 = vadd.f32 %v4225_v55, %v4213_v54  ;;  %v8109_v54 = vld [vmem:[#allocation4 + $0x324] sm:$0xf0]  ;;  %v6072_v55 = vld [vmem:[#allocation4 + $0x490] sm:$0xf] }
 0x1b8   : > { %4463 = vmatpush.bf16.msra.mxu0 %v5665_v59  ;;  %4432 = vmatmul.bf16.vlgmr.msrb.gmra.mxu1 %v9121_v23  ;;  %v8127_v59 = vld [vmem:[#allocation4 + $0x3b4] sm:$0xf0] }
 0x1b9   : > { %4476 = vmatpush.bf16.msra.mxu1 %v5857_v60  ;;  %4445 = vmatmul.bf16.vlgmr.msrb.gmra.mxu2 %v9119_v22  ;;  %v6144_v60 = vld [vmem:[#allocation4 + $0x520] sm:$0xf] }
 0x1ba   : > { %4489 = vmatpush.bf16.msra.mxu2 %v6049_v62  ;;  %4458 = vmatmul.bf16.vlgmr.msrb.gmra.mxu3 %v9123_v27  ;;  %v8175_v62 = vld [vmem:[#allocation4 + $0x534] sm:$0xf0] }
 0x1bb   : > { %4502 = vmatpush.bf16.msra.mxu3 %v6241_v2  ;;  %v5953_v2 = vor.u32 %v8127_v59, %v5952_v58  ;;  %v6145_v5 = vor.u32 %v8175_v62, %v6144_v60  ;;  %v6432_v58 = vld [vmem:[#allocation4 + $0x760] sm:$0xf]  ;;  %v8247_v59 = vld [vmem:[#allocation4 + $0x774] sm:$0xf0]  ;;  %v5497_v62 = vor.u32 %v8013_v44, %v5496_v42 }
 0x1bc   : > { %4464 = vmatpush.bf16.msra.mxu0 %v5641_v35  ;;  %v4238_v7 = vpop.f32.mrf.mxu2  ;;  %v5928_v35 = vld [vmem:[#allocation4 + $0x370] sm:$0xf]  ;;  %v4214_v19 = vpop.f32.mrf.mxu0  ;;  %v6624_v60 = vld [vmem:[#allocation4 + $0x8e0] sm:$0xf]  ;;  %v8379_v42 = vld [vmem:[#allocation4 + $0xb94] sm:$0xf0] }
 0x1bd   : > { %4477 = vmatpush.bf16.msra.mxu1 %v5833_v20  ;;  %v8121_v20 = vld [vmem:[#allocation4 + $0x384] sm:$0xf0]  ;;  %v4251_v11 = vpop.f32.mrf.mxu3 }
 0x1be   : > { %4490 = vmatpush.bf16.msra.mxu2 %v6025_v10  ;;  %v4239_v10 = vadd.f32 %v4238_v7, %v4226_v63  ;;  %v5929_v24 = vor.u32 %v8121_v20, %v5928_v35  ;;  %v8295_v63 = vld [vmem:[#allocation4 + $0x8f4] sm:$0xf0]  ;;  %v6408_v20 = vld [vmem:[#allocation4 + $0x730] sm:$0xf]  ;;  %v8337_v19 = vld [vmem:[#allocation4 + $0xa44] sm:$0xf0] }
 0x1bf   : > { %4503 = vmatpush.bf16.msra.mxu3 %v6217_v16  ;;  %v5545_v16 = vor.u32 %v8025_v4, %v5544_v3  ;;  %v5881_v3 = vor.u32 %v8109_v54, %v5880_v50  ;;  %v7008_v4 = vld [vmem:[#allocation4 + $0xbe0] sm:$0xf]  ;;  %v6625_v43 = vor.u32 %v8295_v63, %v6624_v60  ;;  %v6552_v50 = vld [vmem:[#allocation4 + $0x850] sm:$0xf] }
 0x1c0   : > { %4465 = vmatpush.bf16.msra.mxu0 %v5617_v28  ;;  %v9191_v17 = vadd.f32 %v4251_v11, %v4239_v10  ;;  %v8019_v28 = vld [vmem:[#allocation4 + $0x54] sm:$0xf0]  ;;  %v8241_v10 = vld [vmem:[#allocation4 + $0x744] sm:$0xf0]  ;;  %v6600_v11 = vld [vmem:[#allocation4 + $0x8b0] sm:$0xf]  ;;  %v7009_v12 = vor.u32 %v8391_v6, %v7008_v4 }
 0x1c1   : > { %4478 = vmatpush.bf16.msra.mxu1 %v5809_v29  ;;  %v5712_v29 = vld [vmem:[#allocation4 + $0x1c0] sm:$0xf]  ;;  %v5521_v52 = vor.u32 %v8019_v28, %v5520_v26  ;;  %v6409_v26 = vor.u32 %v8241_v10, %v6408_v20  ;;  %v6601_v28 = vor.u32 %v8289_v13, %v6600_v11  ;;  %v6744_v54 = vld [vmem:[#allocation4 + $0x9d0] sm:$0xf]  ;;  %v8367_v20 = vld [vmem:[#allocation4 + $0xb34] sm:$0xf0] }
 0x1c2   : > { %4491 = vmatpush.bf16.msra.mxu2 %v6001_v30  ;;  %v4227_v30 = vpop.f32.mrf.mxu1  ;;  %v8217_v13 = vld [vmem:[#allocation4 + $0x684] sm:$0xf0] }
 0x1c3   : > { %4504 = vmatpush.bf16.msra.mxu3 %v6193_v39  ;;  %v8115_v39 = vld [vmem:[#allocation4 + $0x354] sm:$0xf0]  ;;  %v6384_v30 = vld [vmem:[#allocation4 + $0x700] sm:$0xf] }
 0x1c4   : > { %4466 = vmatpush.bf16.msra.mxu0 %v5593_v46  ;;  %v5713_v46 = vor.u32 %v8067_v32, %v5712_v29  ;;  %v5905_v47 = vor.u32 %v8115_v39, %v5904_v36  ;;  %v4240_v51 = vpop.f32.mrf.mxu2  ;;  %v6576_v32 = vld [vmem:[#allocation4 + $0x880] sm:$0xf]  ;;  %v8283_v39 = vld [vmem:[#allocation4 + $0x894] sm:$0xf0] }
 0x1c5   : > { %4479 = vmatpush.bf16.msra.mxu1 %v5785_v48  ;;  %v5688_v48 = vld [vmem:[#allocation4 + $0x190] sm:$0xf]  ;;  %v4253_v57 = vpop.f32.mrf.mxu3 }
 0x1c6   : > { %4492 = vmatpush.bf16.msra.mxu2 %v5977_v49  ;;  %v8061_v49 = vld [vmem:[#allocation4 + $0x1a4] sm:$0xf0]  ;;  %v6936_v57 = vld [vmem:[#allocation4 + $0xb50] sm:$0xf] }
 0x1c7   : > { %4505 = vmatpush.bf16.msra.mxu3 %v6169_v56  ;;  %v8157_v56 = vld [vmem:[#allocation4 + $0x4a4] sm:$0xf0] }
 0x1c8   : > { %4467 = vmatpush.bf16.msra.mxu0 %v5569_v0  ;;  %v6816_v0 = vld [vmem:[#allocation4 + $0xa60] sm:$0xf]  ;;  %v6073_v7 = vor.u32 %v8157_v56, %v6072_v55  ;;  %v8325_v55 = vld [vmem:[#allocation4 + $0x9e4] sm:$0xf0] }
 0x1c9   : > { %4480 = vmatpush.bf16.msra.mxu1 %v5761_v1  ;;  %v8343_v1 = vld [vmem:[#allocation4 + $0xa74] sm:$0xf0] }
 0x1ca   : > { %4493 = vmatpush.bf16.msra.mxu2 %v5953_v2  ;;  %v5689_v2 = vor.u32 %v8061_v49, %v5688_v48  ;;  %v6817_v35 = vor.u32 %v8343_v1, %v6816_v0  ;;  %v6360_v48 = vld [vmem:[#allocation4 + $0x6d0] sm:$0xf]  ;;  %v8229_v49 = vld [vmem:[#allocation4 + $0x6e4] sm:$0xf0]  ;;  %v6745_v0 = vor.u32 %v8325_v55, %v6744_v54  ;;  %v6336_v1 = vld [vmem:[#allocation4 + $0x6a0] sm:$0xf] }
 0x1cb   : > { %4506 = vmatpush.bf16.msra.mxu3 %v6145_v5  ;;  %v6433_v5 = vor.u32 %v8247_v59, %v6432_v58  ;;  %v8373_v58 = vld [vmem:[#allocation4 + $0xb64] sm:$0xf0]  ;;  %v6361_v60 = vor.u32 %v8229_v49, %v6360_v48  ;;  %v8259_v49 = vld [vmem:[#allocation4 + $0x7d4] sm:$0xf0] }
 0x1cc   : > { %4468 = vmatpush.bf16.msra.mxu0 %v5545_v16  ;;  %v6792_v16 = vld [vmem:[#allocation4 + $0xa30] sm:$0xf]  ;;  %v6937_v4 = vor.u32 %v8373_v58, %v6936_v57  ;;  %v8355_v54 = vld [vmem:[#allocation4 + $0xad4] sm:$0xf0]  ;;  %v8205_v57 = vld [vmem:[#allocation4 + $0x624] sm:$0xf0] }
 0x1cd   : > { %4481 = vmatpush.bf16.msra.mxu1 %v5737_v21  ;;  %v6984_v21 = vld [vmem:[#allocation4 + $0xbb0] sm:$0xf]  ;;  %v6793_v29 = vor.u32 %v8337_v19, %v6792_v16 }
 0x1ce   : > { %4494 = vmatpush.bf16.msra.mxu2 %v5929_v24  ;;  %v8385_v24 = vld [vmem:[#allocation4 + $0xbc4] sm:$0xf0]  ;;  %v6504_v16 = vld [vmem:[#allocation4 + $0x7f0] sm:$0xf] }
 0x1cf   : > { %4507 = vmatpush.bf16.msra.mxu3 %v6121_v31  ;;  %v8235_v31 = vld [vmem:[#allocation4 + $0x714] sm:$0xf0]  ;;  %v6985_v36 = vor.u32 %v8385_v24, %v6984_v21  ;;  %v8265_v24 = vld [vmem:[#allocation4 + $0x804] sm:$0xf0] }
 0x1d0   : > { %4469 = vmatpush.bf16.msra.mxu0 %v5521_v52  ;;  %v6960_v52 = vld [vmem:[#allocation4 + $0xb80] sm:$0xf]  ;;  %v6385_v44 = vor.u32 %v8235_v31, %v6384_v30  ;;  %v6888_v31 = vld [vmem:[#allocation4 + $0xaf0] sm:$0xf] }
 0x1d1   : > { %4482 = vmatpush.bf16.msra.mxu1 %v5713_v46  ;;  %v6577_v46 = vor.u32 %v8283_v39, %v6576_v32  ;;  %v6961_v51 = vor.u32 %v8379_v42, %v6960_v52  ;;  %v8361_v32 = vld [vmem:[#allocation4 + $0xb04] sm:$0xf0]  ;;  %v6505_v52 = vor.u32 %v8265_v24, %v6504_v16  ;;  %v8583_v16 = vld [vmem:[#allocation4 + $0x11f4] sm:$0xf0] }
 0x1d2   : > { %4495 = vmatpush.bf16.msra.mxu2 %v5905_v47  ;;  %v6769_v47 = vor.u32 %v8331_v45, %v6768_v41  ;;  %v6889_v48 = vor.u32 %v8361_v32, %v6888_v31  ;;  %v8481_v32 = vld [vmem:[#allocation4 + $0xec4] sm:$0xf0] }
 0x1d3   : > { %4508 = vmatpush.bf16.msra.mxu3 %v6097_v53  ;;  %v8277_v53 = vld [vmem:[#allocation4 + $0x864] sm:$0xf0] }
 0x1d4   : > { %4470 = vmatpush.bf16.msra.mxu0 %v5497_v62  ;;  %v4264_v56 = vpop.f32.mrf.mxu0  ;;  %v6553_v63 = vor.u32 %v8277_v53, %v6552_v50  ;;  %v6672_v50 = vld [vmem:[#allocation4 + $0x940] sm:$0xf] }
 0x1d5   : > { %4483 = vmatpush.bf16.msra.mxu1 %v5689_v2  ;;  %v4265_v59 = vadd.f32 %v4264_v56, %v9191_v17  ;;  %v4277_v62 = vpop.f32.mrf.mxu1  ;;  %v8223_v2 = vld [vmem:[#allocation4 + $0x6b4] sm:$0xf0]  ;;  %v6864_v53 = vld [vmem:[#allocation4 + $0xac0] sm:$0xf]  ;;  %v6264_v56 = vld [vmem:[#allocation4 + $0x610] sm:$0xf] }
 0x1d6   : > { %4496 = vmatpush.bf16.msra.mxu2 %v5881_v3  ;;  %v6528_v3 = vld [vmem:[#allocation4 + $0x820] sm:$0xf]  ;;  %v6337_v10 = vor.u32 %v8223_v2, %v6336_v1  ;;  %v8301_v1 = vld [vmem:[#allocation4 + $0x924] sm:$0xf0]  ;;  %v6840_v2 = vld [vmem:[#allocation4 + $0xa90] sm:$0xf] }
 0x1d7   : > { %4509 = vmatpush.bf16.msra.mxu3 %v6073_v7  ;;  %4471 = vmatmul.bf16.vlgmr.msra.gmra.mxu0 %v9085_v9  ;;  %v4278_v6 = vadd.f32 %v4277_v62, %v4265_v59  ;;  %v8271_v7 = vld [vmem:[#allocation4 + $0x834] sm:$0xf0]  ;;  %v8253_v62 = vld [vmem:[#allocation4 + $0x7a4] sm:$0xf0] }
 0x1d8   : > { %4515 = vmatpush.bf16.msrb.mxu0 %v6433_v5  ;;  %4484 = vmatmul.bf16.vlgmr.msra.gmra.mxu1 %v9094_v25  ;;  %v6720_v5 = vld [vmem:[#allocation4 + $0x9a0] sm:$0xf]  ;;  %v6529_v17 = vor.u32 %v8271_v7, %v6528_v3  ;;  %v8349_v3 = vld [vmem:[#allocation4 + $0xaa4] sm:$0xf0]  ;;  %v8439_v7 = vld [vmem:[#allocation4 + $0xd74] sm:$0xf0] }
 0x1d9   : > { %4528 = vmatpush.bf16.msrb.mxu1 %v6625_v43  ;;  %4497 = vmatmul.bf16.vlgmr.msra.gmra.mxu2 %v9083_v8  ;;  %v8319_v43 = vld [vmem:[#allocation4 + $0x9b4] sm:$0xf0] }
 0x1da   : > { %4541 = vmatpush.bf16.msrb.mxu2 %v6817_v35  ;;  %4510 = vmatmul.bf16.vlgmr.msra.gmra.mxu3 %v9088_v15  ;;  %v6912_v35 = vld [vmem:[#allocation4 + $0xb20] sm:$0xf]  ;;  %v6721_v11 = vor.u32 %v8319_v43, %v6720_v5 }
 0x1db   : > { %4554 = vmatpush.bf16.msrb.mxu3 %v7009_v12  ;;  %v6312_v12 = vld [vmem:[#allocation4 + $0x670] sm:$0xf]  ;;  %v6913_v19 = vor.u32 %v8367_v20, %v6912_v35  ;;  %v7392_v5 = vld [vmem:[#allocation4 + $0xee0] sm:$0xf]  ;;  %v6265_v35 = vor.u32 %v8205_v57, %v6264_v56  ;;  %v8487_v20 = vld [vmem:[#allocation4 + $0xef4] sm:$0xf0] }
 0x1dc   : > { %4516 = vmatpush.bf16.msrb.mxu0 %v6409_v26  ;;  %v4290_v21 = vpop.f32.mrf.mxu2  ;;  %v6696_v26 = vld [vmem:[#allocation4 + $0x970] sm:$0xf]  ;;  %v6313_v39 = vor.u32 %v8217_v13, %v6312_v12  ;;  %v7776_v13 = vld [vmem:[#allocation4 + $0x11e0] sm:$0xf]  ;;  %v7393_v24 = vor.u32 %v8487_v20, %v7392_v5  ;;  %v8571_v56 = vld [vmem:[#allocation4 + $0x1194] sm:$0xf0] }
 0x1dd   : > { %4529 = vmatpush.bf16.msrb.mxu1 %v6601_v28  ;;  %v8313_v28 = vld [vmem:[#allocation4 + $0x984] sm:$0xf0]  ;;  %v4303_v30 = vpop.f32.mrf.mxu3  ;;  %v4279_v41 = vpop.f32.mrf.mxu1  ;;  %v7777_v31 = vor.u32 %v8583_v16, %v7776_v13  ;;  %v8463_v16 = vld [vmem:[#allocation4 + $0xe34] sm:$0xf0] }
 0x1de   : > { %4542 = vmatpush.bf16.msrb.mxu2 %v6793_v29  ;;  %v4291_v29 = vadd.f32 %v4290_v21, %v4278_v6  ;;  %v6697_v42 = vor.u32 %v8313_v28, %v6696_v26  ;;  %v7200_v6 = vld [vmem:[#allocation4 + $0xd60] sm:$0xf]  ;;  %v7176_v28 = vld [vmem:[#allocation4 + $0xd30] sm:$0xf] }
 0x1df   : > { %4555 = vmatpush.bf16.msrb.mxu3 %v6985_v36  ;;  %v4266_v36 = vpop.f32.mrf.mxu0  ;;  %v7201_v21 = vor.u32 %v8439_v7, %v7200_v6  ;;  %v7752_v41 = vld [vmem:[#allocation4 + $0x11b0] sm:$0xf]  ;;  %v8565_v7 = vld [vmem:[#allocation4 + $0x1164] sm:$0xf0] }
 0x1e0   : > { %4517 = vmatpush.bf16.msrb.mxu0 %v6385_v44  ;;  %v9198_v45 = vadd.f32 %v4303_v30, %v4291_v29  ;;  %v6288_v44 = vld [vmem:[#allocation4 + $0x640] sm:$0xf]  ;;  %v8433_v29 = vld [vmem:[#allocation4 + $0xd44] sm:$0xf0]  ;;  %v7368_v30 = vld [vmem:[#allocation4 + $0xeb0] sm:$0xf] }
 0x1e1   : > { %4530 = vmatpush.bf16.msrb.mxu1 %v6577_v46  ;;  %v8211_v46 = vld [vmem:[#allocation4 + $0x654] sm:$0xf0]  ;;  %v7560_v36 = vld [vmem:[#allocation4 + $0x1030] sm:$0xf] }
 0x1e2   : > { %4543 = vmatpush.bf16.msrb.mxu2 %v6769_v47  ;;  %v6480_v47 = vld [vmem:[#allocation4 + $0x7c0] sm:$0xf]  ;;  %v6289_v55 = vor.u32 %v8211_v46, %v6288_v44  ;;  %v7369_v44 = vor.u32 %v8481_v32, %v7368_v30  ;;  %v7704_v6 = vld [vmem:[#allocation4 + $0x1150] sm:$0xf] }
 0x1e3   : > { %4556 = vmatpush.bf16.msrb.mxu3 %v6961_v51  ;;  %v8307_v51 = vld [vmem:[#allocation4 + $0x954] sm:$0xf0]  ;;  %v6481_v58 = vor.u32 %v8259_v49, %v6480_v47  ;;  %v7152_v47 = vld [vmem:[#allocation4 + $0xd00] sm:$0xf]  ;;  %v7080_v32 = vld [vmem:[#allocation4 + $0xc70] sm:$0xf] }
 0x1e4   : > { %4518 = vmatpush.bf16.msrb.mxu0 %v6361_v60  ;;  %v6673_v59 = vor.u32 %v8307_v51, %v6672_v50  ;;  %v6456_v60 = vld [vmem:[#allocation4 + $0x790] sm:$0xf]  ;;  %v7344_v49 = vld [vmem:[#allocation4 + $0xe80] sm:$0xf]  ;;  %v8475_v51 = vld [vmem:[#allocation4 + $0xe94] sm:$0xf0] }
 0x1e5   : > { %4531 = vmatpush.bf16.msrb.mxu1 %v6553_v63  ;;  %v6648_v63 = vld [vmem:[#allocation4 + $0x910] sm:$0xf]  ;;  %v4305_v43 = vpop.f32.mrf.mxu3 }
 0x1e6   : > { %4544 = vmatpush.bf16.msrb.mxu2 %v6745_v0  ;;  %v6865_v0 = vor.u32 %v8355_v54, %v6864_v53  ;;  %v6649_v12 = vor.u32 %v8301_v1, %v6648_v63  ;;  %v7536_v53 = vld [vmem:[#allocation4 + $0x1000] sm:$0xf]  ;;  %v8523_v54 = vld [vmem:[#allocation4 + $0x1014] sm:$0xf0]  ;;  %v7320_v63 = vld [vmem:[#allocation4 + $0xe50] sm:$0xf] }
 0x1e7   : > { %4557 = vmatpush.bf16.msrb.mxu3 %v6937_v4  ;;  %v4292_v4 = vpop.f32.mrf.mxu2 }
 0x1e8   : > { %4519 = vmatpush.bf16.msrb.mxu0 %v6337_v10  ;;  %v7584_v10 = vld [vmem:[#allocation4 + $0x1060] sm:$0xf]  ;;  %v8517_v4 = vld [vmem:[#allocation4 + $0xfe4] sm:$0xf0] }
 0x1e9   : > { %4532 = vmatpush.bf16.msrb.mxu1 %v6529_v17  ;;  %v8535_v17 = vld [vmem:[#allocation4 + $0x1074] sm:$0xf0] }
 0x1ea   : > { %4545 = vmatpush.bf16.msrb.mxu2 %v6721_v11  ;;  %v6457_v11 = vor.u32 %v8253_v62, %v6456_v60  ;;  %v7585_v26 = vor.u32 %v8535_v17, %v7584_v10  ;;  %v7537_v60 = vor.u32 %v8523_v54, %v7536_v53  ;;  %v8421_v62 = vld [vmem:[#allocation4 + $0xce4] sm:$0xf0]  ;;  %v7104_v10 = vld [vmem:[#allocation4 + $0xca0] sm:$0xf]  ;;  %v8415_v17 = vld [vmem:[#allocation4 + $0xcb4] sm:$0xf0] }
 0x1eb   : > { %4558 = vmatpush.bf16.msrb.mxu3 %v6913_v19  ;;  %v6841_v19 = vor.u32 %v8349_v3, %v6840_v2  ;;  %v8469_v2 = vld [vmem:[#allocation4 + $0xe64] sm:$0xf0]  ;;  %v7512_v3 = vld [vmem:[#allocation4 + $0xfd0] sm:$0xf] }
 0x1ec   : > { %4520 = vmatpush.bf16.msrb.mxu0 %v6313_v39  ;;  %v8529_v39 = vld [vmem:[#allocation4 + $0x1044] sm:$0xf0]  ;;  %v7513_v20 = vor.u32 %v8517_v4, %v7512_v3  ;;  %v8547_v3 = vld [vmem:[#allocation4 + $0x10d4] sm:$0xf0] }
 0x1ed   : > { %4533 = vmatpush.bf16.msrb.mxu1 %v6505_v52  ;;  %v8577_v52 = vld [vmem:[#allocation4 + $0x11c4] sm:$0xf0]  ;;  %v7561_v46 = vor.u32 %v8529_v39, %v7560_v36  ;;  %v7272_v39 = vld [vmem:[#allocation4 + $0xdf0] sm:$0xf] }
 0x1ee   : > { %4546 = vmatpush.bf16.msrb.mxu2 %v6697_v42  ;;  %v7177_v42 = vor.u32 %v8433_v29, %v7176_v28  ;;  %v7753_v50 = vor.u32 %v8577_v52, %v7752_v41  ;;  %v7105_v29 = vor.u32 %v8415_v17, %v7104_v10  ;;  %v8409_v36 = vld [vmem:[#allocation4 + $0xc84] sm:$0xf0]  ;;  %v7416_v10 = vld [vmem:[#allocation4 + $0xf10] sm:$0xf] }
 0x1ef   : > { %4559 = vmatpush.bf16.msrb.mxu3 %v6889_v48  ;;  %v8427_v48 = vld [vmem:[#allocation4 + $0xd14] sm:$0xf0] }
 0x1f0   : > { %4521 = vmatpush.bf16.msrb.mxu0 %v6289_v55  ;;  %v7728_v55 = vld [vmem:[#allocation4 + $0x1180] sm:$0xf]  ;;  %v7153_v57 = vor.u32 %v8427_v48, %v7152_v47 }
 0x1f1   : > { %4534 = vmatpush.bf16.msrb.mxu1 %v6481_v58  ;;  %v7128_v58 = vld [vmem:[#allocation4 + $0xcd0] sm:$0xf]  ;;  %v7729_v1 = vor.u32 %v8571_v56, %v7728_v55 }
 0x1f2   : > { %4547 = vmatpush.bf16.msrb.mxu2 %v6673_v59  ;;  %v7345_v59 = vor.u32 %v8475_v51, %v7344_v49  ;;  %v7129_v5 = vor.u32 %v8421_v62, %v7128_v58  ;;  %v7656_v49 = vld [vmem:[#allocation4 + $0x10f0] sm:$0xf]  ;;  %v7081_v51 = vor.u32 %v8409_v36, %v7080_v32  ;;  %v8403_v58 = vld [vmem:[#allocation4 + $0xc54] sm:$0xf0]  ;;  %v8196_v36 = vld [vmem:[#allocation4 + $0x5e4] sm:$0xf] }
 0x1f3   : > { %4560 = vmatpush.bf16.msrb.mxu3 %v6865_v0  ;;  %v950_v0 = vperm.slane %v9181_v14, 3  ;;  %v7705_v14 = vor.u32 %v8565_v7, %v7704_v6  ;;  %v7032_v6 = vld [vmem:[#allocation4 + $0xc10] sm:$0xf]  ;;  %v8397_v7 = vld [vmem:[#allocation4 + $0xc24] sm:$0xf0] }
 0x1f4   : > { %4522 = vmatpush.bf16.msrb.mxu0 %v6265_v35  ;;  %v4316_v43 = vpop.f32.mrf.mxu0  ;;  %v7321_v35 = vor.u32 %v8469_v2, %v7320_v63  ;;  %v8451_v63 = vld [vmem:[#allocation4 + $0xdd4] sm:$0xf0]  ;;  %v7632_v2 = vld [vmem:[#allocation4 + $0x10c0] sm:$0xf] }
 0x1f5   : > { %4535 = vmatpush.bf16.msrb.mxu1 %v6457_v11  ;;  %v7296_v11 = vld [vmem:[#allocation4 + $0xe20] sm:$0xf]  ;;  %v4329_v13 = vpop.f32.mrf.mxu1 }
 0x1f6   : > { %4548 = vmatpush.bf16.msrb.mxu2 %v6649_v12  ;;  %v4317_v12 = vadd.f32 %v4316_v43, %v950_v0  ;;  %v7297_v30 = vor.u32 %v8463_v16, %v7296_v11  ;;  %v7440_v0 = vld [vmem:[#allocation4 + $0xf40] sm:$0xf]  ;;  %v7633_v11 = vor.u32 %v8547_v3, %v7632_v2  ;;  %v8136_v2 = vld [vmem:[#allocation4 + $0x404] sm:$0xf]  ;;  %v6002_v3 = vld [vmem:[#allocation4 + $0x418] sm:$0xf0] }
 0x1f7   : > { %4561 = vmatpush.bf16.msrb.mxu3 %v6841_v19  ;;  %4523 = vmatmul.bf16.vlgmr.msrb.gmra.mxu0 %v9103_v37  ;;  %v7488_v19 = vld [vmem:[#allocation4 + $0xfa0] sm:$0xf] }
 0x1f8   : > { %4567 = vmatpush.bf16.msra.mxu0 %v7201_v21  ;;  %4536 = vmatmul.bf16.vlgmr.msrb.gmra.mxu1 %v9107_v40  ;;  %v8511_v21 = vld [vmem:[#allocation4 + $0xfb4] sm:$0xf0]  ;;  %v4330_v28 = vadd.f32 %v4329_v13, %v4317_v12  ;;  %v8493_v12 = vld [vmem:[#allocation4 + $0xf24] sm:$0xf0]  ;;  %v7608_v13 = vld [vmem:[#allocation4 + $0x1090] sm:$0xf] }
 0x1f9   : > { %4580 = vmatpush.bf16.msra.mxu1 %v7393_v24  ;;  %4549 = vmatmul.bf16.vlgmr.msrb.gmra.mxu2 %v9101_v34  ;;  %v7680_v24 = vld [vmem:[#allocation4 + $0x1120] sm:$0xf]  ;;  %v7417_v32 = vor.u32 %v8493_v12, %v7416_v10  ;;  %v8082_v10 = vld [vmem:[#allocation4 + $0x254] sm:$0xf] }
 0x1fa   : > { %4593 = vmatpush.bf16.msra.mxu2 %v7585_v26  ;;  %4562 = vmatmul.bf16.vlgmr.msrb.gmra.mxu3 %v9105_v38  ;;  %v8559_v26 = vld [vmem:[#allocation4 + $0x1134] sm:$0xf0]  ;;  %v8130_v12 = vld [vmem:[#allocation4 + $0x3d4] sm:$0xf] }
 0x1fb   : > { %4606 = vmatpush.bf16.msra.mxu3 %v7777_v31  ;;  %v7489_v31 = vor.u32 %v8511_v21, %v7488_v19  ;;  %v7681_v52 = vor.u32 %v8559_v26, %v7680_v24  ;;  %v8052_v19 = vld [vmem:[#allocation4 + $0x164] sm:$0xf]  ;;  %v5666_v21 = vld [vmem:[#allocation4 + $0x178] sm:$0xf0]  ;;  %v7033_v26 = vor.u32 %v8397_v7, %v7032_v6 }
 0x1fc   : > { %4568 = vmatpush.bf16.msra.mxu0 %v7177_v42  ;;  %v4342_v41 = vpop.f32.mrf.mxu2  ;;  %v8457_v42 = vld [vmem:[#allocation4 + $0xe04] sm:$0xf0]  ;;  %v4318_v54 = vpop.f32.mrf.mxu0  ;;  %v8100_v24 = vld [vmem:[#allocation4 + $0x2e4] sm:$0xf]  ;;  %v6194_v6 = vld [vmem:[#allocation4 + $0x598] sm:$0xf0] }
 0x1fd   : > { %4581 = vmatpush.bf16.msra.mxu1 %v7369_v44  ;;  %v7464_v44 = vld [vmem:[#allocation4 + $0xf70] sm:$0xf]  ;;  %v4343_v47 = vadd.f32 %v4342_v41, %v4330_v28  ;;  %v4355_v48 = vpop.f32.mrf.mxu3  ;;  %v7273_v55 = vor.u32 %v8457_v42, %v7272_v39  ;;  %v5858_v28 = vld [vmem:[#allocation4 + $0x2f8] sm:$0xf0]  ;;  %v6026_v54 = vld [vmem:[#allocation4 + $0x448] sm:$0xf0] }
 0x1fe   : > { %4594 = vmatpush.bf16.msra.mxu2 %v7561_v46  ;;  %v8505_v46 = vld [vmem:[#allocation4 + $0xf84] sm:$0xf0]  ;;  %v6242_v39 = vld [vmem:[#allocation4 + $0x5f8] sm:$0xf0]  ;;  %v5861_v42 = vor.u32 %v8100_v24, %v5858_v28  ;;  %v8028_v28 = vld [vmem:[#allocation4 + $0xa4] sm:$0xf] }
 0x1ff   : > { %4607 = vmatpush.bf16.msra.mxu3 %v7753_v50  ;;  %v8553_v50 = vld [vmem:[#allocation4 + $0x1104] sm:$0xf0]  ;;  %v9205_v53 = vadd.f32 %v4355_v48, %v4343_v47  ;;  %v7465_v56 = vor.u32 %v8505_v46, %v7464_v44  ;;  %v8046_v46 = vld [vmem:[#allocation4 + $0x134] sm:$0xf]  ;;  %v5642_v47 = vld [vmem:[#allocation4 + $0x148] sm:$0xf0] }
 0x200   : > { %4569 = vmatpush.bf16.msra.mxu0 %v7153_v57  ;;  %v7056_v57 = vld [vmem:[#allocation4 + $0xc40] sm:$0xf]  ;;  %v7657_v62 = vor.u32 %v8553_v50, %v7656_v49  ;;  %v8094_v48 = vld [vmem:[#allocation4 + $0x2b4] sm:$0xf]  ;;  %v6245_v49 = vor.u32 %v8196_v36, %v6242_v39  ;;  %v5834_v50 = vld [vmem:[#allocation4 + $0x2c8] sm:$0xf0] }
 0x201   : > { %4582 = vmatpush.bf16.msra.mxu1 %v7345_v59  ;;  %v7248_v59 = vld [vmem:[#allocation4 + $0xdc0] sm:$0xf]  ;;  %v7057_v4 = vor.u32 %v8403_v58, %v7056_v57  ;;  %v5645_v57 = vor.u32 %v8046_v46, %v5642_v47  ;;  %v5837_v58 = vor.u32 %v8094_v48, %v5834_v50  ;;  %v5762_v39 = vld [vmem:[#allocation4 + $0x238] sm:$0xf0]  ;;  %v8022_v50 = vld [vmem:[#allocation4 + $0x74] sm:$0xf] }
 0x202   : > { %4595 = vmatpush.bf16.msra.mxu2 %v7537_v60  ;;  %v4331_v60 = vpop.f32.mrf.mxu1 }
 0x203   : > { %4608 = vmatpush.bf16.msra.mxu3 %v7729_v1  ;;  %v8499_v1 = vld [vmem:[#allocation4 + $0xf54] sm:$0xf0]  ;;  %v8040_v60 = vld [vmem:[#allocation4 + $0x104] sm:$0xf] }
 0x204   : > { %4570 = vmatpush.bf16.msra.mxu0 %v7129_v5  ;;  %v7249_v5 = vor.u32 %v8451_v63, %v7248_v59  ;;  %v7441_v43 = vor.u32 %v8499_v1, %v7440_v0  ;;  %v4344_v17 = vpop.f32.mrf.mxu2  ;;  %v8088_v63 = vld [vmem:[#allocation4 + $0x284] sm:$0xf]  ;;  %v5810_v1 = vld [vmem:[#allocation4 + $0x298] sm:$0xf0] }
 0x205   : > { %4583 = vmatpush.bf16.msra.mxu1 %v7321_v35  ;;  %v7224_v35 = vld [vmem:[#allocation4 + $0xd90] sm:$0xf]  ;;  %v4357_v16 = vpop.f32.mrf.mxu3 }
 0x206   : > { %4596 = vmatpush.bf16.msra.mxu2 %v7513_v20  ;;  %v8445_v20 = vld [vmem:[#allocation4 + $0xda4] sm:$0xf0]  ;;  %v6170_v16 = vld [vmem:[#allocation4 + $0x568] sm:$0xf0] }
 0x207   : > { %4609 = vmatpush.bf16.msra.mxu3 %v7705_v14  ;;  %v8541_v14 = vld [vmem:[#allocation4 + $0x10a4] sm:$0xf0] }
 0x208   : > { %4571 = vmatpush.bf16.msra.mxu0 %v7105_v29  ;;  %v8148_v29 = vld [vmem:[#allocation4 + $0x464] sm:$0xf]  ;;  %v7609_v41 = vor.u32 %v8541_v14, %v7608_v13  ;;  %v5978_v13 = vld [vmem:[#allocation4 + $0x3e8] sm:$0xf0]  ;;  %v8178_v14 = vld [vmem:[#allocation4 + $0x554] sm:$0xf] }
 0x209   : > { %4584 = vmatpush.bf16.msra.mxu1 %v7297_v30  ;;  %v6050_v30 = vld [vmem:[#allocation4 + $0x478] sm:$0xf0]  ;;  %v6173_v36 = vor.u32 %v8178_v14, %v6170_v16  ;;  %v8010_v14 = vld [vmem:[#allocation4 + $0x14] sm:$0xf]  ;;  %v5498_v16 = vld [vmem:[#allocation4 + $0x28] sm:$0xf0] }
 0x20a   : > { %4597 = vmatpush.bf16.msra.mxu2 %v7489_v31  ;;  %v7225_v31 = vor.u32 %v8445_v20, %v7224_v35  ;;  %v6053_v44 = vor.u32 %v8148_v29, %v6050_v30  ;;  %v8034_v35 = vld [vmem:[#allocation4 + $0xd4] sm:$0xf]  ;;  %v5594_v20 = vld [vmem:[#allocation4 + $0xe8] sm:$0xf0]  ;;  %v5570_v29 = vld [vmem:[#allocation4 + $0xb8] sm:$0xf0] }
 0x20b   : > { %4610 = vmatpush.bf16.msra.mxu3 %v7681_v52  ;;  %v5669_v52 = vor.u32 %v8052_v19, %v5666_v21  ;;  %v5597_v19 = vor.u32 %v8034_v35, %v5594_v20  ;;  %v8076_v30 = vld [vmem:[#allocation4 + $0x224] sm:$0xf]  ;;  %v5573_v47 = vor.u32 %v8028_v28, %v5570_v29  ;;  %v5714_v20 = vld [vmem:[#allocation4 + $0x1d8] sm:$0xf0]  ;;  %v8106_v28 = vld [vmem:[#allocation4 + $0x314] sm:$0xf] }
 0x20c   : > { %4572 = vmatpush.bf16.msra.mxu0 %v7081_v51  ;;  %v8142_v51 = vld [vmem:[#allocation4 + $0x434] sm:$0xf]  ;;  %v5765_v48 = vor.u32 %v8076_v30, %v5762_v39 }
 0x20d   : > { %4585 = vmatpush.bf16.msra.mxu1 %v7273_v55  ;;  %v8190_v55 = vld [vmem:[#allocation4 + $0x5b4] sm:$0xf]  ;;  %v6029_v59 = vor.u32 %v8142_v51, %v6026_v54  ;;  %v5546_v51 = vld [vmem:[#allocation4 + $0x88] sm:$0xf0] }
 0x20e   : > { %4598 = vmatpush.bf16.msra.mxu2 %v7465_v56  ;;  %v6218_v56 = vld [vmem:[#allocation4 + $0x5c8] sm:$0xf0]  ;;  %v8070_v54 = vld [vmem:[#allocation4 + $0x1f4] sm:$0xf] }
 0x20f   : > { %4611 = vmatpush.bf16.msra.mxu3 %v7657_v62  ;;  %v5618_v62 = vld [vmem:[#allocation4 + $0x118] sm:$0xf0]  ;;  %v6221_v0 = vor.u32 %v8190_v55, %v6218_v56  ;;  %v5738_v56 = vld [vmem:[#allocation4 + $0x208] sm:$0xf0] }
 0x210   : > { %4573 = vmatpush.bf16.msra.mxu0 %v7057_v4  ;;  %v8184_v4 = vld [vmem:[#allocation4 + $0x584] sm:$0xf]  ;;  %v5621_v7 = vor.u32 %v8040_v60, %v5618_v62  ;;  %v8166_v62 = vld [vmem:[#allocation4 + $0x4f4] sm:$0xf] }
 0x211   : > { %4586 = vmatpush.bf16.msra.mxu1 %v7249_v5  ;;  %v5813_v5 = vor.u32 %v8088_v63, %v5810_v1  ;;  %v6197_v17 = vor.u32 %v8184_v4, %v6194_v6  ;;  %v6122_v63 = vld [vmem:[#allocation4 + $0x508] sm:$0xf0]  ;;  %v8016_v6 = vld [vmem:[#allocation4 + $0x44] sm:$0xf] }
 0x212   : > { %4599 = vmatpush.bf16.msra.mxu2 %v7441_v43  ;;  %v6005_v43 = vor.u32 %v8136_v2, %v6002_v3  ;;  %v5741_v3 = vor.u32 %v8070_v54, %v5738_v56  ;;  %v6125_v35 = vor.u32 %v8166_v62, %v6122_v63  ;;  %v7010_v54 = vld [vmem:[#allocation4 + $0xbf8] sm:$0xf0]  ;;  %v6602_v63 = vld [vmem:[#allocation4 + $0x8c8] sm:$0xf0] }
 0x213   : > { %4612 = vmatpush.bf16.msra.mxu3 %v7633_v11  ;;  %v5786_v11 = vld [vmem:[#allocation4 + $0x268] sm:$0xf0] }
 0x214   : > { %4574 = vmatpush.bf16.msra.mxu0 %v7033_v26  ;;  %v4368_v21 = vpop.f32.mrf.mxu0  ;;  %v5789_v24 = vor.u32 %v8082_v10, %v5786_v11  ;;  %v5981_v26 = vor.u32 %v8130_v12, %v5978_v13  ;;  %v8112_v10 = vld [vmem:[#allocation4 + $0x344] sm:$0xf]  ;;  %v6098_v12 = vld [vmem:[#allocation4 + $0x4d8] sm:$0xf0] }
 0x215   : > { %4587 = vmatpush.bf16.msra.mxu1 %v7225_v31  ;;  %v4369_v31 = vadd.f32 %v4368_v21, %v9205_v53  ;;  %v8160_v11 = vld [vmem:[#allocation4 + $0x4c4] sm:$0xf] }
 0x216   : > { %4600 = vmatpush.bf16.msra.mxu2 %v7417_v32  ;;  %v4381_v32 = vpop.f32.mrf.mxu1  ;;  %v6101_v30 = vor.u32 %v8160_v11, %v6098_v12  ;;  %v8328_v11 = vld [vmem:[#allocation4 + $0xa04] sm:$0xf]  ;;  %v6770_v12 = vld [vmem:[#allocation4 + $0xa18] sm:$0xf0] }
 0x217   : > { %4613 = vmatpush.bf16.msra.mxu3 %v7609_v41  ;;  %4575 = vmatmul.bf16.vlgmr.msra.gmra.mxu0 %v9117_v18  ;;  %v8124_v41 = vld [vmem:[#allocation4 + $0x3a4] sm:$0xf]  ;;  %v4382_v46 = vadd.f32 %v4381_v32, %v4369_v31  ;;  %v5882_v31 = vld [vmem:[#allocation4 + $0x328] sm:$0xf0]  ;;  %v8154_v32 = vld [vmem:[#allocation4 + $0x494] sm:$0xf] }
 0x218   : > { %4619 = vmatpush.bf16.msrb.mxu0 %v5669_v52  ;;  %4588 = vmatmul.bf16.vlgmr.msra.gmra.mxu1 %v9121_v23  ;;  %v5954_v52 = vld [vmem:[#allocation4 + $0x3b8] sm:$0xf0] }
 0x219   : > { %4632 = vmatpush.bf16.msrb.mxu1 %v5861_v42  ;;  %4601 = vmatmul.bf16.vlgmr.msra.gmra.mxu2 %v9119_v22  ;;  %v8172_v42 = vld [vmem:[#allocation4 + $0x524] sm:$0xf] }
 0x21a   : > { %4645 = vmatpush.bf16.msrb.mxu2 %v6053_v44  ;;  %4614 = vmatmul.bf16.vlgmr.msra.gmra.mxu3 %v9123_v27  ;;  %v6146_v44 = vld [vmem:[#allocation4 + $0x538] sm:$0xf0] }
 0x21b   : > { %4658 = vmatpush.bf16.msrb.mxu3 %v6245_v49  ;;  %v5957_v49 = vor.u32 %v8124_v41, %v5954_v52  ;;  %v6149_v53 = vor.u32 %v8172_v42, %v6146_v44  ;;  %v8244_v41 = vld [vmem:[#allocation4 + $0x764] sm:$0xf]  ;;  %v6434_v52 = vld [vmem:[#allocation4 + $0x778] sm:$0xf0]  ;;  %v5501_v44 = vor.u32 %v8010_v14, %v5498_v16 }
 0x21c   : > { %4620 = vmatpush.bf16.msrb.mxu0 %v5645_v57  ;;  %v4394_v55 = vpop.f32.mrf.mxu2  ;;  %v8118_v57 = vld [vmem:[#allocation4 + $0x374] sm:$0xf]  ;;  %v4370_v2 = vpop.f32.mrf.mxu0  ;;  %v8292_v42 = vld [vmem:[#allocation4 + $0x8e4] sm:$0xf]  ;;  %v6962_v14 = vld [vmem:[#allocation4 + $0xb98] sm:$0xf0] }
 0x21d   : > { %4633 = vmatpush.bf16.msrb.mxu1 %v5837_v58  ;;  %v5930_v58 = vld [vmem:[#allocation4 + $0x388] sm:$0xf0]  ;;  %v4407_v60 = vpop.f32.mrf.mxu3 }
 0x21e   : > { %4646 = vmatpush.bf16.msrb.mxu2 %v6029_v59  ;;  %v4395_v59 = vadd.f32 %v4394_v55, %v4382_v46  ;;  %v5933_v4 = vor.u32 %v8118_v57, %v5930_v58  ;;  %v6626_v46 = vld [vmem:[#allocation4 + $0x8f8] sm:$0xf0]  ;;  %v8238_v58 = vld [vmem:[#allocation4 + $0x734] sm:$0xf]  ;;  %v6794_v2 = vld [vmem:[#allocation4 + $0xa48] sm:$0xf0] }
 0x21f   : > { %4659 = vmatpush.bf16.msrb.mxu3 %v6221_v0  ;;  %v5549_v0 = vor.u32 %v8022_v50, %v5546_v51  ;;  %v5885_v50 = vor.u32 %v8106_v28, %v5882_v31  ;;  %v8388_v51 = vld [vmem:[#allocation4 + $0xbe4] sm:$0xf]  ;;  %v6629_v56 = vor.u32 %v8292_v42, %v6626_v46  ;;  %v8274_v28 = vld [vmem:[#allocation4 + $0x854] sm:$0xf]  ;;  %v6746_v31 = vld [vmem:[#allocation4 + $0x9e8] sm:$0xf0] }
 0x220   : > { %4621 = vmatpush.bf16.msrb.mxu0 %v5621_v7  ;;  %v9212_v1 = vadd.f32 %v4407_v60, %v4395_v59  ;;  %v5522_v7 = vld [vmem:[#allocation4 + $0x58] sm:$0xf0]  ;;  %v6410_v59 = vld [vmem:[#allocation4 + $0x748] sm:$0xf0]  ;;  %v8286_v60 = vld [vmem:[#allocation4 + $0x8b4] sm:$0xf]  ;;  %v7013_v62 = vor.u32 %v8388_v51, %v7010_v54 }
 0x221   : > { %4634 = vmatpush.bf16.msrb.mxu1 %v5813_v5  ;;  %v8064_v5 = vld [vmem:[#allocation4 + $0x1c4] sm:$0xf]  ;;  %v5525_v13 = vor.u32 %v8016_v6, %v5522_v7  ;;  %v6413_v6 = vor.u32 %v8238_v58, %v6410_v59  ;;  %v6605_v7 = vor.u32 %v8286_v60, %v6602_v63  ;;  %v6722_v51 = vld [vmem:[#allocation4 + $0x9b8] sm:$0xf0]  ;;  %v6314_v58 = vld [vmem:[#allocation4 + $0x688] sm:$0xf0] }
 0x222   : > { %4647 = vmatpush.bf16.msrb.mxu2 %v6005_v43  ;;  %v4383_v43 = vpop.f32.mrf.mxu1  ;;  %v8220_v42 = vld [vmem:[#allocation4 + $0x6a4] sm:$0xf]  ;;  %v8262_v59 = vld [vmem:[#allocation4 + $0x7f4] sm:$0xf]  ;;  %v6506_v63 = vld [vmem:[#allocation4 + $0x808] sm:$0xf0] }
 0x223   : > { %4660 = vmatpush.bf16.msrb.mxu3 %v6197_v17  ;;  %v5906_v17 = vld [vmem:[#allocation4 + $0x358] sm:$0xf0]  ;;  %v8232_v43 = vld [vmem:[#allocation4 + $0x704] sm:$0xf] }
 0x224   : > { %4622 = vmatpush.bf16.msrb.mxu0 %v5597_v19  ;;  %v5717_v19 = vor.u32 %v8064_v5, %v5714_v20  ;;  %v5909_v21 = vor.u32 %v8112_v10, %v5906_v17  ;;  %v4396_v29 = vpop.f32.mrf.mxu2  ;;  %v8280_v20 = vld [vmem:[#allocation4 + $0x884] sm:$0xf]  ;;  %v6578_v17 = vld [vmem:[#allocation4 + $0x898] sm:$0xf0] }
 0x225   : > { %4635 = vmatpush.bf16.msrb.mxu1 %v5789_v24  ;;  %v8058_v24 = vld [vmem:[#allocation4 + $0x194] sm:$0xf]  ;;  %v4409_v39 = vpop.f32.mrf.mxu3  ;;  %v8268_v46 = vld [vmem:[#allocation4 + $0x824] sm:$0xf] }
 0x226   : > { %4648 = vmatpush.bf16.msrb.mxu2 %v5981_v26  ;;  %v5690_v26 = vld [vmem:[#allocation4 + $0x1a8] sm:$0xf0]  ;;  %v8364_v54 = vld [vmem:[#allocation4 + $0xb24] sm:$0xf] }
 0x227   : > { %4661 = vmatpush.bf16.msrb.mxu3 %v6173_v36  ;;  %v6074_v36 = vld [vmem:[#allocation4 + $0x4a8] sm:$0xf0] }
 0x228   : > { %4623 = vmatpush.bf16.msrb.mxu0 %v5573_v47  ;;  %v8340_v47 = vld [vmem:[#allocation4 + $0xa64] sm:$0xf]  ;;  %v6077_v55 = vor.u32 %v8154_v32, %v6074_v36  ;;  %v6938_v36 = vld [vmem:[#allocation4 + $0xb68] sm:$0xf0] }
 0x229   : > { %4636 = vmatpush.bf16.msrb.mxu1 %v5765_v48  ;;  %v6818_v48 = vld [vmem:[#allocation4 + $0xa78] sm:$0xf0] }
 0x22a   : > { %4649 = vmatpush.bf16.msrb.mxu2 %v5957_v49  ;;  %v5693_v49 = vor.u32 %v8058_v24, %v5690_v26  ;;  %v6821_v57 = vor.u32 %v8340_v47, %v6818_v48  ;;  %v8226_v24 = vld [vmem:[#allocation4 + $0x6d4] sm:$0xf]  ;;  %v6362_v26 = vld [vmem:[#allocation4 + $0x6e8] sm:$0xf0] }
 0x22b   : > { %4662 = vmatpush.bf16.msrb.mxu3 %v6149_v53  ;;  %v6437_v53 = vor.u32 %v8244_v41, %v6434_v52  ;;  %v6365_v39 = vor.u32 %v8226_v24, %v6362_v26  ;;  %v8352_v24 = vld [vmem:[#allocation4 + $0xac4] sm:$0xf]  ;;  %v6866_v26 = vld [vmem:[#allocation4 + $0xad8] sm:$0xf0] }
 0x22c   : > { %4624 = vmatpush.bf16.msrb.mxu0 %v5549_v0  ;;  %v8334_v0 = vld [vmem:[#allocation4 + $0xa34] sm:$0xf] }
 0x22d   : > { %4637 = vmatpush.bf16.msrb.mxu1 %v5741_v3  ;;  %v8382_v3 = vld [vmem:[#allocation4 + $0xbb4] sm:$0xf]  ;;  %v6797_v5 = vor.u32 %v8334_v0, %v6794_v2  ;;  %v6698_v2 = vld [vmem:[#allocation4 + $0x988] sm:$0xf0] }
 0x22e   : > { %4650 = vmatpush.bf16.msrb.mxu2 %v5933_v4  ;;  %v6986_v4 = vld [vmem:[#allocation4 + $0xbc8] sm:$0xf0]  ;;  %v8310_v0 = vld [vmem:[#allocation4 + $0x974] sm:$0xf] }
 0x22f   : > { %4663 = vmatpush.bf16.msrb.mxu3 %v6125_v35  ;;  %v6386_v35 = vld [vmem:[#allocation4 + $0x718] sm:$0xf0]  ;;  %v6989_v10 = vor.u32 %v8382_v3, %v6986_v4 }
 0x230   : > { %4625 = vmatpush.bf16.msrb.mxu0 %v5525_v13  ;;  %v8376_v13 = vld [vmem:[#allocation4 + $0xb84] sm:$0xf]  ;;  %v6389_v16 = vor.u32 %v8232_v43, %v6386_v35 }
 0x231   : > { %4638 = vmatpush.bf16.msrb.mxu1 %v5717_v19  ;;  %v6581_v19 = vor.u32 %v8280_v20, %v6578_v17  ;;  %v6965_v29 = vor.u32 %v8376_v13, %v6962_v14  ;;  %v6701_v17 = vor.u32 %v8310_v0, %v6698_v2  ;;  %v8256_v13 = vld [vmem:[#allocation4 + $0x7c4] sm:$0xf]  ;;  %v7370_v2 = vld [vmem:[#allocation4 + $0xec8] sm:$0xf0] }
 0x232   : > { %4651 = vmatpush.bf16.msrb.mxu2 %v5909_v21  ;;  %v6773_v21 = vor.u32 %v8328_v11, %v6770_v12  ;;  %v8208_v11 = vld [vmem:[#allocation4 + $0x644] sm:$0xf]  ;;  %v6290_v12 = vld [vmem:[#allocation4 + $0x658] sm:$0xf0] }
 0x233   : > { %4664 = vmatpush.bf16.msrb.mxu3 %v6101_v30  ;;  %v8322_v30 = vld [vmem:[#allocation4 + $0x9d4] sm:$0xf] }
 0x234   : > { %4626 = vmatpush.bf16.msrb.mxu0 %v5501_v44  ;;  %v4420_v32 = vpop.f32.mrf.mxu0  ;;  %v6749_v52 = vor.u32 %v8322_v30, %v6746_v31  ;;  %v6338_v44 = vld [vmem:[#allocation4 + $0x6b8] sm:$0xf0] }
 0x235   : > { %4639 = vmatpush.bf16.msrb.mxu1 %v5693_v49  ;;  %v6530_v49 = vld [vmem:[#allocation4 + $0x838] sm:$0xf0] }
 0x236   : > { %4652 = vmatpush.bf16.msrb.mxu2 %v5885_v50  ;;  %v8316_v50 = vld [vmem:[#allocation4 + $0x9a4] sm:$0xf] }
 0x237   : > { %4665 = vmatpush.bf16.msrb.mxu3 %v6077_v55  ;;  %4627 = vmatmul.bf16.vlgmr.msrb.gmra.mxu0 %v9085_v9  ;;  %v8370_v9 = vld [vmem:[#allocation4 + $0xb54] sm:$0xf]  ;;  %v6914_v55 = vld [vmem:[#allocation4 + $0xb38] sm:$0xf0] }
 0x238   : > { %4671 = vmatpush.bf16.msra.mxu0 %v6437_v53  ;;  %4640 = vmatmul.bf16.vlgmr.msrb.gmra.mxu1 %v9094_v25  ;;  %v4433_v25 = vpop.f32.mrf.mxu1  ;;  %v6941_v47 = vor.u32 %v8370_v9, %v6938_v36  ;;  %v6341_v53 = vor.u32 %v8220_v42, %v6338_v44  ;;  %v6917_v60 = vor.u32 %v8364_v54, %v6914_v55  ;;  %v6458_v9 = vld [vmem:[#allocation4 + $0x7a8] sm:$0xf0]  ;;  %v8298_v36 = vld [vmem:[#allocation4 + $0x914] sm:$0xf]  ;;  %v8436_v42 = vld [vmem:[#allocation4 + $0xd64] sm:$0xf] }
 0x239   : > { %4684 = vmatpush.bf16.msra.mxu1 %v6629_v56  ;;  %4653 = vmatmul.bf16.vlgmr.msrb.gmra.mxu2 %v9083_v8  ;;  %v6554_v8 = vld [vmem:[#allocation4 + $0x868] sm:$0xf0]  ;;  %v6725_v56 = vor.u32 %v8316_v50, %v6722_v51  ;;  %v7202_v44 = vld [vmem:[#allocation4 + $0xd78] sm:$0xf0]  ;;  %v8532_v50 = vld [vmem:[#allocation4 + $0x1064] sm:$0xf] }
 0x23a   : > { %4697 = vmatpush.bf16.msra.mxu2 %v6821_v57  ;;  %4666 = vmatmul.bf16.vlgmr.msrb.gmra.mxu3 %v9088_v15  ;;  %v4421_v15 = vadd.f32 %v4420_v32, %v9212_v1  ;;  %v6557_v41 = vor.u32 %v8274_v28, %v6554_v8  ;;  %v6533_v1 = vor.u32 %v8268_v46, %v6530_v49  ;;  %v8214_v57 = vld [vmem:[#allocation4 + $0x674] sm:$0xf]  ;;  %v6266_v8 = vld [vmem:[#allocation4 + $0x628] sm:$0xf0]  ;;  %v8484_v46 = vld [vmem:[#allocation4 + $0xee4] sm:$0xf] }
 0x23b   : > { %4710 = vmatpush.bf16.msra.mxu3 %v7013_v62  ;;  %v6317_v43 = vor.u32 %v8214_v57, %v6314_v58  ;;  %v6293_v28 = vor.u32 %v8208_v11, %v6290_v12  ;;  %v8250_v32 = vld [vmem:[#allocation4 + $0x794] sm:$0xf]  ;;  %v7394_v49 = vld [vmem:[#allocation4 + $0xef8] sm:$0xf0]  ;;  %v7205_v57 = vor.u32 %v8436_v42, %v7202_v44  ;;  %v8472_v11 = vld [vmem:[#allocation4 + $0xe84] sm:$0xf] }
 0x23c   : > { %4672 = vmatpush.bf16.msra.mxu0 %v6413_v6  ;;  %v4434_v48 = vadd.f32 %v4433_v25, %v4421_v15  ;;  %v4446_v62 = vpop.f32.mrf.mxu2  ;;  %v8358_v6 = vld [vmem:[#allocation4 + $0xaf4] sm:$0xf]  ;;  %v6869_v15 = vor.u32 %v8352_v24, %v6866_v26  ;;  %v7586_v51 = vld [vmem:[#allocation4 + $0x1078] sm:$0xf0]  ;;  %v6461_v54 = vor.u32 %v8250_v32, %v6458_v9  ;;  %v7397_v58 = vor.u32 %v8484_v46, %v7394_v49  ;;  %v7514_v9 = vld [vmem:[#allocation4 + $0xfe8] sm:$0xf0] }
 0x23d   : > { %4685 = vmatpush.bf16.msra.mxu1 %v6605_v7  ;;  %v4459_v4 = vpop.f32.mrf.mxu3  ;;  %v6890_v7 = vld [vmem:[#allocation4 + $0xb08] sm:$0xf0]  ;;  %v8346_v25 = vld [vmem:[#allocation4 + $0xa94] sm:$0xf]  ;;  %v7298_v46 = vld [vmem:[#allocation4 + $0xe38] sm:$0xf0] }
 0x23e   : > { %4698 = vmatpush.bf16.msra.mxu2 %v6797_v5  ;;  %v4447_v3 = vadd.f32 %v4446_v62, %v4434_v48  ;;  %v4422_v5 = vpop.f32.mrf.mxu0  ;;  %v6893_v14 = vor.u32 %v8358_v6, %v6890_v7  ;;  %v7178_v62 = vld [vmem:[#allocation4 + $0xd48] sm:$0xf0]  ;;  %v8574_v6 = vld [vmem:[#allocation4 + $0x11b4] sm:$0xf]  ;;  %v8556_v49 = vld [vmem:[#allocation4 + $0x1124] sm:$0xf] }
 0x23f   : > { %4711 = vmatpush.bf16.msra.mxu3 %v6989_v10  ;;  %v6509_v10 = vor.u32 %v8262_v59, %v6506_v63  ;;  %v7589_v59 = vor.u32 %v8532_v50, %v7586_v51  ;;  %v8478_v63 = vld [vmem:[#allocation4 + $0xeb4] sm:$0xf]  ;;  %v7754_v7 = vld [vmem:[#allocation4 + $0x11c8] sm:$0xf0]  ;;  %v7682_v50 = vld [vmem:[#allocation4 + $0x1138] sm:$0xf0] }
 0x240   : > { %4673 = vmatpush.bf16.msra.mxu0 %v6389_v16  ;;  %v4435_v35 = vpop.f32.mrf.mxu1  ;;  %v9219_v20 = vadd.f32 %v4459_v4, %v4447_v3  ;;  %v6482_v16 = vld [vmem:[#allocation4 + $0x7d8] sm:$0xf0]  ;;  %v8526_v3 = vld [vmem:[#allocation4 + $0x1034] sm:$0xf]  ;;  %v7562_v4 = vld [vmem:[#allocation4 + $0x1048] sm:$0xf0]  ;;  %v7757_v12 = vor.u32 %v8574_v6, %v7754_v7 }
 0x241   : > { %4686 = vmatpush.bf16.msra.mxu1 %v6581_v19  ;;  %v8304_v19 = vld [vmem:[#allocation4 + $0x944] sm:$0xf]  ;;  %v6485_v30 = vor.u32 %v8256_v13, %v6482_v16  ;;  %v7565_v35 = vor.u32 %v8526_v3, %v7562_v4  ;;  %v7346_v13 = vld [vmem:[#allocation4 + $0xe98] sm:$0xf0]  ;;  %v8514_v32 = vld [vmem:[#allocation4 + $0xfd4] sm:$0xf] }
 0x242   : > { %4699 = vmatpush.bf16.msra.mxu2 %v6773_v21  ;;  %v6674_v21 = vld [vmem:[#allocation4 + $0x958] sm:$0xf0]  ;;  %v7349_v26 = vor.u32 %v8472_v11, %v7346_v13 }
 0x243   : > { %4712 = vmatpush.bf16.msra.mxu3 %v6965_v29  ;;  %v8202_v29 = vld [vmem:[#allocation4 + $0x614] sm:$0xf]  ;;  %v6677_v31 = vor.u32 %v8304_v19, %v6674_v21  ;;  %v7538_v16 = vld [vmem:[#allocation4 + $0x1018] sm:$0xf0]  ;;  %v8568_v19 = vld [vmem:[#allocation4 + $0x1184] sm:$0xf] }
 0x244   : > { %4674 = vmatpush.bf16.msra.mxu0 %v6365_v39  ;;  %v6650_v39 = vld [vmem:[#allocation4 + $0x928] sm:$0xf0]  ;;  %v6269_v48 = vor.u32 %v8202_v29, %v6266_v8  ;;  %v7730_v21 = vld [vmem:[#allocation4 + $0x1198] sm:$0xf0]  ;;  %v8418_v29 = vld [vmem:[#allocation4 + $0xcd4] sm:$0xf] }
 0x245   : > { %4687 = vmatpush.bf16.msra.mxu1 %v6557_v41  ;;  %v6842_v41 = vld [vmem:[#allocation4 + $0xaa8] sm:$0xf0]  ;;  %v6653_v55 = vor.u32 %v8298_v36, %v6650_v39  ;;  %v8562_v36 = vld [vmem:[#allocation4 + $0x1154] sm:$0xf]  ;;  %v7517_v39 = vor.u32 %v8514_v32, %v7514_v9  ;;  %v7250_v11 = vld [vmem:[#allocation4 + $0xdd8] sm:$0xf0] }
 0x246   : > { %4700 = vmatpush.bf16.msra.mxu2 %v6749_v52  ;;  %v4448_v52 = vpop.f32.mrf.mxu2  ;;  %v7130_v8 = vld [vmem:[#allocation4 + $0xce8] sm:$0xf0]  ;;  %v7442_v13 = vld [vmem:[#allocation4 + $0xf58] sm:$0xf0] }
 0x247   : > { %4713 = vmatpush.bf16.msra.mxu3 %v6941_v47  ;;  %v4461_v47 = vpop.f32.mrf.mxu3  ;;  %v8460_v52 = vld [vmem:[#allocation4 + $0xe24] sm:$0xf]  ;;  %v7418_v32 = vld [vmem:[#allocation4 + $0xf28] sm:$0xf0] }
 0x248   : > { %4675 = vmatpush.bf16.msra.mxu0 %v6341_v53  ;;  %v8580_v53 = vld [vmem:[#allocation4 + $0x11e4] sm:$0xf] }
 0x249   : > { %4688 = vmatpush.bf16.msra.mxu1 %v6533_v1  ;;  %v7778_v1 = vld [vmem:[#allocation4 + $0x11f8] sm:$0xf0]  ;;  %v8508_v47 = vld [vmem:[#allocation4 + $0xfa4] sm:$0xf] }
 0x24a   : > { %4701 = vmatpush.bf16.msra.mxu2 %v6725_v56  ;;  %v6845_v56 = vor.u32 %v8346_v25, %v6842_v41  ;;  %v7781_v0 = vor.u32 %v8580_v53, %v7778_v1  ;;  %v8412_v25 = vld [vmem:[#allocation4 + $0xca4] sm:$0xf]  ;;  %v7106_v41 = vld [vmem:[#allocation4 + $0xcb8] sm:$0xf0]  ;;  %v8406_v53 = vld [vmem:[#allocation4 + $0xc74] sm:$0xf] }
 0x24b   : > { %4714 = vmatpush.bf16.msra.mxu3 %v6917_v60  ;;  %v8430_v60 = vld [vmem:[#allocation4 + $0xd34] sm:$0xf]  ;;  %v7109_v51 = vor.u32 %v8412_v25, %v7106_v41  ;;  %v7082_v1 = vld [vmem:[#allocation4 + $0xc88] sm:$0xf0]  ;;  %v8591_v41 = vld [vmem:[#allocation7 + $0x38] sm:$0xff] }
 0x24c   : > { %4676 = vmatpush.bf16.msra.mxu0 %v6317_v43  ;;  %v7181_v5 = vor.u32 %v8430_v60, %v7178_v62  ;;  %v7373_v43 = vor.u32 %v8478_v63, %v7370_v2  ;;  %v8502_v60 = vld [vmem:[#allocation4 + $0xf74] sm:$0xf]  ;;  %v7466_v62 = vld [vmem:[#allocation4 + $0xf88] sm:$0xf0]  ;;  %v7085_v3 = vor.u32 %v8406_v53, %v7082_v1  ;;  %v9237_v1 = vld [vmem:[#allocation6] sm:$0x3f] }
 0x24d   : > { %4689 = vmatpush.bf16.msra.mxu1 %v6509_v10  ;;  %v8424_v10 = vld [vmem:[#allocation4 + $0xd04] sm:$0xf]  ;;  %v7658_v2 = vld [vmem:[#allocation4 + $0x1108] sm:$0xf0]  ;;  %v7469_v7 = vor.u32 %v8502_v60, %v7466_v62 }
 0x24e   : > { %4702 = vmatpush.bf16.msra.mxu2 %v6701_v17  ;;  %v7154_v17 = vld [vmem:[#allocation4 + $0xd18] sm:$0xf0]  ;;  %v8613_v53 = vld [vmem:[#allocation7 + $0xe8] sm:$0xff] }
 0x24f   : > { %4715 = vmatpush.bf16.msra.mxu3 %v6893_v14  ;;  %v8520_v14 = vld [vmem:[#allocation4 + $0x1004] sm:$0xf]  ;;  %v7157_v24 = vor.u32 %v8424_v10, %v7154_v17 }
 0x250   : > { %4677 = vmatpush.bf16.msra.mxu0 %v6293_v28  ;;  %v7541_v28 = vor.u32 %v8520_v14, %v7538_v16  ;;  %v8544_v14 = vld [vmem:[#allocation4 + $0x10c4] sm:$0xf]  ;;  %v7634_v16 = vld [vmem:[#allocation4 + $0x10d8] sm:$0xf0] }
 0x251   : > { %4690 = vmatpush.bf16.msra.mxu1 %v6485_v30  ;;  %v7733_v30 = vor.u32 %v8568_v19, %v7730_v21  ;;  %v8587_v62 = vld [vmem:[#allocation7 + $0x18] sm:$0xff] }
 0x252   : > { %4703 = vmatpush.bf16.msra.mxu2 %v6677_v31  ;;  %v7322_v31 = vld [vmem:[#allocation4 + $0xe68] sm:$0xf0] }
 0x253   : > { %4716 = vmatpush.bf16.msra.mxu3 %v6869_v15 }
 0x254   : > { %4678 = vmatpush.bf16.msra.mxu0 %v6269_v48  ;;  %v9225_v15 = vpop.f32.mrf.mxu0  ;;  %v7490_v48 = vld [vmem:[#allocation4 + $0xfb8] sm:$0xf0] }
 0x255   : > { %4691 = vmatpush.bf16.msra.mxu1 %v6461_v54  ;;  %v9227_v42 = vpop.f32.mrf.mxu1  ;;  %v7301_v54 = vor.u32 %v8460_v52, %v7298_v46  ;;  %v8599_v52 = vld [vmem:[#allocation7 + $0x78] sm:$0xff] }
 0x256   : > { %4704 = vmatpush.bf16.msra.mxu2 %v6653_v55  ;;  %v7493_v55 = vor.u32 %v8508_v47, %v7490_v48  ;;  %v8615_v46 = vld [vmem:[#allocation7 + $0xf8] sm:$0xff]  ;;  %v8590_v47 = vld [vmem:[#allocation7 + $0x30] sm:$0xff] }
 0x257   : > { %4717 = vmatpush.bf16.msra.mxu3 %v6845_v56  ;;  %4679 = vmatmul.bf16.vlgmr.msra.gmra.mxu0 %v9103_v37  ;;  %v7706_v37 = vld [vmem:[#allocation4 + $0x1168] sm:$0xf0]  ;;  %v8454_v56 = vld [vmem:[#allocation4 + $0xdf4] sm:$0xf] }
 0x258   : > { %4723 = vmatpush.bf16.msrb.mxu0 %v7205_v57  ;;  %4692 = vmatmul.bf16.vlgmr.msra.gmra.mxu1 %v9107_v40  ;;  %v7709_v44 = vor.u32 %v8562_v36, %v7706_v37  ;;  %v8538_v36 = vld [vmem:[#allocation4 + $0x1094] sm:$0xf]  ;;  %v7610_v37 = vld [vmem:[#allocation4 + $0x10a8] sm:$0xf0] }
 0x259   : > { %4736 = vmatpush.bf16.msrb.mxu1 %v7397_v58  ;;  %4705 = vmatmul.bf16.vlgmr.msra.gmra.mxu2 %v9101_v34  ;;  %v8466_v34 = vld [vmem:[#allocation4 + $0xe54] sm:$0xf]  ;;  %v7685_v58 = vor.u32 %v8556_v49, %v7682_v50  ;;  %v7613_v25 = vor.u32 %v8538_v36, %v7610_v37 }
 0x25a   : > { %4749 = vmatpush.bf16.msrb.mxu2 %v7589_v59  ;;  %4718 = vmatmul.bf16.vlgmr.msra.gmra.mxu3 %v9105_v38  ;;  %v7133_v38 = vor.u32 %v8418_v29, %v7130_v8  ;;  %v7325_v40 = vor.u32 %v8466_v34, %v7322_v31  ;;  %v7274_v59 = vld [vmem:[#allocation4 + $0xe08] sm:$0xf0]  ;;  %v8442_v29 = vld [vmem:[#allocation4 + $0xd94] sm:$0xf]  ;;  %v7637_v34 = vor.u32 %v8544_v14, %v7634_v16 }
 0x25b   : > { %4762 = vmatpush.bf16.msrb.mxu3 %v7781_v0  ;;  %v8550_v0 = vld [vmem:[#allocation4 + $0x10f4] sm:$0xf]  ;;  %v7277_v6 = vor.u32 %v8454_v56, %v7274_v59  ;;  %v951_v56 = vperm.slane %v9237_v1, 4  ;;  %v8612_v59 = vld [vmem:[#allocation7 + $0xe0] sm:$0xff] }
 0x25c   : > { %4724 = vmatpush.bf16.msrb.mxu0 %v7181_v5  ;;  %v9229_v57 = vpop.f32.mrf.mxu2  ;;  %v4474_v4 = vpop.f32.mrf.mxu0  ;;  %v8400_v5 = vld [vmem:[#allocation4 + $0xc44] sm:$0xf]  ;;  %v7661_v17 = vor.u32 %v8550_v0, %v7658_v2  ;;  %v8490_v31 = vld [vmem:[#allocation4 + $0xf14] sm:$0xf] }
 0x25d   : > { %4737 = vmatpush.bf16.msrb.mxu1 %v7373_v43  ;;  %v9231_v63 = vpop.f32.mrf.mxu3  ;;  %v7058_v43 = vld [vmem:[#allocation4 + $0xc58] sm:$0xf0]  ;;  %v4487_v10 = vpop.f32.mrf.mxu1  ;;  %v4473_v60 = vadd.f32 %v9225_v15, %v951_v56  ;;  %v8601_v14 = vld [vmem:[#allocation7 + $0x88] sm:$0xff] }
 0x25e   : > { %4750 = vmatpush.bf16.msrb.mxu2 %v7565_v35  ;;  %v8448_v35 = vld [vmem:[#allocation4 + $0xdc4] sm:$0xf]  ;;  %v7061_v19 = vor.u32 %v8400_v5, %v7058_v43  ;;  %v8598_v48 = vld [vmem:[#allocation7 + $0x70] sm:$0xff] }
 0x25f   : > { %4763 = vmatpush.bf16.msrb.mxu3 %v7757_v12  ;;  %v8496_v12 = vld [vmem:[#allocation4 + $0xf44] sm:$0xf]  ;;  %v7253_v21 = vor.u32 %v8448_v35, %v7250_v11  ;;  %v8606_v49 = vld [vmem:[#allocation7 + $0xb0] sm:$0xff] }
 0x260   : > { %4725 = vmatpush.bf16.msrb.mxu0 %v7157_v24  ;;  %v7445_v24 = vor.u32 %v8496_v12, %v7442_v13  ;;  %v8614_v50 = vld [vmem:[#allocation7 + $0xf0] sm:$0xff]  ;;  %v8595_v0 = vld [vmem:[#allocation7 + $0x58] sm:$0xff]  ;;  %v8585_v12 = vld [vmem:[#allocation7 + $0x8] sm:$0xff] }
 0x261   : > { %4738 = vmatpush.bf16.msrb.mxu1 %v7349_v26  ;;  %v8394_v26 = vld [vmem:[#allocation4 + $0xc14] sm:$0xf]  ;;  %v8603_v2 = vld [vmem:[#allocation7 + $0x98] sm:$0xff] }
 0x262   : > { %4751 = vmatpush.bf16.msrb.mxu2 %v7541_v28  ;;  %v7034_v28 = vld [vmem:[#allocation4 + $0xc28] sm:$0xf0]  ;;  %v8611_v4 = vld [vmem:[#allocation7 + $0xd8] sm:$0xff]  ;;  %v8586_v5 = vld [vmem:[#allocation7 + $0x10] sm:$0xff] }
 0x263   : > { %4764 = vmatpush.bf16.msrb.mxu3 %v7733_v30  ;;  %v7226_v30 = vld [vmem:[#allocation4 + $0xda8] sm:$0xf0]  ;;  %v8594_v35 = vld [vmem:[#allocation7 + $0x50] sm:$0xff] }
 0x264   : > { %4726 = vmatpush.bf16.msrb.mxu0 %v7133_v38  ;;  %v4500_v8 = vpop.f32.mrf.mxu2  ;;  %v7037_v38 = vor.u32 %v8394_v26, %v7034_v28  ;;  %v8602_v10 = vld [vmem:[#allocation7 + $0x90] sm:$0xff]  ;;  %v8593_v13 = vld [vmem:[#allocation7 + $0x48] sm:$0xff]  ;;  %v4775_v26 = vmax.f32 %v9154_v33, 0.0  ;;  %v8592_v28 = vld [vmem:[#allocation7 + $0x40] sm:$0xff] }
 0x265   : > { %4739 = vmatpush.bf16.msrb.mxu1 %v7325_v40  ;;  %v4513_v9 = vpop.f32.mrf.mxu3  ;;  %v7229_v40 = vor.u32 %v8442_v29, %v7226_v30  ;;  %v4776_v29 = vmax.f32 %v9175_v61, 0.0  ;;  %v4777_v8 = vmax.f32 %v9198_v45, 0.0  ;;  %v8623_v30 = vld [vmem:[#allocation7 + $0x138] sm:$0xff]  ;;  %v8622_v36 = vld [vmem:[#allocation7 + $0x130] sm:$0xff]  ;;  %v8621_v61 = vld [vmem:[#allocation7 + $0x128] sm:$0xff] }
 0x266   : > { %4752 = vmatpush.bf16.msrb.mxu2 %v7517_v39  ;;  %v7421_v39 = vor.u32 %v8490_v31, %v7418_v32  ;;  %v4778_v31 = vmax.f32 %v9219_v20, 0.0 }
 0x267   : > { %4765 = vmatpush.bf16.msrb.mxu3 %v7709_v44  ;;  %v8607_v44 = vld [vmem:[#allocation7 + $0xb8] sm:$0xff]  ;;  %v4782_v9 = vpack.c.bf16 %v4776_v29, %v4776_v29  ;;  %v4783_v33 = vpack.c.bf16 %v4777_v8, %v4777_v8 }
 0x268   : > { %4727 = vmatpush.bf16.msrb.mxu0 %v7109_v51  ;;  %v8589_v51 = vld [vmem:[#allocation7 + $0x28] sm:$0xff]  ;;  %v4784_v37 = vpack.c.bf16 %v4778_v31, %v4778_v31 }
 0x269   : > { %4740 = vmatpush.bf16.msrb.mxu1 %v7301_v54  ;;  %v8597_v54 = vld [vmem:[#allocation7 + $0x68] sm:$0xff] }
 0x26a   : > { %4753 = vmatpush.bf16.msrb.mxu2 %v7493_v55  ;;  %v8605_v55 = vld [vmem:[#allocation7 + $0xa8] sm:$0xff] }
 0x26b   : > { %4766 = vmatpush.bf16.msrb.mxu3 %v7685_v58 }
 0x26c   : > { %4728 = vmatpush.bf16.msrb.mxu0 %v7085_v3 }
 0x26d   : > { %4741 = vmatpush.bf16.msrb.mxu1 %v7277_v6 }
 0x26e   : > { %4754 = vmatpush.bf16.msrb.mxu2 %v7469_v7  ;;  %v4486_v7 = vadd.f32 %v9227_v42, %v4473_v60  ;;  %v8609_v42 = vld [vmem:[#allocation7 + $0xc8] sm:$0xff] }
 0x26f   : > { %4767 = vmatpush.bf16.msrb.mxu3 %v7661_v17  ;;  %v8610_v17 = vld [vmem:[#allocation7 + $0xd0] sm:$0xff] }
 0x270   : > { %4729 = vmatpush.bf16.msrb.mxu0 %v7061_v19  ;;  %v4499_v11 = vadd.f32 %v9229_v57, %v4486_v7  ;;  %v8600_v57 = vld [vmem:[#allocation7 + $0x80] sm:$0xff] }
 0x271   : > { %4742 = vmatpush.bf16.msrb.mxu1 %v7253_v21 }
 0x272   : > { %4755 = vmatpush.bf16.msrb.mxu2 %v7445_v24  ;;  %v4512_v21 = vadd.f32 %v9231_v63, %v4499_v11  ;;  %v8584_v24 = vld [vmem:[#allocation7] sm:$0xff]  ;;  %v4781_v63 = vpack.c.bf16 %v4775_v26, %v4775_v26 }
 0x273   : > { %4768 = vmatpush.bf16.msrb.mxu3 %v7637_v34  ;;  %v8608_v34 = vld [vmem:[#allocation7 + $0xc0] sm:$0xff] }
 0x274   : > { %4730 = vmatpush.bf16.msrb.mxu0 %v7037_v38  ;;  %v4524_v58 = vpop.f32.mrf.mxu0 }
 0x275   : > { %4743 = vmatpush.bf16.msrb.mxu1 %v7229_v40  ;;  %v4525_v32 = vadd.f32 %v4524_v58, %v4512_v21  ;;  %v8620_v40 = vld [vmem:[#allocation7 + $0x120] sm:$0xff] }
 0x276   : > { %4756 = vmatpush.bf16.msrb.mxu2 %v7421_v39 }
 0x277   : > { %4769 = vmatpush.bf16.msrb.mxu3 %v7613_v25  ;;  %4731 = vmatmul.bf16.vlgmr.msrb.gmra.mxu0 %v9117_v18  ;;  %v8588_v18 = vld [vmem:[#allocation7 + $0x20] sm:$0xff] }
 0x278   : > { %5171 = vmatpush.bf16.msra.mxu0 %v8591_v41  ;;  %4744 = vmatmul.bf16.vlgmr.msrb.gmra.mxu1 %v9121_v23  ;;  %v8604_v23 = vld [vmem:[#allocation7 + $0xa0] sm:$0xff] }
 0x279   : > { %5184 = vmatpush.bf16.msra.mxu1 %v8599_v52  ;;  %4757 = vmatmul.bf16.vlgmr.msrb.gmra.mxu2 %v9119_v22  ;;  %v8596_v22 = vld [vmem:[#allocation7 + $0x60] sm:$0xff]  ;;  %v8619_v52 = vld [vmem:[#allocation7 + $0x118] sm:$0xff] }
 0x27a   : > { %5197 = vmatpush.bf16.msra.mxu2 %v8607_v44  ;;  %4770 = vmatmul.bf16.vlgmr.msrb.gmra.mxu3 %v9123_v27  ;;  %v4537_v27 = vpop.f32.mrf.mxu1 }
 0x27b   : > { %5210 = vmatpush.bf16.msra.mxu3 %v8615_v46  ;;  %v4538_v38 = vadd.f32 %v4537_v27, %v4525_v32 }
 0x27c   : > { %5172 = vmatpush.bf16.msra.mxu0 %v8590_v47  ;;  %v4550_v3 = vpop.f32.mrf.mxu2  ;;  %v4526_v43 = vpop.f32.mrf.mxu0 }
 0x27d   : > { %5185 = vmatpush.bf16.msra.mxu1 %v8598_v48  ;;  %v4563_v6 = vpop.f32.mrf.mxu3  ;;  %v4551_v45 = vadd.f32 %v4550_v3, %v4538_v38  ;;  %v952_v43 = vperm.slane %v9237_v1, 5 }
 0x27e   : > { %5198 = vmatpush.bf16.msra.mxu2 %v8606_v49  ;;  %v8618_v49 = vld [vmem:[#allocation7 + $0x110] sm:$0xff] }
 0x27f   : > { %5211 = vmatpush.bf16.msra.mxu3 %v8614_v50  ;;  %v4564_v25 = vadd.f32 %v4563_v6, %v4551_v45 }
 0x280   : > { %5173 = vmatpush.bf16.msra.mxu0 %v8589_v51 }
 0x281   : > { %5186 = vmatpush.bf16.msra.mxu1 %v8597_v54  ;;  %v8617_v54 = vld [vmem:[#allocation7 + $0x108] sm:$0xff] }
 0x282   : > { %5199 = vmatpush.bf16.msra.mxu2 %v8605_v55  ;;  %v4539_v15 = vpop.f32.mrf.mxu1 }
 0x283   : > { %5212 = vmatpush.bf16.msra.mxu3 %v8613_v53  ;;  %v8626_v15 = vld [vmem:[#allocation7 + $0x150] sm:$0xff] }
 0x284   : > { %5174 = vmatpush.bf16.msra.mxu0 %v8588_v18  ;;  %v4552_v16 = vpop.f32.mrf.mxu2  ;;  %v8616_v18 = vld [vmem:[#allocation7 + $0x100] sm:$0xff] }
 0x285   : > { %5187 = vmatpush.bf16.msra.mxu1 %v8596_v22  ;;  %v4565_v19 = vpop.f32.mrf.mxu3 }
 0x286   : > { %5200 = vmatpush.bf16.msra.mxu2 %v8604_v23 }
 0x287   : > { %5213 = vmatpush.bf16.msra.mxu3 %v8612_v59 }
 0x288   : > { %5175 = vmatpush.bf16.msra.mxu0 %v8587_v62  ;;  %v8631_v62 = vld [vmem:[#allocation7 + $0x178] sm:$0xff] }
 0x289   : > { %5188 = vmatpush.bf16.msra.mxu1 %v8595_v0 }
 0x28a   : > { %5201 = vmatpush.bf16.msra.mxu2 %v8603_v2  ;;  %v8630_v2 = vld [vmem:[#allocation7 + $0x170] sm:$0xff] }
 0x28b   : > { %5214 = vmatpush.bf16.msra.mxu3 %v8611_v4  ;;  %v8629_v4 = vld [vmem:[#allocation7 + $0x168] sm:$0xff] }
 0x28c   : > { %5176 = vmatpush.bf16.msra.mxu0 %v8586_v5  ;;  %v8628_v5 = vld [vmem:[#allocation7 + $0x160] sm:$0xff] }
 0x28d   : > { %5189 = vmatpush.bf16.msra.mxu1 %v8594_v35  ;;  %v8627_v35 = vld [vmem:[#allocation7 + $0x158] sm:$0xff] }
 0x28e   : > { %5202 = vmatpush.bf16.msra.mxu2 %v8602_v10 }
 0x28f   : > { %5215 = vmatpush.bf16.msra.mxu3 %v8610_v17 }
 0x290   : > { %5177 = vmatpush.bf16.msra.mxu0 %v8585_v12 }
 0x291   : > { %5190 = vmatpush.bf16.msra.mxu1 %v8593_v13 }
 0x292   : > { %5203 = vmatpush.bf16.msra.mxu2 %v8601_v14  ;;  %v8625_v14 = vld [vmem:[#allocation7 + $0x148] sm:$0xff] }
 0x293   : > { %5216 = vmatpush.bf16.msra.mxu3 %v8609_v42 }
 0x294   : > { %5178 = vmatpush.bf16.msra.mxu0 %v8584_v24  ;;  %v4576_v20 = vpop.f32.mrf.mxu0  ;;  %v8624_v24 = vld [vmem:[#allocation7 + $0x140] sm:$0xff] }
 0x295   : > { %5191 = vmatpush.bf16.msra.mxu1 %v8592_v28  ;;  %v4589_v39 = vpop.f32.mrf.mxu1  ;;  %v4577_v41 = vadd.f32 %v4576_v20, %v4564_v25 }
 0x296   : > { %5204 = vmatpush.bf16.msra.mxu2 %v8600_v57 }
 0x297   : > { %5217 = vmatpush.bf16.msra.mxu3 %v8608_v34  ;;  %5179 = vmatmul.bf16.vlgmr.msra.gmra.mxu0 %v4781_v63  ;;  %v4590_v46 = vadd.f32 %v4589_v39, %v4577_v41 }
 0x298   : > { %5223 = vmatpush.bf16.msrb.mxu0 %v8623_v30  ;;  %5192 = vmatmul.bf16.vlgmr.msra.gmra.mxu1 %v4782_v9 }
 0x299   : > { %5205 = vmatmul.bf16.vlgmr.msra.gmra.mxu2 %v4783_v33  ;;  %5236 = vmatpush.bf16.msrb.mxu1 %v8631_v62  ;;  %v8632_v62 = vld [vmem:[#allocation9] sm:$0xff] }
 0x29a   : > { %5218 = vmatmul.bf16.vlgmr.msra.gmra.mxu3 %v4784_v37 }
 0x29c   : > { %5224 = vmatpush.bf16.msrb.mxu0 %v8622_v36  ;;  %v4602_v44 = vpop.f32.mrf.mxu2  ;;  %v4578_v48 = vpop.f32.mrf.mxu0 }
 0x29d   : > { %v4615_v47 = vpop.f32.mrf.mxu3  ;;  %v4591_v50 = vpop.f32.mrf.mxu1  ;;  %v4603_v51 = vadd.f32 %v4602_v44, %v4590_v46  ;;  %5237 = vmatpush.bf16.msrb.mxu1 %v8630_v2  ;;  %v8639_v44 = vld [vmem:[#allocation9 + $0x38] sm:$0xff] }
 0x29e   : > { %5315 = vmatpush.bf16.msrb.mxu2 %v8639_v44  ;;  %v8638_v50 = vld [vmem:[#allocation9 + $0x30] sm:$0xff] }
 0x29f   : > { %v4616_v55 = vadd.f32 %v4615_v47, %v4603_v51 }
 0x2a0   : > { %5225 = vmatpush.bf16.msrb.mxu0 %v8621_v61 }
 0x2a1   : > { %v4779_v58 = vmax.f32 %v4616_v55, 0.0  ;;  %5238 = vmatpush.bf16.msrb.mxu1 %v8629_v4  ;;  %v8637_v55 = vld [vmem:[#allocation9 + $0x28] sm:$0xff] }
 0x2a2   : > { %5316 = vmatpush.bf16.msrb.mxu2 %v8638_v50 }
 0x2a3   : > { %v4785_v22 = vpack.c.bf16 %v4779_v58, %v4779_v58  ;;  %v8635_v58 = vld [vmem:[#allocation9 + $0x18] sm:$0xff] }
 0x2a4   : > { %5226 = vmatpush.bf16.msrb.mxu0 %v8620_v40  ;;  %v4604_v53 = vpop.f32.mrf.mxu2 }
 0x2a5   : > { %v4617_v56 = vpop.f32.mrf.mxu3  ;;  %5239 = vmatpush.bf16.msrb.mxu1 %v8628_v5 }
 0x2a6   : > { %5317 = vmatpush.bf16.msrb.mxu2 %v8637_v55 }
 0x2a8   : > { %5227 = vmatpush.bf16.msrb.mxu0 %v8619_v52 }
 0x2a9   : > { %5240 = vmatpush.bf16.msrb.mxu1 %v8627_v35 }
 0x2ac   : > { %5228 = vmatpush.bf16.msrb.mxu0 %v8618_v49 }
 0x2ad   : > { %5241 = vmatpush.bf16.msrb.mxu1 %v8626_v15 }
 0x2b0   : > { %5229 = vmatpush.bf16.msrb.mxu0 %v8617_v54 }
 0x2b1   : > { %5242 = vmatpush.bf16.msrb.mxu1 %v8625_v14 }
 0x2b4   : > { %5230 = vmatpush.bf16.msrb.mxu0 %v8616_v18  ;;  %v4628_v23 = vpop.f32.mrf.mxu0  ;;  %v8636_v18 = vld [vmem:[#allocation9 + $0x20] sm:$0xff] }
 0x2b5   : > { %v4641_v27 = vpop.f32.mrf.mxu1  ;;  %v4629_v17 = vadd.f32 %v4628_v23, %v952_v43  ;;  %5243 = vmatpush.bf16.msrb.mxu1 %v8624_v24  ;;  %5318 = vmatpush.bf16.msrb.mxu2 %v8636_v18  ;;  %v8633_v23 = vld [vmem:[#allocation9 + $0x8] sm:$0xff] }
 0x2b7   : > { %5231 = vmatmul.bf16.vlgmr.msrb.gmra.mxu0 %v4785_v22  ;;  %v4642_v12 = vadd.f32 %v4641_v27, %v4629_v17  ;;  %v8634_v22 = vld [vmem:[#allocation9 + $0x10] sm:$0xff] }
 0x2b9   : > { %5319 = vmatpush.bf16.msrb.mxu2 %v8635_v58 }
 0x2bc   : > { %v4654_v59 = vpop.f32.mrf.mxu2  ;;  %v4630_v0 = vpop.f32.mrf.mxu0 }
 0x2bd   : > { %v4667_v60 = vpop.f32.mrf.mxu3  ;;  %v4643_v3 = vpop.f32.mrf.mxu1  ;;  %v4655_v19 = vadd.f32 %v4654_v59, %v4642_v12  ;;  %5320 = vmatpush.bf16.msrb.mxu2 %v8634_v22 }
 0x2bf   : > { %v4668_v26 = vadd.f32 %v4667_v60, %v4655_v19 }
 0x2c1   : > { %5321 = vmatpush.bf16.msrb.mxu2 %v8633_v23 }
 0x2c4   : > { %v4656_v6 = vpop.f32.mrf.mxu2 }
 0x2c5   : > { %v4669_v7 = vpop.f32.mrf.mxu3  ;;  %5322 = vmatpush.bf16.msrb.mxu2 %v8632_v62 }
 0x2d4   : > { %v4680_v10 = vpop.f32.mrf.mxu0 }
 0x2d5   : > { %v4693_v11 = vpop.f32.mrf.mxu1  ;;  %v4681_v57 = vadd.f32 %v4680_v10, %v4668_v26 }
 0x2d7   : > { %v4694_v29 = vadd.f32 %v4693_v11, %v4681_v57 }
 0x2dc   : > { %v4706_v13 = vpop.f32.mrf.mxu2  ;;  %v4682_v42 = vpop.f32.mrf.mxu0 }
 0x2dd   : > { %v4719_v16 = vpop.f32.mrf.mxu3  ;;  %v4695_v21 = vpop.f32.mrf.mxu1  ;;  %v4707_v8 = vadd.f32 %v4706_v13, %v4694_v29 }
 0x2df   : > { %v4720_v34 = vadd.f32 %v4719_v16, %v4707_v8 }
 0x2e4   : > { %v4708_v28 = vpop.f32.mrf.mxu2 }
 0x2e5   : > { %v4721_v1 = vpop.f32.mrf.mxu3 }
 0x2f4   : > { %v4732_v30 = vpop.f32.mrf.mxu0 }
 0x2f5   : > { %v4745_v31 = vpop.f32.mrf.mxu1  ;;  %v4733_v32 = vadd.f32 %v4732_v30, %v4720_v34 }
 0x2f7   : > { %v4746_v63 = vadd.f32 %v4745_v31, %v4733_v32 }
 0x2fc   : > { %v4758_v9 = vpop.f32.mrf.mxu2  ;;  %v4734_v37 = vpop.f32.mrf.mxu0 }
 0x2fd   : > { %v4759_v33 = vadd.f32 %v4758_v9, %v4746_v63  ;;  %v4771_v36 = vpop.f32.mrf.mxu3  ;;  %v4747_v38 = vpop.f32.mrf.mxu1 }
 0x2ff   : > { %v4772_v61 = vadd.f32 %v4771_v36, %v4759_v33 }
 0x301   : > { %v4780_v45 = vmax.f32 %v4772_v61, 0.0 }
 0x303   : > { %v4786_v20 = vpack.c.bf16 %v4780_v45, %v4780_v45 }
 0x304   : > { %v4760_v40 = vpop.f32.mrf.mxu2 }
 0x305   : > { %v4773_v39 = vpop.f32.mrf.mxu3  ;;  %5244 = vmatmul.bf16.vlgmr.msrb.gmra.mxu1 %v4786_v20 }
 0x314   : > { %v5180_v25 = vpop.f32.mrf.mxu0 }
 0x315   : > { %v5193_v41 = vpop.f32.mrf.mxu1 }
 0x316   : > { %v5194_v52 = vadd.f32 %v5193_v41, %v5180_v25 }
 0x31c   : > { %v5206_v46 = vpop.f32.mrf.mxu2  ;;  %v5182_v49 = vpop.f32.mrf.mxu0 }
 0x31d   : > { %v5207_v47 = vadd.f32 %v5206_v46, %v5194_v52  ;;  %v5219_v48 = vpop.f32.mrf.mxu3  ;;  %v5195_v51 = vpop.f32.mrf.mxu1 }
 0x31f   : > { %v5220_v54 = vadd.f32 %v5219_v48, %v5207_v47 }
 0x324   : > { %v5208_v53 = vpop.f32.mrf.mxu2 }
 0x325   : > { %v5221_v56 = vpop.f32.mrf.mxu3 }
 0x334   : > { %v5232_v27 = vpop.f32.mrf.mxu0 }
 0x335   : > { %v5233_v59 = vadd.f32 %v5232_v27, %v5220_v54 }
 0x33c   : > { %v5234_v60 = vpop.f32.mrf.mxu0 }
 0x382   : > { %v5245_v0 = vpop.f32.mrf.mxu1 }
 0x383   : > { %v5246_v2 = vadd.f32 %v5245_v0, %v5233_v59 }
 0x385   : > { %5249 = vst [vmem:[%s340_s25] sm:$0xff] %v5246_v2  ;;  %v5250_v3 = vpack.c.bf16 %v5246_v2, %v5246_v2 }
 0x387   : > { %5323 = vmatmul.bf16.vlgmr.msrb.gmra.mxu2 %v5250_v3 }
 0x38a   : > { %v5247_v4 = vpop.f32.mrf.mxu1 }
 0x40a   : > { %v5324_v6 = vpop.f32.mrf.mxu2 }
 0x40b   : > { %5328 = vst [vmem:[%s344_s27] sm:$0xff] %v5324_v6 }
 0x412   : > { %v5326_v7 = vpop.f32.mrf.mxu2 }
 0x413 PF: > { %p19_p3 = scmp.ge.s32.totalorder %s9025_s10, 4   ;;  %s9281_s21 = smov %s8913_s22 }
 0x414   : > { %s9282_s22 = smov %s8917_s23  ;;  %s9283_s23 = smov %s9037_s14 }
 0x415   : > { %s9284_s24 = smov %s9025_s10  ;;  %21 = sbr.rel (!%p19_p3) target bundleno = 5 (0x5), region = 108 }
 0x41a   :  { %5362 = vsyncpa [#allocation3], 1 }
 0x41b   :  { %5364 = vsyncpa [#allocation3 + $0x1], 1 }
 0x41c   :  { %5365 = vsyncpa [#allocation5], 1 }
 0x41d   :  { %5366 = vsyncpa [#allocation8], 1 }

</bundles_post_ra>
